<compile_context>
chip_gen: v7x
topology: tpu7x:2x2x1
jax: 0.10.0
libtpu: 0.0.40
codegen_flags: <defaults>
</compile_context>

<pallas_src>
import functools
import math

import jax
import jax.numpy as jnp
from jax.experimental import pallas as pl
from jax.experimental.pallas import tpu as pltpu

BN_EPS = 1e-5
VMEM_LIMIT = 48 * 1024 * 1024  # <= 48 MiB: leaves headroom on v7x (64 MiB physical VMEM)


def _round_up(v, m):
    return ((v + m - 1) // m) * m


# ----------------------------------------------------------------------------
# Kernel 1: row-tiled / K-tiled matmul + bias + activation  (1x1 convolutions)
# ----------------------------------------------------------------------------
def _mm_kernel(a_ref, b_ref, bias_ref, o_ref, acc_ref, *, act):
    k = pl.program_id(1)

    @pl.when(k == 0)
    def _init():
        acc_ref[...] = jnp.zeros_like(acc_ref)

    acc_ref[...] += jnp.dot(a_ref[...], b_ref[...],
                            preferred_element_type=jnp.float32)

    @pl.when(k == pl.num_programs(1) - 1)
    def _fin():
        y = acc_ref[...] + bias_ref[...]
        if act == "relu":
            y = jnp.maximum(y, 0.0)
        elif act == "sigmoid":
            y = jax.nn.sigmoid(y)
        o_ref[...] = y.astype(o_ref.dtype)


def matmul_bias_act(a, b, bias, act=None, tm_cap=256, tk_cap=512):
    """a: (M, K) f32, b: (K, N) f32, bias: (N,) -> (M, N) f32.  bf16 MXU, f32 accumulate."""
    M, K = a.shape
    N = b.shape[1]
    tm = max(8, (min(tm_cap, _round_up(M, 8)) // 8) * 8)
    Mp = _round_up(M, tm)
    tk = K if K <= tk_cap else tk_cap
    Kp = _round_up(K, tk)
    a_p = jnp.pad(a, ((0, Mp - M), (0, Kp - K))).astype(jnp.bfloat16)
    b_p = jnp.pad(b, ((0, Kp - K), (0, 0))).astype(jnp.bfloat16)
    bias2 = bias.reshape(1, N).astype(jnp.float32)

    out = pl.pallas_call(
        functools.partial(_mm_kernel, act=act),
        out_shape=jax.ShapeDtypeStruct((Mp, N), jnp.float32),
        grid=(Mp // tm, Kp // tk),
        in_specs=[
            pl.BlockSpec((tm, tk), lambda i, k: (i, k)),
            pl.BlockSpec((tk, N), lambda i, k: (k, 0)),
            pl.BlockSpec((1, N), lambda i, k: (0, 0)),
        ],
        out_specs=pl.BlockSpec((tm, N), lambda i, k: (i, 0)),
        scratch_shapes=[pltpu.VMEM((tm, N), jnp.float32)],
        compiler_params=pltpu.CompilerParams(
            dimension_semantics=("parallel", "arbitrary"),
            vmem_limit_bytes=VMEM_LIMIT),
    )(a_p, b_p, bias2)
    return out[:M]


# ----------------------------------------------------------------------------
# Kernel 2: 3x3 convolution (stride 1, pad 1) with fused bias / act / input-act
#   grid = (row tiles [parallel], kh taps [arbitrary]); W taps via in-kernel
#   shifted accumulation -> only a 3x (H-shifted) input copy instead of 9x im2col.
# ----------------------------------------------------------------------------
def _conv3x3_kernel(x_ref, w_ref, b_ref, o_ref, acc_ref, *, act, in_act):
    kh = pl.program_id(1)

    @pl.when(kh == 0)
    def _init():
        acc_ref[...] = jnp.zeros_like(acc_ref)

    xt = x_ref[0]                      # (tr*(W+2), Cin) bf16
    if in_act == "relu":
        xt = jnp.maximum(xt, 0.0)
    for kw in range(3):
        y = jnp.dot(xt, w_ref[0, kw], preferred_element_type=jnp.float32)
        if kw:                         # acc[p] needs y[p + kw]
            y = jnp.concatenate(
                [y[kw:, :], jnp.zeros((kw, y.shape[1]), jnp.float32)], axis=0)
        acc_ref[...] += y

    @pl.when(kh == pl.num_programs(1) - 1)
    def _fin():
        r = acc_ref[...] + b_ref[...]
        if act == "relu":
            r = jnp.maximum(r, 0.0)
        elif act == "sigmoid":
            r = jax.nn.sigmoid(r)
        o_ref[...] = r.astype(o_ref.dtype)


def conv3x3_bias_act(x, w_torch, bias, act=None, in_act=None, tr_cap=16):
    """x: (N, H, W, Cin) f32. w_torch: (Cout, Cin, 3, 3). 3x3 conv, stride 1, pad 1."""
    N, H, W, Cin = x.shape
    Cout = w_torch.shape[0]
    Wp = W + 2
    rows = N * H
    tr = max(8, (min(tr_cap, _round_up(rows, 8)) // 8) * 8)   # image rows per tile (mult of 8)
    rows_p = _round_up(rows, tr)
    mt = tr * Wp

    # pad, bf16 cast, 3 H-shifted copies, flatten (N*H, W+2) -> rows of pixels
    xp = jnp.pad(x.astype(jnp.bfloat16), ((0, 0), (1, 1), (1, 1), (0, 0)))
    xs = jnp.stack([xp[:, k:k + H] for k in range(3)], axis=0)       # (3, N, H, Wp, Cin)
    xs = xs.reshape(3, rows * Wp, Cin)
    if rows_p != rows:
        xs = jnp.pad(xs, ((0, 0), (0, (rows_p - rows) * Wp), (0, 0)))

    wk = jnp.transpose(w_torch, (2, 3, 1, 0)).astype(jnp.bfloat16)   # (3, 3, Cin, Cout)
    b2 = (bias if bias is not None
          else jnp.zeros((Cout,), jnp.float32)).reshape(1, Cout).astype(jnp.float32)

    cost = pl.CostEstimate(
        flops=2 * rows_p * Wp * Cin * Cout * 9,
        transcendentals=0,
        bytes_accessed=xs.size * 2 + wk.size * 2 + rows_p * Wp * Cout * 4)

    out = pl.pallas_call(
        functools.partial(_conv3x3_kernel, act=act, in_act=in_act),
        out_shape=jax.ShapeDtypeStruct((rows_p * Wp, Cout), jnp.float32),
        grid=(rows_p // tr, 3),
        in_specs=[
            pl.BlockSpec((1, mt, Cin), lambda r, kh: (kh, r, 0)),
            pl.BlockSpec((1, 3, Cin, Cout), lambda r, kh: (kh, 0, 0, 0)),
            pl.BlockSpec((1, Cout), lambda r, kh: (0, 0)),
        ],
        out_specs=pl.BlockSpec((mt, Cout), lambda r, kh: (r, 0)),
        scratch_shapes=[pltpu.VMEM((mt, Cout), jnp.float32)],
        compiler_params=pltpu.CompilerParams(
            dimension_semantics=("parallel", "arbitrary"),
            vmem_limit_bytes=VMEM_LIMIT),
        cost_estimate=cost,
    )(xs, wk, b2)

    out = out.reshape(rows_p, Wp, Cout)[:rows, :W, :]
    return out.reshape(N, H, W, Cout)


# ----------------------------------------------------------------------------
# Kernel 3: fused CBAM (channel attention MLP + spatial attention 3x3 conv)
# ----------------------------------------------------------------------------
def _cbam_kernel(f_ref, w1_ref, b1_ref, w2_ref, b2_ref, saw_ref, sab_ref, o_ref, *, H, W):
    HW = H * W
    x = f_ref[0]                                      # (HW, C) f32

    # ---- channel attention: global avg/max pool -> shared MLP -> sigmoid gate ----
    avg = jnp.mean(x, axis=0, keepdims=True)          # (1, C)
    mx = jnp.max(x, axis=0, keepdims=True)            # (1, C)
    pools = jnp.concatenate([avg, mx], axis=0)        # (2, C)
    h = jnp.maximum(
        jnp.dot(pools, w1_ref[...], preferred_element_type=jnp.float32) + b1_ref[...], 0.0)
    o = jnp.dot(h, w2_ref[...], preferred_element_type=jnp.float32) + b2_ref[...]
    gate = jax.nn.sigmoid(o[0:1, :] + o[1:2, :])      # (1, C)
    fp = x * gate                                     # (HW, C)

    # ---- spatial attention: channel max/avg -> 3x3 conv (taps via shifts) -> sigmoid ----
    cmax = jnp.max(fp, axis=1, keepdims=True)         # (HW, 1)
    cavg = jnp.mean(fp, axis=1, keepdims=True)        # (HW, 1)
    pool = jnp.concatenate([cmax, cavg], axis=1)      # (HW, 2)  (max, avg) = torch cat order
    col = jax.lax.broadcasted_iota(jnp.int32, (HW, 1), 0) % W
    logit = jnp.zeros((HW, 1), jnp.float32) + sab_ref[...]
    for dh in (-1, 0, 1):
        for dw in (-1, 0, 1):
            s = dh * W + dw
            if s == 0:
                shifted = pool
            elif s > 0:
                shifted = jnp.concatenate(
                    [pool[s:, :], jnp.zeros((s, 2), jnp.float32)], axis=0)
            else:
                shifted = jnp.concatenate(
                    [jnp.zeros((-s, 2), jnp.float32), pool[:HW + s, :]], axis=0)
            if dw == -1:
                shifted = jnp.where(col > 0, shifted, 0.0)
            elif dw == 1:
                shifted = jnp.where(col < W - 1, shifted, 0.0)
            t = (dh + 1) * 3 + (dw + 1)
            logit = logit + jnp.sum(shifted * saw_ref[t:t + 1, :], axis=1, keepdims=True)
    att = jax.nn.sigmoid(logit)                       # (HW, 1)
    o_ref[0] = fp * att


def cbam(f_nhwc, p):
    N, H, W, C = f_nhwc.shape
    HW = H * W
    f = f_nhwc.reshape(N, HW, C)
    mid = p["ca_w1"].shape[0]
    ca_w1 = jnp.transpose(p["ca_w1"]).astype(jnp.float32)     # (C, mid)
    ca_b1 = p["ca_b1"].reshape(1, mid).astype(jnp.float32)
    ca_w2 = jnp.transpose(p["ca_w2"]).astype(jnp.float32)     # (mid, C)
    ca_b2 = p["ca_b2"].reshape(1, C).astype(jnp.float32)
    # torch conv weight (1, 2, 3, 3) -> (9 taps, 2 channels [max, avg])
    sa_w = jnp.transpose(p["sa_w"][0], (1, 2, 0)).reshape(9, 2).astype(jnp.float32)
    sa_b = p["sa_b"].reshape(1, 1).astype(jnp.float32)

    out = pl.pallas_call(
        functools.partial(_cbam_kernel, H=H, W=W),
        out_shape=jax.ShapeDtypeStruct((N, HW, C), jnp.float32),
        grid=(N,),
        in_specs=[
            pl.BlockSpec((1, HW, C), lambda n: (n, 0, 0)),
            pl.BlockSpec((C, mid), lambda n: (0, 0)),
            pl.BlockSpec((1, mid), lambda n: (0, 0)),
            pl.BlockSpec((mid, C), lambda n: (0, 0)),
            pl.BlockSpec((1, C), lambda n: (0, 0)),
            pl.BlockSpec((9, 2), lambda n: (0, 0)),
            pl.BlockSpec((1, 1), lambda n: (0, 0)),
        ],
        out_specs=pl.BlockSpec((1, HW, C), lambda n: (n, 0, 0)),
        compiler_params=pltpu.CompilerParams(
            dimension_semantics=("parallel",),
            vmem_limit_bytes=VMEM_LIMIT),
    )(f, ca_w1, ca_b1, ca_w2, ca_b2, sa_w, sa_b)
    return out.reshape(N, H, W, C)


# ----------------------------------------------------------------------------
# JAX-level layout helpers (pure data movement)
# ----------------------------------------------------------------------------
def pixel_shuffle(x, r):
    n, h, w, c = x.shape
    co = c // (r * r)
    x = x.reshape(n, h, w, co, r, r)
    x = x.transpose(0, 1, 4, 2, 5, 3)
    return x.reshape(n, h * r, w * r, co)


# ----------------------------------------------------------------------------
# Deterministic parameters (no pretrained weights / network access)
# ----------------------------------------------------------------------------
class ParamGen:
    def __init__(self, seed=0):
        self.key = jax.random.PRNGKey(seed)

    def _next(self):
        self.key, k = jax.random.split(self.key)
        return k

    def conv(self, cout, cin, kh, kw, bias=True):
        fan_in = cin * kh * kw
        w = jax.random.normal(self._next(), (cout, cin, kh, kw), jnp.float32) * math.sqrt(
            2.0 / fan_in)
        b = None
        if bias:
            bound = 1.0 / math.sqrt(fan_in)
            b = jax.random.uniform(self._next(), (cout,), jnp.float32, -bound, bound)
        return w, b

    def linear(self, out_f, in_f):
        w = jax.random.normal(self._next(), (out_f, in_f), jnp.float32) * math.sqrt(2.0 / in_f)
        bound = 1.0 / math.sqrt(in_f)
        b = jax.random.uniform(self._next(), (out_f,), jnp.float32, -bound, bound)
        return w, b


def build_unet_block_params(up_in_c, x_in_c, nf, seed=0):
    pg = ParamGen(seed)
    half = up_in_c // 2
    p = {}
    p["shuf_w"], p["shuf_b"] = pg.conv(half * 4, up_in_c, 1, 1, bias=True)   # PixelShuffle_ICNR conv
    ni = half + x_in_c
    p["c1_w"], p["c1_b"] = pg.conv(nf, ni, 3, 3, bias=True)
    p["c2_w"], p["c2_b"] = pg.conv(nf, nf, 3, 3, bias=True)
    mid = int(nf / 16.0)
    p["ca_w1"], p["ca_b1"] = pg.linear(mid, nf)
    p["ca_w2"], p["ca_b2"] = pg.linear(nf, mid)
    p["sa_w"], p["sa_b"] = pg.conv(1, 2, 3, 3, bias=True)
    return p


# ----------------------------------------------------------------------------
# UnetBlock forward
# ----------------------------------------------------------------------------
def unet_block_forward(up_in, left_in, p):
    """up_in: (N, up_in_c, h, w) NCHW, left_in: (N, x_in_c, 2h, 2w) NCHW -> (N, nf, 2h, 2w)."""
    up = jnp.transpose(up_in, (0, 2, 3, 1)).astype(jnp.float32)
    left = jnp.transpose(left_in, (0, 2, 3, 1)).astype(jnp.float32)
    n, h, w, up_c = up.shape
    half = up_c // 2

    # PixelShuffle_ICNR: 1x1 conv (up_c -> 4*half) + bias + ReLU, then PixelShuffle(2)
    shuf_w = p["shuf_w"].reshape(4 * half, up_c)
    y = matmul_bias_act(up.reshape(n * h * w, up_c), jnp.transpose(shuf_w),
                        p["shuf_b"], act="relu")
    up_ps = pixel_shuffle(y.reshape(n, h, w, 4 * half), 2)          # (n, 2h, 2w, half)

    # cat_x = relu(cat([up_ps, bn(left)]));  BN (eval, default stats: scale=1/sqrt(1+eps),
    # shift=0) folded into conv1's left-channel weight columns, relu fused into the conv1 kernel.
    cat = jnp.concatenate([up_ps, left], axis=-1)
    bn_scale = 1.0 / math.sqrt(1.0 + BN_EPS)
    c1_w = jnp.concatenate([p["c1_w"][:, :half], p["c1_w"][:, half:] * bn_scale], axis=1)
    x = conv3x3_bias_act(cat, c1_w, p["c1_b"], act="relu", in_act="relu")

    # CBAM (channel + spatial attention) fused in a single Pallas kernel per batch image
    x = cbam(x, p)

    # conv2 (3x3 + bias + ReLU)
    x = conv3x3_bias_act(x, p["c2_w"], p["c2_b"], act="relu")
    return jnp.transpose(x, (0, 3, 1, 2))                           # back to NCHW


if __name__ == "__main__":
    key = jax.random.PRNGKey(0)
    k_up, k_left = jax.random.split(key)
    up_in_c, x_in_c, nf = 64, 64, 32   # UnetBlock(64, 64, 32) (dec1 of the original network)
    up_in = jax.random.normal(k_up, (2, up_in_c, 8, 8), jnp.float32)
    left_in = jax.random.normal(k_left, (2, x_in_c, 16, 16), jnp.float32)
    params = build_unet_block_params(up_in_c, x_in_c, nf, seed=0)

    out = jax.jit(unet_block_forward)(up_in, left_in, params)
    out = jax.block_until_ready(out)
    assert out.shape == (2, nf, 16, 16), out.shape
    assert bool(jnp.all(jnp.isfinite(out)))
    print("KERNEL_OK")
</pallas_src>

<mosaic_0001>
module attributes {stable_mosaic.version = 11 : i64} {
  func.func @_mm_kernel(%arg0: i32, %arg1: i32, %arg2: memref<128x64xbf16, #tpu.memory_space<vmem>>, %arg3: memref<64x128xbf16, #tpu.memory_space<vmem>>, %arg4: memref<1x128xf32, #tpu.memory_space<vmem>>, %arg5: memref<128x128xf32, #tpu.memory_space<vmem>>, %arg6: memref<128x128xf32, #tpu.memory_space<vmem>>) attributes {dimension_semantics = [#tpu.dimension_semantics<parallel>, #tpu.dimension_semantics<arbitrary>], iteration_bounds = array<i64: 1, 1>, scalar_prefetch = 0 : i64, scratch_operands = 1 : i64, tpu.core_type = #tpu.core_type<tc>, window_params = [{transform_indices = @transform_0, window_bounds = array<i64: 128, 64>}, {transform_indices = @transform_1, window_bounds = array<i64: 64, 128>}, {pipeline_mode = #tpu.pipeline_mode<synchronous>, transform_indices = @transform_2, window_bounds = array<i64: 1, 128>}, {transform_indices = @transform_3, window_bounds = array<i64: 128, 128>}]} {
    %c0_i32 = arith.constant 0 : i32
    %0 = arith.cmpi eq, %arg1, %c0_i32 : i32
    %1 = arith.extui %0 : i1 to i32
    %c0_i32_0 = arith.constant 0 : i32
    %2 = arith.cmpi ne, %1, %c0_i32_0 : i32
    scf.if %2 {
      %cst_10 = arith.constant 0.000000e+00 : f32
      %12 = vector.broadcast %cst_10 : f32 to vector<128x128xf32>
      %c0_11 = arith.constant 0 : index
      %c0_12 = arith.constant 0 : index
      %13 = vector.load %arg6[%c0_11, %c0_12] : memref<128x128xf32, #tpu.memory_space<vmem>>, vector<128x128xf32>
      tpu.vector_store %arg6[%c0_11, %c0_12], %12 {strides = array<i32>} : memref<128x128xf32, #tpu.memory_space<vmem>>, vector<128x128xf32>,
    } else {
    }
    %c0 = arith.constant 0 : index
    %c0_1 = arith.constant 0 : index
    %3 = vector.load %arg6[%c0, %c0_1] : memref<128x128xf32, #tpu.memory_space<vmem>>, vector<128x128xf32>
    %c0_2 = arith.constant 0 : index
    %c0_3 = arith.constant 0 : index
    %4 = vector.load %arg2[%c0_2, %c0_3] : memref<128x64xbf16, #tpu.memory_space<vmem>>, vector<128x64xbf16>
    %c0_4 = arith.constant 0 : index
    %c0_5 = arith.constant 0 : index
    %5 = vector.load %arg3[%c0_4, %c0_5] : memref<64x128xbf16, #tpu.memory_space<vmem>>, vector<64x128xbf16>
    %cst = arith.constant dense<0.000000e+00> : vector<128x128xf32>
    %6 = tpu.matmul %4, %5, %cst {dimension_numbers = #tpu.dot_dimension_numbers<[1], [0], [0], [1], [0, 0, 1, 1], [], []>} : vector<128x64xbf16>, vector<64x128xbf16>, vector<128x128xf32> -> vector<128x128xf32>
    %7 = arith.addf %3, %6 : vector<128x128xf32>
    %c0_6 = arith.constant 0 : index
    %c0_7 = arith.constant 0 : index
    %8 = vector.load %arg6[%c0_6, %c0_7] : memref<128x128xf32, #tpu.memory_space<vmem>>, vector<128x128xf32>
    tpu.vector_store %arg6[%c0_6, %c0_7], %7 {strides = array<i32>} : memref<128x128xf32, #tpu.memory_space<vmem>>, vector<128x128xf32>,
    %c0_i32_8 = arith.constant 0 : i32
    %9 = arith.cmpi eq, %arg1, %c0_i32_8 : i32
    %10 = arith.extui %9 : i1 to i32
    %c0_i32_9 = arith.constant 0 : i32
    %11 = arith.cmpi ne, %10, %c0_i32_9 : i32
    scf.if %11 {
      %c0_10 = arith.constant 0 : index
      %c0_11 = arith.constant 0 : index
      %12 = vector.load %arg6[%c0_10, %c0_11] : memref<128x128xf32, #tpu.memory_space<vmem>>, vector<128x128xf32>
      %c0_12 = arith.constant 0 : index
      %c0_13 = arith.constant 0 : index
      %13 = vector.load %arg4[%c0_12, %c0_13] : memref<1x128xf32, #tpu.memory_space<vmem>>, vector<1x128xf32>
      %14 = vector.broadcast %13 : vector<1x128xf32> to vector<128x128xf32>
      %15 = arith.addf %12, %14 : vector<128x128xf32>
      %cst_14 = arith.constant 0.000000e+00 : f32
      %16 = vector.broadcast %cst_14 : f32 to vector<128x128xf32>
      %17 = arith.maximumf %15, %16 : vector<128x128xf32>
      %c0_15 = arith.constant 0 : index
      %c0_16 = arith.constant 0 : index
      %18 = vector.load %arg5[%c0_15, %c0_16] : memref<128x128xf32, #tpu.memory_space<vmem>>, vector<128x128xf32>
      tpu.vector_store %arg5[%c0_15, %c0_16], %17 {strides = array<i32>} : memref<128x128xf32, #tpu.memory_space<vmem>>, vector<128x128xf32>,
    } else {
    }
    return
  }
  func.func @transform_0(%arg0: i32, %arg1: i32) -> (i32, i32) {
    %c0_i32 = arith.constant 0 : i32
    return %arg0, %arg1 : i32, i32
  }
  func.func @transform_1(%arg0: i32, %arg1: i32) -> (i32, i32) {
    %c0_i32 = arith.constant 0 : i32
    %c0_i32_0 = arith.constant 0 : i32
    return %arg1, %c0_i32 : i32, i32
  }
  func.func @transform_2(%arg0: i32, %arg1: i32) -> (i32, i32) {
    %c0_i32 = arith.constant 0 : i32
    %c0_i32_0 = arith.constant 0 : i32
    %c0_i32_1 = arith.constant 0 : i32
    return %c0_i32, %c0_i32_0 : i32, i32
  }
  func.func @transform_3(%arg0: i32, %arg1: i32) -> (i32, i32) {
    %c0_i32 = arith.constant 0 : i32
    %c0_i32_0 = arith.constant 0 : i32
    return %arg0, %c0_i32 : i32, i32
  }
}

module attributes {stable_mosaic.version = 11 : i64} {
  func.func @_conv3x3_kernel(%arg0: i32, %arg1: i32, %arg2: memref<1x288x96xbf16, #tpu.memory_space<vmem>>, %arg3: memref<1x3x96x32xbf16, #tpu.memory_space<vmem>>, %arg4: memref<1x32xf32, #tpu.memory_space<vmem>>, %arg5: memref<288x32xf32, #tpu.memory_space<vmem>>, %arg6: memref<288x32xf32, #tpu.memory_space<vmem>>) attributes {dimension_semantics = [#tpu.dimension_semantics<parallel>, #tpu.dimension_semantics<arbitrary>], iteration_bounds = array<i64: 2, 3>, scalar_prefetch = 0 : i64, scratch_operands = 1 : i64, tpu.core_type = #tpu.core_type<tc>, window_params = [{transform_indices = @transform_0, window_bounds = array<i64: 1, 288, 96>}, {transform_indices = @transform_1, window_bounds = array<i64: 1, 3, 96, 32>}, {pipeline_mode = #tpu.pipeline_mode<synchronous>, transform_indices = @transform_2, window_bounds = array<i64: 1, 32>}, {transform_indices = @transform_3, window_bounds = array<i64: 288, 32>}]} {
    %c0_i32 = arith.constant 0 : i32
    %0 = arith.cmpi eq, %arg1, %c0_i32 : i32
    %1 = arith.extui %0 : i1 to i32
    %c0_i32_0 = arith.constant 0 : i32
    %2 = arith.cmpi ne, %1, %c0_i32_0 : i32
    scf.if %2 {
      %cst_31 = arith.constant 0.000000e+00 : f32
      %34 = vector.broadcast %cst_31 : f32 to vector<288x32xf32>
      %c0_32 = arith.constant 0 : index
      %c0_33 = arith.constant 0 : index
      %35 = vector.load %arg6[%c0_32, %c0_33] : memref<288x32xf32, #tpu.memory_space<vmem>>, vector<288x32xf32>
      tpu.vector_store %arg6[%c0_32, %c0_33], %34 {strides = array<i32>} : memref<288x32xf32, #tpu.memory_space<vmem>>, vector<288x32xf32>,
    } else {
    }
    %c0 = arith.constant 0 : index
    %c0_1 = arith.constant 0 : index
    %c0_2 = arith.constant 0 : index
    %3 = vector.load %arg2[%c0, %c0_1, %c0_2] : memref<1x288x96xbf16, #tpu.memory_space<vmem>>, vector<1x288x96xbf16>
    %4 = vector.shape_cast %3 : vector<1x288x96xbf16> to vector<288x96xbf16>
    %cst = arith.constant 0.000000e+00 : bf16
    %5 = vector.broadcast %cst : bf16 to vector<288x96xbf16>
    %6 = arith.maximumf %4, %5 : vector<288x96xbf16>
    %c0_3 = arith.constant 0 : index
    %c0_4 = arith.constant 0 : index
    %c0_5 = arith.constant 0 : index
    %c0_6 = arith.constant 0 : index
    %7 = vector.load %arg3[%c0_3, %c0_4, %c0_5, %c0_6] : memref<1x3x96x32xbf16, #tpu.memory_space<vmem>>, vector<1x1x96x32xbf16>
    %8 = vector.shape_cast %7 : vector<1x1x96x32xbf16> to vector<96x32xbf16>
    %cst_7 = arith.constant dense<0.000000e+00> : vector<288x32xf32>
    %9 = tpu.matmul %6, %8, %cst_7 {dimension_numbers = #tpu.dot_dimension_numbers<[1], [0], [0], [1], [0, 0, 1, 1], [], []>} : vector<288x96xbf16>, vector<96x32xbf16>, vector<288x32xf32> -> vector<288x32xf32>
    %c0_8 = arith.constant 0 : index
    %c0_9 = arith.constant 0 : index
    %10 = vector.load %arg6[%c0_8, %c0_9] : memref<288x32xf32, #tpu.memory_space<vmem>>, vector<288x32xf32>
    %11 = arith.addf %10, %9 : vector<288x32xf32>
    %c0_10 = arith.constant 0 : index
    %c0_11 = arith.constant 0 : index
    %12 = vector.load %arg6[%c0_10, %c0_11] : memref<288x32xf32, #tpu.memory_space<vmem>>, vector<288x32xf32>
    tpu.vector_store %arg6[%c0_10, %c0_11], %11 {strides = array<i32>} : memref<288x32xf32, #tpu.memory_space<vmem>>, vector<288x32xf32>,
    %c0_12 = arith.constant 0 : index
    %c1 = arith.constant 1 : index
    %c0_13 = arith.constant 0 : index
    %c0_14 = arith.constant 0 : index
    %13 = vector.load %arg3[%c0_12, %c1, %c0_13, %c0_14] : memref<1x3x96x32xbf16, #tpu.memory_space<vmem>>, vector<1x1x96x32xbf16>
    %14 = vector.shape_cast %13 : vector<1x1x96x32xbf16> to vector<96x32xbf16>
    %cst_15 = arith.constant dense<0.000000e+00> : vector<288x32xf32>
    %15 = tpu.matmul %6, %14, %cst_15 {dimension_numbers = #tpu.dot_dimension_numbers<[1], [0], [0], [1], [0, 0, 1, 1], [], []>} : vector<288x96xbf16>, vector<96x32xbf16>, vector<288x32xf32> -> vector<288x32xf32>
    %16 = vector.extract_strided_slice %15 {offsets = [1, 0], sizes = [287, 32], strides = [1, 1]} : vector<288x32xf32> to vector<287x32xf32>
    %cst_16 = arith.constant 0.000000e+00 : f32
    %17 = vector.broadcast %cst_16 : f32 to vector<1x32xf32>
    %18 = tpu.concatenate %16, %17 in 0 : vector<287x32xf32>, vector<1x32xf32> -> vector<288x32xf32>
    %c0_17 = arith.constant 0 : index
    %c0_18 = arith.constant 0 : index
    %19 = vector.load %arg6[%c0_17, %c0_18] : memref<288x32xf32, #tpu.memory_space<vmem>>, vector<288x32xf32>
    %20 = arith.addf %19, %18 : vector<288x32xf32>
    %c0_19 = arith.constant 0 : index
    %c0_20 = arith.constant 0 : index
    %21 = vector.load %arg6[%c0_19, %c0_20] : memref<288x32xf32, #tpu.memory_space<vmem>>, vector<288x32xf32>
    tpu.vector_store %arg6[%c0_19, %c0_20], %20 {strides = array<i32>} : memref<288x32xf32, #tpu.memory_space<vmem>>, vector<288x32xf32>,
    %c0_21 = arith.constant 0 : index
    %c2 = arith.constant 2 : index
    %c0_22 = arith.constant 0 : index
    %c0_23 = arith.constant 0 : index
    %22 = vector.load %arg3[%c0_21, %c2, %c0_22, %c0_23] : memref<1x3x96x32xbf16, #tpu.memory_space<vmem>>, vector<1x1x96x32xbf16>
    %23 = vector.shape_cast %22 : vector<1x1x96x32xbf16> to vector<96x32xbf16>
    %cst_24 = arith.constant dense<0.000000e+00> : vector<288x32xf32>
    %24 = tpu.matmul %6, %23, %cst_24 {dimension_numbers = #tpu.dot_dimension_numbers<[1], [0], [0], [1], [0, 0, 1, 1], [], []>} : vector<288x96xbf16>, vector<96x32xbf16>, vector<288x32xf32> -> vector<288x32xf32>
    %25 = vector.extract_strided_slice %24 {offsets = [2, 0], sizes = [286, 32], strides = [1, 1]} : vector<288x32xf32> to vector<286x32xf32>
    %cst_25 = arith.constant 0.000000e+00 : f32
    %26 = vector.broadcast %cst_25 : f32 to vector<2x32xf32>
    %27 = tpu.concatenate %25, %26 in 0 : vector<286x32xf32>, vector<2x32xf32> -> vector<288x32xf32>
    %c0_26 = arith.constant 0 : index
    %c0_27 = arith.constant 0 : index
    %28 = vector.load %arg6[%c0_26, %c0_27] : memref<288x32xf32, #tpu.memory_space<vmem>>, vector<288x32xf32>
    %29 = arith.addf %28, %27 : vector<288x32xf32>
    %c0_28 = arith.constant 0 : index
    %c0_29 = arith.constant 0 : index
    %30 = vector.load %arg6[%c0_28, %c0_29] : memref<288x32xf32, #tpu.memory_space<vmem>>, vector<288x32xf32>
    tpu.vector_store %arg6[%c0_28, %c0_29], %29 {strides = array<i32>} : memref<288x32xf32, #tpu.memory_space<vmem>>, vector<288x32xf32>,
    %c2_i32 = arith.constant 2 : i32
    %31 = arith.cmpi eq, %arg1, %c2_i32 : i32
    %32 = arith.extui %31 : i1 to i32
    %c0_i32_30 = arith.constant 0 : i32
    %33 = arith.cmpi ne, %32, %c0_i32_30 : i32
    scf.if %33 {
      %c0_31 = arith.constant 0 : index
      %c0_32 = arith.constant 0 : index
      %34 = vector.load %arg6[%c0_31, %c0_32] : memref<288x32xf32, #tpu.memory_space<vmem>>, vector<288x32xf32>
      %c0_33 = arith.constant 0 : index
      %c0_34 = arith.constant 0 : index
      %35 = vector.load %arg4[%c0_33, %c0_34] : memref<1x32xf32, #tpu.memory_space<vmem>>, vector<1x32xf32>
      %36 = vector.broadcast %35 : vector<1x32xf32> to vector<288x32xf32>
      %37 = arith.addf %34, %36 : vector<288x32xf32>
      %cst_35 = arith.constant 0.000000e+00 : f32
      %38 = vector.broadcast %cst_35 : f32 to vector<288x32xf32>
      %39 = arith.maximumf %37, %38 : vector<288x32xf32>
      %c0_36 = arith.constant 0 : index
      %c0_37 = arith.constant 0 : index
      %40 = vector.load %arg5[%c0_36, %c0_37] : memref<288x32xf32, #tpu.memory_space<vmem>>, vector<288x32xf32>
      tpu.vector_store %arg5[%c0_36, %c0_37], %39 {strides = array<i32>} : memref<288x32xf32, #tpu.memory_space<vmem>>, vector<288x32xf32>,
    } else {
    }
    return
  }
  func.func @transform_0(%arg0: i32, %arg1: i32) -> (i32, i32, i32) {
    %c0_i32 = arith.constant 0 : i32
    %c0_i32_0 = arith.constant 0 : i32
    return %arg1, %arg0, %c0_i32 : i32, i32, i32
  }
  func.func @transform_1(%arg0: i32, %arg1: i32) -> (i32, i32, i32, i32) {
    %c0_i32 = arith.constant 0 : i32
    %c0_i32_0 = arith.constant 0 : i32
    %c0_i32_1 = arith.constant 0 : i32
    %c0_i32_2 = arith.constant 0 : i32
    return %arg1, %c0_i32, %c0_i32_0, %c0_i32_1 : i32, i32, i32, i32
  }
  func.func @transform_2(%arg0: i32, %arg1: i32) -> (i32, i32) {
    %c0_i32 = arith.constant 0 : i32
    %c0_i32_0 = arith.constant 0 : i32
    %c0_i32_1 = arith.constant 0 : i32
    return %c0_i32, %c0_i32_0 : i32, i32
  }
  func.func @transform_3(%arg0: i32, %arg1: i32) -> (i32, i32) {
    %c0_i32 = arith.constant 0 : i32
    %c0_i32_0 = arith.constant 0 : i32
    return %arg0, %c0_i32 : i32, i32
  }
}

module attributes {stable_mosaic.version = 11 : i64} {
  func.func @_cbam_kernel(%arg0: i32, %arg1: memref<1x256x32xf32, #tpu.memory_space<vmem>>, %arg2: memref<32x2xf32, #tpu.memory_space<vmem>>, %arg3: memref<1x2xf32, #tpu.memory_space<vmem>>, %arg4: memref<2x32xf32, #tpu.memory_space<vmem>>, %arg5: memref<1x32xf32, #tpu.memory_space<vmem>>, %arg6: memref<9x2xf32, #tpu.memory_space<vmem>>, %arg7: memref<1x1xf32, #tpu.memory_space<vmem>>, %arg8: memref<1x256x32xf32, #tpu.memory_space<vmem>>) attributes {dimension_semantics = [#tpu.dimension_semantics<parallel>], iteration_bounds = array<i64: 2>, scalar_prefetch = 0 : i64, scratch_operands = 0 : i64, tpu.core_type = #tpu.core_type<tc>, window_params = [{transform_indices = @transform_0, window_bounds = array<i64: 1, 256, 32>}, {pipeline_mode = #tpu.pipeline_mode<synchronous>, transform_indices = @transform_1, window_bounds = array<i64: 32, 2>}, {pipeline_mode = #tpu.pipeline_mode<synchronous>, transform_indices = @transform_2, window_bounds = array<i64: 1, 2>}, {pipeline_mode = #tpu.pipeline_mode<synchronous>, transform_indices = @transform_3, window_bounds = array<i64: 2, 32>}, {pipeline_mode = #tpu.pipeline_mode<synchronous>, transform_indices = @transform_4, window_bounds = array<i64: 1, 32>}, {pipeline_mode = #tpu.pipeline_mode<synchronous>, transform_indices = @transform_5, window_bounds = array<i64: 9, 2>}, {pipeline_mode = #tpu.pipeline_mode<synchronous>, transform_indices = @transform_6, window_bounds = array<i64: 1, 1>}, {transform_indices = @transform_7, window_bounds = array<i64: 1, 256, 32>}]} {
    %c0 = arith.constant 0 : index
    %c0_0 = arith.constant 0 : index
    %c0_1 = arith.constant 0 : index
    %0 = vector.load %arg1[%c0, %c0_0, %c0_1] : memref<1x256x32xf32, #tpu.memory_space<vmem>>, vector<1x256x32xf32>
    %1 = vector.shape_cast %0 : vector<1x256x32xf32> to vector<256x32xf32>
    %cst = arith.constant dense<0.000000e+00> : vector<32xf32>
    %2 = vector.multi_reduction <add>, %1, %cst [0] : vector<256x32xf32> to vector<32xf32>
    %3 = vector.shape_cast %2 : vector<32xf32> to vector<1x32xf32>
    %cst_2 = arith.constant 2.560000e+02 : f32
    %4 = vector.broadcast %cst_2 : f32 to vector<1x32xf32>
    %5 = arith.divf %3, %4 : vector<1x32xf32>
    %cst_3 = arith.constant dense<0xFF800000> : vector<32xf32>
    %6 = vector.multi_reduction <maximumf>, %1, %cst_3 [0] : vector<256x32xf32> to vector<32xf32>
    %7 = vector.shape_cast %6 : vector<32xf32> to vector<1x32xf32>
    %8 = tpu.concatenate %5, %7 in 0 : vector<1x32xf32>, vector<1x32xf32> -> vector<2x32xf32>
    %c0_4 = arith.constant 0 : index
    %c0_5 = arith.constant 0 : index
    %9 = vector.load %arg2[%c0_4, %c0_5] : memref<32x2xf32, #tpu.memory_space<vmem>>, vector<32x2xf32>
    %cst_6 = arith.constant dense<0.000000e+00> : vector<2x2xf32>
    %10 = tpu.matmul %8, %9, %cst_6 {dimension_numbers = #tpu.dot_dimension_numbers<[1], [0], [0], [1], [0, 0, 1, 1], [], []>} : vector<2x32xf32>, vector<32x2xf32>, vector<2x2xf32> -> vector<2x2xf32>
    %c0_7 = arith.constant 0 : index
    %c0_8 = arith.constant 0 : index
    %11 = vector.load %arg3[%c0_7, %c0_8] : memref<1x2xf32, #tpu.memory_space<vmem>>, vector<1x2xf32>
    %12 = vector.broadcast %11 : vector<1x2xf32> to vector<2x2xf32>
    %13 = arith.addf %10, %12 : vector<2x2xf32>
    %cst_9 = arith.constant 0.000000e+00 : f32
    %14 = vector.broadcast %cst_9 : f32 to vector<2x2xf32>
    %15 = arith.maximumf %13, %14 : vector<2x2xf32>
    %c0_10 = arith.constant 0 : index
    %c0_11 = arith.constant 0 : index
    %16 = vector.load %arg4[%c0_10, %c0_11] : memref<2x32xf32, #tpu.memory_space<vmem>>, vector<2x32xf32>
    %cst_12 = arith.constant dense<0.000000e+00> : vector<2x32xf32>
    %17 = tpu.matmul %15, %16, %cst_12 {dimension_numbers = #tpu.dot_dimension_numbers<[1], [0], [0], [1], [0, 0, 1, 1], [], []>} : vector<2x2xf32>, vector<2x32xf32>, vector<2x32xf32> -> vector<2x32xf32>
    %c0_13 = arith.constant 0 : index
    %c0_14 = arith.constant 0 : index
    %18 = vector.load %arg5[%c0_13, %c0_14] : memref<1x32xf32, #tpu.memory_space<vmem>>, vector<1x32xf32>
    %19 = vector.broadcast %18 : vector<1x32xf32> to vector<2x32xf32>
    %20 = arith.addf %17, %19 : vector<2x32xf32>
    %21 = vector.extract_strided_slice %20 {offsets = [0, 0], sizes = [1, 32], strides = [1, 1]} : vector<2x32xf32> to vector<1x32xf32>
    %22 = vector.extract_strided_slice %20 {offsets = [1, 0], sizes = [1, 32], strides = [1, 1]} : vector<2x32xf32> to vector<1x32xf32>
    %23 = arith.addf %21, %22 : vector<1x32xf32>
    %24 = arith.negf %23 : vector<1x32xf32>
    %25 = math.exp %24 : vector<1x32xf32>
    %cst_15 = arith.constant 1.000000e+00 : f32
    %26 = vector.broadcast %cst_15 : f32 to vector<1x32xf32>
    %27 = arith.addf %26, %25 : vector<1x32xf32>
    %28 = arith.divf %26, %27 : vector<1x32xf32>
    %29 = vector.broadcast %28 : vector<1x32xf32> to vector<256x32xf32>
    %30 = arith.mulf %1, %29 : vector<256x32xf32>
    %cst_16 = arith.constant dense<0xFF800000> : vector<256xf32>
    %31 = vector.multi_reduction <maximumf>, %30, %cst_16 [1] : vector<256x32xf32> to vector<256xf32>
    %32 = vector.shape_cast %31 : vector<256xf32> to vector<256x1xf32>
    %cst_17 = arith.constant dense<0.000000e+00> : vector<256xf32>
    %33 = vector.multi_reduction <add>, %30, %cst_17 [1] : vector<256x32xf32> to vector<256xf32>
    %34 = vector.shape_cast %33 : vector<256xf32> to vector<256x1xf32>
    %cst_18 = arith.constant 3.200000e+01 : f32
    %35 = vector.broadcast %cst_18 : f32 to vector<256x1xf32>
    %36 = arith.divf %34, %35 : vector<256x1xf32>
    %37 = tpu.concatenate %32, %36 in 1 : vector<256x1xf32>, vector<256x1xf32> -> vector<256x2xf32>
    %38 = tpu.iota {dimensions = array<i32: 0>} : vector<256x1xi32>
    %c16_i32 = arith.constant 16 : i32
    %c0_i32 = arith.constant 0 : i32
    %39 = arith.cmpi eq, %c16_i32, %c0_i32 : i32
    %c1_i32 = arith.constant 1 : i32
    %40 = arith.select %39, %c1_i32, %c16_i32 : i32
    %41 = vector.broadcast %40 : i32 to vector<256x1xi32>
    %42 = arith.remsi %38, %41 : vector<256x1xi32>
    %c0_i32_19 = arith.constant 0 : i32
    %43 = vector.broadcast %c0_i32_19 : i32 to vector<256x1xi32>
    %44 = arith.cmpi ne, %42, %43 : vector<256x1xi32>
    %c0_i32_20 = arith.constant 0 : i32
    %45 = vector.broadcast %c0_i32_20 : i32 to vector<256x1xi32>
    %46 = arith.cmpi slt, %42, %45 : vector<256x1xi32>
    %c0_i32_21 = arith.constant 0 : i32
    %47 = arith.cmpi slt, %40, %c0_i32_21 : i32
    %48 = vector.broadcast %47 : i1 to vector<256x1xi1>
    %49 = vector.broadcast %48 : vector<256x1xi1> to vector<256x1xi1>
    %50 = arith.xori %46, %49 : vector<256x1xi1>
    %51 = arith.andi %50, %44 : vector<256x1xi1>
    %52 = vector.broadcast %40 : i32 to vector<256x1xi32>
    %53 = arith.addi %42, %52 : vector<256x1xi32>
    %54 = arith.select %51, %53, %42 : vector<256x1xi1>, vector<256x1xi32>
    %cst_22 = arith.constant 0.000000e+00 : f32
    %55 = vector.broadcast %cst_22 : f32 to vector<256x1xf32>
    %c0_23 = arith.constant 0 : index
    %c0_24 = arith.constant 0 : index
    %56 = vector.load %arg7[%c0_23, %c0_24] : memref<1x1xf32, #tpu.memory_space<vmem>>, vector<1x1xf32>
    %57 = vector.broadcast %56 : vector<1x1xf32> to vector<256x1xf32>
    %58 = arith.addf %55, %57 : vector<256x1xf32>
    %cst_25 = arith.constant 0.000000e+00 : f32
    %59 = vector.broadcast %cst_25 : f32 to vector<17x2xf32>
    %60 = vector.extract_strided_slice %37 {offsets = [0, 0], sizes = [239, 2], strides = [1, 1]} : vector<256x2xf32> to vector<239x2xf32>
    %61 = tpu.concatenate %59, %60 in 0 : vector<17x2xf32>, vector<239x2xf32> -> vector<256x2xf32>
    %c0_i32_26 = arith.constant 0 : i32
    %62 = vector.broadcast %c0_i32_26 : i32 to vector<256x1xi32>
    %63 = arith.cmpi sgt, %54, %62 : vector<256x1xi32>
    %cst_27 = arith.constant 0.000000e+00 : f32
    %64 = vector.shape_cast %63 : vector<256x1xi1> to vector<256x1xi1>
    %65 = vector.broadcast %64 : vector<256x1xi1> to vector<256x2xi1>
    %66 = vector.broadcast %cst_27 : f32 to vector<256x2xf32>
    %67 = arith.select %65, %61, %66 : vector<256x2xi1>, vector<256x2xf32>
    %c0_28 = arith.constant 0 : index
    %c0_29 = arith.constant 0 : index
    %68 = vector.load %arg6[%c0_28, %c0_29] : memref<9x2xf32, #tpu.memory_space<vmem>>, vector<1x2xf32>
    %69 = vector.broadcast %68 : vector<1x2xf32> to vector<256x2xf32>
    %70 = arith.mulf %67, %69 : vector<256x2xf32>
    %cst_30 = arith.constant dense<0.000000e+00> : vector<256xf32>
    %71 = vector.multi_reduction <add>, %70, %cst_30 [1] : vector<256x2xf32> to vector<256xf32>
    %72 = vector.shape_cast %71 : vector<256xf32> to vector<256x1xf32>
    %73 = arith.addf %58, %72 : vector<256x1xf32>
    %cst_31 = arith.constant 0.000000e+00 : f32
    %74 = vector.broadcast %cst_31 : f32 to vector<16x2xf32>
    %75 = vector.extract_strided_slice %37 {offsets = [0, 0], sizes = [240, 2], strides = [1, 1]} : vector<256x2xf32> to vector<240x2xf32>
    %76 = tpu.concatenate %74, %75 in 0 : vector<16x2xf32>, vector<240x2xf32> -> vector<256x2xf32>
    %c1 = arith.constant 1 : index
    %c0_32 = arith.constant 0 : index
    %77 = vector.load %arg6[%c1, %c0_32] : memref<9x2xf32, #tpu.memory_space<vmem>>, vector<1x2xf32>
    %78 = vector.broadcast %77 : vector<1x2xf32> to vector<256x2xf32>
    %79 = arith.mulf %76, %78 : vector<256x2xf32>
    %cst_33 = arith.constant dense<0.000000e+00> : vector<256xf32>
    %80 = vector.multi_reduction <add>, %79, %cst_33 [1] : vector<256x2xf32> to vector<256xf32>
    %81 = vector.shape_cast %80 : vector<256xf32> to vector<256x1xf32>
    %82 = arith.addf %73, %81 : vector<256x1xf32>
    %cst_34 = arith.constant 0.000000e+00 : f32
    %83 = vector.broadcast %cst_34 : f32 to vector<15x2xf32>
    %84 = vector.extract_strided_slice %37 {offsets = [0, 0], sizes = [241, 2], strides = [1, 1]} : vector<256x2xf32> to vector<241x2xf32>
    %85 = tpu.concatenate %83, %84 in 0 : vector<15x2xf32>, vector<241x2xf32> -> vector<256x2xf32>
    %c15_i32 = arith.constant 15 : i32
    %86 = vector.broadcast %c15_i32 : i32 to vector<256x1xi32>
    %87 = arith.cmpi slt, %54, %86 : vector<256x1xi32>
    %cst_35 = arith.constant 0.000000e+00 : f32
    %88 = vector.shape_cast %87 : vector<256x1xi1> to vector<256x1xi1>
    %89 = vector.broadcast %88 : vector<256x1xi1> to vector<256x2xi1>
    %90 = vector.broadcast %cst_35 : f32 to vector<256x2xf32>
    %91 = arith.select %89, %85, %90 : vector<256x2xi1>, vector<256x2xf32>
    %c2 = arith.constant 2 : index
    %c0_36 = arith.constant 0 : index
    %92 = vector.load %arg6[%c2, %c0_36] : memref<9x2xf32, #tpu.memory_space<vmem>>, vector<1x2xf32>
    %93 = vector.broadcast %92 : vector<1x2xf32> to vector<256x2xf32>
    %94 = arith.mulf %91, %93 : vector<256x2xf32>
    %cst_37 = arith.constant dense<0.000000e+00> : vector<256xf32>
    %95 = vector.multi_reduction <add>, %94, %cst_37 [1] : vector<256x2xf32> to vector<256xf32>
    %96 = vector.shape_cast %95 : vector<256xf32> to vector<256x1xf32>
    %97 = arith.addf %82, %96 : vector<256x1xf32>
    %cst_38 = arith.constant 0.000000e+00 : f32
    %98 = vector.broadcast %cst_38 : f32 to vector<1x2xf32>
    %99 = vector.extract_strided_slice %37 {offsets = [0, 0], sizes = [255, 2], strides = [1, 1]} : vector<256x2xf32> to vector<255x2xf32>
    %100 = tpu.concatenate %98, %99 in 0 : vector<1x2xf32>, vector<255x2xf32> -> vector<256x2xf32>
    %c0_i32_39 = arith.constant 0 : i32
    %101 = vector.broadcast %c0_i32_39 : i32 to vector<256x1xi32>
    %102 = arith.cmpi sgt, %54, %101 : vector<256x1xi32>
    %cst_40 = arith.constant 0.000000e+00 : f32
    %103 = vector.shape_cast %102 : vector<256x1xi1> to vector<256x1xi1>
    %104 = vector.broadcast %103 : vector<256x1xi1> to vector<256x2xi1>
    %105 = vector.broadcast %cst_40 : f32 to vector<256x2xf32>
    %106 = arith.select %104, %100, %105 : vector<256x2xi1>, vector<256x2xf32>
    %c3 = arith.constant 3 : index
    %c0_41 = arith.constant 0 : index
    %107 = vector.load %arg6[%c3, %c0_41] : memref<9x2xf32, #tpu.memory_space<vmem>>, vector<1x2xf32>
    %108 = vector.broadcast %107 : vector<1x2xf32> to vector<256x2xf32>
    %109 = arith.mulf %106, %108 : vector<256x2xf32>
    %cst_42 = arith.constant dense<0.000000e+00> : vector<256xf32>
    %110 = vector.multi_reduction <add>, %109, %cst_42 [1] : vector<256x2xf32> to vector<256xf32>
    %111 = vector.shape_cast %110 : vector<256xf32> to vector<256x1xf32>
    %112 = arith.addf %97, %111 : vector<256x1xf32>
    %c4 = arith.constant 4 : index
    %c0_43 = arith.constant 0 : index
    %113 = vector.load %arg6[%c4, %c0_43] : memref<9x2xf32, #tpu.memory_space<vmem>>, vector<1x2xf32>
    %114 = vector.broadcast %113 : vector<1x2xf32> to vector<256x2xf32>
    %115 = arith.mulf %37, %114 : vector<256x2xf32>
    %cst_44 = arith.constant dense<0.000000e+00> : vector<256xf32>
    %116 = vector.multi_reduction <add>, %115, %cst_44 [1] : vector<256x2xf32> to vector<256xf32>
    %117 = vector.shape_cast %116 : vector<256xf32> to vector<256x1xf32>
    %118 = arith.addf %112, %117 : vector<256x1xf32>
    %119 = vector.extract_strided_slice %37 {offsets = [1, 0], sizes = [255, 2], strides = [1, 1]} : vector<256x2xf32> to vector<255x2xf32>
    %cst_45 = arith.constant 0.000000e+00 : f32
    %120 = vector.broadcast %cst_45 : f32 to vector<1x2xf32>
    %121 = tpu.concatenate %119, %120 in 0 : vector<255x2xf32>, vector<1x2xf32> -> vector<256x2xf32>
    %c15_i32_46 = arith.constant 15 : i32
    %122 = vector.broadcast %c15_i32_46 : i32 to vector<256x1xi32>
    %123 = arith.cmpi slt, %54, %122 : vector<256x1xi32>
    %cst_47 = arith.constant 0.000000e+00 : f32
    %124 = vector.shape_cast %123 : vector<256x1xi1> to vector<256x1xi1>
    %125 = vector.broadcast %124 : vector<256x1xi1> to vector<256x2xi1>
    %126 = vector.broadcast %cst_47 : f32 to vector<256x2xf32>
    %127 = arith.select %125, %121, %126 : vector<256x2xi1>, vector<256x2xf32>
    %c5 = arith.constant 5 : index
    %c0_48 = arith.constant 0 : index
    %128 = vector.load %arg6[%c5, %c0_48] : memref<9x2xf32, #tpu.memory_space<vmem>>, vector<1x2xf32>
    %129 = vector.broadcast %128 : vector<1x2xf32> to vector<256x2xf32>
    %130 = arith.mulf %127, %129 : vector<256x2xf32>
    %cst_49 = arith.constant dense<0.000000e+00> : vector<256xf32>
    %131 = vector.multi_reduction <add>, %130, %cst_49 [1] : vector<256x2xf32> to vector<256xf32>
    %132 = vector.shape_cast %131 : vector<256xf32> to vector<256x1xf32>
    %133 = arith.addf %118, %132 : vector<256x1xf32>
    %134 = vector.extract_strided_slice %37 {offsets = [15, 0], sizes = [241, 2], strides = [1, 1]} : vector<256x2xf32> to vector<241x2xf32>
    %cst_50 = arith.constant 0.000000e+00 : f32
    %135 = vector.broadcast %cst_50 : f32 to vector<15x2xf32>
    %136 = tpu.concatenate %134, %135 in 0 : vector<241x2xf32>, vector<15x2xf32> -> vector<256x2xf32>
    %c0_i32_51 = arith.constant 0 : i32
    %137 = vector.broadcast %c0_i32_51 : i32 to vector<256x1xi32>
    %138 = arith.cmpi sgt, %54, %137 : vector<256x1xi32>
    %cst_52 = arith.constant 0.000000e+00 : f32
    %139 = vector.shape_cast %138 : vector<256x1xi1> to vector<256x1xi1>
    %140 = vector.broadcast %139 : vector<256x1xi1> to vector<256x2xi1>
    %141 = vector.broadcast %cst_52 : f32 to vector<256x2xf32>
    %142 = arith.select %140, %136, %141 : vector<256x2xi1>, vector<256x2xf32>
    %c6 = arith.constant 6 : index
    %c0_53 = arith.constant 0 : index
    %143 = vector.load %arg6[%c6, %c0_53] : memref<9x2xf32, #tpu.memory_space<vmem>>, vector<1x2xf32>
    %144 = vector.broadcast %143 : vector<1x2xf32> to vector<256x2xf32>
    %145 = arith.mulf %142, %144 : vector<256x2xf32>
    %cst_54 = arith.constant dense<0.000000e+00> : vector<256xf32>
    %146 = vector.multi_reduction <add>, %145, %cst_54 [1] : vector<256x2xf32> to vector<256xf32>
    %147 = vector.shape_cast %146 : vector<256xf32> to vector<256x1xf32>
    %148 = arith.addf %133, %147 : vector<256x1xf32>
    %149 = vector.extract_strided_slice %37 {offsets = [16, 0], sizes = [240, 2], strides = [1, 1]} : vector<256x2xf32> to vector<240x2xf32>
    %cst_55 = arith.constant 0.000000e+00 : f32
    %150 = vector.broadcast %cst_55 : f32 to vector<16x2xf32>
    %151 = tpu.concatenate %149, %150 in 0 : vector<240x2xf32>, vector<16x2xf32> -> vector<256x2xf32>
    %c7 = arith.constant 7 : index
    %c0_56 = arith.constant 0 : index
    %152 = vector.load %arg6[%c7, %c0_56] : memref<9x2xf32, #tpu.memory_space<vmem>>, vector<1x2xf32>
    %153 = vector.broadcast %152 : vector<1x2xf32> to vector<256x2xf32>
    %154 = arith.mulf %151, %153 : vector<256x2xf32>
    %cst_57 = arith.constant dense<0.000000e+00> : vector<256xf32>
    %155 = vector.multi_reduction <add>, %154, %cst_57 [1] : vector<256x2xf32> to vector<256xf32>
    %156 = vector.shape_cast %155 : vector<256xf32> to vector<256x1xf32>
    %157 = arith.addf %148, %156 : vector<256x1xf32>
    %158 = vector.extract_strided_slice %37 {offsets = [17, 0], sizes = [239, 2], strides = [1, 1]} : vector<256x2xf32> to vector<239x2xf32>
    %cst_58 = arith.constant 0.000000e+00 : f32
    %159 = vector.broadcast %cst_58 : f32 to vector<17x2xf32>
    %160 = tpu.concatenate %158, %159 in 0 : vector<239x2xf32>, vector<17x2xf32> -> vector<256x2xf32>
    %c15_i32_59 = arith.constant 15 : i32
    %161 = vector.broadcast %c15_i32_59 : i32 to vector<256x1xi32>
    %162 = arith.cmpi slt, %54, %161 : vector<256x1xi32>
    %cst_60 = arith.constant 0.000000e+00 : f32
    %163 = vector.shape_cast %162 : vector<256x1xi1> to vector<256x1xi1>
    %164 = vector.broadcast %163 : vector<256x1xi1> to vector<256x2xi1>
    %165 = vector.broadcast %cst_60 : f32 to vector<256x2xf32>
    %166 = arith.select %164, %160, %165 : vector<256x2xi1>, vector<256x2xf32>
    %c8 = arith.constant 8 : index
    %c0_61 = arith.constant 0 : index
    %167 = vector.load %arg6[%c8, %c0_61] : memref<9x2xf32, #tpu.memory_space<vmem>>, vector<1x2xf32>
    %168 = vector.broadcast %167 : vector<1x2xf32> to vector<256x2xf32>
    %169 = arith.mulf %166, %168 : vector<256x2xf32>
    %cst_62 = arith.constant dense<0.000000e+00> : vector<256xf32>
    %170 = vector.multi_reduction <add>, %169, %cst_62 [1] : vector<256x2xf32> to vector<256xf32>
    %171 = vector.shape_cast %170 : vector<256xf32> to vector<256x1xf32>
    %172 = arith.addf %157, %171 : vector<256x1xf32>
    %173 = arith.negf %172 : vector<256x1xf32>
    %174 = math.exp %173 : vector<256x1xf32>
    %cst_63 = arith.constant 1.000000e+00 : f32
    %175 = vector.broadcast %cst_63 : f32 to vector<256x1xf32>
    %176 = arith.addf %175, %174 : vector<256x1xf32>
    %177 = arith.divf %175, %176 : vector<256x1xf32>
    %178 = vector.broadcast %177 : vector<256x1xf32> to vector<256x32xf32>
    %179 = arith.mulf %30, %178 : vector<256x32xf32>
    %c0_64 = arith.constant 0 : index
    %c0_65 = arith.constant 0 : index
    %c0_66 = arith.constant 0 : index
    %180 = vector.load %arg8[%c0_64, %c0_65, %c0_66] : memref<1x256x32xf32, #tpu.memory_space<vmem>>, vector<1x256x32xf32>
    %181 = vector.shape_cast %180 : vector<1x256x32xf32> to vector<256x32xf32>
    %182 = vector.shape_cast %179 : vector<256x32xf32> to vector<1x256x32xf32>
    tpu.vector_store %arg8[%c0_64, %c0_65, %c0_66], %182 {strides = array<i32>} : memref<1x256x32xf32, #tpu.memory_space<vmem>>, vector<1x256x32xf32>,
    return
  }
  func.func @transform_0(%arg0: i32) -> (i32, i32, i32) {
    %c0_i32 = arith.constant 0 : i32
    %c0_i32_0 = arith.constant 0 : i32
    %c0_i32_1 = arith.constant 0 : i32
    return %arg0, %c0_i32, %c0_i32_0 : i32, i32, i32
  }
  func.func @transform_1(%arg0: i32) -> (i32, i32) {
    %c0_i32 = arith.constant 0 : i32
    %c0_i32_0 = arith.constant 0 : i32
    %c0_i32_1 = arith.constant 0 : i32
    return %c0_i32, %c0_i32_0 : i32, i32
  }
  func.func @transform_2(%arg0: i32) -> (i32, i32) {
    %c0_i32 = arith.constant 0 : i32
    %c0_i32_0 = arith.constant 0 : i32
    %c0_i32_1 = arith.constant 0 : i32
    return %c0_i32, %c0_i32_0 : i32, i32
  }
  func.func @transform_3(%arg0: i32) -> (i32, i32) {
    %c0_i32 = arith.constant 0 : i32
    %c0_i32_0 = arith.constant 0 : i32
    %c0_i32_1 = arith.constant 0 : i32
    return %c0_i32, %c0_i32_0 : i32, i32
  }
  func.func @transform_4(%arg0: i32) -> (i32, i32) {
    %c0_i32 = arith.constant 0 : i32
    %c0_i32_0 = arith.constant 0 : i32
    %c0_i32_1 = arith.constant 0 : i32
    return %c0_i32, %c0_i32_0 : i32, i32
  }
  func.func @transform_5(%arg0: i32) -> (i32, i32) {
    %c0_i32 = arith.constant 0 : i32
    %c0_i32_0 = arith.constant 0 : i32
    %c0_i32_1 = arith.constant 0 : i32
    return %c0_i32, %c0_i32_0 : i32, i32
  }
  func.func @transform_6(%arg0: i32) -> (i32, i32) {
    %c0_i32 = arith.constant 0 : i32
    %c0_i32_0 = arith.constant 0 : i32
    %c0_i32_1 = arith.constant 0 : i32
    return %c0_i32, %c0_i32_0 : i32, i32
  }
  func.func @transform_7(%arg0: i32) -> (i32, i32, i32) {
    %c0_i32 = arith.constant 0 : i32
    %c0_i32_0 = arith.constant 0 : i32
    %c0_i32_1 = arith.constant 0 : i32
    return %arg0, %c0_i32, %c0_i32_0 : i32, i32, i32
  }
}

module attributes {stable_mosaic.version = 11 : i64} {
  func.func @_conv3x3_kernel(%arg0: i32, %arg1: i32, %arg2: memref<1x288x32xbf16, #tpu.memory_space<vmem>>, %arg3: memref<1x3x32x32xbf16, #tpu.memory_space<vmem>>, %arg4: memref<1x32xf32, #tpu.memory_space<vmem>>, %arg5: memref<288x32xf32, #tpu.memory_space<vmem>>, %arg6: memref<288x32xf32, #tpu.memory_space<vmem>>) attributes {dimension_semantics = [#tpu.dimension_semantics<parallel>, #tpu.dimension_semantics<arbitrary>], iteration_bounds = array<i64: 2, 3>, scalar_prefetch = 0 : i64, scratch_operands = 1 : i64, tpu.core_type = #tpu.core_type<tc>, window_params = [{transform_indices = @transform_0, window_bounds = array<i64: 1, 288, 32>}, {transform_indices = @transform_1, window_bounds = array<i64: 1, 3, 32, 32>}, {pipeline_mode = #tpu.pipeline_mode<synchronous>, transform_indices = @transform_2, window_bounds = array<i64: 1, 32>}, {transform_indices = @transform_3, window_bounds = array<i64: 288, 32>}]} {
    %c0_i32 = arith.constant 0 : i32
    %0 = arith.cmpi eq, %arg1, %c0_i32 : i32
    %1 = arith.extui %0 : i1 to i32
    %c0_i32_0 = arith.constant 0 : i32
    %2 = arith.cmpi ne, %1, %c0_i32_0 : i32
    scf.if %2 {
      %cst_30 = arith.constant 0.000000e+00 : f32
      %32 = vector.broadcast %cst_30 : f32 to vector<288x32xf32>
      %c0_31 = arith.constant 0 : index
      %c0_32 = arith.constant 0 : index
      %33 = vector.load %arg6[%c0_31, %c0_32] : memref<288x32xf32, #tpu.memory_space<vmem>>, vector<288x32xf32>
      tpu.vector_store %arg6[%c0_31, %c0_32], %32 {strides = array<i32>} : memref<288x32xf32, #tpu.memory_space<vmem>>, vector<288x32xf32>,
    } else {
    }
    %c0 = arith.constant 0 : index
    %c0_1 = arith.constant 0 : index
    %c0_2 = arith.constant 0 : index
    %3 = vector.load %arg2[%c0, %c0_1, %c0_2] : memref<1x288x32xbf16, #tpu.memory_space<vmem>>, vector<1x288x32xbf16>
    %4 = vector.shape_cast %3 : vector<1x288x32xbf16> to vector<288x32xbf16>
    %c0_3 = arith.constant 0 : index
    %c0_4 = arith.constant 0 : index
    %c0_5 = arith.constant 0 : index
    %c0_6 = arith.constant 0 : index
    %5 = vector.load %arg3[%c0_3, %c0_4, %c0_5, %c0_6] : memref<1x3x32x32xbf16, #tpu.memory_space<vmem>>, vector<1x1x32x32xbf16>
    %6 = vector.shape_cast %5 : vector<1x1x32x32xbf16> to vector<32x32xbf16>
    %cst = arith.constant dense<0.000000e+00> : vector<288x32xf32>
    %7 = tpu.matmul %4, %6, %cst {dimension_numbers = #tpu.dot_dimension_numbers<[1], [0], [0], [1], [0, 0, 1, 1], [], []>} : vector<288x32xbf16>, vector<32x32xbf16>, vector<288x32xf32> -> vector<288x32xf32>
    %c0_7 = arith.constant 0 : index
    %c0_8 = arith.constant 0 : index
    %8 = vector.load %arg6[%c0_7, %c0_8] : memref<288x32xf32, #tpu.memory_space<vmem>>, vector<288x32xf32>
    %9 = arith.addf %8, %7 : vector<288x32xf32>
    %c0_9 = arith.constant 0 : index
    %c0_10 = arith.constant 0 : index
    %10 = vector.load %arg6[%c0_9, %c0_10] : memref<288x32xf32, #tpu.memory_space<vmem>>, vector<288x32xf32>
    tpu.vector_store %arg6[%c0_9, %c0_10], %9 {strides = array<i32>} : memref<288x32xf32, #tpu.memory_space<vmem>>, vector<288x32xf32>,
    %c0_11 = arith.constant 0 : index
    %c1 = arith.constant 1 : index
    %c0_12 = arith.constant 0 : index
    %c0_13 = arith.constant 0 : index
    %11 = vector.load %arg3[%c0_11, %c1, %c0_12, %c0_13] : memref<1x3x32x32xbf16, #tpu.memory_space<vmem>>, vector<1x1x32x32xbf16>
    %12 = vector.shape_cast %11 : vector<1x1x32x32xbf16> to vector<32x32xbf16>
    %cst_14 = arith.constant dense<0.000000e+00> : vector<288x32xf32>
    %13 = tpu.matmul %4, %12, %cst_14 {dimension_numbers = #tpu.dot_dimension_numbers<[1], [0], [0], [1], [0, 0, 1, 1], [], []>} : vector<288x32xbf16>, vector<32x32xbf16>, vector<288x32xf32> -> vector<288x32xf32>
    %14 = vector.extract_strided_slice %13 {offsets = [1, 0], sizes = [287, 32], strides = [1, 1]} : vector<288x32xf32> to vector<287x32xf32>
    %cst_15 = arith.constant 0.000000e+00 : f32
    %15 = vector.broadcast %cst_15 : f32 to vector<1x32xf32>
    %16 = tpu.concatenate %14, %15 in 0 : vector<287x32xf32>, vector<1x32xf32> -> vector<288x32xf32>
    %c0_16 = arith.constant 0 : index
    %c0_17 = arith.constant 0 : index
    %17 = vector.load %arg6[%c0_16, %c0_17] : memref<288x32xf32, #tpu.memory_space<vmem>>, vector<288x32xf32>
    %18 = arith.addf %17, %16 : vector<288x32xf32>
    %c0_18 = arith.constant 0 : index
    %c0_19 = arith.constant 0 : index
    %19 = vector.load %arg6[%c0_18, %c0_19] : memref<288x32xf32, #tpu.memory_space<vmem>>, vector<288x32xf32>
    tpu.vector_store %arg6[%c0_18, %c0_19], %18 {strides = array<i32>} : memref<288x32xf32, #tpu.memory_space<vmem>>, vector<288x32xf32>,
    %c0_20 = arith.constant 0 : index
    %c2 = arith.constant 2 : index
    %c0_21 = arith.constant 0 : index
    %c0_22 = arith.constant 0 : index
    %20 = vector.load %arg3[%c0_20, %c2, %c0_21, %c0_22] : memref<1x3x32x32xbf16, #tpu.memory_space<vmem>>, vector<1x1x32x32xbf16>
    %21 = vector.shape_cast %20 : vector<1x1x32x32xbf16> to vector<32x32xbf16>
    %cst_23 = arith.constant dense<0.000000e+00> : vector<288x32xf32>
    %22 = tpu.matmul %4, %21, %cst_23 {dimension_numbers = #tpu.dot_dimension_numbers<[1], [0], [0], [1], [0, 0, 1, 1], [], []>} : vector<288x32xbf16>, vector<32x32xbf16>, vector<288x32xf32> -> vector<288x32xf32>
    %23 = vector.extract_strided_slice %22 {offsets = [2, 0], sizes = [286, 32], strides = [1, 1]} : vector<288x32xf32> to vector<286x32xf32>
    %cst_24 = arith.constant 0.000000e+00 : f32
    %24 = vector.broadcast %cst_24 : f32 to vector<2x32xf32>
    %25 = tpu.concatenate %23, %24 in 0 : vector<286x32xf32>, vector<2x32xf32> -> vector<288x32xf32>
    %c0_25 = arith.constant 0 : index
    %c0_26 = arith.constant 0 : index
    %26 = vector.load %arg6[%c0_25, %c0_26] : memref<288x32xf32, #tpu.memory_space<vmem>>, vector<288x32xf32>
    %27 = arith.addf %26, %25 : vector<288x32xf32>
    %c0_27 = arith.constant 0 : index
    %c0_28 = arith.constant 0 : index
    %28 = vector.load %arg6[%c0_27, %c0_28] : memref<288x32xf32, #tpu.memory_space<vmem>>, vector<288x32xf32>
    tpu.vector_store %arg6[%c0_27, %c0_28], %27 {strides = array<i32>} : memref<288x32xf32, #tpu.memory_space<vmem>>, vector<288x32xf32>,
    %c2_i32 = arith.constant 2 : i32
    %29 = arith.cmpi eq, %arg1, %c2_i32 : i32
    %30 = arith.extui %29 : i1 to i32
    %c0_i32_29 = arith.constant 0 : i32
    %31 = arith.cmpi ne, %30, %c0_i32_29 : i32
    scf.if %31 {
      %c0_30 = arith.constant 0 : index
      %c0_31 = arith.constant 0 : index
      %32 = vector.load %arg6[%c0_30, %c0_31] : memref<288x32xf32, #tpu.memory_space<vmem>>, vector<288x32xf32>
      %c0_32 = arith.constant 0 : index
      %c0_33 = arith.constant 0 : index
      %33 = vector.load %arg4[%c0_32, %c0_33] : memref<1x32xf32, #tpu.memory_space<vmem>>, vector<1x32xf32>
      %34 = vector.broadcast %33 : vector<1x32xf32> to vector<288x32xf32>
      %35 = arith.addf %32, %34 : vector<288x32xf32>
      %cst_34 = arith.constant 0.000000e+00 : f32
      %36 = vector.broadcast %cst_34 : f32 to vector<288x32xf32>
      %37 = arith.maximumf %35, %36 : vector<288x32xf32>
      %c0_35 = arith.constant 0 : index
      %c0_36 = arith.constant 0 : index
      %38 = vector.load %arg5[%c0_35, %c0_36] : memref<288x32xf32, #tpu.memory_space<vmem>>, vector<288x32xf32>
      tpu.vector_store %arg5[%c0_35, %c0_36], %37 {strides = array<i32>} : memref<288x32xf32, #tpu.memory_space<vmem>>, vector<288x32xf32>,
    } else {
    }
    return
  }
  func.func @transform_0(%arg0: i32, %arg1: i32) -> (i32, i32, i32) {
    %c0_i32 = arith.constant 0 : i32
    %c0_i32_0 = arith.constant 0 : i32
    return %arg1, %arg0, %c0_i32 : i32, i32, i32
  }
  func.func @transform_1(%arg0: i32, %arg1: i32) -> (i32, i32, i32, i32) {
    %c0_i32 = arith.constant 0 : i32
    %c0_i32_0 = arith.constant 0 : i32
    %c0_i32_1 = arith.constant 0 : i32
    %c0_i32_2 = arith.constant 0 : i32
    return %arg1, %c0_i32, %c0_i32_0, %c0_i32_1 : i32, i32, i32, i32
  }
  func.func @transform_2(%arg0: i32, %arg1: i32) -> (i32, i32) {
    %c0_i32 = arith.constant 0 : i32
    %c0_i32_0 = arith.constant 0 : i32
    %c0_i32_1 = arith.constant 0 : i32
    return %c0_i32, %c0_i32_0 : i32, i32
  }
  func.func @transform_3(%arg0: i32, %arg1: i32) -> (i32, i32) {
    %c0_i32 = arith.constant 0 : i32
    %c0_i32_0 = arith.constant 0 : i32
    return %arg0, %c0_i32 : i32, i32
  }
}

</mosaic_0001>

<bundles_post_ra>
// kernel: unet_block_forward.4
= control target key start
LH: loop header
LB: loop body
LE: loop exit
PB: predicated region body
PF: predicated region fallthrough
CT: control target
= control target key end

     0   :  { %vm139_vm0 = vcmask 523264   ;;  %s563_s1 = inlined_call_operand.vmem [shape: bf16[64,128], index: 1, kind: input, shape index: {}]   ;;  %s564_s0 = inlined_call_operand.vmem [shape: bf16[128,64], index: 0, kind: input, shape index: {}]   ;;  %s565_s2 = inlined_call_operand.vmem [shape: f32[1,128], index: 2, kind: input, shape index: {}]   ;;  %s566_s3 = inlined_call_operand.vmem [shape: f32[128,128], index: 3, kind: output, shape index: {}]  }
   0x1   :  { %v436_v0 = vld [vmem:[%s563_s1] sm:$0xff]   ;;  %v437_v1 = vld [vmem:[%s563_s1 + $0x8] sm:$0xff]   ;;  %v438_v2 = vld [vmem:[%s563_s1 + $0x10] sm:$0xff]  }
   0x2   :  { %404 = vmatprep.subr.bf16.mxu0 %v436_v0  ;;  %428 = vmatprep.subr.bf16.mxu1 %v436_v0  ;;  %v440_v3 = vld [vmem:[%s564_s0] sm:$0xff]   ;;  %v439_v5 = vld [vmem:[%s563_s1 + $0x18] sm:$0xff]   ;;  %v442_v6 = vld [vmem:[%s564_s0 + $0x8] sm:$0xff]  }
   0x3   :  { %405 = vmatpush3.bf16.msra.mxu0 %v436_v0  ;;  %432 = vmatpush3.bf16.msra.mxu1 %v436_v0  ;;  %v441_v4 = vld [vmem:[%s564_s0 + $0x20] sm:$0xff]   ;;  %v443_v7 = vld [vmem:[%s564_s0 + $0x28] sm:$0xff]   ;;  %v444_v8 = vld [vmem:[%s564_s0 + $0x10] sm:$0xff]  }
   0x4   :  { %406 = vmatprep.subr.bf16.mxu0 %v437_v1  ;;  %429 = vmatprep.subr.bf16.mxu1 %v437_v1  ;;  %v445_v9 = vld [vmem:[%s564_s0 + $0x30] sm:$0xff]   ;;  %v446_v10 = vld [vmem:[%s564_s0 + $0x18] sm:$0xff]   ;;  %v391_v12 = vld [vmem:[%s565_s2] ss:$0 sm:$0xff] }
   0x5   :  { %412 = vmatprep.mubr.msk.bf16.mxu0 %vm139_vm0, %v440_v3  ;;  %420 = vmatprep.mubr.msk.bf16.mxu1 %vm139_vm0, %v441_v4  ;;  %v447_v11 = vld [vmem:[%s564_s0 + $0x38] sm:$0xff]  }
   0x7   :  { %407 = vmatpush3.bf16.msra.mxu0 %v437_v1  ;;  %433 = vmatpush3.bf16.msra.mxu1 %v437_v1 }
   0x8   :  { %408 = vmatprep.subr.bf16.mxu0 %v438_v2  ;;  %430 = vmatprep.subr.bf16.mxu1 %v438_v2 }
   0xb   :  { %409 = vmatpush3.bf16.msra.mxu0 %v438_v2  ;;  %434 = vmatpush3.bf16.msra.mxu1 %v438_v2 }
   0xc   :  { %410 = vmatprep.subr.bf16.mxu0 %v439_v5  ;;  %431 = vmatprep.subr.bf16.mxu1 %v439_v5 }
   0xf   :  { %411 = vmatpush3.bf16.msra.mxu0 %v439_v5  ;;  %435 = vmatpush3.bf16.msra.mxu1 %v439_v5 }
  0x12   :  { %413 = vmatmul.mubr.msk.bf16.vlgmr.msra.gmra.mrb[0].mxu0 %vm139_vm0, %v442_v6  ;;  %421 = vmatmul.mubr.msk.bf16.vlgmr.msra.gmra.mrb[0].mxu1 %vm139_vm0, %v443_v7 }
  0x13   :  { %416 = vmatprep.mubr.msk.bf16.mxu0 %vm139_vm0, %v444_v8  ;;  %424 = vmatprep.mubr.msk.bf16.mxu1 %vm139_vm0, %v445_v9 }
  0x1a   :  { %417 = vmatmul.mubr.msk.bf16.gmra.mrb[4].mxu0 %vm139_vm0, %v446_v10  ;;  %425 = vmatmul.mubr.msk.bf16.gmra.mrb[4].mxu1 %vm139_vm0, %v447_v11 }
  0xe5   :  { %v414_v13 = vpop.f32.mrb[0].mxu0  ;;  %v422_v14 = vpop.f32.mrb[0].mxu1 }
  0xe6   :  { %v321_v15 = vadd.f32 %v414_v13, %v391_v12  ;;  %v329_v16 = vadd.f32 %v422_v14, %v391_v12  ;;  %v198_v17 = vpop.f32.mrb[1].mxu0  ;;  %v230_v18 = vpop.f32.mrb[1].mxu1 }
  0xe7   :  { %v319_v19 = vadd.f32 %v391_v12, %v198_v17  ;;  %v327_v20 = vadd.f32 %v391_v12, %v230_v18  ;;  %v415_v21 = vpop.f32.mrb[2].mxu0  ;;  %v423_v22 = vpop.f32.mrb[2].mxu1 }
  0xe8   :  { %v337_v23 = vmax.f32 %v321_v15, 0.0  ;;  %v345_v24 = vmax.f32 %v329_v16, 0.0  ;;  %v322_v25 = vadd.f32 %v415_v21, %v391_v12  ;;  %v330_v26 = vadd.f32 %v423_v22, %v391_v12  ;;  %v201_v27 = vpop.f32.mrb[3].mxu0  ;;  %v233_v28 = vpop.f32.mrb[3].mxu1 }
  0xe9   :  { %v335_v29 = vmax.f32 %v319_v19, 0.0  ;;  %v343_v30 = vmax.f32 %v327_v20, 0.0  ;;  %v320_v31 = vadd.f32 %v391_v12, %v201_v27  ;;  %v328_v32 = vadd.f32 %v391_v12, %v233_v28 }
  0xea   :  { %353 = vst [vmem:[%s566_s3 + $0x10] sm:$0xff] %v337_v23  ;;  %361 = vst [vmem:[%s566_s3 + $0x50] sm:$0xff] %v345_v24  ;;  %v338_v33 = vmax.f32 %v322_v25, 0.0  ;;  %v346_v34 = vmax.f32 %v330_v26, 0.0 }
  0xeb   :  { %351 = vst [vmem:[%s566_s3] sm:$0xff] %v335_v29  ;;  %359 = vst [vmem:[%s566_s3 + $0x40] sm:$0xff] %v343_v30  ;;  %v336_v35 = vmax.f32 %v320_v31, 0.0  ;;  %v344_v36 = vmax.f32 %v328_v32, 0.0 }
  0xec   :  { %354 = vst [vmem:[%s566_s3 + $0x18] sm:$0xff] %v338_v33  ;;  %362 = vst [vmem:[%s566_s3 + $0x58] sm:$0xff] %v346_v34 }
  0xed   :  { %352 = vst [vmem:[%s566_s3 + $0x8] sm:$0xff] %v336_v35  ;;  %360 = vst [vmem:[%s566_s3 + $0x48] sm:$0xff] %v344_v36  ;;  %v418_v37 = vpop.f32.mrb[4].mxu0  ;;  %v426_v38 = vpop.f32.mrb[4].mxu1 }
  0xee   :  { %v325_v39 = vadd.f32 %v418_v37, %v391_v12  ;;  %v333_v40 = vadd.f32 %v426_v38, %v391_v12  ;;  %v214_v41 = vpop.f32.mrb[5].mxu0  ;;  %v246_v42 = vpop.f32.mrb[5].mxu1 }
  0xef   :  { %v323_v43 = vadd.f32 %v391_v12, %v214_v41  ;;  %v331_v44 = vadd.f32 %v391_v12, %v246_v42  ;;  %v419_v45 = vpop.f32.mrb[6].mxu0  ;;  %v427_v46 = vpop.f32.mrb[6].mxu1 }
  0xf0   :  { %v341_v47 = vmax.f32 %v325_v39, 0.0  ;;  %v349_v48 = vmax.f32 %v333_v40, 0.0  ;;  %v326_v49 = vadd.f32 %v419_v45, %v391_v12  ;;  %v334_v50 = vadd.f32 %v427_v46, %v391_v12  ;;  %v217_v51 = vpop.f32.mrb[7].mxu0  ;;  %v249_v52 = vpop.f32.mrb[7].mxu1 }
  0xf1   :  { %v339_v53 = vmax.f32 %v323_v43, 0.0  ;;  %v347_v54 = vmax.f32 %v331_v44, 0.0  ;;  %v324_v55 = vadd.f32 %v391_v12, %v217_v51  ;;  %v332_v56 = vadd.f32 %v391_v12, %v249_v52 }
  0xf2   :  { %357 = vst [vmem:[%s566_s3 + $0x30] sm:$0xff] %v341_v47  ;;  %365 = vst [vmem:[%s566_s3 + $0x70] sm:$0xff] %v349_v48  ;;  %v342_v57 = vmax.f32 %v326_v49, 0.0  ;;  %v350_v58 = vmax.f32 %v334_v50, 0.0 }
  0xf3   :  { %355 = vst [vmem:[%s566_s3 + $0x20] sm:$0xff] %v339_v53  ;;  %363 = vst [vmem:[%s566_s3 + $0x60] sm:$0xff] %v347_v54  ;;  %v340_v59 = vmax.f32 %v324_v55, 0.0  ;;  %v348_v60 = vmax.f32 %v332_v56, 0.0 }
  0xf4   :  { %358 = vst [vmem:[%s566_s3 + $0x38] sm:$0xff] %v342_v57  ;;  %366 = vst [vmem:[%s566_s3 + $0x78] sm:$0xff] %v350_v58 }
  0xf5   :  { %356 = vst [vmem:[%s566_s3 + $0x28] sm:$0xff] %v340_v59  ;;  %364 = vst [vmem:[%s566_s3 + $0x68] sm:$0xff] %v348_v60 }

// kernel: unet_block_forward.5
= control target key start
LH: loop header
LB: loop body
LE: loop exit
PB: predicated region body
PF: predicated region fallthrough
CT: control target
= control target key end

     0   :  { %s2491_s12 = smov 0   ;;  %s2493_s13 = smov 0   ;;  %s3090_s0 = inlined_call_operand.vmem [shape: bf16[3,576,96], index: 0, kind: input, shape index: {}]   ;;  %s3091_s1 = inlined_call_operand.vmem [shape: bf16[3,3,96,32], index: 1, kind: input, shape index: {}]   ;;  %s3092_s2 = inlined_call_operand.vmem [shape: f32[1,32], index: 2, kind: input, shape index: {}]   ;;  %s3093_s3 = inlined_call_operand.vmem [shape: f32[576,32], index: 3, kind: output, shape index: {}]  }
   0x1   :  { %s2495_s14 = smov 0   ;;  %s2497_s15 = smov 0  }
   0x2   :  { %s2499_s16 = smov 0  }
   0x3 LB: > { %s22_s17 = sadd.s32 1, %s2459_s14  ;;  %s25_s18 = sadd.s32 1, %s2463_s15  ;;  %s2467_s16 = sphi %s2499_s16, %s13_s16   ;;  %s2463_s15 = sphi %s2497_s15, %s3097_s15   ;;  %s2459_s14 = sphi %s2495_s14, %s3096_s14   ;;  %s2455_s13 = sphi %s2493_s13, %s3095_s13   ;;  %s2451_s12 = sphi %s2491_s12, %s3094_s12  }
   0x4   : > { %p23_p0 = scmp.ge.s32.totalorder %s22_s17, 3  ;;  %p2016_p1 = scmp.ge.s32.totalorder %s2467_s16, 1 }
   0x5   : > { %p166_p2 = scmp.lt.s32.totalorder %s2467_s16, 7 }
   0x6   : > { %s3099_s17 = smov (%p23_p0, %s22_s17), 0  ;;  %s3101_s18 = smov (!%p23_p0, %s25_s18), %s2463_s15 }
   0x7   : > { %p167_p3 = pnand %p2016_p1, %p166_p2  ;;  %p27_p4 = scmp.ge.s32.totalorder %s3101_s18, 2 }
   0x8   : > { %s199_s19 = smul.u32 (!%p167_p3), 36, %s2455_s13  ;;  %p200_p5 = scmp.lt.s32.totalorder (!%p167_p3), %s2451_s12, 2 }
   0x9   : > { %s3103_s18 = smov (%p27_p4, %s3101_s18), 0  ;;  %170 = sbr.rel (%p167_p3) target bundleno = 404 (0x194), region = 32 }
   0xa   : > { %p202_p6 = scmp.lt.s32.totalorder (!%p167_p3), %s199_s19, 71  ;;  %p2020_p7 = scmp.ne.s32.totalorder (!%p167_p3), %s2451_s12, 0 }
  0x10   : > { %s201_s20 = scalar_select %p200_p5, %s2451_s12, 2 }
  0x11   : > { %s3105_s19 = smov (!%p202_p6, %s199_s19), 71  ;;  %224 = sbr.rel (%p2020_p7) target bundleno = 37 (0x25), region = 36 }
  0x12   : > { %s2367_s21 = smul.u32 72, %s201_s20  ;;  %s2019_s24 = sshll.u32 %s3105_s19, 3  ;;  %vm225_vm0 = vcmask (!%p2020_p7), 261120   ;;  %v2469_v0 = vmov (!%p2020_p7), 0.0  }
  0x13   : > { %s2368_s22 = smul.u32 144, %s201_s20  ;;  %s2538_s7 = scalar_lea.vmem %s3093_s3, %s2019_s24  ;;  %226 = vst.msk [vmem:[#allocation2] sm:$0xff] (!%p2020_p7), %vm225_vm0, %v2469_v0  ;;  %227 = vst.msk [vmem:[#allocation2 + $0x8] sm:$0xff] (!%p2020_p7), %vm225_vm0, %v2469_v0 }
  0x14   : > { %s205_s23 = sadd.s32 %s2367_s21, %s3105_s19  ;;  %228 = vst.msk [vmem:[#allocation2 + $0x10] sm:$0xff] (!%p2020_p7), %vm225_vm0, %v2469_v0  ;;  %229 = vst.msk [vmem:[#allocation2 + $0x18] sm:$0xff] (!%p2020_p7), %vm225_vm0, %v2469_v0 }
  0x15   : > { %s2017_s25 = sshll.u32 %s205_s23, 2  ;;  %s2528_s28 = scalar_lea.vmem %s3091_s1, %s2368_s22  ;;  %230 = vst.msk [vmem:[#allocation2 + $0x20] sm:$0xff] (!%p2020_p7), %vm225_vm0, %v2469_v0  ;;  %231 = vst.msk [vmem:[#allocation2 + $0x28] sm:$0xff] (!%p2020_p7), %vm225_vm0, %v2469_v0 }
  0x16   : > { %s2533_s4 = scalar_lea.vmem %s3090_s0, %s2017_s25  ;;  %232 = vst.msk [vmem:[#allocation2 + $0x30] sm:$0xff] (!%p2020_p7), %vm225_vm0, %v2469_v0  ;;  %233 = vst.msk [vmem:[#allocation2 + $0x38] sm:$0xff] (!%p2020_p7), %vm225_vm0, %v2469_v0 }
  0x17   : > { %234 = vst.msk [vmem:[#allocation2 + $0x40] sm:$0xff] (!%p2020_p7), %vm225_vm0, %v2469_v0  ;;  %235 = vst.msk [vmem:[#allocation2 + $0x48] sm:$0xff] (!%p2020_p7), %vm225_vm0, %v2469_v0 }
  0x18   : > { %236 = vst.msk [vmem:[#allocation2 + $0x50] sm:$0xff] %vm225_vm0, %v2469_v0  ;;  %237 = vst.msk [vmem:[#allocation2 + $0x58] sm:$0xff] %vm225_vm0, %v2469_v0 }
  0x19   : > { %238 = vst.msk [vmem:[#allocation2 + $0x60] sm:$0xff] %vm225_vm0, %v2469_v0  ;;  %239 = vst.msk [vmem:[#allocation2 + $0x68] sm:$0xff] %vm225_vm0, %v2469_v0 }
  0x1a   : > { %240 = vst.msk [vmem:[#allocation2 + $0x70] sm:$0xff] %vm225_vm0, %v2469_v0  ;;  %241 = vst.msk [vmem:[#allocation2 + $0x78] sm:$0xff] %vm225_vm0, %v2469_v0 }
  0x1b   : > { %242 = vst.msk [vmem:[#allocation2 + $0x80] sm:$0xff] %vm225_vm0, %v2469_v0  ;;  %243 = vst.msk [vmem:[#allocation2 + $0x88] sm:$0xff] %vm225_vm0, %v2469_v0 }
  0x1c   : > { %244 = vst.msk [vmem:[#allocation2 + $0x90] sm:$0xff] %vm225_vm0, %v2469_v0  ;;  %245 = vst.msk [vmem:[#allocation2 + $0x98] sm:$0xff] %vm225_vm0, %v2469_v0 }
  0x1d   : > { %246 = vst.msk [vmem:[#allocation2 + $0xa0] sm:$0xff] %vm225_vm0, %v2469_v0  ;;  %247 = vst.msk [vmem:[#allocation2 + $0xa8] sm:$0xff] %vm225_vm0, %v2469_v0 }
  0x1e   : > { %248 = vst.msk [vmem:[#allocation2 + $0xb0] sm:$0xff] %vm225_vm0, %v2469_v0  ;;  %249 = vst.msk [vmem:[#allocation2 + $0xb8] sm:$0xff] %vm225_vm0, %v2469_v0 }
  0x1f   : > { %250 = vst.msk [vmem:[#allocation2 + $0xc0] sm:$0xff] %vm225_vm0, %v2469_v0  ;;  %251 = vst.msk [vmem:[#allocation2 + $0xc8] sm:$0xff] %vm225_vm0, %v2469_v0 }
  0x20   : > { %252 = vst.msk [vmem:[#allocation2 + $0xd0] sm:$0xff] %vm225_vm0, %v2469_v0  ;;  %253 = vst.msk [vmem:[#allocation2 + $0xd8] sm:$0xff] %vm225_vm0, %v2469_v0 }
  0x21   : > { %254 = vst.msk [vmem:[#allocation2 + $0xe0] sm:$0xff] %vm225_vm0, %v2469_v0  ;;  %255 = vst.msk [vmem:[#allocation2 + $0xe8] sm:$0xff] %vm225_vm0, %v2469_v0 }
  0x22   : > { %256 = vst.msk [vmem:[#allocation2 + $0xf0] sm:$0xff] %vm225_vm0, %v2469_v0  ;;  %257 = vst.msk [vmem:[#allocation2 + $0xf8] sm:$0xff] %vm225_vm0, %v2469_v0 }
  0x23   : > { %258 = vst.msk [vmem:[#allocation2 + $0x100] sm:$0xff] %vm225_vm0, %v2469_v0  ;;  %259 = vst.msk [vmem:[#allocation2 + $0x108] sm:$0xff] %vm225_vm0, %v2469_v0 }
  0x24   : > { %260 = vst.msk [vmem:[#allocation2 + $0x110] sm:$0xff] %vm225_vm0, %v2469_v0  ;;  %261 = vst.msk [vmem:[#allocation2 + $0x118] sm:$0xff] %vm225_vm0, %v2469_v0 }
  0x25 PF: > { %v2411_v1 = vld [vmem:[%s2528_s28] sm:$0xff]   ;;  %v2412_v2 = vld [vmem:[%s2528_s28 + $0x8] sm:$0xff]   ;;  %v2413_v3 = vld [vmem:[%s2528_s28 + $0x10] sm:$0xff]   ;;  %v2470_v7 = vmov 0   ;;  %vm472_vm1 = vcmask 785408   ;;  %vm776_vm2 = vcmask 261120  }
  0x26   : > { %2211 = vmatprep.subr.bf16.mxu0 %v2411_v1  ;;  %2355 = vmatprep.subr.bf16.mxu1 %v2411_v1  ;;  %v262_v4 = vld [vmem:[%s2533_s4] sm:$0xf]  ;;  %v263_v5 = vld [vmem:[%s2533_s4 + $0x4] sm:$0xf]  ;;  %v282_v6 = vld [vmem:[%s2533_s4 + $0x50] sm:$0xf] }
  0x27   : > { %2212 = vmatpush3.bf16.msra.mxu0 %v2411_v1  ;;  %2361 = vmatpush3.bf16.msra.mxu1 %v2411_v1  ;;  %v298_v8 = vmax.bf16 %v2470_v7, %v262_v4  ;;  %v299_v9 = vmax.bf16 %v2470_v7, %v263_v5  ;;  %v283_v10 = vld [vmem:[%s2533_s4 + $0x54] sm:$0xf]  ;;  %v318_v11 = vmax.bf16 %v2470_v7, %v282_v6  ;;  %v2414_v12 = vld [vmem:[%s2528_s28 + $0x18] sm:$0xff]   ;;  %v2415_v16 = vld [vmem:[%s2528_s28 + $0x20] sm:$0xff]   ;;  %vm1075_vm3 = vcmask 1046528   ;;  %p2135_p8 = scmp.ne.s32.totalorder %s2451_s12, 2 }
  0x28   : > { %2213 = vmatprep.subr.bf16.mxu0 %v2412_v2  ;;  %2356 = vmatprep.subr.bf16.mxu1 %v2412_v2  ;;  %v319_v13 = vmax.bf16 %v2470_v7, %v283_v10  ;;  %v264_v17 = vld [vmem:[%s2533_s4 + $0x8] sm:$0xf]  ;;  %v265_v18 = vld [vmem:[%s2533_s4 + $0xc] sm:$0xf]  ;;  %v284_v19 = vld [vmem:[%s2533_s4 + $0x58] sm:$0xf] }
  0x29   : > { %v2589_v14 = vcombine.low %v298_v8, %v299_v9  ;;  %v285_v20 = vld [vmem:[%s2533_s4 + $0x5c] sm:$0xf]  ;;  %v2416_v21 = vld [vmem:[%s2528_s28 + $0x28] sm:$0xff]   ;;  %v266_v22 = vld [vmem:[%s2533_s4 + $0x10] sm:$0xf]  ;;  %v300_v24 = vmax.bf16 %v2470_v7, %v264_v17  ;;  %v301_v25 = vmax.bf16 %v2470_v7, %v265_v18  ;;  %v320_v26 = vmax.bf16 %v2470_v7, %v284_v19 }
  0x2a   : > { %v2591_v15 = vcombine.low %v318_v11, %v319_v13  ;;  %v267_v23 = vld [vmem:[%s2533_s4 + $0x14] sm:$0xf]  ;;  %v321_v27 = vmax.bf16 %v2470_v7, %v285_v20  ;;  %v286_v28 = vld [vmem:[%s2533_s4 + $0x60] sm:$0xf]  ;;  %v287_v29 = vld [vmem:[%s2533_s4 + $0x64] sm:$0xf]  ;;  %v302_v32 = vmax.bf16 %v2470_v7, %v266_v22 }
  0x2b   : > { %2214 = vmatpush3.bf16.msra.mxu0 %v2412_v2  ;;  %2362 = vmatpush3.bf16.msra.mxu1 %v2412_v2  ;;  %v2417_v30 = vld [vmem:[%s2528_s28 + $0x30] sm:$0xff]   ;;  %v2418_v31 = vld [vmem:[%s2528_s28 + $0x60] sm:$0xff]   ;;  %v303_v33 = vmax.bf16 %v2470_v7, %v267_v23  ;;  %v322_v34 = vmax.bf16 %v2470_v7, %v286_v28  ;;  %v323_v35 = vmax.bf16 %v2470_v7, %v287_v29  ;;  %v2419_v38 = vld [vmem:[%s2528_s28 + $0x38] sm:$0xff]   ;;  %vm1554_vm4 = vcmask 1045504  }
  0x2c   : > { %2215 = vmatprep.subr.bf16.mxu0 %v2413_v3  ;;  %2357 = vmatprep.subr.bf16.mxu1 %v2413_v3  ;;  %v2617_v36 = vcombine.low %v300_v24, %v301_v25  ;;  %v2619_v37 = vcombine.low %v320_v26, %v321_v27  ;;  %v268_v39 = vld [vmem:[%s2533_s4 + $0x18] sm:$0xf]  ;;  %v269_v40 = vld [vmem:[%s2533_s4 + $0x1c] sm:$0xf]  ;;  %v288_v41 = vld [vmem:[%s2533_s4 + $0x68] sm:$0xf] }
  0x2d   : > { %2223 = vmatprep.mubr.msk.bf16.mxu0 %vm472_vm1, %v2589_v14  ;;  %2243 = vmatprep.mubr.msk.bf16.mxu1 %vm472_vm1, %v2591_v15  ;;  %v289_v42 = vld [vmem:[%s2533_s4 + $0x6c] sm:$0xf]  ;;  %v2626_v43 = vcombine.low %v302_v32, %v303_v33  ;;  %v270_v45 = vld [vmem:[%s2533_s4 + $0x20] sm:$0xf]  ;;  %v271_v46 = vld [vmem:[%s2533_s4 + $0x24] sm:$0xf]  ;;  %v2631_v47 = vcombine.low %v322_v34, %v323_v35  ;;  %v304_v48 = vmax.bf16 %v2470_v7, %v268_v39 }
  0x2e   : > { %v2420_v44 = vld [vmem:[%s2528_s28 + $0x68] sm:$0xff]   ;;  %v290_v49 = vld [vmem:[%s2533_s4 + $0x70] sm:$0xf]  ;;  %v291_v50 = vld [vmem:[%s2533_s4 + $0x74] sm:$0xf]  ;;  %v305_v51 = vmax.bf16 %v2470_v7, %v269_v40  ;;  %v324_v52 = vmax.bf16 %v2470_v7, %v288_v41  ;;  %v325_v53 = vmax.bf16 %v2470_v7, %v289_v42  ;;  %v306_v54 = vmax.bf16 %v2470_v7, %v270_v45 }
  0x2f   : > { %2216 = vmatpush3.bf16.msra.mxu0 %v2413_v3  ;;  %2363 = vmatpush3.bf16.msra.mxu1 %v2413_v3  ;;  %v307_v55 = vmax.bf16 %v2470_v7, %v271_v46  ;;  %v2421_v56 = vld [vmem:[%s2528_s28 + $0x40] sm:$0xff]   ;;  %v326_v57 = vmax.bf16 %v2470_v7, %v290_v49  ;;  %v327_v58 = vmax.bf16 %v2470_v7, %v291_v50  ;;  %v2423_v59 = vld [vmem:[%s2528_s28 + $0x70] sm:$0xff]   ;;  %v272_v62 = vld [vmem:[%s2533_s4 + $0x28] sm:$0xf] }
  0x30   : > { %2217 = vmatprep.subr.bf16.mxu0 %v2414_v12  ;;  %2358 = vmatprep.subr.bf16.mxu1 %v2414_v12  ;;  %v2653_v60 = vcombine.low %v304_v48, %v305_v51  ;;  %v2655_v61 = vcombine.low %v324_v52, %v325_v53  ;;  %v273_v63 = vld [vmem:[%s2533_s4 + $0x2c] sm:$0xf]  ;;  %v292_v0 = vld [vmem:[%s2533_s4 + $0x78] sm:$0xf]  ;;  %v293_v2 = vld [vmem:[%s2533_s4 + $0x7c] sm:$0xf]  ;;  %v308_v10 = vmax.bf16 %v2470_v7, %v272_v62 }
  0x31   : > { %v2660_v1 = vcombine.low %v306_v54, %v307_v55  ;;  %v2422_v3 = vld [vmem:[%s2528_s28 + $0x48] sm:$0xff]   ;;  %v274_v4 = vld [vmem:[%s2533_s4 + $0x30] sm:$0xf]  ;;  %v2665_v5 = vcombine.low %v326_v57, %v327_v58  ;;  %v275_v6 = vld [vmem:[%s2533_s4 + $0x34] sm:$0xf]  ;;  %v309_v11 = vmax.bf16 %v2470_v7, %v273_v63  ;;  %v329_v13 = vmax.bf16 %v2470_v7, %v293_v2 }
  0x32   : > { %v294_v8 = vld [vmem:[%s2533_s4 + $0x80] sm:$0xf]  ;;  %v295_v9 = vld [vmem:[%s2533_s4 + $0x84] sm:$0xf]  ;;  %v310_v17 = vmax.bf16 %v2470_v7, %v274_v4  ;;  %v311_v18 = vmax.bf16 %v2470_v7, %v275_v6  ;;  %v276_v24 = vld [vmem:[%s2533_s4 + $0x38] sm:$0xf] }
  0x33   : > { %2218 = vmatpush3.bf16.msra.mxu0 %v2414_v12  ;;  %2364 = vmatpush3.bf16.msra.mxu1 %v2414_v12  ;;  %v328_v12 = vmax.bf16 %v2470_v7, %v292_v0  ;;  %v330_v19 = vmax.bf16 %v2470_v7, %v294_v8  ;;  %v331_v20 = vmax.bf16 %v2470_v7, %v295_v9  ;;  %v277_v27 = vld [vmem:[%s2533_s4 + $0x3c] sm:$0xf]  ;;  %v296_v28 = vld [vmem:[%s2533_s4 + $0x88] sm:$0xf]  ;;  %v297_v29 = vld [vmem:[%s2533_s4 + $0x8c] sm:$0xf] }
  0x34   : > { %2219 = vmatprep.subr.bf16.mxu0 %v2415_v16  ;;  %2359 = vmatprep.subr.bf16.mxu1 %v2415_v16  ;;  %v2026_v22 = vcombine.low %v308_v10, %v309_v11  ;;  %v2027_v25 = vcombine.low %v310_v17, %v311_v18  ;;  %v279_v32 = vld [vmem:[%s2533_s4 + $0x44] sm:$0xf]  ;;  %v312_v33 = vmax.bf16 %v2470_v7, %v276_v24  ;;  %v2426_v34 = vld [vmem:[%s2528_s28 + $0x58] sm:$0xff]   ;;  %v2428_v40 = vld [vmem:[%s2528_s28 + $0x88] sm:$0xff]  }
  0x35   : > { %v2688_v23 = vcombine.low %v328_v12, %v329_v13  ;;  %v2691_v26 = vcombine.low %v330_v19, %v331_v20  ;;  %v313_v35 = vmax.bf16 %v2470_v7, %v277_v27  ;;  %v333_v39 = vmax.bf16 %v2470_v7, %v297_v29  ;;  %v280_v48 = vld [vmem:[%s2533_s4 + $0x48] sm:$0xf]  ;;  %v281_v49 = vld [vmem:[%s2533_s4 + $0x4c] sm:$0xf]  ;;  %v727_v53 = vld [vmem:[#allocation2 + $0xb8] sm:$0xff] }
  0x36   : > { %v315_v42 = vmax.bf16 %v2470_v7, %v279_v32  ;;  %v316_v50 = vmax.bf16 %v2470_v7, %v280_v48  ;;  %v317_v51 = vmax.bf16 %v2470_v7, %v281_v49  ;;  %v705_v58 = vld [vmem:[#allocation2 + $0x8] sm:$0xff]  ;;  %v710_v6 = vld [vmem:[#allocation2 + $0x30] sm:$0xff]  ;;  %v708_v9 = vld [vmem:[#allocation2 + $0x20] sm:$0xff] }
  0x37   : > { %2220 = vmatpush3.bf16.msra.mxu0 %v2415_v16  ;;  %2365 = vmatpush3.bf16.msra.mxu1 %v2415_v16  ;;  %v2425_v16 = vld [vmem:[%s2528_s28 + $0x78] sm:$0xff]   ;;  %v730_v8 = vld [vmem:[#allocation2 + $0xd0] sm:$0xff]  ;;  %v728_v10 = vld [vmem:[#allocation2 + $0xc0] sm:$0xff] }
  0x38   : > { %2221 = vmatprep.subr.bf16.mxu0 %v2416_v21  ;;  %2360 = vmatprep.subr.bf16.mxu1 %v2416_v21  ;;  %v2030_v52 = vcombine.low %v316_v50, %v317_v51  ;;  %v711_v13 = vld [vmem:[#allocation2 + $0x38] sm:$0xff]  ;;  %v713_v49 = vld [vmem:[#allocation2 + $0x48] sm:$0xff] }
  0x39   : > { %v733_v50 = vld [vmem:[#allocation2 + $0xe8] sm:$0xff] }
  0x3b   : > { %2222 = vmatpush3.bf16.msra.mxu0 %v2416_v21  ;;  %2366 = vmatpush3.bf16.msra.mxu1 %v2416_v21  ;;  %v2424_v21 = vld [vmem:[%s2528_s28 + $0x50] sm:$0xff]  }
  0x3c   : > { %2259 = vmatprep.subr.bf16.mxu1 %v2417_v30  ;;  %2307 = vmatprep.subr.bf16.mxu0 %v2418_v31 }
  0x3e   : > { %2224 = vmatmul.mubr.msk.bf16.vlgmr.msra.gmra.mrb[0].mxu0 %vm472_vm1, %v2617_v36  ;;  %2244 = vmatmul.mubr.msk.bf16.vlgmr.msra.gmra.mrb[0].mxu1 %vm472_vm1, %v2619_v37 }
  0x3f   : > { %2260 = vmatpush3.bf16.msra.mxu1 %v2417_v30  ;;  %2308 = vmatpush3.bf16.msra.mxu0 %v2418_v31  ;;  %v2427_v30 = vld [vmem:[%s2528_s28 + $0x80] sm:$0xff]  }
  0x40   : > { %2261 = vmatprep.subr.bf16.mxu1 %v2419_v38  ;;  %2227 = vmatprep.mubr.msk.bf16.mxu0 %vm472_vm1, %v2626_v43  ;;  %v278_v31 = vld [vmem:[%s2533_s4 + $0x40] sm:$0xf] }
  0x41   : > { %2247 = vmatprep.mubr.msk.bf16.mxu1 %vm472_vm1, %v2631_v47  ;;  %2309 = vmatprep.subr.bf16.mxu0 %v2420_v44  ;;  %v314_v41 = vmax.bf16 %v2470_v7, %v278_v31 }
  0x43   : > { %2262 = vmatpush3.bf16.msra.mxu1 %v2419_v38  ;;  %2310 = vmatpush3.bf16.msra.mxu0 %v2420_v44  ;;  %v332_v38 = vmax.bf16 %v2470_v7, %v296_v28  ;;  %v2028_v44 = vcombine.low %v312_v33, %v313_v35  ;;  %v2029_v46 = vcombine.low %v314_v41, %v315_v42  ;;  %v706_v7 = vld [vmem:[#allocation2 + $0x10] sm:$0xff]  ;;  %v712_v35 = vld [vmem:[#allocation2 + $0x40] sm:$0xff]  ;;  %v715_v41 = vld [vmem:[#allocation2 + $0x58] sm:$0xff] }
  0x44   : > { %2263 = vmatprep.subr.bf16.mxu1 %v2421_v56  ;;  %2311 = vmatprep.subr.bf16.mxu0 %v2423_v59  ;;  %v714_v33 = vld [vmem:[#allocation2 + $0x50] sm:$0xff]  ;;  %v735_v42 = vld [vmem:[#allocation2 + $0xf8] sm:$0xff] }
  0x45   : > { %v2038_v45 = vcombine.low %v332_v38, %v333_v39  ;;  %v732_v38 = vld [vmem:[#allocation2 + $0xe0] sm:$0xff] }
  0x46   : > { %2228 = vmatmul.mubr.msk.bf16.gmra.mrb[4].mxu0 %vm472_vm1, %v2653_v60  ;;  %2248 = vmatmul.mubr.msk.bf16.gmra.mrb[4].mxu1 %vm472_vm1, %v2655_v61 }
  0x47   : > { %2264 = vmatpush3.bf16.msra.mxu1 %v2421_v56  ;;  %2231 = vmatprep.mubr.msk.bf16.mxu0 %vm472_vm1, %v2660_v1 }
  0x48   : > { %2251 = vmatprep.mubr.msk.bf16.mxu1 %vm472_vm1, %v2665_v5  ;;  %2265 = vmatprep.subr.bf16.mxu1 %v2422_v3 }
  0x49   : > { %2312 = vmatpush3.bf16.msra.mxu0 %v2423_v59  ;;  %v725_v59 = vld [vmem:[#allocation2 + $0xa8] sm:$0xff] }
  0x4a   : > { %2313 = vmatprep.subr.bf16.mxu0 %v2425_v16 }
  0x4b   : > { %2266 = vmatpush3.bf16.msra.mxu1 %v2422_v3 }
  0x4c   : > { %2267 = vmatprep.subr.bf16.mxu1 %v2424_v21 }
  0x4d   : > { %2314 = vmatpush3.bf16.msra.mxu0 %v2425_v16  ;;  %v731_v16 = vld [vmem:[#allocation2 + $0xd8] sm:$0xff] }
  0x4e   : > { %2232 = vmatmul.mubr.msk.bf16.gmra.mrb[8].mxu0 %vm472_vm1, %v2026_v22  ;;  %2252 = vmatmul.mubr.msk.bf16.gmra.mrb[8].mxu1 %vm472_vm1, %v2688_v23 }
  0x4f   : > { %2235 = vmatprep.mubr.msk.bf16.mxu0 %vm472_vm1, %v2027_v25  ;;  %2255 = vmatprep.mubr.msk.bf16.mxu1 %vm472_vm1, %v2691_v26 }
  0x50   : > { %2268 = vmatpush3.bf16.msra.mxu1 %v2424_v21  ;;  %2315 = vmatprep.subr.bf16.mxu0 %v2427_v30  ;;  %v709_v21 = vld [vmem:[#allocation2 + $0x28] sm:$0xff] }
  0x51   : > { %2269 = vmatprep.subr.bf16.mxu1 %v2426_v34  ;;  %2316 = vmatpush3.bf16.msra.mxu0 %v2427_v30 }
  0x52   : > { %2317 = vmatprep.subr.bf16.mxu0 %v2428_v40 }
  0x54   : > { %2270 = vmatpush3.bf16.msra.mxu1 %v2426_v34  ;;  %v734_v34 = vld [vmem:[#allocation2 + $0xf0] sm:$0xff] }
  0x55   : > { %2318 = vmatpush3.bf16.msra.mxu0 %v2428_v40 }
  0x56   : > { %2236 = vmatmul.mubr.msk.bf16.gmra.mrb[12].mxu0 %vm472_vm1, %v2028_v44  ;;  %2256 = vmatmul.mubr.msk.bf16.gmra.mrb[12].mxu1 %vm472_vm1, %v2038_v45 }
  0x57   : > { %2239 = vmatprep.mubr.msk.bf16.mxu0 %vm472_vm1, %v2029_v46  ;;  %2271 = vmatprep.mubr.msk.bf16.mxu1 %vm472_vm1, %v2589_v14 }
  0x5e   : > { %2240 = vmatmul.mubr.msk.bf16.gmra.mrb[16].mxu0 %vm472_vm1, %v2030_v52  ;;  %2272 = vmatmul.mubr.msk.bf16.vlgmr.msra.gmra.mrb[16].mxu1 %vm472_vm1, %v2617_v36 }
  0x5f   : > { %2275 = vmatprep.mubr.msk.bf16.mxu1 %vm472_vm1, %v2626_v43  ;;  %2319 = vmatprep.mubr.msk.bf16.mxu0 %vm472_vm1, %v2589_v14  ;;  %v726_v14 = vld [vmem:[#allocation2 + $0xb0] sm:$0xff] }
  0x66   : > { %2276 = vmatmul.mubr.msk.bf16.gmra.mrb[20].mxu1 %vm472_vm1, %v2653_v60  ;;  %2320 = vmatmul.mubr.msk.bf16.vlgmr.msra.gmra.mrb[20].mxu0 %vm472_vm1, %v2617_v36  ;;  %v724_v36 = vld [vmem:[#allocation2 + $0xa0] sm:$0xff] }
  0x67   : > { %2279 = vmatprep.mubr.msk.bf16.mxu1 %vm472_vm1, %v2660_v1  ;;  %2323 = vmatprep.mubr.msk.bf16.mxu0 %vm472_vm1, %v2626_v43 }
  0x6e   : > { %2280 = vmatmul.mubr.msk.bf16.gmra.mrb[24].mxu1 %vm472_vm1, %v2026_v22  ;;  %2324 = vmatmul.mubr.msk.bf16.gmra.mrb[24].mxu0 %vm472_vm1, %v2653_v60 }
  0x6f   : > { %2283 = vmatprep.mubr.msk.bf16.mxu1 %vm472_vm1, %v2027_v25  ;;  %2327 = vmatprep.mubr.msk.bf16.mxu0 %vm472_vm1, %v2660_v1 }
  0x76   : > { %2284 = vmatmul.mubr.msk.bf16.gmra.mrb[28].mxu1 %vm472_vm1, %v2028_v44  ;;  %2328 = vmatmul.mubr.msk.bf16.gmra.mrb[28].mxu0 %vm472_vm1, %v2026_v22  ;;  %v729_v22 = vld [vmem:[#allocation2 + $0xc8] sm:$0xff] }
  0x77   : > { %2287 = vmatprep.mubr.msk.bf16.mxu1 %vm472_vm1, %v2029_v46  ;;  %2331 = vmatprep.mubr.msk.bf16.mxu0 %vm472_vm1, %v2027_v25 }
  0x7e   : > { %2288 = vmatmul.mubr.msk.bf16.gmra.mrb[32].mxu1 %vm472_vm1, %v2030_v52  ;;  %2332 = vmatmul.mubr.msk.bf16.gmra.mrb[32].mxu0 %vm472_vm1, %v2028_v44 }
  0x7f   : > { %2291 = vmatprep.mubr.msk.bf16.mxu1 %vm472_vm1, %v2591_v15  ;;  %2335 = vmatprep.mubr.msk.bf16.mxu0 %vm472_vm1, %v2029_v46 }
  0x86   : > { %2292 = vmatmul.mubr.msk.bf16.gmra.mrb[36].mxu1 %vm472_vm1, %v2619_v37  ;;  %2336 = vmatmul.mubr.msk.bf16.gmra.mrb[36].mxu0 %vm472_vm1, %v2030_v52 }
  0x87   : > { %2295 = vmatprep.mubr.msk.bf16.mxu1 %vm472_vm1, %v2631_v47  ;;  %2339 = vmatprep.mubr.msk.bf16.mxu0 %vm472_vm1, %v2591_v15  ;;  %v704_v15 = vld [vmem:[#allocation2] sm:$0xff] }
  0x8e   : > { %2296 = vmatmul.mubr.msk.bf16.gmra.mrb[40].mxu1 %vm472_vm1, %v2655_v61  ;;  %2340 = vmatmul.mubr.msk.bf16.gmra.mrb[40].mxu0 %vm472_vm1, %v2619_v37 }
  0x8f   : > { %2299 = vmatprep.mubr.msk.bf16.mxu1 %vm472_vm1, %v2665_v5  ;;  %2343 = vmatprep.mubr.msk.bf16.mxu0 %vm472_vm1, %v2631_v47  ;;  %v707_v47 = vld [vmem:[#allocation2 + $0x18] sm:$0xff] }
  0x96   : > { %2300 = vmatmul.mubr.msk.bf16.gmra.mrb[44].mxu1 %vm472_vm1, %v2688_v23  ;;  %2344 = vmatmul.mubr.msk.bf16.gmra.mrb[44].mxu0 %vm472_vm1, %v2655_v61 }
  0x97   : > { %2303 = vmatprep.mubr.msk.bf16.mxu1 %vm472_vm1, %v2691_v26  ;;  %2347 = vmatprep.mubr.msk.bf16.mxu0 %vm472_vm1, %v2665_v5 }
  0x9e   : > { %2304 = vmatmul.mubr.msk.bf16.gmra.mrb[48].mxu1 %vm472_vm1, %v2038_v45  ;;  %2348 = vmatmul.mubr.msk.bf16.gmra.mrb[48].mxu0 %vm472_vm1, %v2688_v23 }
  0x9f   : > { %2351 = vmatprep.mubr.msk.bf16.mxu0 %vm472_vm1, %v2691_v26 }
  0xa6   : > { %2352 = vmatmul.mubr.msk.bf16.gmra.mrb[52].mxu0 %vm472_vm1, %v2038_v45 }
 0x111   : > { %v2225_v37 = vpop.f32.mrb[0].mxu0  ;;  %v2245_v43 = vpop.f32.mrb[0].mxu1 }
 0x112   : > { %v742_v54 = vadd.f32 %v2225_v37, %v706_v7  ;;  %v762_v55 = vadd.f32 %v2245_v43, %v726_v14  ;;  %v561_v56 = vpop.f32.mrb[1].mxu0  ;;  %v641_v57 = vpop.f32.mrb[1].mxu1 }
 0x113   : > { %v740_v60 = vadd.f32 %v704_v15, %v561_v56  ;;  %v760_v61 = vadd.f32 %v724_v36, %v641_v57  ;;  %v2226_v62 = vpop.f32.mrb[2].mxu0  ;;  %v2246_v63 = vpop.f32.mrb[2].mxu1  ;;  %v716_v56 = vld [vmem:[#allocation2 + $0x60] sm:$0xff] }
 0x114   : > { %779 = vst.msk [vmem:[#allocation2 + $0x10] sm:$0xff] %vm776_vm2, %v742_v54  ;;  %799 = vst.msk [vmem:[#allocation2 + $0xb0] sm:$0xff] %vm776_vm2, %v762_v55  ;;  %v743_v0 = vadd.f32 %v2226_v62, %v707_v47  ;;  %v763_v1 = vadd.f32 %v2246_v63, %v727_v53  ;;  %v564_v2 = vpop.f32.mrb[3].mxu0  ;;  %v644_v3 = vpop.f32.mrb[3].mxu1  ;;  %v718_v54 = vld [vmem:[#allocation2 + $0x70] sm:$0xff]  ;;  %v736_v57 = vld [vmem:[#allocation2 + $0x100] sm:$0xff] }
 0x115   : > { %777 = vst.msk [vmem:[#allocation2] sm:$0xff] %vm776_vm2, %v740_v60  ;;  %797 = vst.msk [vmem:[#allocation2 + $0xa0] sm:$0xff] %vm776_vm2, %v760_v61  ;;  %v741_v4 = vadd.f32 %v705_v58, %v564_v2  ;;  %v761_v5 = vadd.f32 %v725_v59, %v644_v3  ;;  %v738_v55 = vld [vmem:[#allocation2 + $0x110] sm:$0xff]  ;;  %v719_v60 = vld [vmem:[#allocation2 + $0x78] sm:$0xff] }
 0x116   : > { %780 = vst.msk [vmem:[#allocation2 + $0x18] sm:$0xff] %vm776_vm2, %v743_v0  ;;  %800 = vst.msk [vmem:[#allocation2 + $0xb8] sm:$0xff] %vm776_vm2, %v763_v1  ;;  %v739_v61 = vld [vmem:[#allocation2 + $0x118] sm:$0xff]  ;;  %v717_v2 = vld [vmem:[#allocation2 + $0x68] sm:$0xff] }
 0x117   : > { %778 = vst.msk [vmem:[#allocation2 + $0x8] sm:$0xff] %vm776_vm2, %v741_v4  ;;  %798 = vst.msk [vmem:[#allocation2 + $0xa8] sm:$0xff] %vm776_vm2, %v761_v5  ;;  %v737_v3 = vld [vmem:[#allocation2 + $0x108] sm:$0xff] }
 0x119   : > { %v2229_v11 = vpop.f32.mrb[4].mxu0  ;;  %v2249_v12 = vpop.f32.mrb[4].mxu1 }
 0x11a   : > { %v746_v17 = vadd.f32 %v2229_v11, %v710_v6  ;;  %v766_v18 = vadd.f32 %v2249_v12, %v730_v8  ;;  %v577_v19 = vpop.f32.mrb[5].mxu0  ;;  %v657_v20 = vpop.f32.mrb[5].mxu1 }
 0x11b   : > { %v744_v23 = vadd.f32 %v708_v9, %v577_v19  ;;  %v764_v24 = vadd.f32 %v728_v10, %v657_v20  ;;  %v2230_v25 = vpop.f32.mrb[6].mxu0  ;;  %v2250_v26 = vpop.f32.mrb[6].mxu1 }
 0x11c   : > { %783 = vst.msk [vmem:[#allocation2 + $0x30] sm:$0xff] %vm776_vm2, %v746_v17  ;;  %803 = vst.msk [vmem:[#allocation2 + $0xd0] sm:$0xff] %vm776_vm2, %v766_v18  ;;  %v747_v27 = vadd.f32 %v2230_v25, %v711_v13  ;;  %v767_v28 = vadd.f32 %v2250_v26, %v731_v16  ;;  %v580_v29 = vpop.f32.mrb[7].mxu0  ;;  %v660_v30 = vpop.f32.mrb[7].mxu1  ;;  %v722_v17 = vld [vmem:[#allocation2 + $0x90] sm:$0xff]  ;;  %v720_v18 = vld [vmem:[#allocation2 + $0x80] sm:$0xff] }
 0x11d   : > { %781 = vst.msk [vmem:[#allocation2 + $0x20] sm:$0xff] %vm776_vm2, %v744_v23  ;;  %801 = vst.msk [vmem:[#allocation2 + $0xc0] sm:$0xff] %vm776_vm2, %v764_v24  ;;  %v745_v31 = vadd.f32 %v709_v21, %v580_v29  ;;  %v765_v32 = vadd.f32 %v729_v22, %v660_v30  ;;  %v723_v21 = vld [vmem:[#allocation2 + $0x98] sm:$0xff]  ;;  %v721_v25 = vld [vmem:[#allocation2 + $0x88] sm:$0xff] }
 0x11e   : > { %784 = vst.msk [vmem:[#allocation2 + $0x38] sm:$0xff] %vm776_vm2, %v747_v27  ;;  %804 = vst.msk [vmem:[#allocation2 + $0xd8] sm:$0xff] %vm776_vm2, %v767_v28 }
 0x11f   : > { %782 = vst.msk [vmem:[#allocation2 + $0x28] sm:$0xff] %vm776_vm2, %v745_v31  ;;  %802 = vst.msk [vmem:[#allocation2 + $0xc8] sm:$0xff] %vm776_vm2, %v765_v32 }
 0x121   : > { %v2233_v39 = vpop.f32.mrb[8].mxu0  ;;  %v2253_v40 = vpop.f32.mrb[8].mxu1 }
 0x122   : > { %v750_v44 = vadd.f32 %v2233_v39, %v714_v33  ;;  %v770_v45 = vadd.f32 %v2253_v40, %v734_v34  ;;  %v593_v46 = vpop.f32.mrb[9].mxu0  ;;  %v673_v48 = vpop.f32.mrb[9].mxu1  ;;  %v1186_v40 = vld [vmem:[#allocation2 + $0x10] sm:$0xff] }
 0x123   : > { %v748_v51 = vadd.f32 %v712_v35, %v593_v46  ;;  %v768_v52 = vadd.f32 %v732_v38, %v673_v48  ;;  %v2234_v7 = vpop.f32.mrb[10].mxu0  ;;  %v2254_v14 = vpop.f32.mrb[10].mxu1  ;;  %v1185_v46 = vld [vmem:[#allocation2 + $0x8] sm:$0xff] }
 0x124   : > { %787 = vst.msk [vmem:[#allocation2 + $0x50] sm:$0xff] %vm776_vm2, %v750_v44  ;;  %807 = vst.msk [vmem:[#allocation2 + $0xf0] sm:$0xff] %vm776_vm2, %v770_v45  ;;  %v751_v15 = vadd.f32 %v2234_v7, %v715_v41  ;;  %v771_v36 = vadd.f32 %v2254_v14, %v735_v42  ;;  %v596_v37 = vpop.f32.mrb[11].mxu0  ;;  %v676_v43 = vpop.f32.mrb[11].mxu1  ;;  %v1184_v45 = vld [vmem:[#allocation2] sm:$0xff] }
 0x125   : > { %785 = vst.msk [vmem:[#allocation2 + $0x40] sm:$0xff] %vm776_vm2, %v748_v51  ;;  %805 = vst.msk [vmem:[#allocation2 + $0xe0] sm:$0xff] %vm776_vm2, %v768_v52  ;;  %v749_v47 = vadd.f32 %v713_v49, %v596_v37  ;;  %v769_v53 = vadd.f32 %v733_v50, %v676_v43 }
 0x126   : > { %788 = vst.msk [vmem:[#allocation2 + $0x58] sm:$0xff] %vm776_vm2, %v751_v15  ;;  %808 = vst.msk [vmem:[#allocation2 + $0xf8] sm:$0xff] %vm776_vm2, %v771_v36 }
 0x127   : > { %786 = vst.msk [vmem:[#allocation2 + $0x48] sm:$0xff] %vm776_vm2, %v749_v47  ;;  %806 = vst.msk [vmem:[#allocation2 + $0xe8] sm:$0xff] %vm776_vm2, %v769_v53 }
 0x129   : > { %v2237_v58 = vpop.f32.mrb[12].mxu0  ;;  %v2257_v59 = vpop.f32.mrb[12].mxu1 }
 0x12a   : > { %v754_v62 = vadd.f32 %v2237_v58, %v718_v54  ;;  %v774_v63 = vadd.f32 %v2257_v59, %v738_v55  ;;  %v609_v0 = vpop.f32.mrb[13].mxu0  ;;  %v689_v1 = vpop.f32.mrb[13].mxu1  ;;  %v1187_v58 = vld [vmem:[#allocation2 + $0x18] sm:$0xff] }
 0x12b   : > { %v752_v4 = vadd.f32 %v716_v56, %v609_v0  ;;  %v772_v5 = vadd.f32 %v736_v57, %v689_v1  ;;  %v2238_v6 = vpop.f32.mrb[14].mxu0  ;;  %v2258_v8 = vpop.f32.mrb[14].mxu1 }
 0x12c   : > { %791 = vst.msk [vmem:[#allocation2 + $0x70] sm:$0xff] %vm776_vm2, %v754_v62  ;;  %811 = vst.msk [vmem:[#allocation2 + $0x110] sm:$0xff] %vm776_vm2, %v774_v63  ;;  %v755_v9 = vadd.f32 %v2238_v6, %v719_v60  ;;  %v775_v10 = vadd.f32 %v2258_v8, %v739_v61  ;;  %v612_v11 = vpop.f32.mrb[15].mxu0  ;;  %v692_v12 = vpop.f32.mrb[15].mxu1  ;;  %v1190_v63 = vld [vmem:[#allocation2 + $0x30] sm:$0xff] }
 0x12d   : > { %789 = vst.msk [vmem:[#allocation2 + $0x60] sm:$0xff] %vm776_vm2, %v752_v4  ;;  %809 = vst.msk [vmem:[#allocation2 + $0x100] sm:$0xff] %vm776_vm2, %v772_v5  ;;  %v753_v13 = vadd.f32 %v717_v2, %v612_v11  ;;  %v773_v16 = vadd.f32 %v737_v3, %v692_v12  ;;  %v1188_v4 = vld [vmem:[#allocation2 + $0x20] sm:$0xff]  ;;  %v1189_v5 = vld [vmem:[#allocation2 + $0x28] sm:$0xff] }
 0x12e   : > { %792 = vst.msk [vmem:[#allocation2 + $0x78] sm:$0xff] %vm776_vm2, %v755_v9  ;;  %812 = vst.msk [vmem:[#allocation2 + $0x118] sm:$0xff] %vm776_vm2, %v775_v10 }
 0x12f   : > { %790 = vst.msk [vmem:[#allocation2 + $0x68] sm:$0xff] %vm776_vm2, %v753_v13  ;;  %810 = vst.msk [vmem:[#allocation2 + $0x108] sm:$0xff] %vm776_vm2, %v773_v16 }
 0x131   : > { %v2241_v19 = vpop.f32.mrb[16].mxu0  ;;  %v2273_v20 = vpop.f32.mrb[16].mxu1 }
 0x132   : > { %v758_v22 = vadd.f32 %v2241_v19, %v722_v17  ;;  %v625_v23 = vpop.f32.mrb[17].mxu0  ;;  %v896_v24 = vpop.f32.mrb[17].mxu1  ;;  %v1079_v29 = vrot.slane %v2273_v20, 1 }
 0x133   : > { %v756_v26 = vadd.f32 %v720_v18, %v625_v23  ;;  %v2242_v27 = vpop.f32.mrb[18].mxu0  ;;  %v2274_v28 = vpop.f32.mrb[18].mxu1  ;;  %v1076_v34 = vrot.slane %v896_v24, 1 }
 0x134   : > { %795 = vst.msk [vmem:[#allocation2 + $0x90] sm:$0xff] %vm776_vm2, %v758_v22  ;;  %v759_v30 = vadd.f32 %v2242_v27, %v723_v21  ;;  %v1081_v31 = vrot.slane %v2274_v28, 1  ;;  %v628_v32 = vpop.f32.mrb[19].mxu0  ;;  %v899_v33 = vpop.f32.mrb[19].mxu1 }
 0x135   : > { %793 = vst.msk [vmem:[#allocation2 + $0x80] sm:$0xff] %vm776_vm2, %v756_v26  ;;  %v757_v35 = vadd.f32 %v721_v25, %v628_v32  ;;  %v1077_v38 = vrot.slane %v899_v33, 1 }
 0x136   : > { %796 = vst.msk [vmem:[#allocation2 + $0x98] sm:$0xff] %vm776_vm2, %v759_v30  ;;  %v1082_v39 = vsel %vm1075_vm3, %v1079_v29, %v1081_v31 }
 0x137   : > { %v1222_v41 = vadd.f32 %v1186_v40, %v1082_v39  ;;  %794 = vst.msk [vmem:[#allocation2 + $0x88] sm:$0xff] %vm776_vm2, %v757_v35  ;;  %v1078_v42 = vsel %vm1075_vm3, %v1076_v34, %v1077_v38  ;;  %v1080_v44 = vsel %vm1075_vm3, %v1077_v38, %v1079_v29  ;;  %v1191_v34 = vld [vmem:[#allocation2 + $0x38] sm:$0xff] }
 0x138   : > { %v1220_v48 = vadd.f32 %v1184_v45, %v1078_v42  ;;  %v1221_v49 = vadd.f32 %v1185_v46, %v1080_v44  ;;  %v1194_v42 = vld [vmem:[#allocation2 + $0x50] sm:$0xff] }
 0x139   : > { %1258 = vst.msk [vmem:[#allocation2 + $0x10] sm:$0xff] %vm776_vm2, %v1222_v41  ;;  %v2277_v50 = vpop.f32.mrb[20].mxu1  ;;  %v2321_v51 = vpop.f32.mrb[20].mxu0 }
 0x13a   : > { %1256 = vst.msk [vmem:[#allocation2] sm:$0xff] %vm776_vm2, %v1220_v48  ;;  %1257 = vst.msk [vmem:[#allocation2 + $0x8] sm:$0xff] %vm776_vm2, %v1221_v49  ;;  %v1558_v52 = vrot.slane %v2321_v51, 2  ;;  %v912_v7 = vpop.f32.mrb[21].mxu1  ;;  %v1375_v14 = vpop.f32.mrb[21].mxu0  ;;  %v1087_v47 = vrot.slane %v2277_v50, 1 }
 0x13b   : > { %v1083_v15 = vrot.slane %v912_v7, 1  ;;  %v1555_v36 = vrot.slane %v1375_v14, 2  ;;  %v2278_v37 = vpop.f32.mrb[22].mxu1  ;;  %v2322_v43 = vpop.f32.mrb[22].mxu0  ;;  %v1192_v50 = vld [vmem:[#allocation2 + $0x40] sm:$0xff]  ;;  %v1193_v51 = vld [vmem:[#allocation2 + $0x48] sm:$0xff] }
 0x13c   : > { %v1089_v53 = vrot.slane %v2278_v37, 1  ;;  %v1560_v54 = vrot.slane %v2322_v43, 2  ;;  %v915_v55 = vpop.f32.mrb[23].mxu1  ;;  %v1378_v56 = vpop.f32.mrb[23].mxu0 }
 0x13d   : > { %v1084_v57 = vsel %vm1075_vm3, %v1081_v31, %v1083_v15  ;;  %v1085_v59 = vrot.slane %v915_v55, 1  ;;  %v1556_v60 = vrot.slane %v1378_v56, 2 }
 0x13e   : > { %v1223_v61 = vadd.f32 %v1187_v58, %v1084_v57  ;;  %v1090_v62 = vsel %vm1075_vm3, %v1087_v47, %v1089_v53  ;;  %v1561_v0 = vsel %vm1554_vm4, %v1558_v52, %v1560_v54 }
 0x13f   : > { %v1226_v1 = vadd.f32 %v1190_v63, %v1090_v62  ;;  %v1086_v2 = vsel %vm1075_vm3, %v1083_v15, %v1085_v59  ;;  %v1088_v3 = vsel %vm1075_vm3, %v1085_v59, %v1087_v47  ;;  %v1557_v6 = vsel %vm1554_vm4, %v1555_v36, %v1556_v60 }
 0x140   : > { %1259 = vst.msk [vmem:[#allocation2 + $0x18] sm:$0xff] %vm776_vm2, %v1223_v61  ;;  %v1665_v8 = vld [vmem:[#allocation2 + $0x10] sm:$0xff]  ;;  %v1224_v9 = vadd.f32 %v1188_v4, %v1086_v2  ;;  %v1225_v10 = vadd.f32 %v1189_v5, %v1088_v3  ;;  %v1559_v11 = vsel %vm1554_vm4, %v1556_v60, %v1558_v52 }
 0x141   : > { %1262 = vst.msk [vmem:[#allocation2 + $0x30] sm:$0xff] %vm776_vm2, %v1226_v1  ;;  %v1701_v12 = vadd.f32 %v1665_v8, %v1561_v0  ;;  %v1663_v13 = vld [vmem:[#allocation2] sm:$0xff]  ;;  %v1664_v16 = vld [vmem:[#allocation2 + $0x8] sm:$0xff]  ;;  %v2281_v17 = vpop.f32.mrb[24].mxu1  ;;  %v2325_v18 = vpop.f32.mrb[24].mxu0  ;;  %v1195_v8 = vld [vmem:[#allocation2 + $0x58] sm:$0xff] }
 0x142   : > { %1260 = vst.msk [vmem:[#allocation2 + $0x20] sm:$0xff] %vm776_vm2, %v1224_v9  ;;  %1261 = vst.msk [vmem:[#allocation2 + $0x28] sm:$0xff] %vm776_vm2, %v1225_v10  ;;  %v1699_v19 = vadd.f32 %v1663_v13, %v1557_v6  ;;  %v1700_v20 = vadd.f32 %v1664_v16, %v1559_v11  ;;  %v1566_v21 = vrot.slane %v2325_v18, 2  ;;  %v928_v22 = vpop.f32.mrb[25].mxu1  ;;  %v1391_v23 = vpop.f32.mrb[25].mxu0  ;;  %v1095_v28 = vrot.slane %v2281_v17, 1 }
 0x143   : > { %1737 = vst.msk [vmem:[#allocation2 + $0x10] sm:$0xff] %vm776_vm2, %v1701_v12  ;;  %v1091_v24 = vrot.slane %v928_v22, 1  ;;  %v1562_v25 = vrot.slane %v1391_v23, 2  ;;  %v2282_v26 = vpop.f32.mrb[26].mxu1  ;;  %v2326_v27 = vpop.f32.mrb[26].mxu0  ;;  %v1198_v16 = vld [vmem:[#allocation2 + $0x70] sm:$0xff] }
 0x144   : > { %1735 = vst.msk [vmem:[#allocation2] sm:$0xff] %vm776_vm2, %v1699_v19  ;;  %1736 = vst.msk [vmem:[#allocation2 + $0x8] sm:$0xff] %vm776_vm2, %v1700_v20  ;;  %v1097_v29 = vrot.slane %v2282_v26, 1  ;;  %v1568_v30 = vrot.slane %v2326_v27, 2  ;;  %v931_v31 = vpop.f32.mrb[27].mxu1  ;;  %v1394_v32 = vpop.f32.mrb[27].mxu0 }
 0x145   : > { %v1092_v33 = vsel %vm1075_vm3, %v1089_v53, %v1091_v24  ;;  %v1563_v35 = vsel %vm1554_vm4, %v1560_v54, %v1562_v25  ;;  %v1093_v38 = vrot.slane %v931_v31, 1  ;;  %v1564_v39 = vrot.slane %v1394_v32, 2  ;;  %v1196_v22 = vld [vmem:[#allocation2 + $0x60] sm:$0xff]  ;;  %v1197_v23 = vld [vmem:[#allocation2 + $0x68] sm:$0xff] }
 0x146   : > { %v1227_v40 = vadd.f32 %v1191_v34, %v1092_v33  ;;  %v1098_v41 = vsel %vm1075_vm3, %v1095_v28, %v1097_v29  ;;  %v1569_v44 = vsel %vm1554_vm4, %v1566_v21, %v1568_v30 }
 0x147   : > { %v1666_v45 = vld [vmem:[#allocation2 + $0x18] sm:$0xff]  ;;  %v1230_v46 = vadd.f32 %v1194_v42, %v1098_v41  ;;  %v1094_v48 = vsel %vm1075_vm3, %v1091_v24, %v1093_v38  ;;  %v1096_v49 = vsel %vm1075_vm3, %v1093_v38, %v1095_v28  ;;  %v1565_v52 = vsel %vm1554_vm4, %v1562_v25, %v1564_v39 }
 0x148   : > { %1263 = vst.msk [vmem:[#allocation2 + $0x38] sm:$0xff] %vm776_vm2, %v1227_v40  ;;  %v1702_v7 = vadd.f32 %v1666_v45, %v1563_v35  ;;  %v1669_v14 = vld [vmem:[#allocation2 + $0x30] sm:$0xff]  ;;  %v1228_v15 = vadd.f32 %v1192_v50, %v1094_v48  ;;  %v1229_v36 = vadd.f32 %v1193_v51, %v1096_v49  ;;  %v1567_v37 = vsel %vm1554_vm4, %v1564_v39, %v1566_v21 }
 0x149   : > { %1266 = vst.msk [vmem:[#allocation2 + $0x50] sm:$0xff] %vm776_vm2, %v1230_v46  ;;  %v1705_v43 = vadd.f32 %v1669_v14, %v1569_v44  ;;  %v1667_v47 = vld [vmem:[#allocation2 + $0x20] sm:$0xff]  ;;  %v1668_v53 = vld [vmem:[#allocation2 + $0x28] sm:$0xff]  ;;  %v2285_v54 = vpop.f32.mrb[28].mxu1  ;;  %v2329_v55 = vpop.f32.mrb[28].mxu0  ;;  %v1199_v14 = vld [vmem:[#allocation2 + $0x78] sm:$0xff] }
 0x14a   : > { %1738 = vst.msk [vmem:[#allocation2 + $0x18] sm:$0xff] %vm776_vm2, %v1702_v7  ;;  %1264 = vst.msk [vmem:[#allocation2 + $0x40] sm:$0xff] %vm776_vm2, %v1228_v15  ;;  %v1703_v56 = vadd.f32 %v1667_v47, %v1565_v52  ;;  %v1704_v57 = vadd.f32 %v1668_v53, %v1567_v37  ;;  %v1574_v58 = vrot.slane %v2329_v55, 2  ;;  %v944_v59 = vpop.f32.mrb[29].mxu1  ;;  %v1407_v60 = vpop.f32.mrb[29].mxu0  ;;  %v1103_v1 = vrot.slane %v2285_v54, 1 }
 0x14b   : > { %1265 = vst.msk [vmem:[#allocation2 + $0x48] sm:$0xff] %vm776_vm2, %v1229_v36  ;;  %1741 = vst.msk [vmem:[#allocation2 + $0x30] sm:$0xff] %vm776_vm2, %v1705_v43  ;;  %v1099_v61 = vrot.slane %v944_v59, 1  ;;  %v1570_v62 = vrot.slane %v1407_v60, 2  ;;  %v2286_v63 = vpop.f32.mrb[30].mxu1  ;;  %v2330_v0 = vpop.f32.mrb[30].mxu0 }
 0x14c   : > { %1739 = vst.msk [vmem:[#allocation2 + $0x20] sm:$0xff] %vm776_vm2, %v1703_v56  ;;  %1740 = vst.msk [vmem:[#allocation2 + $0x28] sm:$0xff] %vm776_vm2, %v1704_v57  ;;  %v1105_v2 = vrot.slane %v2286_v63, 1  ;;  %v1576_v3 = vrot.slane %v2330_v0, 2  ;;  %v947_v4 = vpop.f32.mrb[31].mxu1  ;;  %v1410_v5 = vpop.f32.mrb[31].mxu0 }
 0x14d   : > { %v1100_v6 = vsel %vm1075_vm3, %v1097_v29, %v1099_v61  ;;  %v1571_v9 = vsel %vm1554_vm4, %v1568_v30, %v1570_v62  ;;  %v1101_v10 = vrot.slane %v947_v4, 1  ;;  %v1572_v11 = vrot.slane %v1410_v5, 2  ;;  %v1202_v53 = vld [vmem:[#allocation2 + $0x90] sm:$0xff]  ;;  %v1200_v59 = vld [vmem:[#allocation2 + $0x80] sm:$0xff]  ;;  %v1201_v60 = vld [vmem:[#allocation2 + $0x88] sm:$0xff] }
 0x14e   : > { %v1231_v12 = vadd.f32 %v1195_v8, %v1100_v6  ;;  %v1106_v13 = vsel %vm1075_vm3, %v1103_v1, %v1105_v2  ;;  %v1577_v17 = vsel %vm1554_vm4, %v1574_v58, %v1576_v3 }
 0x14f   : > { %v1670_v18 = vld [vmem:[#allocation2 + $0x38] sm:$0xff]  ;;  %v1234_v19 = vadd.f32 %v1198_v16, %v1106_v13  ;;  %v1102_v20 = vsel %vm1075_vm3, %v1099_v61, %v1101_v10  ;;  %v1104_v21 = vsel %vm1075_vm3, %v1101_v10, %v1103_v1  ;;  %v1573_v24 = vsel %vm1554_vm4, %v1570_v62, %v1572_v11 }
 0x150   : > { %1267 = vst.msk [vmem:[#allocation2 + $0x58] sm:$0xff] %vm776_vm2, %v1231_v12  ;;  %v1706_v25 = vadd.f32 %v1670_v18, %v1571_v9  ;;  %v1673_v26 = vld [vmem:[#allocation2 + $0x50] sm:$0xff]  ;;  %v1232_v27 = vadd.f32 %v1196_v22, %v1102_v20  ;;  %v1233_v28 = vadd.f32 %v1197_v23, %v1104_v21  ;;  %v1575_v29 = vsel %vm1554_vm4, %v1572_v11, %v1574_v58 }
 0x151   : > { %1270 = vst.msk [vmem:[#allocation2 + $0x70] sm:$0xff] %vm776_vm2, %v1234_v19  ;;  %v1709_v30 = vadd.f32 %v1673_v26, %v1577_v17  ;;  %v1671_v31 = vld [vmem:[#allocation2 + $0x40] sm:$0xff]  ;;  %v2289_v33 = vpop.f32.mrb[32].mxu1  ;;  %v2333_v34 = vpop.f32.mrb[32].mxu0  ;;  %v1203_v26 = vld [vmem:[#allocation2 + $0x98] sm:$0xff] }
 0x152   : > { %v1672_v32 = vld [vmem:[#allocation2 + $0x48] sm:$0xff]  ;;  %1742 = vst.msk [vmem:[#allocation2 + $0x38] sm:$0xff] %vm776_vm2, %v1706_v25  ;;  %1268 = vst.msk [vmem:[#allocation2 + $0x60] sm:$0xff] %vm776_vm2, %v1232_v27  ;;  %v1707_v35 = vadd.f32 %v1671_v31, %v1573_v24  ;;  %v1582_v39 = vrot.slane %v2333_v34, 2  ;;  %v960_v40 = vpop.f32.mrb[33].mxu1  ;;  %v1423_v41 = vpop.f32.mrb[33].mxu0 }
 0x153   : > { %1269 = vst.msk [vmem:[#allocation2 + $0x68] sm:$0xff] %vm776_vm2, %v1233_v28  ;;  %v1708_v38 = vadd.f32 %v1672_v32, %v1575_v29  ;;  %1745 = vst.msk [vmem:[#allocation2 + $0x50] sm:$0xff] %vm776_vm2, %v1709_v30  ;;  %v1107_v42 = vrot.slane %v960_v40, 1  ;;  %v1578_v44 = vrot.slane %v1423_v41, 2  ;;  %v2290_v45 = vpop.f32.mrb[34].mxu1  ;;  %v2334_v46 = vpop.f32.mrb[34].mxu0 }
 0x154   : > { %1743 = vst.msk [vmem:[#allocation2 + $0x40] sm:$0xff] %vm776_vm2, %v1707_v35  ;;  %v1111_v48 = vrot.slane %v2289_v33, 1  ;;  %v1113_v49 = vrot.slane %v2290_v45, 1  ;;  %v1584_v50 = vrot.slane %v2334_v46, 2  ;;  %v963_v51 = vpop.f32.mrb[35].mxu1  ;;  %v1426_v52 = vpop.f32.mrb[35].mxu0 }
 0x155   : > { %1744 = vst.msk [vmem:[#allocation2 + $0x48] sm:$0xff] %vm776_vm2, %v1708_v38  ;;  %v1108_v7 = vsel %vm1075_vm3, %v1105_v2, %v1107_v42  ;;  %v1579_v15 = vsel %vm1554_vm4, %v1576_v3, %v1578_v44  ;;  %v1109_v36 = vrot.slane %v963_v51, 1  ;;  %v1580_v37 = vrot.slane %v1426_v52, 2  ;;  %v1206_v32 = vld [vmem:[#allocation2 + $0xb0] sm:$0xff]  ;;  %v1204_v40 = vld [vmem:[#allocation2 + $0xa0] sm:$0xff]  ;;  %v1205_v41 = vld [vmem:[#allocation2 + $0xa8] sm:$0xff] }
 0x156   : > { %v1235_v43 = vadd.f32 %v1199_v14, %v1108_v7  ;;  %v1114_v47 = vsel %vm1075_vm3, %v1111_v48, %v1113_v49  ;;  %v1585_v54 = vsel %vm1554_vm4, %v1582_v39, %v1584_v50 }
 0x157   : > { %v1674_v55 = vld [vmem:[#allocation2 + $0x58] sm:$0xff]  ;;  %v1238_v56 = vadd.f32 %v1202_v53, %v1114_v47  ;;  %v1110_v57 = vsel %vm1075_vm3, %v1107_v42, %v1109_v36  ;;  %v1112_v58 = vsel %vm1075_vm3, %v1109_v36, %v1111_v48  ;;  %v1581_v61 = vsel %vm1554_vm4, %v1578_v44, %v1580_v37 }
 0x158   : > { %1271 = vst.msk [vmem:[#allocation2 + $0x78] sm:$0xff] %vm776_vm2, %v1235_v43  ;;  %v1710_v62 = vadd.f32 %v1674_v55, %v1579_v15  ;;  %v1677_v63 = vld [vmem:[#allocation2 + $0x70] sm:$0xff]  ;;  %v1236_v0 = vadd.f32 %v1200_v59, %v1110_v57  ;;  %v1237_v1 = vadd.f32 %v1201_v60, %v1112_v58  ;;  %v1583_v2 = vsel %vm1554_vm4, %v1580_v37, %v1582_v39 }
 0x159   : > { %1274 = vst.msk [vmem:[#allocation2 + $0x90] sm:$0xff] %vm776_vm2, %v1238_v56  ;;  %v1713_v3 = vadd.f32 %v1677_v63, %v1585_v54  ;;  %v1675_v4 = vld [vmem:[#allocation2 + $0x60] sm:$0xff]  ;;  %v2293_v6 = vpop.f32.mrb[36].mxu1  ;;  %v2337_v8 = vpop.f32.mrb[36].mxu0  ;;  %v1207_v63 = vld [vmem:[#allocation2 + $0xb8] sm:$0xff] }
 0x15a   : > { %v1676_v5 = vld [vmem:[#allocation2 + $0x68] sm:$0xff]  ;;  %1746 = vst.msk [vmem:[#allocation2 + $0x58] sm:$0xff] %vm776_vm2, %v1710_v62  ;;  %1272 = vst.msk [vmem:[#allocation2 + $0x80] sm:$0xff] %vm776_vm2, %v1236_v0  ;;  %v1711_v9 = vadd.f32 %v1675_v4, %v1581_v61  ;;  %v1590_v11 = vrot.slane %v2337_v8, 2  ;;  %v976_v12 = vpop.f32.mrb[37].mxu1  ;;  %v1439_v13 = vpop.f32.mrb[37].mxu0 }
 0x15b   : > { %1273 = vst.msk [vmem:[#allocation2 + $0x88] sm:$0xff] %vm776_vm2, %v1237_v1  ;;  %v1712_v10 = vadd.f32 %v1676_v5, %v1583_v2  ;;  %1749 = vst.msk [vmem:[#allocation2 + $0x70] sm:$0xff] %vm776_vm2, %v1713_v3  ;;  %v1115_v16 = vrot.slane %v976_v12, 1  ;;  %v1586_v17 = vrot.slane %v1439_v13, 2  ;;  %v2294_v18 = vpop.f32.mrb[38].mxu1  ;;  %v2338_v19 = vpop.f32.mrb[38].mxu0 }
 0x15c   : > { %1747 = vst.msk [vmem:[#allocation2 + $0x60] sm:$0xff] %vm776_vm2, %v1711_v9  ;;  %v1119_v20 = vrot.slane %v2293_v6, 1  ;;  %v1121_v21 = vrot.slane %v2294_v18, 1  ;;  %v1592_v22 = vrot.slane %v2338_v19, 2  ;;  %v979_v23 = vpop.f32.mrb[39].mxu1  ;;  %v1442_v24 = vpop.f32.mrb[39].mxu0 }
 0x15d   : > { %1748 = vst.msk [vmem:[#allocation2 + $0x68] sm:$0xff] %vm776_vm2, %v1712_v10  ;;  %v1116_v25 = vsel %vm1075_vm3, %v1113_v49, %v1115_v16  ;;  %v1587_v27 = vsel %vm1554_vm4, %v1584_v50, %v1586_v17  ;;  %v1117_v28 = vrot.slane %v979_v23, 1  ;;  %v1588_v29 = vrot.slane %v1442_v24, 2  ;;  %v1210_v5 = vld [vmem:[#allocation2 + $0xd0] sm:$0xff]  ;;  %v1208_v12 = vld [vmem:[#allocation2 + $0xc0] sm:$0xff]  ;;  %v1209_v13 = vld [vmem:[#allocation2 + $0xc8] sm:$0xff] }
 0x15e   : > { %v1239_v30 = vadd.f32 %v1203_v26, %v1116_v25  ;;  %v1122_v31 = vsel %vm1075_vm3, %v1119_v20, %v1121_v21  ;;  %v1593_v33 = vsel %vm1554_vm4, %v1590_v11, %v1592_v22 }
 0x15f   : > { %v1678_v34 = vld [vmem:[#allocation2 + $0x78] sm:$0xff]  ;;  %v1242_v35 = vadd.f32 %v1206_v32, %v1122_v31  ;;  %v1118_v38 = vsel %vm1075_vm3, %v1115_v16, %v1117_v28  ;;  %v1120_v39 = vsel %vm1075_vm3, %v1117_v28, %v1119_v20  ;;  %v1589_v42 = vsel %vm1554_vm4, %v1586_v17, %v1588_v29 }
 0x160   : > { %1275 = vst.msk [vmem:[#allocation2 + $0x98] sm:$0xff] %vm776_vm2, %v1239_v30  ;;  %v1714_v44 = vadd.f32 %v1678_v34, %v1587_v27  ;;  %v1681_v45 = vld [vmem:[#allocation2 + $0x90] sm:$0xff]  ;;  %v1240_v46 = vadd.f32 %v1204_v40, %v1118_v38  ;;  %v1241_v48 = vadd.f32 %v1205_v41, %v1120_v39  ;;  %v1591_v49 = vsel %vm1554_vm4, %v1588_v29, %v1590_v11 }
 0x161   : > { %1278 = vst.msk [vmem:[#allocation2 + $0xb0] sm:$0xff] %vm776_vm2, %v1242_v35  ;;  %v1717_v50 = vadd.f32 %v1681_v45, %v1593_v33  ;;  %v1679_v51 = vld [vmem:[#allocation2 + $0x80] sm:$0xff]  ;;  %v2297_v7 = vpop.f32.mrb[40].mxu1  ;;  %v2341_v14 = vpop.f32.mrb[40].mxu0  ;;  %v1211_v45 = vld [vmem:[#allocation2 + $0xd8] sm:$0xff] }
 0x162   : > { %v1680_v52 = vld [vmem:[#allocation2 + $0x88] sm:$0xff]  ;;  %1750 = vst.msk [vmem:[#allocation2 + $0x78] sm:$0xff] %vm776_vm2, %v1714_v44  ;;  %1276 = vst.msk [vmem:[#allocation2 + $0xa0] sm:$0xff] %vm776_vm2, %v1240_v46  ;;  %v1715_v15 = vadd.f32 %v1679_v51, %v1589_v42  ;;  %v1598_v37 = vrot.slane %v2341_v14, 2  ;;  %v992_v43 = vpop.f32.mrb[41].mxu1  ;;  %v1455_v47 = vpop.f32.mrb[41].mxu0 }
 0x163   : > { %1277 = vst.msk [vmem:[#allocation2 + $0xa8] sm:$0xff] %vm776_vm2, %v1241_v48  ;;  %v1716_v36 = vadd.f32 %v1680_v52, %v1591_v49  ;;  %1753 = vst.msk [vmem:[#allocation2 + $0x90] sm:$0xff] %vm776_vm2, %v1717_v50  ;;  %v1123_v53 = vrot.slane %v992_v43, 1  ;;  %v1594_v54 = vrot.slane %v1455_v47, 2  ;;  %v2298_v55 = vpop.f32.mrb[42].mxu1  ;;  %v2342_v56 = vpop.f32.mrb[42].mxu0 }
 0x164   : > { %1751 = vst.msk [vmem:[#allocation2 + $0x80] sm:$0xff] %vm776_vm2, %v1715_v15  ;;  %v1127_v57 = vrot.slane %v2297_v7, 1  ;;  %v1129_v58 = vrot.slane %v2298_v55, 1  ;;  %v1600_v59 = vrot.slane %v2342_v56, 2  ;;  %v995_v60 = vpop.f32.mrb[43].mxu1  ;;  %v1458_v61 = vpop.f32.mrb[43].mxu0 }
 0x165   : > { %1752 = vst.msk [vmem:[#allocation2 + $0x88] sm:$0xff] %vm776_vm2, %v1716_v36  ;;  %v1124_v62 = vsel %vm1075_vm3, %v1121_v21, %v1123_v53  ;;  %v1595_v0 = vsel %vm1554_vm4, %v1592_v22, %v1594_v54  ;;  %v1125_v1 = vrot.slane %v995_v60, 1  ;;  %v1596_v2 = vrot.slane %v1458_v61, 2  ;;  %v1214_v52 = vld [vmem:[#allocation2 + $0xf0] sm:$0xff]  ;;  %v1212_v43 = vld [vmem:[#allocation2 + $0xe0] sm:$0xff]  ;;  %v1213_v47 = vld [vmem:[#allocation2 + $0xe8] sm:$0xff] }
 0x166   : > { %v1243_v3 = vadd.f32 %v1207_v63, %v1124_v62  ;;  %v1130_v4 = vsel %vm1075_vm3, %v1127_v57, %v1129_v58  ;;  %v1601_v6 = vsel %vm1554_vm4, %v1598_v37, %v1600_v59 }
 0x167   : > { %v1682_v8 = vld [vmem:[#allocation2 + $0x98] sm:$0xff]  ;;  %v1246_v9 = vadd.f32 %v1210_v5, %v1130_v4  ;;  %v1126_v10 = vsel %vm1075_vm3, %v1123_v53, %v1125_v1  ;;  %v1128_v11 = vsel %vm1075_vm3, %v1125_v1, %v1127_v57  ;;  %v1597_v16 = vsel %vm1554_vm4, %v1594_v54, %v1596_v2 }
 0x168   : > { %1279 = vst.msk [vmem:[#allocation2 + $0xb8] sm:$0xff] %vm776_vm2, %v1243_v3  ;;  %v1718_v17 = vadd.f32 %v1682_v8, %v1595_v0  ;;  %v1685_v18 = vld [vmem:[#allocation2 + $0xb0] sm:$0xff]  ;;  %v1244_v19 = vadd.f32 %v1208_v12, %v1126_v10  ;;  %v1245_v20 = vadd.f32 %v1209_v13, %v1128_v11  ;;  %v1599_v21 = vsel %vm1554_vm4, %v1596_v2, %v1598_v37 }
 0x169   : > { %1282 = vst.msk [vmem:[#allocation2 + $0xd0] sm:$0xff] %vm776_vm2, %v1246_v9  ;;  %v1721_v22 = vadd.f32 %v1685_v18, %v1601_v6  ;;  %v1683_v23 = vld [vmem:[#allocation2 + $0xa0] sm:$0xff]  ;;  %v2301_v25 = vpop.f32.mrb[44].mxu1  ;;  %v2345_v26 = vpop.f32.mrb[44].mxu0  ;;  %v1215_v18 = vld [vmem:[#allocation2 + $0xf8] sm:$0xff] }
 0x16a   : > { %v1684_v24 = vld [vmem:[#allocation2 + $0xa8] sm:$0xff]  ;;  %1754 = vst.msk [vmem:[#allocation2 + $0x98] sm:$0xff] %vm776_vm2, %v1718_v17  ;;  %1280 = vst.msk [vmem:[#allocation2 + $0xc0] sm:$0xff] %vm776_vm2, %v1244_v19  ;;  %v1719_v27 = vadd.f32 %v1683_v23, %v1597_v16  ;;  %v1606_v29 = vrot.slane %v2345_v26, 2  ;;  %v1008_v30 = vpop.f32.mrb[45].mxu1  ;;  %v1471_v31 = vpop.f32.mrb[45].mxu0 }
 0x16b   : > { %1281 = vst.msk [vmem:[#allocation2 + $0xc8] sm:$0xff] %vm776_vm2, %v1245_v20  ;;  %v1720_v28 = vadd.f32 %v1684_v24, %v1599_v21  ;;  %1757 = vst.msk [vmem:[#allocation2 + $0xb0] sm:$0xff] %vm776_vm2, %v1721_v22  ;;  %v1131_v32 = vrot.slane %v1008_v30, 1  ;;  %v1602_v33 = vrot.slane %v1471_v31, 2  ;;  %v2302_v34 = vpop.f32.mrb[46].mxu1  ;;  %v2346_v35 = vpop.f32.mrb[46].mxu0 }
 0x16c   : > { %1755 = vst.msk [vmem:[#allocation2 + $0xa0] sm:$0xff] %vm776_vm2, %v1719_v27  ;;  %v1135_v38 = vrot.slane %v2301_v25, 1  ;;  %v1137_v39 = vrot.slane %v2302_v34, 1  ;;  %v1608_v40 = vrot.slane %v2346_v35, 2  ;;  %v1011_v41 = vpop.f32.mrb[47].mxu1  ;;  %v1474_v42 = vpop.f32.mrb[47].mxu0 }
 0x16d   : > { %1756 = vst.msk [vmem:[#allocation2 + $0xa8] sm:$0xff] %vm776_vm2, %v1720_v28  ;;  %v1132_v44 = vsel %vm1075_vm3, %v1129_v58, %v1131_v32  ;;  %v1603_v46 = vsel %vm1554_vm4, %v1600_v59, %v1602_v33  ;;  %v1133_v48 = vrot.slane %v1011_v41, 1  ;;  %v1604_v49 = vrot.slane %v1474_v42, 2  ;;  %v1218_v25 = vld [vmem:[#allocation2 + $0x110] sm:$0xff]  ;;  %v1219_v26 = vld [vmem:[#allocation2 + $0x118] sm:$0xff]  ;;  %v1217_v34 = vld [vmem:[#allocation2 + $0x108] sm:$0xff] }
 0x16e   : > { %v1247_v50 = vadd.f32 %v1211_v45, %v1132_v44  ;;  %v1138_v51 = vsel %vm1075_vm3, %v1135_v38, %v1137_v39  ;;  %v1609_v7 = vsel %vm1554_vm4, %v1606_v29, %v1608_v40 }
 0x16f   : > { %v1686_v14 = vld [vmem:[#allocation2 + $0xb8] sm:$0xff]  ;;  %v1250_v15 = vadd.f32 %v1214_v52, %v1138_v51  ;;  %v1134_v36 = vsel %vm1075_vm3, %v1131_v32, %v1133_v48  ;;  %v1136_v37 = vsel %vm1075_vm3, %v1133_v48, %v1135_v38  ;;  %v1605_v53 = vsel %vm1554_vm4, %v1602_v33, %v1604_v49  ;;  %v1216_v33 = vld [vmem:[#allocation2 + $0x100] sm:$0xff] }
 0x170   : > { %1283 = vst.msk [vmem:[#allocation2 + $0xd8] sm:$0xff] %vm776_vm2, %v1247_v50  ;;  %v1722_v54 = vadd.f32 %v1686_v14, %v1603_v46  ;;  %v1689_v55 = vld [vmem:[#allocation2 + $0xd0] sm:$0xff]  ;;  %v1248_v56 = vadd.f32 %v1212_v43, %v1134_v36  ;;  %v1249_v57 = vadd.f32 %v1213_v47, %v1136_v37  ;;  %v1607_v58 = vsel %vm1554_vm4, %v1604_v49, %v1606_v29 }
 0x171   : > { %1286 = vst.msk [vmem:[#allocation2 + $0xf0] sm:$0xff] %vm776_vm2, %v1250_v15  ;;  %v1725_v59 = vadd.f32 %v1689_v55, %v1609_v7  ;;  %v1687_v60 = vld [vmem:[#allocation2 + $0xc0] sm:$0xff]  ;;  %v2305_v62 = vpop.f32.mrb[48].mxu1  ;;  %v2349_v63 = vpop.f32.mrb[48].mxu0 }
 0x172   : > { %v1688_v61 = vld [vmem:[#allocation2 + $0xc8] sm:$0xff]  ;;  %1758 = vst.msk [vmem:[#allocation2 + $0xb8] sm:$0xff] %vm776_vm2, %v1722_v54  ;;  %1284 = vst.msk [vmem:[#allocation2 + $0xe0] sm:$0xff] %vm776_vm2, %v1248_v56  ;;  %v1723_v0 = vadd.f32 %v1687_v60, %v1605_v53  ;;  %v1614_v2 = vrot.slane %v2349_v63, 2  ;;  %v1024_v3 = vpop.f32.mrb[49].mxu1  ;;  %v1487_v4 = vpop.f32.mrb[49].mxu0 }
 0x173   : > { %1285 = vst.msk [vmem:[#allocation2 + $0xe8] sm:$0xff] %vm776_vm2, %v1249_v57  ;;  %v1724_v1 = vadd.f32 %v1688_v61, %v1607_v58  ;;  %1761 = vst.msk [vmem:[#allocation2 + $0xd0] sm:$0xff] %vm776_vm2, %v1725_v59  ;;  %v1139_v5 = vrot.slane %v1024_v3, 1  ;;  %v1610_v6 = vrot.slane %v1487_v4, 2  ;;  %v2306_v8 = vpop.f32.mrb[50].mxu1  ;;  %v2350_v9 = vpop.f32.mrb[50].mxu0 }
 0x174   : > { %1759 = vst.msk [vmem:[#allocation2 + $0xc0] sm:$0xff] %vm776_vm2, %v1723_v0  ;;  %v1143_v10 = vrot.slane %v2305_v62, 1  ;;  %v1145_v11 = vrot.slane %v2306_v8, 1  ;;  %v1616_v12 = vrot.slane %v2350_v9, 2  ;;  %v1027_v13 = vpop.f32.mrb[51].mxu1  ;;  %v1490_v16 = vpop.f32.mrb[51].mxu0 }
 0x175   : > { %1760 = vst.msk [vmem:[#allocation2 + $0xc8] sm:$0xff] %vm776_vm2, %v1724_v1  ;;  %v1140_v17 = vsel %vm1075_vm3, %v1137_v39, %v1139_v5  ;;  %v1611_v19 = vsel %vm1554_vm4, %v1608_v40, %v1610_v6  ;;  %v1141_v20 = vrot.slane %v1027_v13, 1  ;;  %v1612_v21 = vrot.slane %v1490_v16, 2  ;;  %v2965_v3 = vld [vmem:[%s3092_s2] ss:$0 sm:$0xff] (!%p2135_p8)  ;;  %v1776_v4 = vld [vmem:[#allocation2 + $0x8] sm:$0xff] (!%p2135_p8) }
 0x176   : > { %v1251_v22 = vadd.f32 %v1215_v18, %v1140_v17  ;;  %v1146_v23 = vsel %vm1075_vm3, %v1143_v10, %v1145_v11  ;;  %v1183_v24 = vsel %vm1075_vm3, %v1145_v11, 0.0  ;;  %v1617_v27 = vsel %vm1554_vm4, %v1614_v2, %v1616_v12  ;;  %v1777_v8 = vld [vmem:[#allocation2 + $0x10] sm:$0xff] (!%p2135_p8)  ;;  %v1778_v9 = vld [vmem:[#allocation2 + $0x18] sm:$0xff] (!%p2135_p8)  ;;  %v1780_v16 = vld [vmem:[#allocation2 + $0x28] sm:$0xff] (!%p2135_p8) }
 0x177   : > { %v1690_v28 = vld [vmem:[#allocation2 + $0xd8] sm:$0xff]  ;;  %v1254_v29 = vadd.f32 %v1218_v25, %v1146_v23  ;;  %v1255_v30 = vadd.f32 %v1219_v26, %v1183_v24  ;;  %v1142_v31 = vsel %vm1075_vm3, %v1139_v5, %v1141_v20  ;;  %v1144_v32 = vsel %vm1075_vm3, %v1141_v20, %v1143_v10  ;;  %v1779_v10 = vld [vmem:[#allocation2 + $0x20] sm:$0xff] (!%p2135_p8)  ;;  %v1781_v17 = vld [vmem:[#allocation2 + $0x30] sm:$0xff] (!%p2135_p8) }
 0x178   : > { %1287 = vst.msk [vmem:[#allocation2 + $0xf8] sm:$0xff] %vm776_vm2, %v1251_v22  ;;  %v1726_v35 = vadd.f32 %v1690_v28, %v1611_v19  ;;  %v1693_v38 = vld [vmem:[#allocation2 + $0xf0] sm:$0xff]  ;;  %v1252_v39 = vadd.f32 %v1216_v33, %v1142_v31  ;;  %v1253_v40 = vadd.f32 %v1217_v34, %v1144_v32  ;;  %v1613_v41 = vsel %vm1554_vm4, %v1610_v6, %v1612_v21  ;;  %v1782_v18 = vld [vmem:[#allocation2 + $0x38] sm:$0xff] (!%p2135_p8)  ;;  %v1783_v23 = vld [vmem:[#allocation2 + $0x40] sm:$0xff] (!%p2135_p8) }
 0x179   : > { %1290 = vst.msk [vmem:[#allocation2 + $0x110] sm:$0xff] %vm776_vm2, %v1254_v29  ;;  %1291 = vst.msk [vmem:[#allocation2 + $0x118] sm:$0xff] %vm776_vm2, %v1255_v30  ;;  %v1729_v42 = vadd.f32 %v1693_v38, %v1617_v27  ;;  %v1615_v44 = vsel %vm1554_vm4, %v1612_v21, %v1614_v2  ;;  %v1691_v45 = vld [vmem:[#allocation2 + $0xe0] sm:$0xff]  ;;  %v2353_v48 = vpop.f32.mrb[52].mxu0  ;;  %v1819_v6 = vadd.f32 (!%p2135_p8), %v2965_v3, %v1776_v4  ;;  %v1784_v24 = vld [vmem:[#allocation2 + $0x48] sm:$0xff] (!%p2135_p8) }
 0x17a   : > { %v1692_v46 = vld [vmem:[#allocation2 + $0xe8] sm:$0xff]  ;;  %1762 = vst.msk [vmem:[#allocation2 + $0xd8] sm:$0xff] %vm776_vm2, %v1726_v35  ;;  %1288 = vst.msk [vmem:[#allocation2 + $0x100] sm:$0xff] %vm776_vm2, %v1252_v39  ;;  %v1727_v49 = vadd.f32 %v1691_v45, %v1613_v41  ;;  %v1622_v51 = vrot.slane %v2353_v48, 2  ;;  %v1503_v52 = vpop.f32.mrb[53].mxu0  ;;  %v1775_v2 = vld [vmem:[#allocation2] sm:$0xff] (!%p2135_p8)  ;;  %v1820_v11 = vadd.f32 (!%p2135_p8), %v2965_v3, %v1777_v8  ;;  %v1822_v13 = vadd.f32 (!%p2135_p8), %v2965_v3, %v1779_v10 }
 0x17b   : > { %1289 = vst.msk [vmem:[#allocation2 + $0x108] sm:$0xff] %vm776_vm2, %v1253_v40  ;;  %v1728_v50 = vadd.f32 %v1692_v46, %v1615_v44  ;;  %1765 = vst.msk [vmem:[#allocation2 + $0xf0] sm:$0xff] %vm776_vm2, %v1729_v42  ;;  %v1618_v7 = vrot.slane %v1503_v52, 2  ;;  %v2354_v14 = vpop.f32.mrb[54].mxu0  ;;  %v1818_v5 = vadd.f32 (!%p2135_p8), %v2965_v3, %v1775_v2  ;;  %v1855_v20 = vmax.f32 (!%p2135_p8), %v1819_v6, 0.0  ;;  %v1785_v25 = vld [vmem:[#allocation2 + $0x50] sm:$0xff] (!%p2135_p8) }
 0x17c   : > { %1763 = vst.msk [vmem:[#allocation2 + $0xe0] sm:$0xff] %vm776_vm2, %v1727_v49  ;;  %v1624_v15 = vrot.slane %v2354_v14, 2  ;;  %v1506_v36 = vpop.f32.mrb[55].mxu0  ;;  %v1823_v21 = vadd.f32 (!%p2135_p8), %v2965_v3, %v1780_v16  ;;  %v1824_v22 = vadd.f32 (!%p2135_p8), %v2965_v3, %v1781_v17  ;;  %v1856_v26 = vmax.f32 (!%p2135_p8), %v1820_v11, 0.0  ;;  %v1786_v30 = vld [vmem:[#allocation2 + $0x58] sm:$0xff] (!%p2135_p8)  ;;  %v1787_v31 = vld [vmem:[#allocation2 + $0x60] sm:$0xff] (!%p2135_p8) }
 0x17d   : > { %1764 = vst.msk [vmem:[#allocation2 + $0xe8] sm:$0xff] %vm776_vm2, %v1728_v50  ;;  %v1619_v37 = vsel %vm1554_vm4, %v1616_v12, %v1618_v7  ;;  %v1620_v43 = vrot.slane %v1506_v36, 2  ;;  %v1821_v12 = vadd.f32 (!%p2135_p8), %v2965_v3, %v1778_v9  ;;  %v1854_v19 = vmax.f32 (!%p2135_p8), %v1818_v5, 0.0  ;;  %v1788_v32 = vld [vmem:[#allocation2 + $0x68] sm:$0xff] (!%p2135_p8)  ;;  %1891 = vst.msk [vmem:[%s2538_s7 + $0x8] sm:$0xff] (!%p2135_p8), %vm776_vm2, %v1855_v20  ;;  %v1789_v39 = vld [vmem:[#allocation2 + $0x70] sm:$0xff] (!%p2135_p8) }
 0x17e   : > { %v1625_v47 = vsel %vm1554_vm4, %v1622_v51, %v1624_v15  ;;  %v1662_v57 = vsel %vm1554_vm4, %v1624_v15, 0.0  ;;  %v1858_v28 = vmax.f32 (!%p2135_p8), %v1822_v13, 0.0  ;;  %v1825_v29 = vadd.f32 (!%p2135_p8), %v2965_v3, %v1782_v18  ;;  %v1790_v40 = vld [vmem:[#allocation2 + $0x78] sm:$0xff] (!%p2135_p8)  ;;  %1892 = vst.msk [vmem:[%s2538_s7 + $0x10] sm:$0xff] (!%p2135_p8), %vm776_vm2, %v1856_v26  ;;  %v1791_v46 = vld [vmem:[#allocation2 + $0x80] sm:$0xff] (!%p2135_p8)  ;;  %v1792_v48 = vld [vmem:[#allocation2 + $0x88] sm:$0xff] (!%p2135_p8) }
 0x17f   : > { %v1694_v53 = vld [vmem:[#allocation2 + $0xf8] sm:$0xff]  ;;  %v1621_v54 = vsel %vm1554_vm4, %v1618_v7, %v1620_v43  ;;  %v1623_v55 = vsel %vm1554_vm4, %v1620_v43, %v1622_v51  ;;  %1774 = sbr.rel (%p2135_p8) target bundleno = 404 (0x194), region = 40  ;;  %v1857_v27 = vmax.f32 (!%p2135_p8), %v1821_v12, 0.0  ;;  %1890 = vst.msk [vmem:[%s2538_s7] sm:$0xff] (!%p2135_p8), %vm776_vm2, %v1854_v19  ;;  %v1859_v33 = vmax.f32 (!%p2135_p8), %v1823_v21, 0.0  ;;  %v1793_v7 = vld [vmem:[#allocation2 + $0x90] sm:$0xff] (!%p2135_p8) }
 0x180   : > { %v1730_v56 = vadd.f32 %v1694_v53, %v1619_v37  ;;  %v1697_v58 = vld [vmem:[#allocation2 + $0x110] sm:$0xff]  ;;  %v1698_v59 = vld [vmem:[#allocation2 + $0x118] sm:$0xff]  ;;  %v1860_v34 = vmax.f32 (!%p2135_p8), %v1824_v22, 0.0  ;;  %v1826_v35 = vadd.f32 (!%p2135_p8), %v2965_v3, %v1783_v23  ;;  %v1827_v38 = vadd.f32 (!%p2135_p8), %v2965_v3, %v1784_v24  ;;  %1894 = vst.msk [vmem:[%s2538_s7 + $0x20] sm:$0xff] (!%p2135_p8), %vm776_vm2, %v1858_v28  ;;  %v1795_v15 = vld [vmem:[#allocation2 + $0xa0] sm:$0xff] (!%p2135_p8) }
 0x181   : > { %v1733_v60 = vadd.f32 %v1697_v58, %v1625_v47  ;;  %v1734_v61 = vadd.f32 %v1698_v59, %v1662_v57  ;;  %v1695_v62 = vld [vmem:[#allocation2 + $0x100] sm:$0xff]  ;;  %1893 = vst.msk [vmem:[%s2538_s7 + $0x18] sm:$0xff] (!%p2135_p8), %vm776_vm2, %v1857_v27  ;;  %v1861_v41 = vmax.f32 (!%p2135_p8), %v1825_v29, 0.0  ;;  %v1828_v42 = vadd.f32 (!%p2135_p8), %v2965_v3, %v1785_v25  ;;  %1895 = vst.msk [vmem:[%s2538_s7 + $0x28] sm:$0xff] (!%p2135_p8), %vm776_vm2, %v1859_v33  ;;  %v1794_v14 = vld [vmem:[#allocation2 + $0x98] sm:$0xff] (!%p2135_p8) }
 0x182   : > { %v1696_v63 = vld [vmem:[#allocation2 + $0x108] sm:$0xff]  ;;  %1766 = vst.msk [vmem:[#allocation2 + $0xf8] sm:$0xff] %vm776_vm2, %v1730_v56  ;;  %v1731_v0 = vadd.f32 %v1695_v62, %v1621_v54  ;;  %v1829_v44 = vadd.f32 (!%p2135_p8), %v2965_v3, %v1786_v30  ;;  %v1830_v45 = vadd.f32 (!%p2135_p8), %v2965_v3, %v1787_v31  ;;  %1896 = vst.msk [vmem:[%s2538_s7 + $0x30] sm:$0xff] (!%p2135_p8), %vm776_vm2, %v1860_v34  ;;  %v1862_v49 = vmax.f32 (!%p2135_p8), %v1826_v35, 0.0  ;;  %v1797_v54 = vld [vmem:[#allocation2 + $0xb0] sm:$0xff] (!%p2135_p8) }
 0x183   : > { %v1732_v1 = vadd.f32 %v1696_v63, %v1623_v55  ;;  %1769 = vst.msk [vmem:[#allocation2 + $0x110] sm:$0xff] %vm776_vm2, %v1733_v60  ;;  %1770 = vst.msk [vmem:[#allocation2 + $0x118] sm:$0xff] %vm776_vm2, %v1734_v61  ;;  %v1863_v50 = vmax.f32 (!%p2135_p8), %v1827_v38, 0.0  ;;  %v1831_v51 = vadd.f32 (!%p2135_p8), %v2965_v3, %v1788_v32  ;;  %v1832_v52 = vadd.f32 (!%p2135_p8), %v2965_v3, %v1789_v39  ;;  %v1796_v53 = vld [vmem:[#allocation2 + $0xa8] sm:$0xff] (!%p2135_p8)  ;;  %v1798_v59 = vld [vmem:[#allocation2 + $0xb8] sm:$0xff] (!%p2135_p8) }
 0x184   : > { %1767 = vst.msk [vmem:[#allocation2 + $0x100] sm:$0xff] %vm776_vm2, %v1731_v0  ;;  %1897 = vst.msk [vmem:[%s2538_s7 + $0x38] sm:$0xff] (!%p2135_p8), %vm776_vm2, %v1861_v41  ;;  %v1864_v36 = vmax.f32 (!%p2135_p8), %v1828_v42, 0.0  ;;  %v1865_v37 = vmax.f32 (!%p2135_p8), %v1829_v44, 0.0  ;;  %v1866_v43 = vmax.f32 (!%p2135_p8), %v1830_v45, 0.0  ;;  %v1833_v47 = vadd.f32 (!%p2135_p8), %v2965_v3, %v1790_v40  ;;  %v1799_v0 = vld [vmem:[#allocation2 + $0xc0] sm:$0xff] (!%p2135_p8) }
 0x185   : > { %1768 = vst.msk [vmem:[#allocation2 + $0x108] sm:$0xff] %vm776_vm2, %v1732_v1  ;;  %1898 = vst.msk [vmem:[%s2538_s7 + $0x40] sm:$0xff] (!%p2135_p8), %vm776_vm2, %v1862_v49  ;;  %v1867_v55 = vmax.f32 (!%p2135_p8), %v1831_v51, 0.0  ;;  %v1868_v56 = vmax.f32 (!%p2135_p8), %v1832_v52, 0.0  ;;  %v1834_v57 = vadd.f32 (!%p2135_p8), %v2965_v3, %v1791_v46  ;;  %v1835_v58 = vadd.f32 (!%p2135_p8), %v2965_v3, %v1792_v48  ;;  %v1800_v1 = vld [vmem:[#allocation2 + $0xc8] sm:$0xff] (!%p2135_p8)  ;;  %v1801_v8 = vld [vmem:[#allocation2 + $0xd0] sm:$0xff] (!%p2135_p8) }
 0x186   : > { %1899 = vst.msk [vmem:[%s2538_s7 + $0x48] sm:$0xff] %vm776_vm2, %v1863_v50  ;;  %1900 = vst.msk [vmem:[%s2538_s7 + $0x50] sm:$0xff] %vm776_vm2, %v1864_v36  ;;  %v1869_v60 = vmax.f32 %v1833_v47, 0.0  ;;  %v1836_v61 = vadd.f32 %v2965_v3, %v1793_v7  ;;  %v1837_v62 = vadd.f32 %v2965_v3, %v1794_v14  ;;  %v1838_v63 = vadd.f32 %v2965_v3, %v1795_v15  ;;  %v1802_v9 = vld [vmem:[#allocation2 + $0xd8] sm:$0xff]  ;;  %v1803_v10 = vld [vmem:[#allocation2 + $0xe0] sm:$0xff] }
 0x187   : > { %1901 = vst.msk [vmem:[%s2538_s7 + $0x58] sm:$0xff] %vm776_vm2, %v1865_v37  ;;  %1902 = vst.msk [vmem:[%s2538_s7 + $0x60] sm:$0xff] %vm776_vm2, %v1866_v43  ;;  %v1870_v2 = vmax.f32 %v1834_v57, 0.0  ;;  %v1871_v4 = vmax.f32 %v1835_v58, 0.0  ;;  %v1839_v5 = vadd.f32 %v2965_v3, %v1796_v53  ;;  %v1840_v6 = vadd.f32 %v2965_v3, %v1797_v54  ;;  %v1804_v17 = vld [vmem:[#allocation2 + $0xe8] sm:$0xff]  ;;  %v1805_v18 = vld [vmem:[#allocation2 + $0xf0] sm:$0xff] }
 0x188   : > { %1903 = vst.msk [vmem:[%s2538_s7 + $0x68] sm:$0xff] %vm776_vm2, %v1867_v55  ;;  %1904 = vst.msk [vmem:[%s2538_s7 + $0x70] sm:$0xff] %vm776_vm2, %v1868_v56  ;;  %v1872_v11 = vmax.f32 %v1836_v61, 0.0  ;;  %v1873_v12 = vmax.f32 %v1837_v62, 0.0  ;;  %v1874_v13 = vmax.f32 %v1838_v63, 0.0  ;;  %v1841_v16 = vadd.f32 %v2965_v3, %v1798_v59 }
 0x189   : > { %1905 = vst.msk [vmem:[%s2538_s7 + $0x78] sm:$0xff] %vm776_vm2, %v1869_v60  ;;  %1906 = vst.msk [vmem:[%s2538_s7 + $0x80] sm:$0xff] %vm776_vm2, %v1870_v2  ;;  %v1875_v19 = vmax.f32 %v1839_v5, 0.0  ;;  %v1876_v20 = vmax.f32 %v1840_v6, 0.0  ;;  %v1842_v21 = vadd.f32 %v2965_v3, %v1799_v0  ;;  %v1843_v22 = vadd.f32 %v2965_v3, %v1800_v1  ;;  %v1806_v23 = vld [vmem:[#allocation2 + $0xf8] sm:$0xff] }
 0x18a   : > { %1907 = vst.msk [vmem:[%s2538_s7 + $0x88] sm:$0xff] %vm776_vm2, %v1871_v4  ;;  %1908 = vst.msk [vmem:[%s2538_s7 + $0x90] sm:$0xff] %vm776_vm2, %v1872_v11  ;;  %v1877_v24 = vmax.f32 %v1841_v16, 0.0  ;;  %v1844_v25 = vadd.f32 %v2965_v3, %v1801_v8  ;;  %v1845_v26 = vadd.f32 %v2965_v3, %v1802_v9  ;;  %v1846_v27 = vadd.f32 %v2965_v3, %v1803_v10  ;;  %v1809_v34 = vld [vmem:[#allocation2 + $0x110] sm:$0xff]  ;;  %v1810_v35 = vld [vmem:[#allocation2 + $0x118] sm:$0xff] }
 0x18b   : > { %1909 = vst.msk [vmem:[%s2538_s7 + $0x98] sm:$0xff] %vm776_vm2, %v1873_v12  ;;  %1910 = vst.msk [vmem:[%s2538_s7 + $0xa0] sm:$0xff] %vm776_vm2, %v1874_v13  ;;  %v1807_v28 = vld [vmem:[#allocation2 + $0x100] sm:$0xff]  ;;  %v1878_v30 = vmax.f32 %v1842_v21, 0.0  ;;  %v1879_v31 = vmax.f32 %v1843_v22, 0.0  ;;  %v1847_v32 = vadd.f32 %v2965_v3, %v1804_v17  ;;  %v1848_v33 = vadd.f32 %v2965_v3, %v1805_v18 }
 0x18c   : > { %v1808_v29 = vld [vmem:[#allocation2 + $0x108] sm:$0xff]  ;;  %1911 = vst.msk [vmem:[%s2538_s7 + $0xa8] sm:$0xff] %vm776_vm2, %v1875_v19  ;;  %1912 = vst.msk [vmem:[%s2538_s7 + $0xb0] sm:$0xff] %vm776_vm2, %v1876_v20  ;;  %v1880_v38 = vmax.f32 %v1844_v25, 0.0  ;;  %v1881_v39 = vmax.f32 %v1845_v26, 0.0  ;;  %v1882_v40 = vmax.f32 %v1846_v27, 0.0  ;;  %v1849_v41 = vadd.f32 %v2965_v3, %v1806_v23 }
 0x18d   : > { %1913 = vst.msk [vmem:[%s2538_s7 + $0xb8] sm:$0xff] %vm776_vm2, %v1877_v24  ;;  %1914 = vst.msk [vmem:[%s2538_s7 + $0xc0] sm:$0xff] %vm776_vm2, %v1878_v30  ;;  %v1883_v42 = vmax.f32 %v1847_v32, 0.0  ;;  %v1884_v44 = vmax.f32 %v1848_v33, 0.0  ;;  %v1850_v45 = vadd.f32 %v2965_v3, %v1807_v28  ;;  %v1851_v46 = vadd.f32 %v2965_v3, %v1808_v29 }
 0x18e   : > { %1915 = vst.msk [vmem:[%s2538_s7 + $0xc8] sm:$0xff] %vm776_vm2, %v1879_v31  ;;  %1916 = vst.msk [vmem:[%s2538_s7 + $0xd0] sm:$0xff] %vm776_vm2, %v1880_v38  ;;  %v1885_v48 = vmax.f32 %v1849_v41, 0.0  ;;  %v1852_v49 = vadd.f32 %v2965_v3, %v1809_v34  ;;  %v1853_v50 = vadd.f32 %v2965_v3, %v1810_v35 }
 0x18f   : > { %1917 = vst.msk [vmem:[%s2538_s7 + $0xd8] sm:$0xff] %vm776_vm2, %v1881_v39  ;;  %1918 = vst.msk [vmem:[%s2538_s7 + $0xe0] sm:$0xff] %vm776_vm2, %v1882_v40  ;;  %v1886_v51 = vmax.f32 %v1850_v45, 0.0  ;;  %v1887_v52 = vmax.f32 %v1851_v46, 0.0 }
 0x190   : > { %1919 = vst.msk [vmem:[%s2538_s7 + $0xe8] sm:$0xff] %vm776_vm2, %v1883_v42  ;;  %1920 = vst.msk [vmem:[%s2538_s7 + $0xf0] sm:$0xff] %vm776_vm2, %v1884_v44  ;;  %v1888_v7 = vmax.f32 %v1852_v49, 0.0  ;;  %v1889_v14 = vmax.f32 %v1853_v50, 0.0 }
 0x191   : > { %1921 = vst.msk [vmem:[%s2538_s7 + $0xf8] sm:$0xff] %vm776_vm2, %v1885_v48  ;;  %1922 = vst.msk [vmem:[%s2538_s7 + $0x100] sm:$0xff] %vm776_vm2, %v1886_v51 }
 0x192   : > { %1923 = vst.msk [vmem:[%s2538_s7 + $0x108] sm:$0xff] %vm776_vm2, %v1887_v52  ;;  %1924 = vst.msk [vmem:[%s2538_s7 + $0x110] sm:$0xff] %vm776_vm2, %v1888_v7 }
 0x193   : > { %1925 = vst.msk [vmem:[%s2538_s7 + $0x118] sm:$0xff] %vm776_vm2, %v1889_v14 }
 0x194 PF: > { %s13_s16 = sadd.s32 1, %s2467_s16   ;;  %s3094_s12 = smov %s2459_s14 }
 0x195   : > { %p10_p9 = scmp.ge.s32.totalorder %s13_s16, 8   ;;  %s3095_s13 = smov %s2463_s15 }
 0x196   : > { %s3096_s14 = smov %s3099_s17  ;;  %s3097_s15 = smov %s3103_s18 }
 0x197   :  { %12 = sbr.rel (!%p10_p9) target bundleno = 3 (0x3), region = 75 }

// kernel: unet_block_forward.6
= control target key start
LH: loop header
LB: loop body
LE: loop exit
PB: predicated region body
PF: predicated region fallthrough
CT: control target
= control target key end

     0   :  { %s4202_s26 = smov 0   ;;  %s7630_s0 = inlined_call_operand.vmem [shape: f32[2,256,32], index: 0, kind: input, shape index: {}]   ;;  %s7631_s1 = inlined_call_operand.vmem [shape: f32[32,2], index: 1, kind: input, shape index: {}]   ;;  %s7632_s2 = inlined_call_operand.vmem [shape: f32[1,2], index: 2, kind: input, shape index: {}]   ;;  %s7633_s3 = inlined_call_operand.vmem [shape: f32[2,32], index: 3, kind: input, shape index: {}]   ;;  %s7634_s4 = inlined_call_operand.vmem [shape: f32[1,32], index: 4, kind: input, shape index: {}]   ;;  %s7635_s5 = inlined_call_operand.vmem [shape: f32[9,2], index: 5, kind: input, shape index: {}]   ;;  %s7636_s6 = inlined_call_operand.<no memory space> [shape: f32[1,1], index: 6, kind: input, shape index: {}]   ;;  %s7637_s7 = inlined_call_operand.vmem [shape: f32[2,256,32], index: 7, kind: output, shape index: {}]  }
   0x1   :  { %v12_v0 = vstv %s7636_s6 }
   0x2   :  { %13 = vst [vmem:[#allocation2] sm:$0x1] %v12_v0 }
   0x3 LB: > { %s3901_s27 = sadd.s32 4294967295, %s4153_s26   ;;  %p3905_p0 = scmp.ge.s32.totalorder %s4153_s26, 1  ;;  %s4153_s26 = sphi %s4202_s26, %s19_s26  }
   0x4   : > { %p239_p1 = scmp.lt.s32.totalorder %s4153_s26, 3 }
   0x6   : > { %p240_p2 = pnand %p3905_p0, %p239_p1 }
   0x8   : > { %243 = sbr.rel (%p240_p2) target bundleno = 1648 (0x670), region = 48 }
   0xf   : > { %v456_v1 = vld [vmem:[%s7631_s1] sm:$0xff]  ;;  %v457_v2 = vld [vmem:[%s7631_s1 + $0x8] sm:$0xff]  ;;  %v458_v3 = vld [vmem:[%s7631_s1 + $0x10] sm:$0xff]  ;;  %v4155_v4 = vmov 0.0|0.0   ;;  %vm4156_vm0 = vmmov 0   ;;  %v4157_v7 = vmov 0.0  }
  0x10   : > { %3985 = vmatprep.subr.bf16.mxu0 %v4155_v4  ;;  %v3986_v5 = vpack.c.bf16 %v457_v2, %v456_v1  ;;  %v459_v6 = vld [vmem:[%s7631_s1 + $0x18] sm:$0xff]  ;;  %3977 = vmatprep.mubr.msk.f32.mxu0 %vm4156_vm0, %v4157_v7  ;;  %p271_p3 = scmp.lt.s32.totalorder %s3901_s27, 1  ;;  %vm7747_vm1 = vcmask 261120   ;;  %vm7761_vm2 = vcmask 1040384   ;;  %vm553_vm3 = vcmask 1041408  }
  0x11   : > { %3980 = vmatprep.subr.mxu1 %v4157_v7  ;;  %3982 = vmatprep.mubr.msk.f32.mxu1 %vm4156_vm0, %v4157_v7  ;;  %v3989_v8 = vpack.c.bf16 %v459_v6, %v458_v3  ;;  %vm7753_vm4 = vcmask 15360   ;;  %vm898_vm5 = vcmask 7168   ;;  %vm7749_vm6 = vcmask 1046528  }
  0x12   : > { %3987 = vmatpush3.bf16.msra.mxu0 %v3986_v5  ;;  %s8487_s27 = smov (!%p271_p3, %s3901_s27), 1 }
  0x13   : > { %3988 = vmatprep.subr.bf16.mxu0 %v4155_v4  ;;  %s3960_s12 = sshll.u32 %s8487_s27, 8 }
  0x14   : > { %s4230_s15 = scalar_lea.vmem %s7630_s0, %s3960_s12  ;;  %s7529_s20 = scalar_lea.vmem %s7637_s7, %s3960_s12 }
  0x15   : > { %v4233_v9 = vld [vmem:[%s4230_s15] sm:$0xff]  ;;  %v4236_v10 = vld [vmem:[%s4230_s15 + $0x8] sm:$0xff]  ;;  %v4239_v11 = vld [vmem:[%s4230_s15 + $0x10] sm:$0xff] }
  0x16   : > { %3990 = vmatpush3.bf16.msra.mxu0 %v3989_v8  ;;  %v4242_v12 = vld [vmem:[%s4230_s15 + $0x18] sm:$0xff]  ;;  %v314_v13 = vsel %vm7747_vm1, %v4233_v9, 0.0  ;;  %v315_v14 = vsel %vm7747_vm1, %v4236_v10, 0.0  ;;  %v317_v15 = vsel %vm7747_vm1, %v4239_v11, 0.0  ;;  %v4251_v16 = vld [vmem:[%s4230_s15 + $0x20] sm:$0xff]  ;;  %v4256_v19 = vld [vmem:[%s4230_s15 + $0x28] sm:$0xff] }
  0x17   : > { %v316_v17 = vadd.f32 %v315_v14, %v314_v13  ;;  %v319_v18 = vsel %vm7747_vm1, %v4242_v12, 0.0  ;;  %v321_v21 = vsel %vm7747_vm1, %v4251_v16, 0.0  ;;  %v4261_v22 = vld [vmem:[%s4230_s15 + $0x30] sm:$0xff]  ;;  %v323_v24 = vsel %vm7747_vm1, %v4256_v19, 0.0  ;;  %v4266_v25 = vld [vmem:[%s4230_s15 + $0x38] sm:$0xff]  ;;  %v4269_v27 = vld [vmem:[%s4230_s15 + $0x40] sm:$0xff] }
  0x18   : > { %v325_v28 = vsel %vm7747_vm1, %v4261_v22, 0.0  ;;  %v327_v30 = vsel %vm7747_vm1, %v4266_v25, 0.0  ;;  %v4276_v31 = vld [vmem:[%s4230_s15 + $0x48] sm:$0xff]  ;;  %v329_v33 = vsel %vm7747_vm1, %v4269_v27, 0.0  ;;  %v385_v34 = vsel %vm7747_vm1, %v4233_v9, -inf  ;;  %v4283_v35 = vld [vmem:[%s4230_s15 + $0x50] sm:$0xff] }
  0x19   : > { %v318_v20 = vadd.f32 %v317_v15, %v316_v17  ;;  %v386_v36 = vsel %vm7747_vm1, %v4236_v10, -inf  ;;  %v387_v37 = vsel %vm7747_vm1, %v4239_v11, -inf  ;;  %v388_v38 = vsel %vm7747_vm1, %v4242_v12, -inf  ;;  %v4302_v45 = vld [vmem:[%s4230_s15 + $0x58] sm:$0xff]  ;;  %v4307_v49 = vld [vmem:[%s4230_s15 + $0x60] sm:$0xff]  ;;  %v4320_v59 = vld [vmem:[%s4230_s15 + $0x68] sm:$0xff] }
  0x1a   : > { %v389_v39 = vsel %vm7747_vm1, %v4251_v16, -inf  ;;  %v391_v41 = vsel %vm7747_vm1, %v4256_v19, -inf  ;;  %v393_v42 = vsel %vm7747_vm1, %v4261_v22, -inf  ;;  %v395_v43 = vsel %vm7747_vm1, %v4266_v25, -inf  ;;  %v4325_v62 = vld [vmem:[%s4230_s15 + $0x70] sm:$0xff]  ;;  %v4328_v3 = vld [vmem:[%s4230_s15 + $0x78] sm:$0xff] }
  0x1b   : > { %v320_v23 = vadd.f32 %v319_v18, %v318_v20  ;;  %v331_v44 = vsel %vm7747_vm1, %v4276_v31, 0.0  ;;  %v333_v47 = vsel %vm7747_vm1, %v4283_v35, 0.0  ;;  %v390_v48 = vmax.f32 %v385_v34, %v389_v39  ;;  %v4341_v14 = vld [vmem:[%s4230_s15 + $0x80] sm:$0xff]  ;;  %v4346_v18 = vld [vmem:[%s4230_s15 + $0x88] sm:$0xff]  ;;  %v4349_v20 = vld [vmem:[%s4230_s15 + $0x90] sm:$0xff] }
  0x1c   : > { %v392_v50 = vmax.f32 %v386_v36, %v391_v41  ;;  %v394_v51 = vmax.f32 %v387_v37, %v393_v42  ;;  %v396_v52 = vmax.f32 %v388_v38, %v395_v43  ;;  %v397_v53 = vsel %vm7747_vm1, %v4269_v27, -inf  ;;  %v4365_v38 = vld [vmem:[%s4230_s15 + $0xa0] sm:$0xff]  ;;  %v4368_v39 = vld [vmem:[%s4230_s15 + $0xa8] sm:$0xff] }
  0x1d   : > { %v322_v26 = vadd.f32 %v321_v21, %v320_v23  ;;  %v399_v55 = vsel %vm7747_vm1, %v4276_v31, -inf  ;;  %v401_v56 = vsel %vm7747_vm1, %v4283_v35, -inf  ;;  %v403_v57 = vsel %vm7747_vm1, %v4302_v45, -inf }
  0x1e   : > { %v335_v58 = vsel %vm7747_vm1, %v4302_v45, 0.0  ;;  %v337_v61 = vsel %vm7747_vm1, %v4307_v49, 0.0  ;;  %v398_v63 = vmax.f32 %v390_v48, %v397_v53  ;;  %v400_v0 = vmax.f32 %v392_v50, %v399_v55  ;;  %v4389_v55 = vld [vmem:[%s4230_s15 + $0xc0] sm:$0xff] }
  0x1f   : > { %v324_v29 = vadd.f32 %v323_v24, %v322_v26  ;;  %v402_v1 = vmax.f32 %v394_v51, %v401_v56  ;;  %v404_v2 = vmax.f32 %v396_v52, %v403_v57  ;;  %v405_v5 = vsel %vm7747_vm1, %v4307_v49, -inf  ;;  %v4392_v57 = vld [vmem:[%s4230_s15 + $0xc8] sm:$0xff] }
  0x20   : > { %v407_v6 = vsel %vm7747_vm1, %v4320_v59, -inf  ;;  %v409_v7 = vsel %vm7747_vm1, %v4325_v62, -inf  ;;  %v339_v8 = vsel %vm7747_vm1, %v4320_v59, 0.0  ;;  %v411_v13 = vsel %vm7747_vm1, %v4328_v3, -inf }
  0x21   : > { %v326_v32 = vadd.f32 %v325_v28, %v324_v29  ;;  %v341_v17 = vsel %vm7747_vm1, %v4325_v62, 0.0  ;;  %v406_v21 = vmax.f32 %v398_v63, %v405_v5  ;;  %v408_v23 = vmax.f32 %v400_v0, %v407_v6  ;;  %v4354_v28 = vld [vmem:[%s4230_s15 + $0x98] sm:$0xff]  ;;  %v4399_v0 = vld [vmem:[%s4230_s15 + $0xd0] sm:$0xff] }
  0x22   : > { %v410_v24 = vmax.f32 %v402_v1, %v409_v7  ;;  %v413_v26 = vsel %vm7747_vm1, %v4341_v14, -inf  ;;  %v343_v34 = vsel %vm7747_vm1, %v4328_v3, 0.0  ;;  %v419_v36 = vsel %vm7747_vm1, %v4354_v28, -inf  ;;  %v4402_v1 = vld [vmem:[%s4230_s15 + $0xd8] sm:$0xff] }
  0x23   : > { %v328_v40 = vadd.f32 %v327_v30, %v326_v32  ;;  %v412_v30 = vmax.f32 %v404_v2, %v411_v13  ;;  %v415_v32 = vsel %vm7747_vm1, %v4346_v18, -inf  ;;  %v414_v41 = vmax.f32 %v406_v21, %v413_v26 }
  0x24   : > { %v416_v42 = vmax.f32 %v408_v23, %v415_v32  ;;  %v421_v50 = vsel %vm7747_vm1, %v4365_v38, -inf  ;;  %v423_v51 = vsel %vm7747_vm1, %v4368_v39, -inf  ;;  %v347_v52 = vsel %vm7747_vm1, %v4346_v18, 0.0  ;;  %v4419_v23 = vld [vmem:[%s4230_s15 + $0xe0] sm:$0xff] }
  0x25   : > { %v330_v46 = vadd.f32 %v329_v33, %v328_v40  ;;  %v417_v33 = vsel %vm7747_vm1, %v4349_v20, -inf  ;;  %v345_v40 = vsel %vm7747_vm1, %v4341_v14, 0.0  ;;  %v420_v48 = vmax.f32 %v412_v30, %v419_v36  ;;  %v4424_v30 = vld [vmem:[%s4230_s15 + $0xe8] sm:$0xff] }
  0x26   : > { %v418_v43 = vmax.f32 %v410_v24, %v417_v33  ;;  %v429_v63 = vsel %vm7747_vm1, %v4389_v55, -inf  ;;  %v431_v6 = vsel %vm7747_vm1, %v4392_v57, -inf  ;;  %v351_v7 = vsel %vm7747_vm1, %v4354_v28, 0.0 }
  0x27   : > { %v332_v54 = vadd.f32 %v331_v44, %v330_v46  ;;  %v4373_v44 = vld [vmem:[%s4230_s15 + $0xb0] sm:$0xff]  ;;  %v4376_v46 = vld [vmem:[%s4230_s15 + $0xb8] sm:$0xff]  ;;  %v435_v13 = vsel %vm7747_vm1, %v4402_v1, -inf  ;;  %v353_v24 = vsel %vm7747_vm1, %v4365_v38, 0.0  ;;  %v437_v36 = vsel %vm7747_vm1, %v4419_v23, -inf }
  0x28   : > { %v425_v53 = vsel %vm7747_vm1, %v4373_v44, -inf }
  0x29   : > { %v334_v60 = vadd.f32 %v333_v47, %v332_v54  ;;  %v427_v54 = vsel %vm7747_vm1, %v4376_v46, -inf }
  0x2a   : > { %v428_v5 = vmax.f32 %v420_v48, %v427_v54  ;;  %v359_v54 = vsel %vm7747_vm1, %v4376_v46, 0.0 }
  0x2b   : > { %v336_v4 = vadd.f32 %v335_v58, %v334_v60  ;;  %v349_v58 = vsel %vm7747_vm1, %v4349_v20, 0.0  ;;  %v422_v60 = vmax.f32 %v414_v41, %v421_v50 }
  0x2d   : > { %v338_v15 = vadd.f32 %v337_v61, %v336_v4  ;;  %v424_v61 = vmax.f32 %v416_v42, %v423_v51  ;;  %v426_v4 = vmax.f32 %v418_v43, %v425_v53  ;;  %v430_v26 = vmax.f32 %v422_v60, %v429_v63 }
  0x2f   : > { %v340_v29 = vadd.f32 %v339_v8, %v338_v15  ;;  %v433_v8 = vsel %vm7747_vm1, %v4399_v0, -inf  ;;  %v4413_v15 = vld [vmem:[%s4230_s15 + $0xf0] sm:$0xff]  ;;  %v438_v48 = vmax.f32 %v430_v26, %v437_v36 }
  0x30   : > { %v434_v33 = vmax.f32 %v426_v4, %v433_v8  ;;  %v441_v41 = vsel %vm7747_vm1, %v4413_v15, -inf  ;;  %v367_v8 = vsel %vm7747_vm1, %v4402_v1, 0.0 }
  0x31   : > { %v342_v37 = vadd.f32 %v341_v17, %v340_v29  ;;  %v4416_v17 = vld [vmem:[%s4230_s15 + $0xf8] sm:$0xff]  ;;  %v432_v29 = vmax.f32 %v424_v61, %v431_v6 }
  0x32   : > { %v443_v42 = vsel %vm7747_vm1, %v4416_v17, -inf }
  0x33   : > { %v344_v47 = vadd.f32 %v343_v34, %v342_v37  ;;  %v436_v34 = vmax.f32 %v428_v5, %v435_v13  ;;  %v355_v37 = vsel %vm7747_vm1, %v4368_v39, 0.0  ;;  %v365_v5 = vsel %vm7747_vm1, %v4399_v0, 0.0 }
  0x35   : > { %v346_v56 = vadd.f32 %v345_v40, %v344_v47  ;;  %v439_v40 = vsel %vm7747_vm1, %v4424_v30, -inf  ;;  %v357_v47 = vsel %vm7747_vm1, %v4373_v44, 0.0  ;;  %v444_v53 = vmax.f32 %v436_v34, %v443_v42 }
  0x36   : > { %v440_v51 = vmax.f32 %v432_v29, %v439_v40  ;;  %v371_v29 = vsel %vm7747_vm1, %v4424_v30, 0.0 }
  0x37   : > { %v348_v2 = vadd.f32 %v347_v52, %v346_v56  ;;  %v442_v52 = vmax.f32 %v434_v33, %v441_v41  ;;  %v373_v33 = vsel %vm7747_vm1, %v4413_v15, 0.0 }
  0x38   : > { %v445_v61 = vmax.f32 %v438_v48, %v440_v51 }
  0x39   : > { %v350_v21 = vadd.f32 %v349_v58, %v348_v2  ;;  %v361_v58 = vsel %vm7747_vm1, %v4389_v55, 0.0  ;;  %v446_v63 = vmax.f32 %v442_v52, %v444_v53  ;;  %v363_v2 = vsel %vm7747_vm1, %v4392_v57, 0.0 }
  0x3b   : > { %v352_v32 = vadd.f32 %v351_v7, %v350_v21  ;;  %v447_v7 = vmax.f32 %v445_v61, %v446_v63  ;;  %v369_v21 = vsel %vm7747_vm1, %v4419_v23, 0.0  ;;  %v541_v61 = vld [vmem:[%s7633_s3] sm:$0x3] }
  0x3c   : > { %3981 = vmatpush3.msk.msra.mxu1 %vm553_vm3, %v541_v61  ;;  %v3910_v63 = vld [vmem:[%s7632_s2] ss:$0 sm:$0xff] }
  0x3d   : > { %v354_v43 = vadd.f32 %v353_v24, %v352_v32  ;;  %v448_v26 = vrot.slane %v447_v7, 4 }
  0x3f   : > { %v356_v50 = vadd.f32 %v355_v37, %v354_v43  ;;  %v449_v36 = vmax.f32 %v447_v7, %v448_v26  ;;  %v375_v37 = vsel %vm7747_vm1, %v4416_v17, 0.0  ;;  %v3917_v7 = vld [vmem:[%s7635_s5] ss:$0 sm:$0xff] }
  0x41   : > { %v358_v56 = vadd.f32 %v357_v47, %v356_v50  ;;  %v450_v42 = vrot.slane %v449_v36, 2 }
  0x43   : > { %v360_v60 = vadd.f32 %v359_v54, %v358_v56  ;;  %v451_v48 = vmax.f32 %v449_v36, %v450_v42  ;;  %v4486_v36 = vld [vmem:[%s7635_s5 + $0x7] ss:$0 sm:$0xff] }
  0x45   : > { %v362_v4 = vadd.f32 %v361_v58, %v360_v60  ;;  %v452_v52 = vrot.slane %v451_v48, 1 }
  0x47   : > { %v364_v6 = vadd.f32 %v363_v2, %v362_v4  ;;  %v453_v56 = vmax.f32 %v451_v48, %v452_v52 }
  0x49   : > { %v366_v13 = vadd.f32 %v365_v5, %v364_v6 }
  0x4b   : > { %v368_v24 = vadd.f32 %v367_v8, %v366_v13  ;;  %v1607_v8 = vmul.f32 0.0, %v3917_v7 }
  0x4d   : > { %v370_v32 = vadd.f32 %v369_v21, %v368_v24  ;;  %v1638_v13 = vsel %vm7753_vm4, %v1607_v8, 0.0  ;;  %v4472_v21 = vld [vmem:[%s7635_s5 + $0x1] ss:$0 sm:$0xff]  ;;  %v3919_v24 = vld [vmem:[%s7635_s5 + $0x2] ss:$0 sm:$0xff] }
  0x4e   : > { %1639 = vadd.xlane.f32.xlu0 %v1638_v13  ;;  %v1767_v26 = vmul.f32 0.0, %v4472_v21 }
  0x4f   : > { %v372_v34 = vadd.f32 %v371_v29, %v370_v32  ;;  %v2149_v29 = vmul.f32 0.0, %v3919_v24 }
  0x50   : > { %v1798_v32 = vsel %vm7753_vm4, %v1767_v26, 0.0 }
  0x51   : > { %v374_v40 = vadd.f32 %v373_v33, %v372_v34  ;;  %v2181_v33 = vsel %vm7753_vm4, %v2149_v29, 0.0  ;;  %1799 = vadd.xlane.f32.xlu1 %v1798_v32  ;;  %v3923_v34 = vld [vmem:[%s7635_s5 + $0x6] ss:$0 sm:$0xff] }
  0x52   : > { %2182 = vadd.xlane.f32.xlu0 %v2181_v33 }
  0x53   : > { %v376_v41 = vadd.f32 %v375_v37, %v374_v40  ;;  %v2949_v37 = vmul.f32 0.0, %v3923_v34  ;;  %v3113_v40 = vmul.f32 0.0, %v4486_v36 }
  0x55   : > { %v377_v43 = vrot.slane %v376_v41, 4  ;;  %v3204_v42 = vsel %vm7753_vm4, %v3113_v40, 0.0 }
  0x56   : > { %3205 = vadd.xlane.f32.xlu0 %v3204_v42 }
  0x57   : > { %v378_v47 = vadd.f32 %v377_v43, %v376_v41  ;;  %v3043_v41 = vsel %vm7753_vm4, %v2949_v37, 0.0  ;;  %v3912_v43 = vld [vmem:[%s7634_s4] ss:$0 sm:$0xff] }
  0x58   : > { %3044 = vadd.xlane.f32.xlu1 %v3043_v41 }
  0x59   : > { %v379_v50 = vrot.slane %v378_v47, 2 }
  0x5b   : > { %v380_v51 = vadd.f32 %v379_v50, %v378_v47 }
  0x5d   : > { %v381_v53 = vrot.slane %v380_v51, 1 }
  0x5f   : > { %v382_v54 = vadd.f32 %v381_v53, %v380_v51 }
  0x61   : > { %v384_v58 = vmul.f32 0.00390625, %v382_v54 }
  0x63   : > { %v455_v60 = vsel %vm7761_vm2, %v384_v58, %v453_v56  ;;  %v637_v58 = vlaneseq }
  0x64   : > { %3978 = vmatmul.mubr.msk.f32.vlgmr.msra.gmra.mrb[0].mxu0 %vm7747_vm1, %v455_v60 }
  0x65   : > { %v4494_v60 = vshrl.u32 %v637_v58, 7 }
  0x67   : > { %v639_v61 = vsub.s32 0, %v4494_v60 }
 0x137   : > { %v536_v2 = vpop.f32.mrb[0].mxu0 }
 0x138   : > { %v537_v4 = vadd.f32 %v3910_v63, %v536_v2  ;;  %v3979_v5 = vpop.f32.mrb[1].mxu0 }
 0x13a   : > { %v540_v6 = vmax.f32 %v537_v4, 0.0 }
 0x13c   : > { %3983 = vmatmul.mubr.msk.f32.vlgmr.msra.gmra.mrb[0].mxu1 %vm7753_vm4, %v540_v6 }
 0x20f   : > { %v623_v47 = vpop.f32.mrb[0].mxu1 }
 0x210   : > { %v624_v48 = vadd.f32 %v3912_v43, %v623_v47  ;;  %v3984_v50 = vpop.f32.mrb[1].mxu1 }
 0x212   : > { %v628_v51 = vrot.slane %v624_v48, 1 }
 0x214   : > { %v630_v52 = vadd.f32 %v628_v51, %v624_v48 }
 0x216   : > { %v3915_v53 = vmul.f32 -1.442695, %v630_v52 }
 0x218   : > { %4005 = vpow2.f32 %v3915_v53 }
 0x222   : > { %v4006_v54 = vpop.eup %4005 }
 0x223   : > { %v634_v56 = vadd.f32 1.0, %v4006_v54 }
 0x225   : > { %4007 = vrcp.f32 %v634_v56 }
 0x22f   : > { %v4008_v63 = vpop.eup %4007 }
 0x230   : > { %v4497_v2 = vrot.slane %v4008_v63, %v639_v61 }
 0x232   : > { %v4501_v4 = vmul.f32 %v4497_v2, %v4239_v11  ;;  %v4505_v5 = vmul.f32 %v4497_v2, %v4233_v9  ;;  %v4513_v8 = vmul.f32 %v4497_v2, %v4242_v12  ;;  %v4517_v13 = vmul.f32 %v4497_v2, %v4236_v10 }
 0x233   : > { %v4525_v24 = vmul.f32 %v4497_v2, %v4256_v19  ;;  %v4529_v12 = vmul.f32 %v4497_v2, %v4251_v16  ;;  %v4537_v29 = vmul.f32 %v4497_v2, %v4266_v25  ;;  %v4541_v19 = vmul.f32 %v4497_v2, %v4261_v22 }
 0x234   : > { %7773 = vst [vmem:[#allocation3_spill] sm:$0xff] %v4501_v4  ;;  %7774 = vst [vmem:[#allocation4_spill] sm:$0xff] %v4505_v5  ;;  %v679_v6 = vsel %vm7747_vm1, %v4501_v4, -inf  ;;  %v673_v7 = vsel %vm7747_vm1, %v4505_v5, -inf  ;;  %v682_v9 = vsel %vm7747_vm1, %v4513_v8, -inf  ;;  %v676_v11 = vsel %vm7747_vm1, %v4517_v13, -inf }
 0x235   : > { %7775 = vst [vmem:[#allocation5_spill] sm:$0xff] %v4513_v8  ;;  %7776 = vst [vmem:[#allocation6_spill] sm:$0xff] %v4517_v13  ;;  %680 = vmax.xlane.f32.xlu1 %v679_v6  ;;  %674 = vmax.xlane.f32.xlu0 %v673_v7  ;;  %v688_v10 = vsel %vm7747_vm1, %v4525_v24, -inf  ;;  %v685_v26 = vsel %vm7747_vm1, %v4529_v12, -inf  ;;  %v694_v16 = vsel %vm7747_vm1, %v4537_v29, -inf  ;;  %v691_v32 = vsel %vm7747_vm1, %v4541_v19, -inf }
 0x236   : > { %7777 = vst [vmem:[#allocation7_spill] sm:$0xff] %v4525_v24  ;;  %7778 = vst [vmem:[#allocation8_spill] sm:$0xff] %v4529_v12  ;;  %v4549_v33 = vmul.f32 %v4497_v2, %v4276_v31  ;;  %v4553_v25 = vmul.f32 %v4497_v2, %v4269_v27  ;;  %v4561_v37 = vmul.f32 %v4497_v2, %v4302_v45 }
 0x237   : > { %7779 = vst [vmem:[#allocation9_spill] sm:$0xff] %v4537_v29  ;;  %7780 = vst [vmem:[#allocation10_spill] sm:$0xff] %v4541_v19  ;;  %v4565_v31 = vmul.f32 %v4497_v2, %v4283_v35  ;;  %v4573_v41 = vmul.f32 %v4497_v2, %v4320_v59  ;;  %v4577_v45 = vmul.f32 %v4497_v2, %v4307_v49 }
 0x238   : > { %7781 = vst [vmem:[#allocation11_spill] sm:$0xff] %v4549_v33  ;;  %7782 = vst [vmem:[#allocation12_spill] sm:$0xff] %v4553_v25  ;;  %v700_v22 = vsel %vm7747_vm1, %v4549_v33, -inf  ;;  %v697_v34 = vsel %vm7747_vm1, %v4553_v25, -inf  ;;  %v706_v27 = vsel %vm7747_vm1, %v4561_v37, -inf  ;;  %v4585_v43 = vmul.f32 %v4497_v2, %v4328_v3 }
 0x239   : > { %683 = vmax.xlane.f32.xlu1 %v682_v9  ;;  %677 = vmax.xlane.f32.xlu0 %v676_v11  ;;  %7783 = vst [vmem:[#allocation13_spill] sm:$0xff] %v4561_v37  ;;  %7784 = vst [vmem:[#allocation14_spill] sm:$0xff] %v4565_v31  ;;  %v703_v40 = vsel %vm7747_vm1, %v4565_v31, -inf  ;;  %v712_v35 = vsel %vm7747_vm1, %v4573_v41, -inf  ;;  %v709_v42 = vsel %vm7747_vm1, %v4577_v45, -inf  ;;  %v4589_v59 = vmul.f32 %v4497_v2, %v4325_v62 }
 0x23a   : > { %7785 = vst [vmem:[#allocation15_spill] sm:$0xff] %v4573_v41  ;;  %7786 = vst [vmem:[#allocation16_spill] sm:$0xff] %v4577_v45  ;;  %v718_v49 = vsel %vm7747_vm1, %v4585_v43, -inf  ;;  %v4597_v48 = vmul.f32 %v4497_v2, %v4346_v18  ;;  %v4601_v3 = vmul.f32 %v4497_v2, %v4341_v14  ;;  %v4609_v51 = vmul.f32 %v4497_v2, %v4354_v28 }
 0x23b   : > { %7787 = vst [vmem:[#allocation17_spill] sm:$0xff] %v4585_v43  ;;  %7788 = vst [vmem:[#allocation18_spill] sm:$0xff] %v4589_v59  ;;  %v715_v47 = vsel %vm7747_vm1, %v4589_v59, -inf  ;;  %v4613_v18 = vmul.f32 %v4497_v2, %v4349_v20  ;;  %v4621_v53 = vmul.f32 %v4497_v2, %v4368_v39  ;;  %v4625_v28 = vmul.f32 %v4497_v2, %v4365_v38 }
 0x23c   : > { %7789 = vst [vmem:[#allocation19_spill] sm:$0xff] %v4597_v48  ;;  %7790 = vst [vmem:[#allocation20_spill] sm:$0xff] %v4601_v3  ;;  %v724_v62 = vsel %vm7747_vm1, %v4597_v48, -inf  ;;  %v721_v50 = vsel %vm7747_vm1, %v4601_v3, -inf  ;;  %v730_v14 = vsel %vm7747_vm1, %v4609_v51, -inf  ;;  %v4633_v56 = vmul.f32 %v4497_v2, %v4376_v46 }
 0x23d   : > { %689 = vmax.xlane.f32.xlu1 %v688_v10  ;;  %686 = vmax.xlane.f32.xlu0 %v685_v26  ;;  %7791 = vst [vmem:[#allocation21_spill] sm:$0xff] %v4609_v51  ;;  %7792 = vst [vmem:[#allocation22_spill] sm:$0xff] %v4613_v18  ;;  %v727_v52 = vsel %vm7747_vm1, %v4613_v18, -inf  ;;  %v736_v20 = vsel %vm7747_vm1, %v4621_v53, -inf  ;;  %v733_v54 = vsel %vm7747_vm1, %v4625_v28, -inf  ;;  %v4637_v39 = vmul.f32 %v4497_v2, %v4373_v44 }
 0x23e   : > { %7793 = vst [vmem:[#allocation23_spill] sm:$0xff] %v4621_v53  ;;  %7794 = vst [vmem:[#allocation24_spill] sm:$0xff] %v4625_v28  ;;  %v742_v38 = vsel %vm7747_vm1, %v4633_v56, -inf  ;;  %v4645_v61 = vmul.f32 %v4497_v2, %v4392_v57  ;;  %v4649_v46 = vmul.f32 %v4497_v2, %v4389_v55  ;;  %v4657_v6 = vmul.f32 %v4497_v2, %v4402_v1 }
 0x23f   : > { %7795 = vst [vmem:[#allocation25_spill] sm:$0xff] %v4633_v56  ;;  %7796 = vst [vmem:[#allocation26_spill] sm:$0xff] %v4637_v39  ;;  %v739_v58 = vsel %vm7747_vm1, %v4637_v39, -inf  ;;  %v4661_v57 = vmul.f32 %v4497_v2, %v4399_v0  ;;  %v4669_v9 = vmul.f32 %v4497_v2, %v4424_v30  ;;  %v4673_v1 = vmul.f32 %v4497_v2, %v4419_v23 }
 0x240   : > { %7797 = vst [vmem:[#allocation27_spill] sm:$0xff] %v4645_v61  ;;  %7798 = vst [vmem:[#allocation28_spill] sm:$0xff] %v4649_v46  ;;  %v748_v44 = vsel %vm7747_vm1, %v4645_v61, -inf  ;;  %v745_v63 = vsel %vm7747_vm1, %v4649_v46, -inf  ;;  %v754_v55 = vsel %vm7747_vm1, %v4657_v6, -inf  ;;  %v4681_v10 = vmul.f32 %v4497_v2, %v4416_v17 }
 0x241   : > { %695 = vmax.xlane.f32.xlu1 %v694_v16  ;;  %692 = vmax.xlane.f32.xlu0 %v691_v32  ;;  %7799 = vst [vmem:[#allocation29_spill] sm:$0xff] %v4657_v6  ;;  %7800 = vst [vmem:[#allocation30_spill] sm:$0xff] %v4661_v57  ;;  %v751_v7 = vsel %vm7747_vm1, %v4661_v57, -inf  ;;  %v760_v0 = vsel %vm7747_vm1, %v4669_v9, -inf  ;;  %v757_v11 = vsel %vm7747_vm1, %v4673_v1, -inf  ;;  %v4685_v30 = vmul.f32 %v4497_v2, %v4413_v15 }
 0x242   : > { %7801 = vst [vmem:[#allocation31_spill] sm:$0xff] %v4669_v9  ;;  %7802 = vst [vmem:[#allocation32_spill] sm:$0xff] %v4673_v1  ;;  %v766_v23 = vsel %vm7747_vm1, %v4681_v10, -inf  ;;  %v772_v16 = vsel %vm7747_vm1, %v4517_v13, 0.0  ;;  %v769_v17 = vsel %vm7747_vm1, %v4505_v5, 0.0  ;;  %v778_v15 = vsel %vm7747_vm1, %v4513_v8, 0.0 }
 0x243   : > { %7803 = vst [vmem:[#allocation33_spill] sm:$0xff] %v4681_v10  ;;  %7804 = vst [vmem:[#allocation34_spill] sm:$0xff] %v4685_v30  ;;  %v763_v26 = vsel %vm7747_vm1, %v4685_v30, -inf  ;;  %v775_v2 = vsel %vm7747_vm1, %v4501_v4, 0.0  ;;  %v784_v32 = vsel %vm7747_vm1, %v4525_v24, 0.0 }
 0x245   : > { %701 = vmax.xlane.f32.xlu1 %v700_v22  ;;  %698 = vmax.xlane.f32.xlu0 %v697_v34  ;;  %v781_v22 = vsel %vm7747_vm1, %v4529_v12, 0.0  ;;  %v790_v34 = vsel %vm7747_vm1, %v4537_v29, 0.0 }
 0x249   : > { %707 = vmax.xlane.f32.xlu1 %v706_v27  ;;  %704 = vmax.xlane.f32.xlu0 %v703_v40  ;;  %v787_v27 = vsel %vm7747_vm1, %v4541_v19, 0.0  ;;  %v796_v40 = vsel %vm7747_vm1, %v4549_v33, 0.0 }
 0x24d   : > { %713 = vmax.xlane.f32.xlu1 %v712_v35  ;;  %710 = vmax.xlane.f32.xlu0 %v709_v42  ;;  %v793_v35 = vsel %vm7747_vm1, %v4553_v25, 0.0  ;;  %v802_v42 = vsel %vm7747_vm1, %v4561_v37, 0.0 }
 0x251   : > { %719 = vmax.xlane.f32.xlu1 %v718_v49  ;;  %716 = vmax.xlane.f32.xlu0 %v715_v47  ;;  %v799_v49 = vsel %vm7747_vm1, %v4565_v31, 0.0  ;;  %v808_v47 = vsel %vm7747_vm1, %v4573_v41, 0.0 }
 0x255   : > { %725 = vmax.xlane.f32.xlu1 %v724_v62  ;;  %722 = vmax.xlane.f32.xlu0 %v721_v50  ;;  %v805_v62 = vsel %vm7747_vm1, %v4577_v45, 0.0  ;;  %v814_v50 = vsel %vm7747_vm1, %v4585_v43, 0.0 }
 0x259   : > { %731 = vmax.xlane.f32.xlu1 %v730_v14  ;;  %728 = vmax.xlane.f32.xlu0 %v727_v52  ;;  %v811_v14 = vsel %vm7747_vm1, %v4589_v59, 0.0  ;;  %v820_v52 = vsel %vm7747_vm1, %v4597_v48, 0.0 }
 0x25d   : > { %737 = vmax.xlane.f32.xlu1 %v736_v20  ;;  %734 = vmax.xlane.f32.xlu0 %v733_v54  ;;  %v817_v20 = vsel %vm7747_vm1, %v4601_v3, 0.0  ;;  %v826_v54 = vsel %vm7747_vm1, %v4609_v51, 0.0 }
 0x261   : > { %743 = vmax.xlane.f32.xlu1 %v742_v38  ;;  %740 = vmax.xlane.f32.xlu0 %v739_v58  ;;  %v823_v38 = vsel %vm7747_vm1, %v4613_v18, 0.0  ;;  %v832_v58 = vsel %vm7747_vm1, %v4621_v53, 0.0 }
 0x265   : > { %749 = vmax.xlane.f32.xlu1 %v748_v44  ;;  %746 = vmax.xlane.f32.xlu0 %v745_v63  ;;  %v829_v44 = vsel %vm7747_vm1, %v4625_v28, 0.0  ;;  %v838_v63 = vsel %vm7747_vm1, %v4633_v56, 0.0 }
 0x269   : > { %755 = vmax.xlane.f32.xlu1 %v754_v55  ;;  %752 = vmax.xlane.f32.xlu0 %v751_v7  ;;  %v835_v55 = vsel %vm7747_vm1, %v4637_v39, 0.0  ;;  %v844_v7 = vsel %vm7747_vm1, %v4645_v61, 0.0 }
 0x26d   : > { %761 = vmax.xlane.f32.xlu1 %v760_v0  ;;  %758 = vmax.xlane.f32.xlu0 %v757_v11  ;;  %v841_v0 = vsel %vm7747_vm1, %v4649_v46, 0.0  ;;  %v850_v11 = vsel %vm7747_vm1, %v4657_v6, 0.0 }
 0x271   : > { %767 = vmax.xlane.f32.xlu1 %v766_v23  ;;  %764 = vmax.xlane.f32.xlu0 %v763_v26  ;;  %v847_v23 = vsel %vm7747_vm1, %v4661_v57, 0.0  ;;  %v856_v26 = vsel %vm7747_vm1, %v4669_v9, 0.0 }
 0x275   : > { %773 = vadd.xlane.f32.xlu1 %v772_v16  ;;  %770 = vadd.xlane.f32.xlu0 %v769_v17  ;;  %v853_v16 = vsel %vm7747_vm1, %v4673_v1, 0.0  ;;  %v862_v17 = vsel %vm7747_vm1, %v4681_v10, 0.0 }
 0x279   : > { %779 = vadd.xlane.f32.xlu1 %v778_v15  ;;  %776 = vadd.xlane.f32.xlu0 %v775_v2  ;;  %v859_v15 = vsel %vm7747_vm1, %v4685_v30, 0.0  ;;  %v4755_v2 = vpop.xlane.xlu0 %1639 }
 0x27a   : > { %7805 = vst [vmem:[#allocation35_spill] sm:$0xff] %v4755_v2 }
 0x27d   : > { %785 = vadd.xlane.f32.xlu1 %v784_v32  ;;  %782 = vadd.xlane.f32.xlu0 %v781_v22  ;;  %v4757_v32 = vpop.xlane.xlu1 %1799  ;;  %v4759_v22 = vpop.xlane.xlu0 %2182 }
 0x27e   : > { %7806 = vst [vmem:[#allocation36_spill] sm:$0xff] %v4757_v32  ;;  %7807 = vst [vmem:[#allocation37_spill] sm:$0xff] %v4759_v22 }
 0x281   : > { %791 = vadd.xlane.f32.xlu1 %v790_v34  ;;  %788 = vadd.xlane.f32.xlu0 %v787_v27  ;;  %v4761_v34 = vpop.xlane.xlu1 %3044  ;;  %v4763_v27 = vpop.xlane.xlu0 %3205 }
 0x282   : > { %7808 = vst [vmem:[#allocation38_spill] sm:$0xff] %v4761_v34  ;;  %7809 = vst [vmem:[#allocation39_spill] sm:$0xff] %v4763_v27 }
 0x285   : > { %797 = vadd.xlane.f32.xlu1 %v796_v40  ;;  %794 = vadd.xlane.f32.xlu0 %v793_v35 }
 0x289   : > { %803 = vadd.xlane.f32.xlu1 %v802_v42  ;;  %800 = vadd.xlane.f32.xlu0 %v799_v49 }
 0x28d   : > { %809 = vadd.xlane.f32.xlu1 %v808_v47  ;;  %806 = vadd.xlane.f32.xlu0 %v805_v62 }
 0x291   : > { %815 = vadd.xlane.f32.xlu1 %v814_v50  ;;  %812 = vadd.xlane.f32.xlu0 %v811_v14 }
 0x295   : > { %821 = vadd.xlane.f32.xlu1 %v820_v52  ;;  %818 = vadd.xlane.f32.xlu0 %v817_v20 }
 0x299   : > { %827 = vadd.xlane.f32.xlu1 %v826_v54  ;;  %824 = vadd.xlane.f32.xlu0 %v823_v38 }
 0x29d   : > { %833 = vadd.xlane.f32.xlu1 %v832_v58  ;;  %830 = vadd.xlane.f32.xlu0 %v829_v44 }
 0x2a1   : > { %839 = vadd.xlane.f32.xlu1 %v838_v63  ;;  %836 = vadd.xlane.f32.xlu0 %v835_v55 }
 0x2a5   : > { %845 = vadd.xlane.f32.xlu1 %v844_v7  ;;  %842 = vadd.xlane.f32.xlu0 %v841_v0 }
 0x2a9   : > { %851 = vadd.xlane.f32.xlu1 %v850_v11  ;;  %848 = vadd.xlane.f32.xlu0 %v847_v23 }
 0x2ad   : > { %857 = vadd.xlane.f32.xlu1 %v856_v26  ;;  %854 = vadd.xlane.f32.xlu0 %v853_v16 }
 0x2b1   : > { %863 = vadd.xlane.f32.xlu1 %v862_v17  ;;  %860 = vadd.xlane.f32.xlu0 %v859_v15 }
 0x2c2   : > { %v681_v40 = vpop.xlane.xlu1 %680  ;;  %v675_v35 = vpop.xlane.xlu0 %674 }
 0x2c6   : > { %v684_v42 = vpop.xlane.xlu1 %683  ;;  %v678_v49 = vpop.xlane.xlu0 %677 }
 0x2ca   : > { %v690_v47 = vpop.xlane.xlu1 %689  ;;  %v687_v62 = vpop.xlane.xlu0 %686 }
 0x2ce   : > { %v4765_v50 = vpop.xlane.xlu1 %695  ;;  %v4767_v14 = vpop.xlane.xlu0 %692 }
 0x2d2   : > { %v4769_v52 = vpop.xlane.xlu1 %701  ;;  %v4771_v20 = vpop.xlane.xlu0 %698 }
 0x2d6   : > { %v4773_v54 = vpop.xlane.xlu1 %707  ;;  %v4775_v38 = vpop.xlane.xlu0 %704 }
 0x2da   : > { %v4777_v58 = vpop.xlane.xlu1 %713  ;;  %v4779_v44 = vpop.xlane.xlu0 %710 }
 0x2de   : > { %v4781_v63 = vpop.xlane.xlu1 %719  ;;  %v4783_v55 = vpop.xlane.xlu0 %716 }
 0x2e2   : > { %v4785_v7 = vpop.xlane.xlu1 %725  ;;  %v4787_v0 = vpop.xlane.xlu0 %722 }
 0x2e6   : > { %v4789_v11 = vpop.xlane.xlu1 %731  ;;  %v4791_v23 = vpop.xlane.xlu0 %728 }
 0x2ea   : > { %v4793_v26 = vpop.xlane.xlu1 %737  ;;  %v4795_v16 = vpop.xlane.xlu0 %734 }
 0x2ee   : > { %v4797_v17 = vpop.xlane.xlu1 %743  ;;  %v4799_v15 = vpop.xlane.xlu0 %740 }
 0x2f2   : > { %v4801_v30 = vpop.xlane.xlu1 %749  ;;  %v4803_v1 = vpop.xlane.xlu0 %746 }
 0x2f6   : > { %v4805_v57 = vpop.xlane.xlu1 %755  ;;  %v4807_v10 = vpop.xlane.xlu0 %752 }
 0x2fa   : > { %v4809_v46 = vpop.xlane.xlu1 %761  ;;  %v4811_v9 = vpop.xlane.xlu0 %758 }
 0x2fe   : > { %v4813_v39 = vpop.xlane.xlu1 %767  ;;  %v4815_v6 = vpop.xlane.xlu0 %764 }
 0x302   : > { %v774_v28 = vpop.xlane.xlu1 %773  ;;  %v771_v61 = vpop.xlane.xlu0 %770 }
 0x303   : > { %v867_v18 = vmul.f32 0.03125, %v774_v28  ;;  %v866_v56 = vmul.f32 0.03125, %v771_v61 }
 0x305   : > { %v4818_v3 = vsel %vm898_vm5, %v678_v49, %v867_v18  ;;  %v4821_v53 = vsel %vm898_vm5, %v675_v35, %v866_v56 }
 0x306   : > { %v780_v59 = vpop.xlane.xlu1 %779  ;;  %v777_v51 = vpop.xlane.xlu0 %776  ;;  %v1769_v45 = vmul.f32 %v4472_v21, %v4818_v3  ;;  %v1768_v48 = vmul.f32 %v4472_v21, %v4821_v53  ;;  %v7672_v5 = vrot.slane %v4821_v53, 7 }
 0x307   : > { %v869_v31 = vmul.f32 0.03125, %v780_v59  ;;  %v868_v43 = vmul.f32 0.03125, %v777_v51 }
 0x308   : > { %v1804_v25 = vsel %vm7753_vm4, %v1769_v45, 0.0  ;;  %v1801_v28 = vsel %vm7753_vm4, %v1768_v48, 0.0 }
 0x309   : > { %v4830_v18 = vsel %vm898_vm5, %v684_v42, %v869_v31  ;;  %v4833_v56 = vsel %vm898_vm5, %v681_v40, %v868_v43  ;;  %1805 = vadd.xlane.f32.xlu1 %v1804_v25  ;;  %1802 = vadd.xlane.f32.xlu0 %v1801_v28 }
 0x30a   : > { %7810 = vst [vmem:[#allocation40_spill] sm:$0xff] %v4830_v18  ;;  %v786_v61 = vpop.xlane.xlu1 %785  ;;  %v783_v35 = vpop.xlane.xlu0 %782  ;;  %v1771_v49 = vmul.f32 %v4472_v21, %v4830_v18  ;;  %v1770_v59 = vmul.f32 %v4472_v21, %v4833_v56 }
 0x30b   : > { %v871_v51 = vmul.f32 0.03125, %v786_v61  ;;  %v870_v45 = vmul.f32 0.03125, %v783_v35 }
 0x30c   : > { %v1810_v48 = vsel %vm7753_vm4, %v1771_v49, 0.0  ;;  %v1807_v31 = vsel %vm7753_vm4, %v1770_v59, 0.0 }
 0x30d   : > { %v4842_v42 = vsel %vm898_vm5, %v690_v47, %v871_v51  ;;  %v4845_v25 = vsel %vm898_vm5, %v687_v62, %v870_v45  ;;  %1811 = vadd.xlane.f32.xlu1 %v1810_v48  ;;  %1808 = vadd.xlane.f32.xlu0 %v1807_v31 }
 0x30e   : > { %7811 = vst [vmem:[#allocation41_spill] sm:$0xff] %v4842_v42  ;;  %v792_v43 = vpop.xlane.xlu1 %791  ;;  %v789_v40 = vpop.xlane.xlu0 %788  ;;  %v1773_v28 = vmul.f32 %v4472_v21, %v4842_v42  ;;  %v1772_v61 = vmul.f32 %v4472_v21, %v4845_v25 }
 0x30f   : > { %v873_v35 = vmul.f32 0.03125, %v792_v43  ;;  %v872_v49 = vmul.f32 0.03125, %v789_v40 }
 0x310   : > { %v1816_v59 = vsel %vm7753_vm4, %v1773_v28, 0.0  ;;  %v1813_v47 = vsel %vm7753_vm4, %v1772_v61, 0.0 }
 0x311   : > { %v4855_v62 = vsel %vm898_vm5, %v4765_v50, %v873_v35  ;;  %v4859_v51 = vsel %vm898_vm5, %v4767_v14, %v872_v49  ;;  %1817 = vadd.xlane.f32.xlu1 %v1816_v59  ;;  %1814 = vadd.xlane.f32.xlu0 %v1813_v47 }
 0x312   : > { %v798_v45 = vpop.xlane.xlu1 %797  ;;  %v795_v48 = vpop.xlane.xlu0 %794  ;;  %v1775_v31 = vmul.f32 %v4472_v21, %v4855_v62  ;;  %v1774_v43 = vmul.f32 %v4472_v21, %v4859_v51 }
 0x313   : > { %v875_v40 = vmul.f32 0.03125, %v798_v45  ;;  %v874_v28 = vmul.f32 0.03125, %v795_v48 }
 0x314   : > { %v1822_v61 = vsel %vm7753_vm4, %v1775_v31, 0.0  ;;  %v1819_v50 = vsel %vm7753_vm4, %v1774_v43, 0.0 }
 0x315   : > { %v4869_v14 = vsel %vm898_vm5, %v4769_v52, %v875_v40  ;;  %v4873_v35 = vsel %vm898_vm5, %v4771_v20, %v874_v28  ;;  %1823 = vadd.xlane.f32.xlu1 %v1822_v61  ;;  %1820 = vadd.xlane.f32.xlu0 %v1819_v50 }
 0x316   : > { %v804_v49 = vpop.xlane.xlu1 %803  ;;  %v801_v59 = vpop.xlane.xlu0 %800  ;;  %v1777_v47 = vmul.f32 %v4472_v21, %v4869_v14  ;;  %v1776_v45 = vmul.f32 %v4472_v21, %v4873_v35 }
 0x317   : > { %v877_v48 = vmul.f32 0.03125, %v804_v49  ;;  %v876_v31 = vmul.f32 0.03125, %v801_v59 }
 0x318   : > { %v1828_v43 = vsel %vm7753_vm4, %v1777_v47, 0.0  ;;  %v1825_v52 = vsel %vm7753_vm4, %v1776_v45, 0.0 }
 0x319   : > { %v4883_v20 = vsel %vm898_vm5, %v4773_v54, %v877_v48  ;;  %v4887_v40 = vsel %vm898_vm5, %v4775_v38, %v876_v31  ;;  %1829 = vadd.xlane.f32.xlu1 %v1828_v43  ;;  %1826 = vadd.xlane.f32.xlu0 %v1825_v52 }
 0x31a   : > { %v810_v28 = vpop.xlane.xlu1 %809  ;;  %v807_v61 = vpop.xlane.xlu0 %806  ;;  %v1779_v50 = vmul.f32 %v4472_v21, %v4883_v20  ;;  %v1778_v49 = vmul.f32 %v4472_v21, %v4887_v40 }
 0x31b   : > { %v879_v59 = vmul.f32 0.03125, %v810_v28  ;;  %v878_v47 = vmul.f32 0.03125, %v807_v61 }
 0x31c   : > { %v1834_v45 = vsel %vm7753_vm4, %v1779_v50, 0.0  ;;  %v1831_v54 = vsel %vm7753_vm4, %v1778_v49, 0.0 }
 0x31d   : > { %v4897_v38 = vsel %vm898_vm5, %v4777_v58, %v879_v59  ;;  %v4901_v48 = vsel %vm898_vm5, %v4779_v44, %v878_v47  ;;  %1835 = vadd.xlane.f32.xlu1 %v1834_v45  ;;  %1832 = vadd.xlane.f32.xlu0 %v1831_v54 }
 0x31e   : > { %v816_v31 = vpop.xlane.xlu1 %815  ;;  %v813_v43 = vpop.xlane.xlu0 %812  ;;  %v1781_v52 = vmul.f32 %v4472_v21, %v4897_v38  ;;  %v1780_v28 = vmul.f32 %v4472_v21, %v4901_v48 }
 0x31f   : > { %v881_v61 = vmul.f32 0.03125, %v816_v31  ;;  %v880_v50 = vmul.f32 0.03125, %v813_v43 }
 0x320   : > { %v1840_v49 = vsel %vm7753_vm4, %v1781_v52, 0.0  ;;  %v1837_v58 = vsel %vm7753_vm4, %v1780_v28, 0.0 }
 0x321   : > { %v4911_v44 = vsel %vm898_vm5, %v4781_v63, %v881_v61  ;;  %v4915_v59 = vsel %vm898_vm5, %v4783_v55, %v880_v50  ;;  %1841 = vadd.xlane.f32.xlu1 %v1840_v49  ;;  %1838 = vadd.xlane.f32.xlu0 %v1837_v58 }
 0x322   : > { %7812 = vst [vmem:[#allocation42_spill] sm:$0xff] %v4911_v44  ;;  %v822_v47 = vpop.xlane.xlu1 %821  ;;  %v819_v45 = vpop.xlane.xlu0 %818  ;;  %v1783_v54 = vmul.f32 %v4472_v21, %v4911_v44  ;;  %v1782_v31 = vmul.f32 %v4472_v21, %v4915_v59 }
 0x323   : > { %v883_v43 = vmul.f32 0.03125, %v822_v47  ;;  %v882_v52 = vmul.f32 0.03125, %v819_v45 }
 0x324   : > { %v1846_v28 = vsel %vm7753_vm4, %v1783_v54, 0.0  ;;  %v1843_v63 = vsel %vm7753_vm4, %v1782_v31, 0.0 }
 0x325   : > { %v4925_v55 = vsel %vm898_vm5, %v4785_v7, %v883_v43  ;;  %v4929_v61 = vsel %vm898_vm5, %v4787_v0, %v882_v52  ;;  %1847 = vadd.xlane.f32.xlu1 %v1846_v28  ;;  %1844 = vadd.xlane.f32.xlu0 %v1843_v63 }
 0x326   : > { %7813 = vst [vmem:[#allocation43_spill] sm:$0xff] %v4929_v61  ;;  %v828_v50 = vpop.xlane.xlu1 %827  ;;  %v825_v49 = vpop.xlane.xlu0 %824  ;;  %v1785_v58 = vmul.f32 %v4472_v21, %v4925_v55  ;;  %v1784_v47 = vmul.f32 %v4472_v21, %v4929_v61 }
 0x327   : > { %v885_v45 = vmul.f32 0.03125, %v828_v50  ;;  %v884_v54 = vmul.f32 0.03125, %v825_v49 }
 0x328   : > { %v1852_v31 = vsel %vm7753_vm4, %v1785_v58, 0.0  ;;  %v1849_v7 = vsel %vm7753_vm4, %v1784_v47, 0.0 }
 0x329   : > { %v4939_v0 = vsel %vm898_vm5, %v4789_v11, %v885_v45  ;;  %v4943_v43 = vsel %vm898_vm5, %v4791_v23, %v884_v54  ;;  %1853 = vadd.xlane.f32.xlu1 %v1852_v31  ;;  %1850 = vadd.xlane.f32.xlu0 %v1849_v7 }
 0x32a   : > { %7814 = vst [vmem:[#allocation44_spill] sm:$0xff] %v4939_v0  ;;  %v834_v52 = vpop.xlane.xlu1 %833  ;;  %v831_v28 = vpop.xlane.xlu0 %830  ;;  %v1787_v63 = vmul.f32 %v4472_v21, %v4939_v0  ;;  %v1786_v50 = vmul.f32 %v4472_v21, %v4943_v43 }
 0x32b   : > { %v887_v49 = vmul.f32 0.03125, %v834_v52  ;;  %v886_v58 = vmul.f32 0.03125, %v831_v28 }
 0x32c   : > { %v1858_v47 = vsel %vm7753_vm4, %v1787_v63, 0.0  ;;  %v1855_v11 = vsel %vm7753_vm4, %v1786_v50, 0.0 }
 0x32d   : > { %v4953_v23 = vsel %vm898_vm5, %v4793_v26, %v887_v49  ;;  %v4957_v45 = vsel %vm898_vm5, %v4795_v16, %v886_v58  ;;  %1859 = vadd.xlane.f32.xlu1 %v1858_v47  ;;  %1856 = vadd.xlane.f32.xlu0 %v1855_v11 }
 0x32e   : > { %7815 = vst [vmem:[#allocation45_spill] sm:$0xff] %v4957_v45  ;;  %v840_v54 = vpop.xlane.xlu1 %839  ;;  %v837_v31 = vpop.xlane.xlu0 %836  ;;  %v1789_v7 = vmul.f32 %v4472_v21, %v4953_v23  ;;  %v1788_v52 = vmul.f32 %v4472_v21, %v4957_v45 }
 0x32f   : > { %v889_v28 = vmul.f32 0.03125, %v840_v54  ;;  %v888_v63 = vmul.f32 0.03125, %v837_v31 }
 0x330   : > { %v1864_v50 = vsel %vm7753_vm4, %v1789_v7, 0.0  ;;  %v1861_v26 = vsel %vm7753_vm4, %v1788_v52, 0.0 }
 0x331   : > { %v4967_v16 = vsel %vm898_vm5, %v4797_v17, %v889_v28  ;;  %v4971_v49 = vsel %vm898_vm5, %v4799_v15, %v888_v63  ;;  %1865 = vadd.xlane.f32.xlu1 %v1864_v50  ;;  %1862 = vadd.xlane.f32.xlu0 %v1861_v26 }
 0x332   : > { %7816 = vst [vmem:[#allocation46_spill] sm:$0xff] %v4967_v16  ;;  %v846_v58 = vpop.xlane.xlu1 %845  ;;  %v843_v47 = vpop.xlane.xlu0 %842  ;;  %v1791_v11 = vmul.f32 %v4472_v21, %v4967_v16  ;;  %v1790_v54 = vmul.f32 %v4472_v21, %v4971_v49 }
 0x333   : > { %v891_v31 = vmul.f32 0.03125, %v846_v58  ;;  %v890_v7 = vmul.f32 0.03125, %v843_v47 }
 0x334   : > { %v1870_v52 = vsel %vm7753_vm4, %v1791_v11, 0.0  ;;  %v1867_v17 = vsel %vm7753_vm4, %v1790_v54, 0.0 }
 0x335   : > { %v4981_v15 = vsel %vm898_vm5, %v4801_v30, %v891_v31  ;;  %v4985_v28 = vsel %vm898_vm5, %v4803_v1, %v890_v7  ;;  %1871 = vadd.xlane.f32.xlu1 %v1870_v52  ;;  %1868 = vadd.xlane.f32.xlu0 %v1867_v17 }
 0x336   : > { %7817 = vst [vmem:[#allocation47_spill] sm:$0xff] %v4985_v28  ;;  %v852_v63 = vpop.xlane.xlu1 %851  ;;  %v849_v50 = vpop.xlane.xlu0 %848  ;;  %v1793_v26 = vmul.f32 %v4472_v21, %v4981_v15  ;;  %v1792_v58 = vmul.f32 %v4472_v21, %v4985_v28 }
 0x337   : > { %v893_v47 = vmul.f32 0.03125, %v852_v63  ;;  %v892_v11 = vmul.f32 0.03125, %v849_v50 }
 0x338   : > { %v1876_v54 = vsel %vm7753_vm4, %v1793_v26, 0.0  ;;  %v1873_v30 = vsel %vm7753_vm4, %v1792_v58, 0.0 }
 0x339   : > { %v4995_v1 = vsel %vm898_vm5, %v4805_v57, %v893_v47  ;;  %v4999_v31 = vsel %vm898_vm5, %v4807_v10, %v892_v11  ;;  %1877 = vadd.xlane.f32.xlu1 %v1876_v54  ;;  %1874 = vadd.xlane.f32.xlu0 %v1873_v30  ;;  %v5018_v11 = vld [vmem:[%s7635_s5 + $0x4] ss:$0 sm:$0xff] }
 0x33a   : > { %7818 = vst [vmem:[#allocation48_spill] sm:$0xff] %v4995_v1  ;;  %v858_v7 = vpop.xlane.xlu1 %857  ;;  %v855_v52 = vpop.xlane.xlu0 %854  ;;  %v1795_v17 = vmul.f32 %v4472_v21, %v4995_v1  ;;  %v1794_v63 = vmul.f32 %v4472_v21, %v4999_v31 }
 0x33b   : > { %v895_v50 = vmul.f32 0.03125, %v858_v7  ;;  %v894_v26 = vmul.f32 0.03125, %v855_v52  ;;  %v2518_v52 = vmul.f32 %v5018_v11, %v4821_v53 }
 0x33c   : > { %v1882_v58 = vsel %vm7753_vm4, %v1795_v17, 0.0  ;;  %v1879_v57 = vsel %vm7753_vm4, %v1794_v63, 0.0 }
 0x33d   : > { %v5009_v10 = vsel %vm898_vm5, %v4809_v46, %v895_v50  ;;  %v5013_v47 = vsel %vm898_vm5, %v4811_v9, %v894_v26  ;;  %1883 = vadd.xlane.f32.xlu1 %v1882_v58  ;;  %1880 = vadd.xlane.f32.xlu0 %v1879_v57  ;;  %v2519_v9 = vmul.f32 %v5018_v11, %v4818_v3  ;;  %v2550_v63 = vsel %vm7753_vm4, %v2518_v52, 0.0 }
 0x33e   : > { %7819 = vst [vmem:[#allocation49_spill] sm:$0xff] %v5013_v47  ;;  %v1797_v54 = vmul.f32 %v4472_v21, %v5009_v10  ;;  %v1796_v30 = vmul.f32 %v4472_v21, %v5013_v47  ;;  %v2521_v50 = vmul.f32 %v5018_v11, %v4830_v18  ;;  %v2520_v21 = vmul.f32 %v5018_v11, %v4833_v56 }
 0x33f   : > { %v2553_v17 = vsel %vm7753_vm4, %v2519_v9, 0.0  ;;  %v2523_v57 = vmul.f32 %v5018_v11, %v4842_v42  ;;  %v2524_v9 = vmul.f32 %v5018_v11, %v4859_v51 }
 0x340   : > { %v1888_v46 = vsel %vm7753_vm4, %v1797_v54, 0.0  ;;  %v1885_v7 = vsel %vm7753_vm4, %v1796_v30, 0.0  ;;  %v2559_v26 = vsel %vm7753_vm4, %v2521_v50, 0.0  ;;  %v2556_v58 = vsel %vm7753_vm4, %v2520_v21, 0.0 }
 0x341   : > { %1889 = vadd.xlane.f32.xlu1 %v1888_v46  ;;  %1886 = vadd.xlane.f32.xlu0 %v1885_v7  ;;  %v2522_v54 = vmul.f32 %v5018_v11, %v4845_v25  ;;  %v2565_v30 = vsel %vm7753_vm4, %v2523_v57, 0.0  ;;  %v2525_v7 = vmul.f32 %v5018_v11, %v4855_v62  ;;  %v2526_v50 = vmul.f32 %v5018_v11, %v4873_v35 }
 0x342   : > { %v2528_v57 = vmul.f32 %v5018_v11, %v4887_v40 }
 0x343   : > { %v2562_v46 = vsel %vm7753_vm4, %v2522_v54, 0.0  ;;  %v2571_v52 = vsel %vm7753_vm4, %v2525_v7, 0.0  ;;  %v2530_v7 = vmul.f32 %v5018_v11, %v4901_v48 }
 0x345   : > { %2554 = vadd.xlane.f32.xlu1 %v2553_v17  ;;  %2551 = vadd.xlane.f32.xlu0 %v2550_v63  ;;  %v2568_v17 = vsel %vm7753_vm4, %v2524_v9, 0.0  ;;  %v2527_v63 = vmul.f32 %v5018_v11, %v4869_v14 }
 0x347   : > { %v2577_v21 = vsel %vm7753_vm4, %v2527_v63, 0.0  ;;  %v2532_v63 = vmul.f32 %v5018_v11, %v4915_v59 }
 0x349   : > { %2560 = vadd.xlane.f32.xlu1 %v2559_v26  ;;  %2557 = vadd.xlane.f32.xlu0 %v2556_v58  ;;  %v2574_v26 = vsel %vm7753_vm4, %v2526_v50, 0.0  ;;  %v2529_v58 = vmul.f32 %v5018_v11, %v4883_v20 }
 0x34b   : > { %v2583_v54 = vsel %vm7753_vm4, %v2529_v58, 0.0  ;;  %v2534_v58 = vmul.f32 %v5018_v11, %v4929_v61 }
 0x34d   : > { %2566 = vadd.xlane.f32.xlu1 %v2565_v30  ;;  %2563 = vadd.xlane.f32.xlu0 %v2562_v46  ;;  %v2580_v30 = vsel %vm7753_vm4, %v2528_v57, 0.0  ;;  %v2531_v46 = vmul.f32 %v5018_v11, %v4897_v38 }
 0x34f   : > { %v2589_v9 = vsel %vm7753_vm4, %v2531_v46, 0.0  ;;  %v2536_v46 = vmul.f32 %v5018_v11, %v4943_v43 }
 0x351   : > { %2572 = vadd.xlane.f32.xlu1 %v2571_v52  ;;  %2569 = vadd.xlane.f32.xlu0 %v2568_v17  ;;  %v2586_v52 = vsel %vm7753_vm4, %v2530_v7, 0.0  ;;  %v2533_v17 = vmul.f32 %v5018_v11, %v4911_v44 }
 0x353   : > { %v2595_v50 = vsel %vm7753_vm4, %v2533_v17, 0.0  ;;  %v2538_v17 = vmul.f32 %v5018_v11, %v4957_v45 }
 0x355   : > { %2578 = vadd.xlane.f32.xlu1 %v2577_v21  ;;  %2575 = vadd.xlane.f32.xlu0 %v2574_v26  ;;  %v2592_v21 = vsel %vm7753_vm4, %v2532_v63, 0.0  ;;  %v2535_v26 = vmul.f32 %v5018_v11, %v4925_v55 }
 0x357   : > { %v2601_v57 = vsel %vm7753_vm4, %v2535_v26, 0.0  ;;  %v2540_v26 = vmul.f32 %v5018_v11, %v4971_v49 }
 0x359   : > { %2584 = vadd.xlane.f32.xlu1 %v2583_v54  ;;  %2581 = vadd.xlane.f32.xlu0 %v2580_v30  ;;  %v2598_v54 = vsel %vm7753_vm4, %v2534_v58, 0.0  ;;  %v2537_v30 = vmul.f32 %v5018_v11, %v4939_v0 }
 0x35b   : > { %v2607_v7 = vsel %vm7753_vm4, %v2537_v30, 0.0  ;;  %v2542_v30 = vmul.f32 %v5018_v11, %v4985_v28 }
 0x35d   : > { %2590 = vadd.xlane.f32.xlu1 %v2589_v9  ;;  %2587 = vadd.xlane.f32.xlu0 %v2586_v52  ;;  %v2604_v9 = vsel %vm7753_vm4, %v2536_v46, 0.0  ;;  %v2539_v52 = vmul.f32 %v5018_v11, %v4953_v23  ;;  %v864_v46 = vpop.xlane.xlu1 %863 }
 0x35f   : > { %v2613_v63 = vsel %vm7753_vm4, %v2539_v52, 0.0  ;;  %v2622_v52 = vsel %vm7753_vm4, %v2542_v30, 0.0 }
 0x361   : > { %2596 = vadd.xlane.f32.xlu1 %v2595_v50  ;;  %2593 = vadd.xlane.f32.xlu0 %v2592_v21  ;;  %v2610_v50 = vsel %vm7753_vm4, %v2538_v17, 0.0  ;;  %v2541_v21 = vmul.f32 %v5018_v11, %v4967_v16  ;;  %v2545_v17 = vmul.f32 %v5018_v11, %v4995_v1 }
 0x363   : > { %v2619_v58 = vsel %vm7753_vm4, %v2541_v21, 0.0 }
 0x365   : > { %2602 = vadd.xlane.f32.xlu1 %v2601_v57  ;;  %2599 = vadd.xlane.f32.xlu0 %v2598_v54  ;;  %v2616_v57 = vsel %vm7753_vm4, %v2540_v26, 0.0  ;;  %v2543_v54 = vmul.f32 %v5018_v11, %v4981_v15  ;;  %v2631_v26 = vsel %vm7753_vm4, %v2545_v17, 0.0 }
 0x369   : > { %2608 = vadd.xlane.f32.xlu1 %v2607_v7  ;;  %2605 = vadd.xlane.f32.xlu0 %v2604_v9  ;;  %v861_v7 = vpop.xlane.xlu0 %860  ;;  %v2625_v9 = vsel %vm7753_vm4, %v2543_v54, 0.0  ;;  %v2546_v54 = vmul.f32 %v5018_v11, %v5013_v47 }
 0x36a   : > { %v896_v21 = vmul.f32 0.03125, %v861_v7 }
 0x36d   : > { %2614 = vadd.xlane.f32.xlu1 %v2613_v63  ;;  %2611 = vadd.xlane.f32.xlu0 %v2610_v50  ;;  %v2544_v63 = vmul.f32 %v5018_v11, %v4999_v31  ;;  %v897_v50 = vmul.f32 0.03125, %v864_v46  ;;  %v5120_v46 = vsel %vm898_vm5, %v4815_v6, %v896_v21  ;;  %v3084_v6 = vmul.f32 %v4486_v36, %v4830_v18 }
 0x36e   : > { %v2548_v17 = vmul.f32 %v5018_v11, %v5120_v46 }
 0x36f   : > { %v5116_v30 = vsel %vm898_vm5, %v4813_v39, %v897_v50  ;;  %v3083_v50 = vmul.f32 %v4486_v36, %v4833_v56  ;;  %v3117_v21 = vsel %vm7753_vm4, %v3084_v6, 0.0 }
 0x370   : > { %7820 = vst [vmem:[#allocation50_spill] sm:$0xff] %v5116_v30 }
 0x371   : > { %2620 = vadd.xlane.f32.xlu1 %v2619_v58  ;;  %2617 = vadd.xlane.f32.xlu0 %v2616_v57  ;;  %v2628_v58 = vsel %vm7753_vm4, %v2544_v63, 0.0  ;;  %v2547_v57 = vmul.f32 %v5018_v11, %v5009_v10  ;;  %v2640_v63 = vsel %vm7753_vm4, %v2548_v17, 0.0 }
 0x373   : > { %v2637_v7 = vsel %vm7753_vm4, %v2547_v57, 0.0 }
 0x375   : > { %2626 = vadd.xlane.f32.xlu1 %v2625_v9  ;;  %2623 = vadd.xlane.f32.xlu0 %v2622_v52  ;;  %v2634_v9 = vsel %vm7753_vm4, %v2546_v54, 0.0  ;;  %v2549_v52 = vmul.f32 %v5018_v11, %v5116_v30  ;;  %v3086_v11 = vmul.f32 %v4486_v36, %v4842_v42 }
 0x377   : > { %v2643_v39 = vsel %vm7753_vm4, %v2549_v52, 0.0  ;;  %v3123_v57 = vsel %vm7753_vm4, %v3086_v11, 0.0 }
 0x379   : > { %2632 = vadd.xlane.f32.xlu1 %v2631_v26  ;;  %2629 = vadd.xlane.f32.xlu0 %v2628_v58  ;;  %v3114_v26 = vsel %vm7753_vm4, %v3083_v50, 0.0  ;;  %v3085_v58 = vmul.f32 %v4486_v36, %v4845_v25 }
 0x37b   : > { %v3120_v54 = vsel %vm7753_vm4, %v3085_v58, 0.0 }
 0x37d   : > { %2638 = vadd.xlane.f32.xlu1 %v2637_v7  ;;  %2635 = vadd.xlane.f32.xlu0 %v2634_v9  ;;  %v5145_v7 = vld [vmem:[%s7635_s5 + $0x7] ss:$0 sm:$0xff] }
 0x37e   : > { %v3088_v9 = vmul.f32 %v5145_v7, %v4855_v62  ;;  %v3087_v52 = vmul.f32 %v5145_v7, %v4859_v51  ;;  %v3112_v34 = vmul.f32 %v5145_v7, %v5116_v30 }
 0x380   : > { %v3129_v36 = vsel %vm7753_vm4, %v3088_v9, 0.0  ;;  %v3126_v17 = vsel %vm7753_vm4, %v3087_v52, 0.0 }
 0x381   : > { %2644 = vadd.xlane.f32.xlu1 %v2643_v39  ;;  %2641 = vadd.xlane.f32.xlu0 %v2640_v63  ;;  %v3090_v39 = vmul.f32 %v5145_v7, %v4869_v14  ;;  %v3089_v63 = vmul.f32 %v5145_v7, %v4873_v35 }
 0x383   : > { %v3135_v6 = vsel %vm7753_vm4, %v3090_v39, 0.0  ;;  %v3132_v50 = vsel %vm7753_vm4, %v3089_v63, 0.0  ;;  %v3096_v39 = vmul.f32 %v5145_v7, %v4911_v44  ;;  %v3095_v63 = vmul.f32 %v5145_v7, %v4915_v59 }
 0x385   : > { %3118 = vadd.xlane.f32.xlu1 %v3117_v21  ;;  %3115 = vadd.xlane.f32.xlu0 %v3114_v26  ;;  %v3092_v21 = vmul.f32 %v5145_v7, %v4883_v20  ;;  %v3091_v26 = vmul.f32 %v5145_v7, %v4887_v40 }
 0x387   : > { %v3141_v11 = vsel %vm7753_vm4, %v3092_v21, 0.0  ;;  %v3138_v58 = vsel %vm7753_vm4, %v3091_v26, 0.0  ;;  %v3153_v21 = vsel %vm7753_vm4, %v3096_v39, 0.0  ;;  %v3150_v26 = vsel %vm7753_vm4, %v3095_v63, 0.0 }
 0x388   : > { %v3100_v39 = vmul.f32 %v5145_v7, %v4939_v0  ;;  %v3099_v63 = vmul.f32 %v5145_v7, %v4943_v43 }
 0x389   : > { %3124 = vadd.xlane.f32.xlu1 %v3123_v57  ;;  %3121 = vadd.xlane.f32.xlu0 %v3120_v54  ;;  %v3094_v57 = vmul.f32 %v5145_v7, %v4897_v38  ;;  %v3093_v54 = vmul.f32 %v5145_v7, %v4901_v48 }
 0x38a   : > { %v3162_v19 = vsel %vm7753_vm4, %v3099_v63, 0.0  ;;  %v3103_v63 = vmul.f32 %v5145_v7, %v4971_v49 }
 0x38c   : > { %v3174_v4 = vsel %vm7753_vm4, %v3103_v63, 0.0  ;;  %v3107_v63 = vmul.f32 %v5145_v7, %v4999_v31 }
 0x38d   : > { %3130 = vadd.xlane.f32.xlu1 %v3129_v36  ;;  %3127 = vadd.xlane.f32.xlu0 %v3126_v17  ;;  %v3147_v36 = vsel %vm7753_vm4, %v3094_v57, 0.0  ;;  %v3144_v17 = vsel %vm7753_vm4, %v3093_v54, 0.0 }
 0x38e   : > { %v3186_v13 = vsel %vm7753_vm4, %v3107_v63, 0.0 }
 0x391   : > { %3136 = vadd.xlane.f32.xlu1 %v3135_v6  ;;  %3133 = vadd.xlane.f32.xlu0 %v3132_v50 }
 0x395   : > { %3142 = vadd.xlane.f32.xlu1 %v3141_v11  ;;  %3139 = vadd.xlane.f32.xlu0 %v3138_v58  ;;  %v3098_v11 = vmul.f32 %v5145_v7, %v4925_v55  ;;  %v3097_v58 = vmul.f32 %v5145_v7, %v4929_v61 }
 0x396   : > { %v5169_v9 = vpop.xlane.xlu1 %1805  ;;  %v5171_v52 = vpop.xlane.xlu0 %1802 }
 0x397   : > { %7821 = vst [vmem:[#allocation51_spill] sm:$0xff] %v5169_v9  ;;  %7822 = vst [vmem:[#allocation52_spill] sm:$0xff] %v5171_v52 }
 0x399   : > { %3148 = vadd.xlane.f32.xlu1 %v3147_v36  ;;  %3145 = vadd.xlane.f32.xlu0 %v3144_v17  ;;  %v3159_v36 = vsel %vm7753_vm4, %v3098_v11, 0.0  ;;  %v3156_v17 = vsel %vm7753_vm4, %v3097_v58, 0.0  ;;  %v3102_v11 = vmul.f32 %v5145_v7, %v4953_v23  ;;  %v3101_v58 = vmul.f32 %v5145_v7, %v4957_v45 }
 0x39a   : > { %v5179_v6 = vpop.xlane.xlu1 %1811  ;;  %v5181_v50 = vpop.xlane.xlu0 %1808 }
 0x39b   : > { %7823 = vst [vmem:[#allocation53_spill] sm:$0xff] %v5179_v6  ;;  %7824 = vst [vmem:[#allocation54_spill] sm:$0xff] %v5181_v50  ;;  %v3168_v12 = vsel %vm7753_vm4, %v3101_v58, 0.0  ;;  %v3105_v58 = vmul.f32 %v5145_v7, %v4985_v28 }
 0x39d   : > { %3154 = vadd.xlane.f32.xlu1 %v3153_v21  ;;  %3151 = vadd.xlane.f32.xlu0 %v3150_v26  ;;  %v3165_v26 = vsel %vm7753_vm4, %v3100_v39, 0.0  ;;  %v3104_v39 = vmul.f32 %v5145_v7, %v4967_v16  ;;  %v3180_v24 = vsel %vm7753_vm4, %v3105_v58, 0.0  ;;  %v3109_v58 = vmul.f32 %v5145_v7, %v5013_v47 }
 0x39e   : > { %v5189_v57 = vpop.xlane.xlu1 %1817  ;;  %v5191_v54 = vpop.xlane.xlu0 %1814 }
 0x39f   : > { %7825 = vst [vmem:[#allocation55_spill] sm:$0xff] %v5189_v57  ;;  %7826 = vst [vmem:[#allocation56_spill] sm:$0xff] %v5191_v54  ;;  %v3192_v63 = vsel %vm7753_vm4, %v3109_v58, 0.0  ;;  %v7673_v58 = vrot.slane %v4830_v18, 7 }
 0x3a1   : > { %3160 = vadd.xlane.f32.xlu1 %v3159_v36  ;;  %3157 = vadd.xlane.f32.xlu0 %v3156_v17  ;;  %v3171_v17 = vsel %vm7753_vm4, %v3102_v11, 0.0  ;;  %v3106_v11 = vmul.f32 %v5145_v7, %v4981_v15 }
 0x3a2   : > { %v5199_v41 = vpop.xlane.xlu1 %1823  ;;  %v5201_v21 = vpop.xlane.xlu0 %1820 }
 0x3a3   : > { %7827 = vst [vmem:[#allocation57_spill] sm:$0xff] %v5199_v41  ;;  %7828 = vst [vmem:[#allocation58_spill] sm:$0xff] %v5201_v21 }
 0x3a5   : > { %3166 = vadd.xlane.f32.xlu1 %v3165_v26  ;;  %3163 = vadd.xlane.f32.xlu0 %v3162_v19  ;;  %v3177_v19 = vsel %vm7753_vm4, %v3104_v39, 0.0  ;;  %v3108_v39 = vmul.f32 %v5145_v7, %v4995_v1 }
 0x3a6   : > { %v5209_v37 = vpop.xlane.xlu1 %1829  ;;  %v5211_v36 = vpop.xlane.xlu0 %1826 }
 0x3a7   : > { %7829 = vst [vmem:[#allocation59_spill] sm:$0xff] %v5209_v37  ;;  %7830 = vst [vmem:[#allocation60_spill] sm:$0xff] %v5211_v36 }
 0x3a9   : > { %3172 = vadd.xlane.f32.xlu1 %v3171_v17  ;;  %3169 = vadd.xlane.f32.xlu0 %v3168_v12  ;;  %v3183_v12 = vsel %vm7753_vm4, %v3106_v11, 0.0  ;;  %v3110_v11 = vmul.f32 %v5145_v7, %v5009_v10 }
 0x3aa   : > { %v5219_v33 = vpop.xlane.xlu1 %1835  ;;  %v5221_v26 = vpop.xlane.xlu0 %1832 }
 0x3ab   : > { %7831 = vst [vmem:[#allocation61_spill] sm:$0xff] %v5219_v33  ;;  %7832 = vst [vmem:[#allocation62_spill] sm:$0xff] %v5221_v26 }
 0x3ad   : > { %3178 = vadd.xlane.f32.xlu1 %v3177_v19  ;;  %3175 = vadd.xlane.f32.xlu0 %v3174_v4  ;;  %v3189_v4 = vsel %vm7753_vm4, %v3108_v39, 0.0  ;;  %v3195_v39 = vsel %vm7753_vm4, %v3110_v11, 0.0  ;;  %v7674_v11 = vrot.slane %v4833_v56, 7 }
 0x3ae   : > { %v5229_v29 = vpop.xlane.xlu1 %1841  ;;  %v5231_v17 = vpop.xlane.xlu0 %1838 }
 0x3af   : > { %7833 = vst [vmem:[#allocation63_spill] sm:$0xff] %v5229_v29  ;;  %7834 = vst [vmem:[#allocation64_spill] sm:$0xff] %v5231_v17 }
 0x3b1   : > { %3184 = vadd.xlane.f32.xlu1 %v3183_v12  ;;  %3181 = vadd.xlane.f32.xlu0 %v3180_v24  ;;  %v7671_v24 = vrot.slane %v4818_v3, 7 }
 0x3b2   : > { %v5239_v8 = vpop.xlane.xlu1 %1847  ;;  %v5241_v19 = vpop.xlane.xlu0 %1844 }
 0x3b3   : > { %7835 = vst [vmem:[#allocation65_spill] sm:$0xff] %v5239_v8  ;;  %7836 = vst [vmem:[#allocation66_spill] sm:$0xff] %v5241_v19  ;;  %v3111_v8 = vmul.f32 %v5145_v7, %v5120_v46 }
 0x3b5   : > { %3190 = vadd.xlane.f32.xlu1 %v3189_v4  ;;  %3187 = vadd.xlane.f32.xlu0 %v3186_v13  ;;  %v1388_v13 = vsel %vm7761_vm2, %v7672_v5, %v7671_v24  ;;  %v5269_v4 = vld [vmem:[%s7635_s5 + $0x3] ss:$0 sm:$0xff]  ;;  %v5283_v24 = vld [vmem:[%s7635_s5] ss:$0 sm:$0xff] }
 0x3b6   : > { %v5251_v12 = vpop.xlane.xlu1 %1853  ;;  %v5253_v27 = vpop.xlane.xlu0 %1850  ;;  %v1609_v5 = vmul.f32 %v5283_v24, %v1388_v13 }
 0x3b7   : > { %7837 = vst [vmem:[#allocation67_spill] sm:$0xff] %v5251_v12  ;;  %7838 = vst [vmem:[#allocation68_spill] sm:$0xff] %v5253_v27  ;;  %v2354_v27 = vmul.f32 %v5269_v4, %v1388_v13 }
 0x3b8   : > { %v1644_v13 = vsel %vm7753_vm4, %v1609_v5, 0.0 }
 0x3b9   : > { %3196 = vadd.xlane.f32.xlu1 %v3195_v39  ;;  %3193 = vadd.xlane.f32.xlu0 %v3192_v63  ;;  %v3201_v39 = vsel %vm7753_vm4, %v3112_v34, 0.0  ;;  %v3198_v63 = vsel %vm7753_vm4, %v3111_v8, 0.0  ;;  %v7676_v8 = vrot.slane %v4845_v25, 7  ;;  %v7675_v34 = vrot.slane %v4842_v42, 7 }
 0x3ba   : > { %v5273_v12 = vpop.xlane.xlu1 %1859  ;;  %v5275_v7 = vpop.xlane.xlu0 %1856  ;;  %v2388_v33 = vsel %vm7753_vm4, %v2354_v27, 0.0  ;;  %v7677_v27 = vrot.slane %v4855_v62, 7 }
 0x3bb   : > { %7839 = vst [vmem:[#allocation69_spill] sm:$0xff] %v5273_v12  ;;  %7840 = vst [vmem:[#allocation70_spill] sm:$0xff] %v5275_v7  ;;  %v5291_v7 = vsel %vm7761_vm2, %v7674_v11, %v7673_v58  ;;  %v5310_v58 = vsel %vm7761_vm2, %v7676_v8, %v7675_v34  ;;  %v7678_v11 = vrot.slane %v4859_v51, 7  ;;  %v7680_v8 = vrot.slane %v4873_v35, 7 }
 0x3bc   : > { %v1613_v37 = vmul.f32 %v5283_v24, %v5310_v58 }
 0x3bd   : > { %3202 = vadd.xlane.f32.xlu1 %v3201_v39  ;;  %3199 = vadd.xlane.f32.xlu0 %v3198_v63  ;;  %v2356_v39 = vmul.f32 %v5269_v4, %v5291_v7  ;;  %v1611_v63 = vmul.f32 %v5283_v24, %v5291_v7  ;;  %v5329_v34 = vsel %vm7761_vm2, %v7678_v11, %v7677_v27  ;;  %v7682_v11 = vrot.slane %v4887_v40, 7 }
 0x3be   : > { %v5295_v12 = vpop.xlane.xlu1 %1865  ;;  %v5297_v29 = vpop.xlane.xlu0 %1862  ;;  %v1615_v57 = vmul.f32 %v5283_v24, %v5329_v34 }
 0x3bf   : > { %7841 = vst [vmem:[#allocation71_spill] sm:$0xff] %v5295_v12  ;;  %7842 = vst [vmem:[#allocation72_spill] sm:$0xff] %v5297_v29  ;;  %v2394_v19 = vsel %vm7753_vm4, %v2356_v39, 0.0  ;;  %v7679_v39 = vrot.slane %v4869_v14, 7 }
 0x3c1   : > { %2389 = vadd.xlane.f32.xlu1 %v2388_v33  ;;  %1645 = vadd.xlane.f32.xlu0 %v1644_v13  ;;  %v1650_v33 = vsel %vm7753_vm4, %v1611_v63, 0.0  ;;  %v2358_v13 = vmul.f32 %v5269_v4, %v5310_v58  ;;  %v5348_v27 = vsel %vm7761_vm2, %v7680_v8, %v7679_v39  ;;  %v7684_v8 = vrot.slane %v4901_v48, 7 }
 0x3c2   : > { %v5314_v5 = vpop.xlane.xlu1 %1871  ;;  %v5316_v12 = vpop.xlane.xlu0 %1868  ;;  %v1617_v6 = vmul.f32 %v5283_v24, %v5348_v27 }
 0x3c3   : > { %7843 = vst [vmem:[#allocation73_spill] sm:$0xff] %v5314_v5  ;;  %7844 = vst [vmem:[#allocation74_spill] sm:$0xff] %v5316_v12  ;;  %v2400_v41 = vsel %vm7753_vm4, %v2358_v13, 0.0  ;;  %v7681_v13 = vrot.slane %v4883_v20, 7 }
 0x3c5   : > { %2395 = vadd.xlane.f32.xlu1 %v2394_v19  ;;  %1651 = vadd.xlane.f32.xlu0 %v1650_v33  ;;  %v1656_v19 = vsel %vm7753_vm4, %v1613_v37, 0.0  ;;  %v2360_v33 = vmul.f32 %v5269_v4, %v5329_v34  ;;  %v5367_v39 = vsel %vm7761_vm2, %v7682_v11, %v7681_v13  ;;  %v7686_v11 = vrot.slane %v4915_v59, 7 }
 0x3c6   : > { %v5333_v63 = vpop.xlane.xlu1 %1877  ;;  %v5335_v5 = vpop.xlane.xlu0 %1874  ;;  %v1619_v26 = vmul.f32 %v5283_v24, %v5367_v39 }
 0x3c7   : > { %7845 = vst [vmem:[#allocation75_spill] sm:$0xff] %v5333_v63  ;;  %7846 = vst [vmem:[#allocation76_spill] sm:$0xff] %v5335_v5  ;;  %v2406_v17 = vsel %vm7753_vm4, %v2360_v33, 0.0  ;;  %v7683_v33 = vrot.slane %v4897_v38, 7 }
 0x3c9   : > { %2401 = vadd.xlane.f32.xlu1 %v2400_v41  ;;  %1657 = vadd.xlane.f32.xlu0 %v1656_v19  ;;  %v1662_v41 = vsel %vm7753_vm4, %v1615_v57, 0.0  ;;  %v2362_v19 = vmul.f32 %v5269_v4, %v5348_v27  ;;  %v5386_v13 = vsel %vm7761_vm2, %v7684_v8, %v7683_v33  ;;  %v7688_v8 = vrot.slane %v4929_v61, 7 }
 0x3ca   : > { %v5352_v37 = vpop.xlane.xlu1 %1883  ;;  %v5354_v63 = vpop.xlane.xlu0 %1880  ;;  %v1621_v36 = vmul.f32 %v5283_v24, %v5386_v13 }
 0x3cb   : > { %7847 = vst [vmem:[#allocation77_spill] sm:$0xff] %v5352_v37  ;;  %7848 = vst [vmem:[#allocation78_spill] sm:$0xff] %v5354_v63  ;;  %v2412_v9 = vsel %vm7753_vm4, %v2362_v19, 0.0  ;;  %v7685_v19 = vrot.slane %v4911_v44, 7 }
 0x3cd   : > { %2407 = vadd.xlane.f32.xlu1 %v2406_v17  ;;  %1663 = vadd.xlane.f32.xlu0 %v1662_v41  ;;  %v1668_v17 = vsel %vm7753_vm4, %v1617_v6, 0.0  ;;  %v2364_v41 = vmul.f32 %v5269_v4, %v5367_v39  ;;  %v5405_v33 = vsel %vm7761_vm2, %v7686_v11, %v7685_v19  ;;  %v7690_v11 = vrot.slane %v4943_v43, 7 }
 0x3ce   : > { %v5371_v57 = vpop.xlane.xlu1 %1889  ;;  %v5373_v37 = vpop.xlane.xlu0 %1886  ;;  %v1623_v21 = vmul.f32 %v5283_v24, %v5405_v33 }
 0x3cf   : > { %7849 = vst [vmem:[#allocation79_spill] sm:$0xff] %v5371_v57  ;;  %7850 = vst [vmem:[#allocation80_spill] sm:$0xff] %v5373_v37  ;;  %v2418_v37 = vsel %vm7753_vm4, %v2364_v41, 0.0  ;;  %v7687_v41 = vrot.slane %v4925_v55, 7 }
 0x3d1   : > { %2413 = vadd.xlane.f32.xlu1 %v2412_v9  ;;  %1669 = vadd.xlane.f32.xlu0 %v1668_v17  ;;  %v1674_v9 = vsel %vm7753_vm4, %v1619_v26, 0.0  ;;  %v2366_v17 = vmul.f32 %v5269_v4, %v5386_v13  ;;  %v5424_v19 = vsel %vm7761_vm2, %v7688_v8, %v7687_v41  ;;  %v7692_v8 = vrot.slane %v4957_v45, 7 }
 0x3d2   : > { %v5390_v6 = vpop.xlane.xlu1 %2554  ;;  %v5392_v57 = vpop.xlane.xlu0 %2551 }
 0x3d3   : > { %7851 = vst [vmem:[#allocation81_spill] sm:$0xff] %v5390_v6  ;;  %7852 = vst [vmem:[#allocation82_spill] sm:$0xff] %v5392_v57  ;;  %v2424_v63 = vsel %vm7753_vm4, %v2366_v17, 0.0  ;;  %v7689_v17 = vrot.slane %v4939_v0, 7 }
 0x3d5   : > { %2419 = vadd.xlane.f32.xlu1 %v2418_v37  ;;  %1675 = vadd.xlane.f32.xlu0 %v1674_v9  ;;  %v1680_v37 = vsel %vm7753_vm4, %v1621_v36, 0.0  ;;  %v2368_v9 = vmul.f32 %v5269_v4, %v5405_v33  ;;  %v5443_v41 = vsel %vm7761_vm2, %v7690_v11, %v7689_v17  ;;  %v7694_v11 = vrot.slane %v4971_v49, 7 }
 0x3d6   : > { %v5409_v26 = vpop.xlane.xlu1 %2560  ;;  %v5411_v6 = vpop.xlane.xlu0 %2557  ;;  %v1627_v12 = vmul.f32 %v5283_v24, %v5443_v41 }
 0x3d7   : > { %7853 = vst [vmem:[#allocation83_spill] sm:$0xff] %v5409_v26  ;;  %7854 = vst [vmem:[#allocation84_spill] sm:$0xff] %v5411_v6  ;;  %v2430_v5 = vsel %vm7753_vm4, %v2368_v9, 0.0  ;;  %v1625_v6 = vmul.f32 %v5283_v24, %v5424_v19  ;;  %v7691_v9 = vrot.slane %v4953_v23, 7 }
 0x3d9   : > { %2425 = vadd.xlane.f32.xlu1 %v2424_v63  ;;  %1681 = vadd.xlane.f32.xlu0 %v1680_v37  ;;  %v1686_v63 = vsel %vm7753_vm4, %v1623_v21, 0.0  ;;  %v2370_v37 = vmul.f32 %v5269_v4, %v5424_v19  ;;  %v5462_v17 = vsel %vm7761_vm2, %v7692_v8, %v7691_v9  ;;  %v7696_v8 = vrot.slane %v4985_v28, 7 }
 0x3da   : > { %v5428_v36 = vpop.xlane.xlu1 %2566  ;;  %v5430_v26 = vpop.xlane.xlu0 %2563  ;;  %v1629_v54 = vmul.f32 %v5283_v24, %v5462_v17 }
 0x3db   : > { %7855 = vst [vmem:[#allocation85_spill] sm:$0xff] %v5428_v36  ;;  %7856 = vst [vmem:[#allocation86_spill] sm:$0xff] %v5430_v26  ;;  %v2436_v26 = vsel %vm7753_vm4, %v2370_v37, 0.0  ;;  %v7693_v37 = vrot.slane %v4967_v16, 7 }
 0x3dd   : > { %2431 = vadd.xlane.f32.xlu1 %v2430_v5  ;;  %1687 = vadd.xlane.f32.xlu0 %v1686_v63  ;;  %v1692_v5 = vsel %vm7753_vm4, %v1625_v6, 0.0  ;;  %v2372_v63 = vmul.f32 %v5269_v4, %v5443_v41  ;;  %v5481_v9 = vsel %vm7761_vm2, %v7694_v11, %v7693_v37  ;;  %v7698_v11 = vrot.slane %v4999_v31, 7 }
 0x3de   : > { %v5447_v21 = vpop.xlane.xlu1 %2572  ;;  %v5449_v36 = vpop.xlane.xlu0 %2569  ;;  %v1631_v29 = vmul.f32 %v5283_v24, %v5481_v9 }
 0x3df   : > { %7857 = vst [vmem:[#allocation87_spill] sm:$0xff] %v5447_v21  ;;  %7858 = vst [vmem:[#allocation88_spill] sm:$0xff] %v5449_v36  ;;  %v2442_v36 = vsel %vm7753_vm4, %v2372_v63, 0.0  ;;  %v7695_v63 = vrot.slane %v4981_v15, 7 }
 0x3e1   : > { %2437 = vadd.xlane.f32.xlu1 %v2436_v26  ;;  %1693 = vadd.xlane.f32.xlu0 %v1692_v5  ;;  %v1698_v26 = vsel %vm7753_vm4, %v1627_v12, 0.0  ;;  %v2374_v5 = vmul.f32 %v5269_v4, %v5462_v17  ;;  %v5500_v37 = vsel %vm7761_vm2, %v7696_v8, %v7695_v63  ;;  %v7700_v8 = vrot.slane %v5013_v47, 7 }
 0x3e2   : > { %v5466_v6 = vpop.xlane.xlu1 %2578  ;;  %v5468_v21 = vpop.xlane.xlu0 %2575  ;;  %v1633_v50 = vmul.f32 %v5283_v24, %v5500_v37 }
 0x3e3   : > { %7859 = vst [vmem:[#allocation89_spill] sm:$0xff] %v5466_v6  ;;  %7860 = vst [vmem:[#allocation90_spill] sm:$0xff] %v5468_v21  ;;  %v2448_v21 = vsel %vm7753_vm4, %v2374_v5, 0.0  ;;  %v7697_v5 = vrot.slane %v4995_v1, 7 }
 0x3e5   : > { %2443 = vadd.xlane.f32.xlu1 %v2442_v36  ;;  %1699 = vadd.xlane.f32.xlu0 %v1698_v26  ;;  %v1704_v36 = vsel %vm7753_vm4, %v1629_v54, 0.0  ;;  %v2376_v26 = vmul.f32 %v5269_v4, %v5481_v9  ;;  %v5519_v63 = vsel %vm7761_vm2, %v7698_v11, %v7697_v5 }
 0x3e6   : > { %v5485_v12 = vpop.xlane.xlu1 %2584  ;;  %v5487_v6 = vpop.xlane.xlu0 %2581  ;;  %v2380_v52 = vmul.f32 %v5269_v4, %v5519_v63  ;;  %v1635_v5 = vmul.f32 %v5283_v24, %v5519_v63 }
 0x3e7   : > { %7861 = vst [vmem:[#allocation91_spill] sm:$0xff] %v5485_v12  ;;  %7862 = vst [vmem:[#allocation92_spill] sm:$0xff] %v5487_v6  ;;  %v2454_v6 = vsel %vm7753_vm4, %v2376_v26, 0.0  ;;  %v7699_v26 = vrot.slane %v5009_v10, 7 }
 0x3e9   : > { %2449 = vadd.xlane.f32.xlu1 %v2448_v21  ;;  %1705 = vadd.xlane.f32.xlu0 %v1704_v36  ;;  %v1710_v21 = vsel %vm7753_vm4, %v1631_v29, 0.0  ;;  %v2378_v36 = vmul.f32 %v5269_v4, %v5500_v37  ;;  %v5539_v11 = vsel %vm7761_vm2, %v7700_v8, %v7699_v26 }
 0x3ea   : > { %v5504_v54 = vpop.xlane.xlu1 %2590  ;;  %v5506_v12 = vpop.xlane.xlu0 %2587  ;;  %v2382_v57 = vmul.f32 %v5269_v4, %v5539_v11  ;;  %v1637_v26 = vmul.f32 %v5283_v24, %v5539_v11 }
 0x3eb   : > { %7863 = vst [vmem:[#allocation93_spill] sm:$0xff] %v5504_v54  ;;  %7864 = vst [vmem:[#allocation94_spill] sm:$0xff] %v5506_v12  ;;  %v7702_v12 = vrot.slane %v5120_v46, 7 }
 0x3ec   : > { %v2472_v22 = vsel %vm7753_vm4, %v2382_v57, 0.0 }
 0x3ed   : > { %2455 = vadd.xlane.f32.xlu1 %v2454_v6  ;;  %1711 = vadd.xlane.f32.xlu0 %v1710_v21  ;;  %v2460_v6 = vsel %vm7753_vm4, %v2378_v36, 0.0  ;;  %v1716_v21 = vsel %vm7753_vm4, %v1633_v50, 0.0  ;;  %v7701_v36 = vrot.slane %v5116_v30, 7  ;;  %v7703_v50 = vrot.slane %v4818_v3, 1 }
 0x3ee   : > { %v5523_v29 = vpop.xlane.xlu1 %2596  ;;  %v5525_v54 = vpop.xlane.xlu0 %2593 }
 0x3ef   : > { %7865 = vst [vmem:[#allocation95_spill] sm:$0xff] %v5523_v29  ;;  %7866 = vst [vmem:[#allocation96_spill] sm:$0xff] %v5525_v54  ;;  %v5559_v8 = vsel %vm7761_vm2, %v7702_v12, %v7701_v36  ;;  %v1728_v36 = vsel %vm7753_vm4, %v1637_v26, 0.0  ;;  %v7711_v26 = vrot.slane %v4845_v25, 1 }
 0x3f0   : > { %v2384_v12 = vmul.f32 %v5269_v4, %v5559_v8 }
 0x3f1   : > { %2461 = vadd.xlane.f32.xlu1 %v2460_v6  ;;  %1717 = vadd.xlane.f32.xlu0 %v1716_v21  ;;  %v2466_v6 = vsel %vm7753_vm4, %v2380_v52, 0.0  ;;  %v1722_v21 = vsel %vm7753_vm4, %v1635_v5, 0.0  ;;  %v7869_v52 = vrot.slane %v4821_v53, 1 }
 0x3f2   : > { %v5544_v29 = vpop.xlane.xlu1 %2602  ;;  %v5546_v54 = vpop.xlane.xlu0 %2599  ;;  %v2478_v2 = vsel %vm7753_vm4, %v2384_v12, 0.0 }
 0x3f3   : > { %7867 = vst [vmem:[#allocation97_spill] sm:$0xff] %v5544_v29  ;;  %7868 = vst [vmem:[#allocation98_spill] sm:$0xff] %v5546_v54  ;;  %v5566_v5 = vsel %vm7749_vm6, %v7869_v52, %v7703_v50  ;;  %v7705_v29 = vrot.slane %v4833_v56, 1  ;;  %v7704_v54 = vrot.slane %v4830_v18, 1  ;;  %v5581_v52 = vld [vmem:[%s7635_s5 + $0x2] ss:$0 sm:$0xff] }
 0x3f4   : > { %v2151_v50 = vmul.f32 %v5581_v52, %v5566_v5 }
 0x3f5   : > { %2467 = vadd.xlane.f32.xlu1 %v2466_v6  ;;  %1723 = vadd.xlane.f32.xlu0 %v1722_v21  ;;  %v5590_v57 = vsel %vm7749_vm6, %v7705_v29, %v7704_v54 }
 0x3f6   : > { %v5570_v6 = vpop.xlane.xlu1 %2608  ;;  %v5572_v21 = vpop.xlane.xlu0 %2605  ;;  %v2153_v29 = vmul.f32 %v5581_v52, %v5590_v57 }
 0x3f7   : > { %7870 = vst [vmem:[#allocation99_spill] sm:$0xff] %v5570_v6  ;;  %7871 = vst [vmem:[#allocation100_spill] sm:$0xff] %v5572_v21  ;;  %v7710_v6 = vrot.slane %v4842_v42, 1 }
 0x3f9   : > { %2473 = vadd.xlane.f32.xlu1 %v2472_v22  ;;  %1729 = vadd.xlane.f32.xlu0 %v1728_v36  ;;  %v2187_v22 = vsel %vm7753_vm4, %v2151_v50, 0.0  ;;  %v5603_v36 = vld [vmem:[%s7635_s5 + $0x6] ss:$0 sm:$0xff]  ;;  %v5614_v12 = vsel %vm7749_vm6, %v7711_v26, %v7710_v6  ;;  %v7713_v50 = vrot.slane %v4859_v51, 1  ;;  %v7715_v26 = vrot.slane %v4873_v35, 1 }
 0x3fa   : > { %v5594_v21 = vpop.xlane.xlu1 %2614  ;;  %v5596_v32 = vpop.xlane.xlu0 %2611  ;;  %v2919_v54 = vmul.f32 %v5603_v36, %v5291_v7  ;;  %v2155_v42 = vmul.f32 %v5581_v52, %v5614_v12 }
 0x3fb   : > { %7872 = vst [vmem:[#allocation101_spill] sm:$0xff] %v5594_v21  ;;  %7873 = vst [vmem:[#allocation102_spill] sm:$0xff] %v5596_v32  ;;  %v7712_v21 = vrot.slane %v4855_v62, 1 }
 0x3fc   : > { %v2953_v7 = vsel %vm7753_vm4, %v2919_v54, 0.0  ;;  %v7714_v54 = vrot.slane %v4869_v14, 1 }
 0x3fd   : > { %2479 = vadd.xlane.f32.xlu1 %v2478_v2  ;;  %2188 = vadd.xlane.f32.xlu0 %v2187_v22  ;;  %v2193_v2 = vsel %vm7753_vm4, %v2153_v29, 0.0  ;;  %v2921_v22 = vmul.f32 %v5603_v36, %v5310_v58  ;;  %v5633_v6 = vsel %vm7749_vm6, %v7713_v50, %v7712_v21  ;;  %v7717_v50 = vrot.slane %v4887_v40, 1 }
 0x3fe   : > { %v5618_v32 = vpop.xlane.xlu1 %2620  ;;  %v5620_v18 = vpop.xlane.xlu0 %2617  ;;  %v5652_v21 = vsel %vm7749_vm6, %v7715_v26, %v7714_v54  ;;  %v7719_v26 = vrot.slane %v4901_v48, 1 }
 0x3ff   : > { %7874 = vst [vmem:[#allocation103_spill] sm:$0xff] %v5618_v32  ;;  %7875 = vst [vmem:[#allocation104_spill] sm:$0xff] %v5620_v18  ;;  %v2959_v58 = vsel %vm7753_vm4, %v2921_v22, 0.0  ;;  %v2157_v18 = vmul.f32 %v5581_v52, %v5633_v6  ;;  %v7716_v22 = vrot.slane %v4883_v20, 1 }
 0x401   : > { %2954 = vadd.xlane.f32.xlu1 %v2953_v7  ;;  %2194 = vadd.xlane.f32.xlu0 %v2193_v2  ;;  %v2199_v7 = vsel %vm7753_vm4, %v2155_v42, 0.0  ;;  %v2923_v2 = vmul.f32 %v5603_v36, %v5329_v34  ;;  %v5671_v54 = vsel %vm7749_vm6, %v7717_v50, %v7716_v22  ;;  %v7721_v50 = vrot.slane %v4915_v59, 1 }
 0x402   : > { %v5637_v29 = vpop.xlane.xlu1 %2626  ;;  %v5639_v32 = vpop.xlane.xlu0 %2623 }
 0x403   : > { %7876 = vst [vmem:[#allocation105_spill] sm:$0xff] %v5637_v29  ;;  %7877 = vst [vmem:[#allocation106_spill] sm:$0xff] %v5639_v32  ;;  %v2965_v34 = vsel %vm7753_vm4, %v2923_v2, 0.0  ;;  %v2159_v32 = vmul.f32 %v5581_v52, %v5652_v21  ;;  %v7718_v2 = vrot.slane %v4897_v38, 1 }
 0x405   : > { %2960 = vadd.xlane.f32.xlu1 %v2959_v58  ;;  %2200 = vadd.xlane.f32.xlu0 %v2199_v7  ;;  %v2205_v58 = vsel %vm7753_vm4, %v2157_v18, 0.0  ;;  %v2925_v7 = vmul.f32 %v5603_v36, %v5348_v27  ;;  %v5690_v22 = vsel %vm7749_vm6, %v7719_v26, %v7718_v2  ;;  %v7723_v26 = vrot.slane %v4929_v61, 1 }
 0x406   : > { %v5656_v42 = vpop.xlane.xlu1 %2632  ;;  %v5658_v29 = vpop.xlane.xlu0 %2629 }
 0x407   : > { %7878 = vst [vmem:[#allocation107_spill] sm:$0xff] %v5656_v42  ;;  %7879 = vst [vmem:[#allocation108_spill] sm:$0xff] %v5658_v29  ;;  %v2971_v27 = vsel %vm7753_vm4, %v2925_v7, 0.0  ;;  %v2161_v29 = vmul.f32 %v5581_v52, %v5671_v54  ;;  %v7720_v7 = vrot.slane %v4911_v44, 1 }
 0x409   : > { %2966 = vadd.xlane.f32.xlu1 %v2965_v34  ;;  %2206 = vadd.xlane.f32.xlu0 %v2205_v58  ;;  %v2211_v34 = vsel %vm7753_vm4, %v2159_v32, 0.0  ;;  %v2927_v58 = vmul.f32 %v5603_v36, %v5367_v39  ;;  %v5709_v2 = vsel %vm7749_vm6, %v7721_v50, %v7720_v7  ;;  %v7725_v50 = vrot.slane %v4943_v43, 1 }
 0x40a   : > { %v5675_v18 = vpop.xlane.xlu1 %2638  ;;  %v5677_v42 = vpop.xlane.xlu0 %2635 }
 0x40b   : > { %7880 = vst [vmem:[#allocation109_spill] sm:$0xff] %v5675_v18  ;;  %7881 = vst [vmem:[#allocation110_spill] sm:$0xff] %v5677_v42  ;;  %v2977_v39 = vsel %vm7753_vm4, %v2927_v58, 0.0  ;;  %v2163_v42 = vmul.f32 %v5581_v52, %v5690_v22  ;;  %v7722_v58 = vrot.slane %v4925_v55, 1 }
 0x40d   : > { %2972 = vadd.xlane.f32.xlu1 %v2971_v27  ;;  %2212 = vadd.xlane.f32.xlu0 %v2211_v34  ;;  %v2217_v27 = vsel %vm7753_vm4, %v2161_v29, 0.0  ;;  %v2929_v34 = vmul.f32 %v5603_v36, %v5386_v13  ;;  %v5728_v7 = vsel %vm7749_vm6, %v7723_v26, %v7722_v58  ;;  %v7727_v26 = vrot.slane %v4957_v45, 1 }
 0x40e   : > { %v5694_v32 = vpop.xlane.xlu1 %2644  ;;  %v5696_v18 = vpop.xlane.xlu0 %2641 }
 0x40f   : > { %7882 = vst [vmem:[#allocation111_spill] sm:$0xff] %v5694_v32  ;;  %7883 = vst [vmem:[#allocation112_spill] sm:$0xff] %v5696_v18  ;;  %v2983_v13 = vsel %vm7753_vm4, %v2929_v34, 0.0  ;;  %v2165_v18 = vmul.f32 %v5581_v52, %v5709_v2  ;;  %v7724_v34 = vrot.slane %v4939_v0, 1 }
 0x411   : > { %2978 = vadd.xlane.f32.xlu1 %v2977_v39  ;;  %2218 = vadd.xlane.f32.xlu0 %v2217_v27  ;;  %v2223_v39 = vsel %vm7753_vm4, %v2163_v42, 0.0  ;;  %v2931_v27 = vmul.f32 %v5603_v36, %v5405_v33  ;;  %v5747_v58 = vsel %vm7749_vm6, %v7725_v50, %v7724_v34  ;;  %v7729_v50 = vrot.slane %v4971_v49, 1 }
 0x412   : > { %v5713_v29 = vpop.xlane.xlu1 %3118  ;;  %v5715_v32 = vpop.xlane.xlu0 %3115 }
 0x413   : > { %7884 = vst [vmem:[#allocation113_spill] sm:$0xff] %v5713_v29  ;;  %7885 = vst [vmem:[#allocation114_spill] sm:$0xff] %v5715_v32  ;;  %v2989_v33 = vsel %vm7753_vm4, %v2931_v27, 0.0  ;;  %v2167_v32 = vmul.f32 %v5581_v52, %v5728_v7  ;;  %v7726_v27 = vrot.slane %v4953_v23, 1 }
 0x415   : > { %2984 = vadd.xlane.f32.xlu1 %v2983_v13  ;;  %2224 = vadd.xlane.f32.xlu0 %v2223_v39  ;;  %v2229_v13 = vsel %vm7753_vm4, %v2165_v18, 0.0  ;;  %v2933_v39 = vmul.f32 %v5603_v36, %v5424_v19  ;;  %v5766_v34 = vsel %vm7749_vm6, %v7727_v26, %v7726_v27  ;;  %v7731_v26 = vrot.slane %v4985_v28, 1 }
 0x416   : > { %v5732_v42 = vpop.xlane.xlu1 %3124  ;;  %v5734_v29 = vpop.xlane.xlu0 %3121 }
 0x417   : > { %7886 = vst [vmem:[#allocation115_spill] sm:$0xff] %v5732_v42  ;;  %7887 = vst [vmem:[#allocation116_spill] sm:$0xff] %v5734_v29  ;;  %v2995_v19 = vsel %vm7753_vm4, %v2933_v39, 0.0  ;;  %v2169_v29 = vmul.f32 %v5581_v52, %v5747_v58  ;;  %v7728_v39 = vrot.slane %v4967_v16, 1 }
 0x419   : > { %2990 = vadd.xlane.f32.xlu1 %v2989_v33  ;;  %2230 = vadd.xlane.f32.xlu0 %v2229_v13  ;;  %v2235_v33 = vsel %vm7753_vm4, %v2167_v32, 0.0  ;;  %v2935_v13 = vmul.f32 %v5603_v36, %v5443_v41  ;;  %v5785_v27 = vsel %vm7749_vm6, %v7729_v50, %v7728_v39  ;;  %v7733_v50 = vrot.slane %v4999_v31, 1 }
 0x41a   : > { %v5751_v18 = vpop.xlane.xlu1 %3130  ;;  %v5753_v42 = vpop.xlane.xlu0 %3127 }
 0x41b   : > { %7888 = vst [vmem:[#allocation117_spill] sm:$0xff] %v5751_v18  ;;  %7889 = vst [vmem:[#allocation118_spill] sm:$0xff] %v5753_v42  ;;  %v3001_v41 = vsel %vm7753_vm4, %v2935_v13, 0.0  ;;  %v2171_v42 = vmul.f32 %v5581_v52, %v5766_v34  ;;  %v7730_v13 = vrot.slane %v4981_v15, 1 }
 0x41d   : > { %2996 = vadd.xlane.f32.xlu1 %v2995_v19  ;;  %2236 = vadd.xlane.f32.xlu0 %v2235_v33  ;;  %v2241_v19 = vsel %vm7753_vm4, %v2169_v29, 0.0  ;;  %v2937_v33 = vmul.f32 %v5603_v36, %v5462_v17  ;;  %v5804_v39 = vsel %vm7749_vm6, %v7731_v26, %v7730_v13  ;;  %v7735_v26 = vrot.slane %v5013_v47, 1 }
 0x41e   : > { %v5770_v32 = vpop.xlane.xlu1 %3136  ;;  %v5772_v18 = vpop.xlane.xlu0 %3133 }
 0x41f   : > { %7890 = vst [vmem:[#allocation119_spill] sm:$0xff] %v5770_v32  ;;  %7891 = vst [vmem:[#allocation120_spill] sm:$0xff] %v5772_v18  ;;  %v3007_v17 = vsel %vm7753_vm4, %v2937_v33, 0.0  ;;  %v2173_v18 = vmul.f32 %v5581_v52, %v5785_v27  ;;  %v7732_v33 = vrot.slane %v4995_v1, 1 }
 0x421   : > { %3002 = vadd.xlane.f32.xlu1 %v3001_v41  ;;  %2242 = vadd.xlane.f32.xlu0 %v2241_v19  ;;  %v2247_v41 = vsel %vm7753_vm4, %v2171_v42, 0.0  ;;  %v2939_v19 = vmul.f32 %v5603_v36, %v5481_v9  ;;  %v5823_v13 = vsel %vm7749_vm6, %v7733_v50, %v7732_v33 }
 0x422   : > { %v5789_v29 = vpop.xlane.xlu1 %3142  ;;  %v5791_v32 = vpop.xlane.xlu0 %3139 }
 0x423   : > { %7892 = vst [vmem:[#allocation121_spill] sm:$0xff] %v5789_v29  ;;  %7893 = vst [vmem:[#allocation122_spill] sm:$0xff] %v5791_v32  ;;  %v3013_v9 = vsel %vm7753_vm4, %v2939_v19, 0.0  ;;  %v2175_v32 = vmul.f32 %v5581_v52, %v5804_v39  ;;  %v7734_v19 = vrot.slane %v5009_v10, 1 }
 0x425   : > { %3008 = vadd.xlane.f32.xlu1 %v3007_v17  ;;  %2248 = vadd.xlane.f32.xlu0 %v2247_v41  ;;  %v2253_v17 = vsel %vm7753_vm4, %v2173_v18, 0.0  ;;  %v2941_v41 = vmul.f32 %v5603_v36, %v5500_v37  ;;  %v5842_v33 = vsel %vm7749_vm6, %v7735_v26, %v7734_v19 }
 0x426   : > { %v5808_v42 = vpop.xlane.xlu1 %3148  ;;  %v5810_v29 = vpop.xlane.xlu0 %3145 }
 0x427   : > { %7894 = vst [vmem:[#allocation123_spill] sm:$0xff] %v5808_v42  ;;  %7895 = vst [vmem:[#allocation124_spill] sm:$0xff] %v5810_v29  ;;  %v3019_v37 = vsel %vm7753_vm4, %v2941_v41, 0.0  ;;  %v2177_v29 = vmul.f32 %v5581_v52, %v5823_v13 }
 0x429   : > { %3014 = vadd.xlane.f32.xlu1 %v3013_v9  ;;  %2254 = vadd.xlane.f32.xlu0 %v2253_v17  ;;  %v2259_v9 = vsel %vm7753_vm4, %v2175_v32, 0.0  ;;  %v2943_v17 = vmul.f32 %v5603_v36, %v5519_v63  ;;  %v2265_v63 = vsel %vm7753_vm4, %v2177_v29, 0.0 }
 0x42a   : > { %v5827_v18 = vpop.xlane.xlu1 %3154  ;;  %v5829_v42 = vpop.xlane.xlu0 %3151 }
 0x42b   : > { %7896 = vst [vmem:[#allocation125_spill] sm:$0xff] %v5827_v18  ;;  %7897 = vst [vmem:[#allocation126_spill] sm:$0xff] %v5829_v42  ;;  %v3025_v32 = vsel %vm7753_vm4, %v2943_v17, 0.0  ;;  %v2945_v18 = vmul.f32 %v5603_v36, %v5539_v11  ;;  %v2947_v11 = vmul.f32 %v5603_v36, %v5559_v8 }
 0x42d   : > { %3020 = vadd.xlane.f32.xlu1 %v3019_v37  ;;  %2260 = vadd.xlane.f32.xlu0 %v2259_v9  ;;  %v2179_v37 = vmul.f32 %v5581_v52, %v5842_v33  ;;  %v5857_v9 = vld [vmem:[%s7635_s5 + $0x5] ss:$0 sm:$0xff]  ;;  %v3031_v17 = vsel %vm7753_vm4, %v2945_v18, 0.0  ;;  %v3037_v18 = vsel %vm7753_vm4, %v2947_v11, 0.0 }
 0x42e   : > { %v5844_v50 = vpop.xlane.xlu1 %3160  ;;  %v5846_v41 = vpop.xlane.xlu0 %3157  ;;  %v2720_v52 = vmul.f32 %v5857_v9, %v5566_v5  ;;  %v2722_v5 = vmul.f32 %v5857_v9, %v5590_v57 }
 0x42f   : > { %7898 = vst [vmem:[#allocation127_spill] sm:$0xff] %v5844_v50  ;;  %7899 = vst [vmem:[#allocation128_spill] sm:$0xff] %v5846_v41  ;;  %v2271_v29 = vsel %vm7753_vm4, %v2179_v37, 0.0 }
 0x430   : > { %v2752_v37 = vsel %vm7753_vm4, %v2720_v52, 0.0  ;;  %v2724_v52 = vmul.f32 %v5857_v9, %v5614_v12 }
 0x431   : > { %3026 = vadd.xlane.f32.xlu1 %v3025_v32  ;;  %2266 = vadd.xlane.f32.xlu0 %v2265_v63  ;;  %v5872_v32 = vld [vmem:[%s7635_s5 + $0x8] ss:$0 sm:$0xff] }
 0x432   : > { %v5859_v19 = vpop.xlane.xlu1 %3166  ;;  %v5861_v26 = vpop.xlane.xlu0 %3163  ;;  %v3274_v8 = vmul.f32 %v5872_v32, %v5590_v57  ;;  %v3276_v11 = vmul.f32 %v5872_v32, %v5614_v12  ;;  %v3300_v41 = vmul.f32 %v5872_v32, %v5842_v33 }
 0x433   : > { %7900 = vst [vmem:[#allocation129_spill] sm:$0xff] %v5859_v19  ;;  %7901 = vst [vmem:[#allocation130_spill] sm:$0xff] %v5861_v26 }
 0x435   : > { %3032 = vadd.xlane.f32.xlu1 %v3031_v17  ;;  %2272 = vadd.xlane.f32.xlu0 %v2271_v29  ;;  %v3305_v29 = vsel %vm7753_vm4, %v3274_v8, 0.0  ;;  %v3278_v8 = vmul.f32 %v5872_v32, %v5633_v6 }
 0x436   : > { %v5874_v63 = vpop.xlane.xlu1 %3172  ;;  %v5876_v19 = vpop.xlane.xlu0 %3169 }
 0x437   : > { %7902 = vst [vmem:[#allocation131_spill] sm:$0xff] %v5874_v63  ;;  %7903 = vst [vmem:[#allocation132_spill] sm:$0xff] %v5876_v19  ;;  %v2758_v63 = vsel %vm7753_vm4, %v2722_v5, 0.0  ;;  %v2726_v5 = vmul.f32 %v5857_v9, %v5633_v6  ;;  %v2746_v19 = vmul.f32 %v5857_v9, %v5823_v13 }
 0x439   : > { %3038 = vadd.xlane.f32.xlu1 %v3037_v18  ;;  %2753 = vadd.xlane.f32.xlu0 %v2752_v37  ;;  %v3311_v18 = vsel %vm7753_vm4, %v3276_v11, 0.0  ;;  %v2764_v37 = vsel %vm7753_vm4, %v2724_v52, 0.0  ;;  %v3280_v11 = vmul.f32 %v5872_v32, %v5652_v21  ;;  %v2728_v52 = vmul.f32 %v5857_v9, %v5652_v21 }
 0x43a   : > { %v5884_v36 = vpop.xlane.xlu1 %3178  ;;  %v5886_v17 = vpop.xlane.xlu0 %3175 }
 0x43b   : > { %7904 = vst [vmem:[#allocation133_spill] sm:$0xff] %v5884_v36  ;;  %7905 = vst [vmem:[#allocation134_spill] sm:$0xff] %v5886_v17 }
 0x43d   : > { %3306 = vadd.xlane.f32.xlu1 %v3305_v29  ;;  %2759 = vadd.xlane.f32.xlu0 %v2758_v63  ;;  %v3317_v63 = vsel %vm7753_vm4, %v3278_v8, 0.0  ;;  %v2770_v29 = vsel %vm7753_vm4, %v2726_v5, 0.0  ;;  %v3282_v8 = vmul.f32 %v5872_v32, %v5671_v54  ;;  %v2730_v5 = vmul.f32 %v5857_v9, %v5671_v54 }
 0x43e   : > { %v5894_v50 = vpop.xlane.xlu1 %3184  ;;  %v5896_v57 = vpop.xlane.xlu0 %3181 }
 0x43f   : > { %7906 = vst [vmem:[#allocation135_spill] sm:$0xff] %v5894_v50  ;;  %7907 = vst [vmem:[#allocation136_spill] sm:$0xff] %v5896_v57 }
 0x441   : > { %3312 = vadd.xlane.f32.xlu1 %v3311_v18  ;;  %2765 = vadd.xlane.f32.xlu0 %v2764_v37  ;;  %v3323_v18 = vsel %vm7753_vm4, %v3280_v11, 0.0  ;;  %v2776_v37 = vsel %vm7753_vm4, %v2728_v52, 0.0  ;;  %v3284_v11 = vmul.f32 %v5872_v32, %v5690_v22  ;;  %v2732_v52 = vmul.f32 %v5857_v9, %v5690_v22 }
 0x442   : > { %v5904_v36 = vpop.xlane.xlu1 %3190  ;;  %v5906_v12 = vpop.xlane.xlu0 %3187 }
 0x443   : > { %7908 = vst [vmem:[#allocation137_spill] sm:$0xff] %v5904_v36  ;;  %7909 = vst [vmem:[#allocation138_spill] sm:$0xff] %v5906_v12 }
 0x445   : > { %3318 = vadd.xlane.f32.xlu1 %v3317_v63  ;;  %2771 = vadd.xlane.f32.xlu0 %v2770_v29  ;;  %v3329_v63 = vsel %vm7753_vm4, %v3282_v8, 0.0  ;;  %v2782_v29 = vsel %vm7753_vm4, %v2730_v5, 0.0  ;;  %v3286_v8 = vmul.f32 %v5872_v32, %v5709_v2  ;;  %v2734_v5 = vmul.f32 %v5857_v9, %v5709_v2 }
 0x446   : > { %v5914_v50 = vpop.xlane.xlu1 %3196  ;;  %v5916_v6 = vpop.xlane.xlu0 %3193 }
 0x447   : > { %7910 = vst [vmem:[#allocation139_spill] sm:$0xff] %v5914_v50  ;;  %7911 = vst [vmem:[#allocation140_spill] sm:$0xff] %v5916_v6 }
 0x449   : > { %3324 = vadd.xlane.f32.xlu1 %v3323_v18  ;;  %2777 = vadd.xlane.f32.xlu0 %v2776_v37  ;;  %v3335_v18 = vsel %vm7753_vm4, %v3284_v11, 0.0  ;;  %v2788_v37 = vsel %vm7753_vm4, %v2732_v52, 0.0  ;;  %v3288_v11 = vmul.f32 %v5872_v32, %v5728_v7  ;;  %v2736_v52 = vmul.f32 %v5857_v9, %v5728_v7 }
 0x44a   : > { %v5924_v12 = vpop.xlane.xlu1 %3202  ;;  %v5926_v21 = vpop.xlane.xlu0 %3199 }
 0x44b   : > { %7912 = vst [vmem:[#allocation141_spill] sm:$0xff] %v5924_v12  ;;  %7913 = vst [vmem:[#allocation142_spill] sm:$0xff] %v5926_v21 }
 0x44d   : > { %3330 = vadd.xlane.f32.xlu1 %v3329_v63  ;;  %2783 = vadd.xlane.f32.xlu0 %v2782_v29  ;;  %v3341_v63 = vsel %vm7753_vm4, %v3286_v8, 0.0  ;;  %v2794_v29 = vsel %vm7753_vm4, %v2734_v5, 0.0  ;;  %v3290_v8 = vmul.f32 %v5872_v32, %v5747_v58  ;;  %v2738_v5 = vmul.f32 %v5857_v9, %v5747_v58 }
 0x44e   : > { %v5934_v6 = vpop.xlane.xlu1 %2389  ;;  %v5936_v54 = vpop.xlane.xlu0 %1645 }
 0x44f   : > { %7914 = vst [vmem:[#allocation143_spill] sm:$0xff] %v5934_v6  ;;  %7915 = vst [vmem:[#allocation144_spill] sm:$0xff] %v5936_v54 }
 0x451   : > { %3336 = vadd.xlane.f32.xlu1 %v3335_v18  ;;  %2789 = vadd.xlane.f32.xlu0 %v2788_v37  ;;  %v3347_v18 = vsel %vm7753_vm4, %v3288_v11, 0.0  ;;  %v2800_v37 = vsel %vm7753_vm4, %v2736_v52, 0.0  ;;  %v3292_v11 = vmul.f32 %v5872_v32, %v5766_v34  ;;  %v2740_v52 = vmul.f32 %v5857_v9, %v5766_v34 }
 0x452   : > { %v5944_v21 = vpop.xlane.xlu1 %2395  ;;  %v5946_v22 = vpop.xlane.xlu0 %1651 }
 0x453   : > { %7916 = vst [vmem:[#allocation145_spill] sm:$0xff] %v5944_v21  ;;  %7917 = vst [vmem:[#allocation146_spill] sm:$0xff] %v5946_v22 }
 0x455   : > { %3342 = vadd.xlane.f32.xlu1 %v3341_v63  ;;  %2795 = vadd.xlane.f32.xlu0 %v2794_v29  ;;  %v3353_v63 = vsel %vm7753_vm4, %v3290_v8, 0.0  ;;  %v2806_v29 = vsel %vm7753_vm4, %v2738_v5, 0.0  ;;  %v3294_v8 = vmul.f32 %v5872_v32, %v5785_v27  ;;  %v2742_v5 = vmul.f32 %v5857_v9, %v5785_v27 }
 0x456   : > { %v5954_v12 = vpop.xlane.xlu1 %2401  ;;  %v5956_v2 = vpop.xlane.xlu0 %1657  ;;  %v934_v27 = vadd.s32 16, %v4494_v60 }
 0x457   : > { %7918 = vst [vmem:[#allocation147_spill] sm:$0xff] %v5954_v12  ;;  %7919 = vst [vmem:[#allocation148_spill] sm:$0xff] %v5956_v2  ;;  %v942_v12 = vadd.s32 80, %v4494_v60 }
 0x459   : > { %3348 = vadd.xlane.f32.xlu1 %v3347_v18  ;;  %2801 = vadd.xlane.f32.xlu0 %v2800_v37  ;;  %v3359_v18 = vsel %vm7753_vm4, %v3292_v11, 0.0  ;;  %v2812_v37 = vsel %vm7753_vm4, %v2740_v52, 0.0  ;;  %v3296_v11 = vmul.f32 %v5872_v32, %v5804_v39  ;;  %v2744_v52 = vmul.f32 %v5857_v9, %v5804_v39 }
 0x45a   : > { %v5964_v50 = vpop.xlane.xlu1 %2407  ;;  %v5966_v7 = vpop.xlane.xlu0 %1663  ;;  %v7737_v39 = vrot.slane %v5120_v46, 1 }
 0x45b   : > { %7920 = vst [vmem:[#allocation149_spill] sm:$0xff] %v5964_v50  ;;  %7921 = vst [vmem:[#allocation150_spill] sm:$0xff] %v5966_v7  ;;  %v3371_v17 = vsel %vm7753_vm4, %v3296_v11, 0.0  ;;  %v968_v11 = vand.u32 15, %v4494_v60  ;;  %v950_v7 = vadd.s32 144, %v4494_v60 }
 0x45d   : > { %3354 = vadd.xlane.f32.xlu1 %v3353_v63  ;;  %2807 = vadd.xlane.f32.xlu0 %v2806_v29  ;;  %v3365_v63 = vsel %vm7753_vm4, %v3294_v8, 0.0  ;;  %v2818_v29 = vsel %vm7753_vm4, %v2742_v5, 0.0  ;;  %v2824_v8 = vsel %vm7753_vm4, %v2744_v52, 0.0  ;;  %v3298_v5 = vmul.f32 %v5872_v32, %v5823_v13 }
 0x45e   : > { %v5974_v36 = vpop.xlane.xlu1 %2413  ;;  %v5976_v58 = vpop.xlane.xlu0 %1669  ;;  %v936_v52 = vadd.s32 32, %v4494_v60  ;;  %vm6035_vm8 = vcmp.gt.s32.totalorder %v968_v11, 0 }
 0x45f   : > { %7922 = vst [vmem:[#allocation151_spill] sm:$0xff] %v5974_v36  ;;  %7923 = vst [vmem:[#allocation152_spill] sm:$0xff] %v5976_v58  ;;  %v3377_v13 = vsel %vm7753_vm4, %v3298_v5, 0.0 }
 0x461   : > { %3360 = vadd.xlane.f32.xlu1 %v3359_v18  ;;  %2813 = vadd.xlane.f32.xlu0 %v2812_v37 }
 0x462   : > { %v5984_v57 = vpop.xlane.xlu1 %2419  ;;  %v5986_v34 = vpop.xlane.xlu0 %1675 }
 0x463   : > { %7924 = vst [vmem:[#allocation153_spill] sm:$0xff] %v5984_v57  ;;  %7925 = vst [vmem:[#allocation154_spill] sm:$0xff] %v5986_v34  ;;  %v7966_v34 = vrot.slane %v4869_v14, 7 }
 0x465   : > { %3366 = vadd.xlane.f32.xlu1 %v3365_v63  ;;  %2819 = vadd.xlane.f32.xlu0 %v2818_v29  ;;  %v7736_v63 = vrot.slane %v5116_v30, 1  ;;  %v982_v29 = vand.u32 15, %v934_v27 }
 0x466   : > { %v5995_v18 = vpop.xlane.xlu1 %2425  ;;  %v5997_v37 = vpop.xlane.xlu0 %1681 }
 0x467   : > { %7926 = vst [vmem:[#allocation155_spill] sm:$0xff] %v5995_v18  ;;  %7927 = vst [vmem:[#allocation156_spill] sm:$0xff] %v5997_v37  ;;  %v2679_v27 = vsel %vm7749_vm6, %v7737_v39, %v7736_v63  ;;  %vm6027_vm7 = vcmp.gt.s32.totalorder %v982_v29, 0  ;;  %v3383_v63 = vsel %vm7753_vm4, %v3300_v41, 0.0  ;;  %v7939_v41 = vrot.slane %v4833_v56, 7 }
 0x468   : > { %v2750_v29 = vmul.f32 %v5857_v9, %v2679_v27  ;;  %v7965_v37 = vrot.slane %v4887_v40, 7 }
 0x469   : > { %3372 = vadd.xlane.f32.xlu1 %v3371_v17  ;;  %2825 = vadd.xlane.f32.xlu0 %v2824_v8  ;;  %v2830_v17 = vsel %vm7753_vm4, %v2746_v19, 0.0  ;;  %v2748_v8 = vmul.f32 %v5857_v9, %v5842_v33 }
 0x46a   : > { %v6007_v26 = vpop.xlane.xlu1 %2431  ;;  %v6009_v18 = vpop.xlane.xlu0 %1687 }
 0x46b   : > { %7928 = vst [vmem:[#allocation157_spill] sm:$0xff] %v6007_v26  ;;  %7929 = vst [vmem:[#allocation158_spill] sm:$0xff] %v6009_v18  ;;  %v7930_v26 = vrot.slane %v4821_v53, 7  ;;  %v2836_v39 = vsel %vm7753_vm4, %v2748_v8, 0.0  ;;  %v7940_v8 = vrot.slane %v4818_v3, 7 }
 0x46d   : > { %3378 = vadd.xlane.f32.xlu1 %v3377_v13  ;;  %2831 = vadd.xlane.f32.xlu0 %v2830_v17  ;;  %v1475_v57 = vsel %vm7761_vm2, 0.0, %v7930_v26  ;;  %v996_v13 = vand.u32 15, %v936_v52  ;;  %v938_v17 = vadd.s32 48, %v4494_v60  ;;  %v3302_v26 = vmul.f32 %v5872_v32, %v2679_v27 }
 0x46e   : > { %v6031_v19 = vpop.xlane.xlu1 %2437  ;;  %v6033_v5 = vpop.xlane.xlu0 %1693  ;;  %v2316_v11 = vsel %vm6035_vm8, %v1475_v57, 0.0  ;;  %v6057_v32 = vsel %vm7761_vm2, %v7940_v8, %v7939_v41  ;;  %v7943_v41 = vrot.slane %v4845_v25, 7  ;;  %v7944_v8 = vld [vmem:[#allocation40_spill] sm:$0xff] }
 0x46f   : > { %7933 = vst [vmem:[#allocation159_spill] sm:$0xff] %v6031_v19  ;;  %7934 = vst [vmem:[#allocation160_spill] sm:$0xff] %v6033_v5  ;;  %v1572_v19 = vsel %vm6027_vm7, %v1475_v57, 0.0  ;;  %vm6059_vm9 = vcmp.gt.s32.totalorder %v996_v13, 0  ;;  %v3389_v27 = vsel %vm7753_vm4, %v3302_v26, 0.0  ;;  %v2353_v50 = vmul.f32 %v5269_v4, %v2316_v11 }
 0x470   : > { %v1608_v57 = vmul.f32 %v5283_v24, %v1572_v19  ;;  %v1574_v13 = vsel %vm6059_vm9, %v6057_v32, 0.0  ;;  %v7945_v19 = vrot.slane %v7944_v8, 7 }
 0x471   : > { %3384 = vadd.xlane.f32.xlu1 %v3383_v63  ;;  %2837 = vadd.xlane.f32.xlu0 %v2836_v39  ;;  %v1010_v63 = vand.u32 15, %v938_v17  ;;  %v940_v39 = vadd.s32 64, %v4494_v60  ;;  %v2318_v17 = vsel %vm6027_vm7, %v6057_v32, 0.0  ;;  %v2385_v6 = vsel %vm7753_vm4, %v2353_v50, 0.0 }
 0x472   : > { %v6048_v42 = vpop.xlane.xlu1 %2443  ;;  %v6050_v52 = vpop.xlane.xlu0 %1699  ;;  %v6079_v26 = vsel %vm7761_vm2, %v7945_v19, %v7943_v41  ;;  %v1641_v21 = vsel %vm7753_vm4, %v1608_v57, 0.0  ;;  %v2355_v41 = vmul.f32 %v5269_v4, %v2318_v17  ;;  %v7952_v50 = vrot.slane %v4859_v51, 7  ;;  %v7953_v57 = vld [vmem:[#allocation41_spill] sm:$0xff] }
 0x473   : > { %7937 = vst [vmem:[#allocation161_spill] sm:$0xff] %v6048_v42  ;;  %7938 = vst [vmem:[#allocation162_spill] sm:$0xff] %v6050_v52  ;;  %v2842_v42 = vsel %vm7753_vm4, %v2750_v29, 0.0  ;;  %vm6085_vm10 = vcmp.gt.s32.totalorder %v1010_v63, 0  ;;  %v1610_v52 = vmul.f32 %v5283_v24, %v1574_v13  ;;  %v2320_v19 = vsel %vm6059_vm9, %v6079_v26, 0.0 }
 0x474   : > { %v1576_v63 = vsel %vm6085_vm10, %v6079_v26, 0.0  ;;  %v7954_v13 = vrot.slane %v7953_v57, 7  ;;  %v2357_v5 = vmul.f32 %v5269_v4, %v2320_v19  ;;  %v7958_v4 = vrot.slane %v4855_v62, 7 }
 0x475   : > { %3390 = vadd.xlane.f32.xlu1 %v3389_v27  ;;  %2843 = vadd.xlane.f32.xlu0 %v2842_v42  ;;  %v1024_v27 = vand.u32 15, %v940_v39  ;;  %v1612_v18 = vmul.f32 %v5283_v24, %v1576_v63 }
 0x476   : > { %v6081_v29 = vpop.xlane.xlu1 %2449  ;;  %v6083_v11 = vpop.xlane.xlu0 %1705  ;;  %v6109_v17 = vsel %vm7761_vm2, %v7954_v13, %v7952_v50  ;;  %v7957_v50 = vrot.slane %v4873_v35, 7 }
 0x477   : > { %7946 = vst [vmem:[#allocation40_spill] sm:$0xff] %v6081_v29  ;;  %7947 = vst [vmem:[#allocation163_spill] sm:$0xff] %v6083_v11  ;;  %vm6111_vm11 = vcmp.gt.s32.totalorder %v1024_v27, 0  ;;  %v1653_v13 = vsel %vm7753_vm4, %v1612_v18, 0.0 }
 0x478   : > { %v1578_v27 = vsel %vm6111_vm11, %v6109_v17, 0.0 }
 0x479   : > { %1642 = vadd.xlane.f32.xlu1 %v1641_v21  ;;  %2386 = vadd.xlane.f32.xlu0 %v2385_v6  ;;  %v1038_v6 = vand.u32 15, %v942_v12  ;;  %v944_v21 = vadd.s32 96, %v4494_v60  ;;  %v2322_v12 = vsel %vm6085_vm10, %v6109_v17, 0.0 }
 0x47a   : > { %v6100_v39 = vpop.xlane.xlu1 %2455  ;;  %v6102_v29 = vpop.xlane.xlu0 %1711 }
 0x47b   : > { %7950 = vst [vmem:[#allocation164_spill] sm:$0xff] %v6100_v39  ;;  %7951 = vst [vmem:[#allocation165_spill] sm:$0xff] %v6102_v29  ;;  %v1647_v39 = vsel %vm7753_vm4, %v1610_v52, 0.0  ;;  %v2391_v29 = vsel %vm7753_vm4, %v2355_v41, 0.0  ;;  %v6131_v52 = vsel %vm7761_vm2, %v7958_v4, %v7957_v50  ;;  %v946_v41 = vadd.s32 112, %v4494_v60 }
 0x47c   : > { %vm6138_vm12 = vcmp.gt.s32.totalorder %v1038_v6, 0  ;;  %v1052_v63 = vand.u32 15, %v944_v21  ;;  %v6147_v50 = vld [vmem:[%s7635_s5] ss:$0 sm:$0xff] }
 0x47d   : > { %1648 = vadd.xlane.f32.xlu1 %v1647_v39  ;;  %2392 = vadd.xlane.f32.xlu0 %v2391_v29  ;;  %v2397_v39 = vsel %vm7753_vm4, %v2357_v5, 0.0  ;;  %v1614_v4 = vmul.f32 %v6147_v50, %v1578_v27  ;;  %v2324_v5 = vsel %vm6111_vm11, %v6131_v52, 0.0  ;;  %v1580_v18 = vsel %vm6138_vm12, %v6131_v52, 0.0 }
 0x47e   : > { %v6134_v24 = vpop.xlane.xlu1 %2461  ;;  %v6136_v29 = vpop.xlane.xlu0 %1717  ;;  %v1066_v21 = vand.u32 15, %v946_v41  ;;  %vm6173_vm13 = vcmp.gt.s32.totalorder %v1052_v63, 0  ;;  %v7969_v63 = vrot.slane %v4901_v48, 7 }
 0x47f   : > { %7959 = vst [vmem:[#allocation41_spill] sm:$0xff] %v6134_v24  ;;  %7960 = vst [vmem:[#allocation166_spill] sm:$0xff] %v6136_v29  ;;  %v6153_v24 = vld [vmem:[%s7635_s5 + $0x3] ss:$0 sm:$0xff]  ;;  %v1659_v41 = vsel %vm7753_vm4, %v1614_v4, 0.0 }
 0x480   : > { %v2359_v6 = vmul.f32 %v6153_v24, %v2322_v12  ;;  %v6171_v12 = vsel %vm7761_vm2, %v7966_v34, %v7965_v37  ;;  %vm6195_vm14 = vcmp.gt.s32.totalorder %v1066_v21, 0 }
 0x481   : > { %1654 = vadd.xlane.f32.xlu1 %v1653_v13  ;;  %2398 = vadd.xlane.f32.xlu0 %v2397_v39  ;;  %v948_v39 = vadd.s32 128, %v4494_v60  ;;  %v2361_v13 = vmul.f32 %v6153_v24, %v2324_v5  ;;  %v1582_v34 = vsel %vm6173_vm13, %v6171_v12, 0.0  ;;  %v2326_v37 = vsel %vm6138_vm12, %v6171_v12, 0.0 }
 0x482   : > { %v6162_v29 = vpop.xlane.xlu1 %2467  ;;  %v6164_v27 = vpop.xlane.xlu0 %1723  ;;  %v7970_v5 = vrot.slane %v4883_v20, 7  ;;  %v1618_v54 = vmul.f32 %v6147_v50, %v1582_v34 }
 0x483   : > { %7963 = vst [vmem:[#allocation167_spill] sm:$0xff] %v6162_v29  ;;  %7964 = vst [vmem:[#allocation168_spill] sm:$0xff] %v6164_v27  ;;  %v2403_v29 = vsel %vm7753_vm4, %v2359_v6, 0.0  ;;  %v1616_v27 = vmul.f32 %v6147_v50, %v1580_v18  ;;  %v7971_v6 = vmov 0  ;;  %v2409_v2 = vsel %vm7753_vm4, %v2361_v13, 0.0 }
 0x484   : > { %v6193_v4 = vsel %vm7761_vm2, %v7970_v5, %v7969_v63  ;;  %v7972_v6 = vsel %vm6195_vm14, 4294967295, %v7971_v6  ;;  %v2363_v63 = vmul.f32 %v6153_v24, %v2326_v37  ;;  %v7979_v13 = vrot.slane %v4897_v38, 7 }
 0x485   : > { %1660 = vadd.xlane.f32.xlu1 %v1659_v41  ;;  %2404 = vadd.xlane.f32.xlu0 %v2403_v29  ;;  %7973 = vst [vmem:[#allocation169_spill] sm:$0xff] %v7972_v6  ;;  %v1080_v41 = vand.u32 15, %v948_v39  ;;  %v1665_v22 = vsel %vm7753_vm4, %v1616_v27, 0.0  ;;  %v1584_v21 = vsel %vm6195_vm14, %v6193_v4, 0.0  ;;  %v2328_v39 = vsel %vm6173_vm13, %v6193_v4, 0.0 }
 0x486   : > { %v6199_v29 = vpop.xlane.xlu1 %2473  ;;  %v6201_v18 = vpop.xlane.xlu0 %1729  ;;  %v7978_v27 = vrot.slane %v4915_v59, 7  ;;  %v7980_v37 = vmov 0  ;;  %v2365_v30 = vmul.f32 %v6153_v24, %v2328_v39 }
 0x487   : > { %7974 = vst [vmem:[#allocation170_spill] sm:$0xff] %v6199_v29  ;;  %7975 = vst [vmem:[#allocation171_spill] sm:$0xff] %v6201_v18  ;;  %vm6225_vm15 = vcmp.gt.s32.totalorder %v1080_v41, 0  ;;  %v1620_v18 = vmul.f32 %v6147_v50, %v1584_v21  ;;  %v7984_v21 = vrot.slane %v4911_v44, 7 }
 0x488   : > { %v6223_v34 = vsel %vm7761_vm2, %v7979_v13, %v7978_v27  ;;  %v7981_v37 = vsel %vm6225_vm15, 4294967295, %v7980_v37  ;;  %v7983_v27 = vrot.slane %v4929_v61, 7  ;;  %v954_v13 = vadd.s32 176, %v4494_v60 }
 0x489   : > { %1666 = vadd.xlane.f32.xlu1 %v1665_v22  ;;  %2410 = vadd.xlane.f32.xlu0 %v2409_v2  ;;  %7982 = vst [vmem:[#allocation174_spill] sm:$0xff] %v7981_v37  ;;  %v1094_v22 = vand.u32 15, %v950_v7  ;;  %v952_v2 = vadd.s32 160, %v4494_v60  ;;  %v1586_v41 = vsel %vm6225_vm15, %v6223_v34, 0.0  ;;  %v2330_v7 = vsel %vm6195_vm14, %v6223_v34, 0.0 }
 0x48a   : > { %v6214_v5 = vpop.xlane.xlu1 %2479  ;;  %v6216_v29 = vpop.xlane.xlu0 %2188  ;;  %v1677_v6 = vsel %vm7753_vm4, %v1620_v18, 0.0  ;;  %v2421_v61 = vsel %vm7753_vm4, %v2365_v30, 0.0  ;;  %v1622_v44 = vmul.f32 %v6147_v50, %v1586_v41  ;;  %v7992_v30 = vrot.slane %v4943_v43, 7 }
 0x48b   : > { %7976 = vst [vmem:[#allocation172_spill] sm:$0xff] %v6214_v5  ;;  %7977 = vst [vmem:[#allocation173_spill] sm:$0xff] %v6216_v29  ;;  %v1671_v5 = vsel %vm7753_vm4, %v1618_v54, 0.0  ;;  %v2415_v29 = vsel %vm7753_vm4, %v2363_v63, 0.0  ;;  %v6245_v54 = vsel %vm7761_vm2, %v7984_v21, %v7983_v27  ;;  %vm6251_vm0 = vcmp.gt.s32.totalorder %v1094_v22, 0 }
 0x48c   : > { %v2367_v27 = vmul.f32 %v6153_v24, %v2330_v7  ;;  %v2332_v21 = vsel %vm6225_vm15, %v6245_v54, 0.0  ;;  %v1588_v22 = vsel %vm6251_vm0, %v6245_v54, 0.0  ;;  %v7993_v18 = vrot.slane %v4925_v55, 7 }
 0x48d   : > { %1672 = vadd.xlane.f32.xlu1 %v1671_v5  ;;  %2416 = vadd.xlane.f32.xlu0 %v2415_v29  ;;  %v7987_v29 = vmov 0  ;;  %v1108_v5 = vand.u32 15, %v952_v2  ;;  %v7994_v7 = vmov 0  ;;  %v1624_v37 = vmul.f32 %v6147_v50, %v1588_v22 }
 0x48e   : > { %v6247_v63 = vpop.xlane.xlu1 %2954  ;;  %v6249_v39 = vpop.xlane.xlu0 %2194  ;;  %v7988_v29 = vsel %vm6251_vm0, 4294967295, %v7987_v29  ;;  %v6275_v41 = vsel %vm7761_vm2, %v7993_v18, %v7992_v30  ;;  %v7997_v30 = vrot.slane %v4957_v45, 7  ;;  %v958_v18 = vadd.s32 208, %v4494_v60 }
 0x48f   : > { %7985 = vst [vmem:[#allocation175_spill] sm:$0xff] %v6247_v63  ;;  %7986 = vst [vmem:[#allocation176_spill] sm:$0xff] %v6249_v39  ;;  %vm6277_vm3 = vcmp.gt.s32.totalorder %v1108_v5, 0  ;;  %v2369_v39 = vmul.f32 %v6153_v24, %v2332_v21  ;;  %v7998_v21 = vrot.slane %v4939_v0, 7  ;;  %v1689_v45 = vsel %vm7753_vm4, %v1624_v37, 0.0 }
 0x490   : > { %7989 = vst [vmem:[#allocation177_spill] sm:$0xff] %v7988_v29  ;;  %v7995_v7 = vsel %vm6277_vm3, 4294967295, %v7994_v7  ;;  %v1590_v5 = vsel %vm6277_vm3, %v6275_v41, 0.0  ;;  %v8006_v37 = vrot.slane %v4971_v49, 7 }
 0x491   : > { %1678 = vadd.xlane.f32.xlu1 %v1677_v6  ;;  %2422 = vadd.xlane.f32.xlu0 %v2421_v61  ;;  %7996 = vst [vmem:[#allocation180_spill] sm:$0xff] %v7995_v7  ;;  %v1122_v61 = vand.u32 15, %v954_v13  ;;  %v956_v6 = vadd.s32 192, %v4494_v60  ;;  %v2334_v13 = vsel %vm6251_vm0, %v6275_v41, 0.0  ;;  %v2433_v29 = vsel %vm7753_vm4, %v2369_v39, 0.0 }
 0x492   : > { %v6266_v2 = vpop.xlane.xlu1 %2960  ;;  %v6268_v63 = vpop.xlane.xlu0 %2200  ;;  %v1626_v0 = vmul.f32 %v6147_v50, %v1590_v5  ;;  %v8007_v39 = vrot.slane %v4953_v23, 7 }
 0x493   : > { %7990 = vst [vmem:[#allocation178_spill] sm:$0xff] %v6266_v2  ;;  %7991 = vst [vmem:[#allocation179_spill] sm:$0xff] %v6268_v63  ;;  %v1683_v2 = vsel %vm7753_vm4, %v1622_v44, 0.0  ;;  %v2427_v63 = vsel %vm7753_vm4, %v2367_v27, 0.0  ;;  %v6297_v44 = vsel %vm7761_vm2, %v7998_v21, %v7997_v30  ;;  %vm6303_vm5 = vcmp.gt.s32.totalorder %v1122_v61, 0 }
 0x494   : > { %v2371_v30 = vmul.f32 %v6153_v24, %v2334_v13  ;;  %v2336_v21 = vsel %vm6277_vm3, %v6297_v44, 0.0  ;;  %v1592_v61 = vsel %vm6303_vm5, %v6297_v44, 0.0  ;;  %v6327_v5 = vsel %vm7761_vm2, %v8007_v39, %v8006_v37 }
 0x495   : > { %1684 = vadd.xlane.f32.xlu1 %v1683_v2  ;;  %2428 = vadd.xlane.f32.xlu0 %v2427_v63  ;;  %v8001_v63 = vmov 0  ;;  %v1136_v2 = vand.u32 15, %v956_v6  ;;  %v8008_v13 = vmov 0  ;;  %v1628_v7 = vmul.f32 %v6147_v50, %v1592_v61 }
 0x496   : > { %v6299_v27 = vpop.xlane.xlu1 %2966  ;;  %v6301_v22 = vpop.xlane.xlu0 %2206  ;;  %v8002_v63 = vsel %vm6303_vm5, 4294967295, %v8001_v63  ;;  %v8011_v37 = vrot.slane %v4985_v28, 7  ;;  %v962_v39 = vadd.s32 240, %v4494_v60 }
 0x497   : > { %7999 = vst [vmem:[#allocation181_spill] sm:$0xff] %v6299_v27  ;;  %8000 = vst [vmem:[#allocation182_spill] sm:$0xff] %v6301_v22  ;;  %vm6329_vm1 = vcmp.gt.s32.totalorder %v1136_v2, 0  ;;  %v2373_v22 = vmul.f32 %v6153_v24, %v2336_v21  ;;  %v8012_v21 = vrot.slane %v4967_v16, 7  ;;  %v1701_v28 = vsel %vm7753_vm4, %v1628_v7, 0.0 }
 0x498   : > { %8003 = vst [vmem:[#allocation183_spill] sm:$0xff] %v8002_v63  ;;  %v8009_v13 = vsel %vm6329_vm1, 4294967295, %v8008_v13  ;;  %v1594_v2 = vsel %vm6329_vm1, %v6327_v5, 0.0  ;;  %v8020_v7 = vrot.slane %v4999_v31, 7 }
 0x499   : > { %1690 = vadd.xlane.f32.xlu1 %v1689_v45  ;;  %2434 = vadd.xlane.f32.xlu0 %v2433_v29  ;;  %8010 = vst [vmem:[#allocation186_spill] sm:$0xff] %v8009_v13  ;;  %v1150_v45 = vand.u32 15, %v958_v18  ;;  %v960_v29 = vadd.s32 224, %v4494_v60  ;;  %v2338_v18 = vsel %vm6303_vm5, %v6327_v5, 0.0  ;;  %v2445_v63 = vsel %vm7753_vm4, %v2373_v22, 0.0 }
 0x49a   : > { %v6318_v6 = vpop.xlane.xlu1 %2972  ;;  %v6320_v27 = vpop.xlane.xlu0 %2212  ;;  %v1630_v16 = vmul.f32 %v6147_v50, %v1594_v2  ;;  %v8021_v22 = vrot.slane %v4981_v15, 7 }
 0x49b   : > { %8004 = vst [vmem:[#allocation184_spill] sm:$0xff] %v6318_v6  ;;  %8005 = vst [vmem:[#allocation185_spill] sm:$0xff] %v6320_v27  ;;  %v1695_v6 = vsel %vm7753_vm4, %v1626_v0, 0.0  ;;  %v2439_v27 = vsel %vm7753_vm4, %v2371_v30, 0.0  ;;  %v6349_v0 = vsel %vm7761_vm2, %v8012_v21, %v8011_v37  ;;  %vm6355_vm6 = vcmp.gt.s32.totalorder %v1150_v45, 0 }
 0x49c   : > { %v2375_v37 = vmul.f32 %v6153_v24, %v2338_v18  ;;  %v2340_v21 = vsel %vm6329_vm1, %v6349_v0, 0.0  ;;  %v1596_v45 = vsel %vm6355_vm6, %v6349_v0, 0.0  ;;  %v6379_v2 = vsel %vm7761_vm2, %v8021_v22, %v8020_v7 }
 0x49d   : > { %1696 = vadd.xlane.f32.xlu1 %v1695_v6  ;;  %2440 = vadd.xlane.f32.xlu0 %v2439_v27  ;;  %v8015_v27 = vmov 0  ;;  %v1164_v6 = vand.u32 15, %v960_v29  ;;  %v8022_v18 = vmov 0  ;;  %vm8025_vm1 = vcmask 15360  }
 0x49e   : > { %v6351_v30 = vpop.xlane.xlu1 %2978  ;;  %v6353_v61 = vpop.xlane.xlu0 %2218  ;;  %v8016_v27 = vsel %vm6355_vm6, 4294967295, %v8015_v27  ;;  %vm8026_vm5 = vmmov %vm8025_vm1  ;;  %v1632_v13 = vmul.f32 %v6147_v50, %v1596_v45  ;;  %v8027_v7 = vrot.slane %v5013_v47, 7  ;;  %v935_v22 = vadd.s32 24, %v4494_v60 }
 0x49f   : > { %8013 = vst [vmem:[#allocation187_spill] sm:$0xff] %v6351_v30  ;;  %8014 = vst [vmem:[#allocation188_spill] sm:$0xff] %v6353_v61  ;;  %vm6381_vm4 = vcmp.gt.s32.totalorder %v1164_v6, 0  ;;  %v2377_v61 = vmul.f32 %v6153_v24, %v2340_v21  ;;  %v8028_v21 = vrot.slane %v4995_v1, 7 }
 0x4a0   : > { %8017 = vst [vmem:[#allocation189_spill] sm:$0xff] %v8016_v27  ;;  %v8023_v18 = vsel %vm6381_vm4, 4294967295, %v8022_v18  ;;  %v1598_v6 = vsel %vm6381_vm4, %v6379_v2, 0.0 }
 0x4a1   : > { %1702 = vadd.xlane.f32.xlu1 %v1701_v28  ;;  %2446 = vadd.xlane.f32.xlu0 %v2445_v63  ;;  %8024 = vst [vmem:[#allocation192_spill] sm:$0xff] %v8023_v18  ;;  %v1178_v28 = vand.u32 15, %v962_v39  ;;  %v933_v63 = vadd.s32 8, %v4494_v60  ;;  %v2342_v39 = vsel %vm6355_vm6, %v6379_v2, 0.0  ;;  %v2457_v27 = vsel %vm8026_vm5, %v2377_v61, 0.0  ;;  %vm8033_vm6 = vmmov %vm8026_vm5 }
 0x4a2   : > { %v6370_v29 = vpop.xlane.xlu1 %2984  ;;  %v6372_v30 = vpop.xlane.xlu0 %2224  ;;  %v1713_v47 = vsel %vm8033_vm6, %v1632_v13, 0.0  ;;  %v1634_v1 = vmul.f32 %v6147_v50, %v1598_v6 }
 0x4a3   : > { %8018 = vst [vmem:[#allocation190_spill] sm:$0xff] %v6370_v29  ;;  %8019 = vst [vmem:[#allocation191_spill] sm:$0xff] %v6372_v30  ;;  %v1707_v29 = vsel %vm8025_vm1, %v1630_v16, 0.0  ;;  %v2451_v30 = vsel %vm8026_vm5, %v2375_v37, 0.0  ;;  %v6401_v16 = vsel %vm7761_vm2, %v8028_v21, %v8027_v7  ;;  %vm6407_vm1 = vcmp.gt.s32.totalorder %v1178_v28, 0 }
 0x4a4   : > { %v2379_v7 = vmul.f32 %v6153_v24, %v2342_v39  ;;  %v2344_v21 = vsel %vm6381_vm4, %v6401_v16, 0.0  ;;  %v1600_v28 = vsel %vm6407_vm1, %v6401_v16, 0.0  ;;  %vm8035_vm2 = vcmask 1046528  }
 0x4a5   : > { %1708 = vadd.xlane.f32.xlu1 %v1707_v29  ;;  %2452 = vadd.xlane.f32.xlu0 %v2451_v30  ;;  %v8031_v30 = vmov 0  ;;  %v975_v29 = vand.u32 15, %v933_v63  ;;  %v8034_v63 = vrot.slane %v4821_v53, 1  ;;  %v8040_v39 = vrot.slane %v5120_v46, 7 }
 0x4a6   : > { %v6403_v37 = vpop.xlane.xlu1 %2990  ;;  %v6405_v45 = vpop.xlane.xlu0 %2230  ;;  %v8032_v30 = vsel %vm6407_vm1, 4294967295, %v8031_v30  ;;  %vm8042_vm5 = vcmask 1040384   ;;  %v937_v53 = vadd.s32 40, %v4494_v60 }
 0x4a7   : > { %8029 = vst [vmem:[#allocation193_spill] sm:$0xff] %v6403_v37  ;;  %8030 = vst [vmem:[#allocation194_spill] sm:$0xff] %v6405_v45  ;;  %v2016_v61 = vsel %vm8035_vm2, 0.0, %v8034_v63  ;;  %vm6429_vm6 = vcmp.lt.s32.totalorder %v975_v29, 15  ;;  %v989_v45 = vand.u32 15, %v935_v22  ;;  %v2381_v63 = vmul.f32 %v6153_v24, %v2344_v21 }
 0x4a8   : > { %vm8043_vm2 = vcmask 15360   ;;  %v1636_v29 = vmul.f32 %v6147_v50, %v1600_v28  ;;  %v2113_v18 = vsel %vm6429_vm6, %v2016_v61, 0.0  ;;  %v8047_v21 = vrot.slane %v4833_v56, 1  ;;  %v6471_v56 = vld [vmem:[%s7635_s5 + $0x2] ss:$0 sm:$0xff] }
 0x4a9   : > { %1714 = vadd.xlane.f32.xlu1 %v1713_v47  ;;  %2458 = vadd.xlane.f32.xlu0 %v2457_v27  ;;  %v8041_v47 = vrot.slane %v5009_v10, 7  ;;  %vm8044_vm4 = vmmov %vm8043_vm2  ;;  %v939_v28 = vadd.s32 56, %v4494_v60  ;;  %v2469_v61 = vsel %vm8043_vm2, %v2381_v63, 0.0 }
 0x4aa   : > { %v6425_v37 = vpop.xlane.xlu1 %2996  ;;  %v6427_v13 = vpop.xlane.xlu0 %2236 }
 0x4ab   : > { %8036 = vst [vmem:[#allocation195_spill] sm:$0xff] %v6425_v37  ;;  %8037 = vst [vmem:[#allocation196_spill] sm:$0xff] %v6427_v13  ;;  %v6438_v27 = vsel %vm8042_vm5, %v8041_v47, %v8040_v39  ;;  %v1719_v37 = vsel %vm8043_vm2, %v1634_v1, 0.0  ;;  %v2463_v13 = vsel %vm8044_vm4, %v2379_v7, 0.0  ;;  %v8048_v1 = vrot.slane %v4818_v3, 1 }
 0x4ac   : > { %v2346_v39 = vsel %vm6407_vm1, %v6438_v27, 0.0  ;;  %vm8049_vm4 = vcmask 1046528   ;;  %vm6461_vm5 = vcmp.lt.s32.totalorder %v989_v45, 15  ;;  %vm8052_vm1 = vmmov %vm8043_vm2  ;;  %v2150_v3 = vmul.f32 %v6471_v56, %v2113_v18 }
 0x4ad   : > { %1720 = vadd.xlane.f32.xlu1 %v1719_v37  ;;  %2464 = vadd.xlane.f32.xlu0 %v2463_v13  ;;  %v6459_v7 = vsel %vm8049_vm4, %v8048_v1, %v8047_v21  ;;  %v1003_v37 = vand.u32 15, %v937_v53  ;;  %v1725_v13 = vsel %vm8052_vm1, %v1636_v29, 0.0  ;;  %v2383_v21 = vmul.f32 %v6153_v24, %v2346_v39  ;;  %vm8056_vm1 = vmmov %vm8049_vm4 }
 0x4ae   : > { %v6450_v22 = vpop.xlane.xlu1 %3002  ;;  %v6452_v47 = vpop.xlane.xlu0 %2242  ;;  %v2882_v45 = vsel %vm6035_vm8, %v6057_v32, 0.0  ;;  %v2115_v53 = vsel %vm6461_vm5, %v6459_v7, 0.0  ;;  %v8054_v1 = vrot.slane %v4845_v25, 1  ;;  %v8055_v18 = vrot.slane %v7944_v8, 1  ;;  %vm8059_vm8 = vmmov %vm8043_vm2 }
 0x4af   : > { %8045 = vst [vmem:[#allocation197_spill] sm:$0xff] %v6450_v22  ;;  %8046 = vst [vmem:[#allocation198_spill] sm:$0xff] %v6452_v47  ;;  %vm6492_vm4 = vcmp.lt.s32.totalorder %v1003_v37, 15  ;;  %v1017_v32 = vand.u32 15, %v939_v28  ;;  %v941_v39 = vadd.s32 72, %v4494_v60  ;;  %v2184_v25 = vsel %vm8059_vm8, %v2150_v3, 0.0 }
 0x4b0   : > { %v6490_v24 = vsel %vm8056_vm1, %v8055_v18, %v8054_v1  ;;  %v2475_v8 = vsel %vm8043_vm2, %v2383_v21, 0.0  ;;  %v2152_v1 = vmul.f32 %v6471_v56, %v2115_v53  ;;  %v2884_v28 = vsel %vm6027_vm7, %v6079_v26, 0.0  ;;  %vm8065_vm7 = vmmov %vm8043_vm2 }
 0x4b1   : > { %1726 = vadd.xlane.f32.xlu1 %v1725_v13  ;;  %2470 = vadd.xlane.f32.xlu0 %v2469_v61  ;;  %v6500_v61 = vld [vmem:[%s7635_s5 + $0x6] ss:$0 sm:$0xff]  ;;  %v2117_v37 = vsel %vm6492_vm4, %v6490_v24, 0.0  ;;  %v8061_v3 = vrot.slane %v4859_v51, 1  ;;  %v8062_v21 = vrot.slane %v7953_v57, 1  ;;  %vm6523_vm8 = vcmp.lt.s32.totalorder %v1017_v32, 15 }
 0x4b2   : > { %v6481_v63 = vpop.xlane.xlu1 %3008  ;;  %v6483_v29 = vpop.xlane.xlu0 %2248  ;;  %v2918_v13 = vmul.f32 %v6500_v61, %v2882_v45  ;;  %v2190_v26 = vsel %vm8065_vm7, %v2152_v1, 0.0  ;;  %v2920_v51 = vmul.f32 %v6500_v61, %v2884_v28  ;;  %v2886_v57 = vsel %vm6059_vm9, %v6109_v17, 0.0  ;;  %vm8071_vm9 = vmmov %vm8065_vm7 }
 0x4b3   : > { %8053 = vst [vmem:[#allocation199_spill] sm:$0xff] %v6481_v63  ;;  %v6521_v45 = vsel %vm8056_vm1, %v8062_v21, %v8061_v3  ;;  %v8068_v1 = vrot.slane %v4855_v62, 1  ;;  %v945_v28 = vadd.s32 104, %v4494_v60  ;;  %v2922_v21 = vmul.f32 %v6500_v61, %v2886_v57 }
 0x4b4   : > { %v2950_v36 = vsel %vm8043_vm2, %v2918_v13, 0.0  ;;  %v2119_v32 = vsel %vm6523_vm8, %v6521_v45, 0.0  ;;  %v8067_v13 = vrot.slane %v4873_v35, 1  ;;  %v957_v22 = vadd.s32 200, %v4494_v60 }
 0x4b5   : > { %2185 = vadd.xlane.f32.xlu1 %v2184_v25  ;;  %2476 = vadd.xlane.f32.xlu0 %v2475_v8  ;;  %v1031_v25 = vand.u32 15, %v941_v39  ;;  %v943_v8 = vadd.s32 88, %v4494_v60  ;;  %v2156_v35 = vmul.f32 %v6471_v56, %v2119_v32  ;;  %v2962_v42 = vsel %vm8065_vm7, %v2922_v21, 0.0 }
 0x4b6   : > { %v6512_v18 = vpop.xlane.xlu1 %3014  ;;  %v6514_v63 = vpop.xlane.xlu0 %2254  ;;  %v8079_v21 = vrot.slane %v4901_v48, 1  ;;  %v2688_v6 = vsel %vm6492_vm4, %v6521_v45, 0.0 }
 0x4b7   : > { %8060 = vst [vmem:[#allocation200_spill] sm:$0xff] %v6512_v18  ;;  %v2154_v18 = vmul.f32 %v6471_v56, %v2117_v37  ;;  %v6547_v37 = vsel %vm8056_vm1, %v8068_v1, %v8067_v13  ;;  %vm6549_vm2 = vcmp.lt.s32.totalorder %v1031_v25, 15  ;;  %v1045_v17 = vand.u32 15, %v943_v8 }
 0x4b8   : > { %v2121_v62 = vsel %vm6549_vm2, %v6547_v37, 0.0  ;;  %v2888_v25 = vsel %vm6085_vm10, %v6131_v52, 0.0  ;;  %v1059_v1 = vand.u32 15, %v945_v28  ;;  %vm8077_vm10 = vmmov %vm8065_vm7  ;;  %v3244_v50 = vsel %vm6492_vm4, %v6547_v37, 0.0 }
 0x4b9   : > { %2191 = vadd.xlane.f32.xlu1 %v2190_v26  ;;  %2951 = vadd.xlane.f32.xlu0 %v2950_v36  ;;  %v2196_v36 = vsel %vm8071_vm9, %v2154_v18, 0.0  ;;  %v2956_v26 = vsel %vm8065_vm7, %v2920_v51, 0.0  ;;  %v8073_v18 = vrot.slane %v4887_v40, 1  ;;  %v8074_v51 = vrot.slane %v4869_v14, 1 }
 0x4ba   : > { %v6538_v39 = vpop.xlane.xlu1 %3020  ;;  %v6540_v3 = vpop.xlane.xlu0 %2260  ;;  %vm6575_vm9 = vcmp.lt.s32.totalorder %v1045_v17, 15  ;;  %v2202_v52 = vsel %vm8077_vm10, %v2156_v35, 0.0  ;;  %v2924_v40 = vmul.f32 %v6500_v61, %v2888_v25  ;;  %v2890_v14 = vsel %vm6111_vm11, %v6171_v12, 0.0  ;;  %vm8083_vm11 = vmmov %vm8077_vm10 }
 0x4bb   : > { %8066 = vst [vmem:[#allocation201_spill] sm:$0xff] %v6538_v39  ;;  %v6573_v57 = vsel %vm8056_vm1, %v8074_v51, %v8073_v18  ;;  %v8080_v35 = vrot.slane %v4883_v20, 1  ;;  %vm6601_vm7 = vcmp.lt.s32.totalorder %v1059_v1, 15  ;;  %v949_v25 = vadd.s32 136, %v4494_v60  ;;  %v8107_v39 = vld [vmem:[#allocation44_spill] sm:$0xff] }
 0x4bc   : > { %v2123_v17 = vsel %vm6575_vm9, %v6573_v57, 0.0  ;;  %v2926_v51 = vmul.f32 %v6500_v61, %v2890_v14  ;;  %v2892_v20 = vsel %vm6138_vm12, %v6193_v4, 0.0  ;;  %vm8089_vm12 = vmmov %vm8077_vm10  ;;  %v2692_v33 = vsel %vm6549_vm2, %v6573_v57, 0.0 }
 0x4bd   : > { %2197 = vadd.xlane.f32.xlu1 %v2196_v36  ;;  %2957 = vadd.xlane.f32.xlu0 %v2956_v26  ;;  %v947_v36 = vadd.s32 120, %v4494_v60  ;;  %v2158_v26 = vmul.f32 %v6471_v56, %v2121_v62  ;;  %v6599_v62 = vsel %vm8056_vm1, %v8080_v35, %v8079_v21  ;;  %v2160_v48 = vmul.f32 %v6471_v56, %v2123_v17 }
 0x4be   : > { %v6564_v8 = vpop.xlane.xlu1 %3026  ;;  %v6566_v13 = vpop.xlane.xlu0 %2266  ;;  %v2125_v1 = vsel %vm6601_vm7, %v6599_v62, 0.0  ;;  %v1087_v4 = vand.u32 15, %v949_v25  ;;  %v951_v17 = vadd.s32 152, %v4494_v60  ;;  %v2928_v35 = vmul.f32 %v6500_v61, %v2892_v20  ;;  %v8090_v20 = vld [vmem:[#allocation43_spill] sm:$0xff] }
 0x4bf   : > { %8072 = vst [vmem:[#allocation202_spill] sm:$0xff] %v6564_v8  ;;  %v1073_v12 = vand.u32 15, %v947_v36  ;;  %v3248_v53 = vsel %vm6549_vm2, %v6599_v62, 0.0 }
 0x4c0   : > { %v2980_v58 = vsel %vm8077_vm10, %v2928_v35, 0.0  ;;  %v8098_v35 = vrot.slane %v4943_v43, 1 }
 0x4c1   : > { %2203 = vadd.xlane.f32.xlu1 %v2202_v52  ;;  %2963 = vadd.xlane.f32.xlu0 %v2962_v42  ;;  %v2208_v42 = vsel %vm8083_vm11, %v2158_v26, 0.0  ;;  %v2968_v52 = vsel %vm8077_vm10, %v2924_v40, 0.0  ;;  %v8085_v26 = vrot.slane %v4915_v59, 1  ;;  %v8086_v40 = vrot.slane %v4897_v38, 1 }
 0x4c2   : > { %v6590_v28 = vpop.xlane.xlu1 %3032  ;;  %v6592_v18 = vpop.xlane.xlu0 %2272  ;;  %vm6627_vm11 = vcmp.lt.s32.totalorder %v1073_v12, 15  ;;  %v2162_v59 = vmul.f32 %v6471_v56, %v2125_v1  ;;  %v2894_v12 = vsel %vm6173_vm13, %v6223_v34, 0.0  ;;  %vm8096_vm13 = vmmov %vm8077_vm10 }
 0x4c3   : > { %8078 = vst [vmem:[#allocation203_spill] sm:$0xff] %v6590_v28  ;;  %v6625_v14 = vsel %vm8056_vm1, %v8086_v40, %v8085_v26  ;;  %v8092_v40 = vld [vmem:[#allocation42_spill] sm:$0xff] }
 0x4c4   : > { %v2127_v38 = vsel %vm6627_vm11, %v6625_v14, 0.0  ;;  %v2220_v34 = vsel %vm8096_vm13, %v2162_v59, 0.0  ;;  %v8099_v59 = vrot.slane %v4925_v55, 1  ;;  %v3250_v9 = vsel %vm6575_vm9, %v6625_v14, 0.0 }
 0x4c5   : > { %2209 = vadd.xlane.f32.xlu1 %v2208_v42  ;;  %2969 = vadd.xlane.f32.xlu0 %v2968_v52  ;;  %v2214_v42 = vsel %vm8089_vm12, %v2160_v48, 0.0  ;;  %v2974_v52 = vsel %vm8077_vm10, %v2926_v51, 0.0  ;;  %v8091_v48 = vrot.slane %v8090_v20, 1  ;;  %v8093_v51 = vrot.slane %v8092_v40, 1 }
 0x4c6   : > { %v6616_v36 = vpop.xlane.xlu1 %3038  ;;  %v6618_v21 = vpop.xlane.xlu0 %2753  ;;  %vm6653_vm12 = vcmp.lt.s32.totalorder %v1087_v4, 15  ;;  %v2164_v28 = vmul.f32 %v6471_v56, %v2127_v38  ;;  %v2930_v20 = vmul.f32 %v6500_v61, %v2894_v12  ;;  %v6677_v38 = vsel %vm8056_vm1, %v8099_v59, %v8098_v35 }
 0x4c7   : > { %8084 = vst [vmem:[#allocation204_spill] sm:$0xff] %v6616_v36  ;;  %v6651_v1 = vsel %vm8056_vm1, %v8093_v51, %v8091_v48  ;;  %v953_v36 = vadd.s32 168, %v4494_v60  ;;  %v2896_v48 = vsel %vm6195_vm14, %v6245_v54, 0.0  ;;  %vm8102_vm14 = vmmov %vm8096_vm13  ;;  %v3254_v11 = vsel %vm6627_vm11, %v6677_v38, 0.0 }
 0x4c8   : > { %v2129_v4 = vsel %vm6653_vm12, %v6651_v1, 0.0  ;;  %v2226_v40 = vsel %vm8102_vm14, %v2164_v28, 0.0  ;;  %v2986_v8 = vsel %vm8096_vm13, %v2930_v20, 0.0  ;;  %v8108_v20 = vrot.slane %v8107_v39, 1 }
 0x4c9   : > { %2215 = vadd.xlane.f32.xlu1 %v2214_v42  ;;  %2975 = vadd.xlane.f32.xlu0 %v2974_v52  ;;  %v1101_v52 = vand.u32 15, %v951_v17  ;;  %v1115_v54 = vand.u32 15, %v953_v36  ;;  %v2166_v43 = vmul.f32 %v6471_v56, %v2129_v4  ;;  %v2898_v36 = vsel %vm6225_vm15, %v6275_v41, 0.0  ;;  %vm8111_vm15 = vmmov %vm8096_vm13 }
 0x4ca   : > { %v6642_v25 = vpop.xlane.xlu1 %3306  ;;  %v6644_v26 = vpop.xlane.xlu0 %2759  ;;  %v3252_v32 = vsel %vm6601_vm7, %v6651_v1, 0.0 }
 0x4cb   : > { %vm6679_vm10 = vcmp.lt.s32.totalorder %v1101_v52, 15  ;;  %vm6705_vm14 = vcmp.lt.s32.totalorder %v1115_v54, 15  ;;  %v2232_v52 = vsel %vm8111_vm15, %v2166_v43, 0.0  ;;  %v8116_v43 = vrot.slane %v4953_v23, 1 }
 0x4cc   : > { %v2131_v55 = vsel %vm6679_vm10, %v6677_v38, 0.0 }
 0x4cd   : > { %2221 = vadd.xlane.f32.xlu1 %v2220_v34  ;;  %2981 = vadd.xlane.f32.xlu0 %v2980_v58  ;;  %v955_v58 = vadd.s32 184, %v4494_v60  ;;  %v2932_v34 = vmul.f32 %v6500_v61, %v2896_v48  ;;  %v8105_v48 = vld [vmem:[#allocation45_spill] sm:$0xff]  ;;  %v2168_v47 = vmul.f32 %v6471_v56, %v2131_v55 }
 0x4ce   : > { %v6668_v17 = vpop.xlane.xlu1 %3312  ;;  %v6670_v51 = vpop.xlane.xlu0 %2765  ;;  %v8106_v28 = vrot.slane %v8105_v48, 1  ;;  %v2934_v48 = vmul.f32 %v6500_v61, %v2898_v36  ;;  %v8117_v36 = vmov 0 }
 0x4cf   : > { %v2992_v41 = vsel %vm8096_vm13, %v2932_v34, 0.0  ;;  %v8115_v34 = vrot.slane %v4971_v49, 1 }
 0x4d0   : > { %v6703_v4 = vsel %vm8056_vm1, %v8108_v20, %v8106_v28  ;;  %v2900_v28 = vsel %vm6251_vm0, %v6297_v44, 0.0  ;;  %v1143_v44 = vand.u32 15, %v957_v22  ;;  %vm8119_vm0 = vmmov %vm8111_vm15  ;;  %v2902_v22 = vsel %vm6277_vm3, %v6327_v5, 0.0 }
 0x4d1   : > { %2227 = vadd.xlane.f32.xlu1 %v2226_v40  ;;  %2987 = vadd.xlane.f32.xlu0 %v2986_v8  ;;  %v1129_v40 = vand.u32 15, %v955_v58  ;;  %v2133_v54 = vsel %vm6705_vm14, %v6703_v4, 0.0  ;;  %v6729_v55 = vsel %vm8056_vm1, %v8116_v43, %v8115_v34  ;;  %v2238_v39 = vsel %vm8119_vm0, %v2168_v47, 0.0  ;;  %vm8120_vm15 = vmmov %vm8119_vm0 }
 0x4d2   : > { %v6694_v35 = vpop.xlane.xlu1 %3318  ;;  %v6696_v59 = vpop.xlane.xlu0 %2771  ;;  %v2170_v49 = vmul.f32 %v6471_v56, %v2133_v54  ;;  %vm6757_vm0 = vcmp.lt.s32.totalorder %v1143_v44, 15  ;;  %vm8129_vm3 = vmmov %vm8120_vm15  ;;  %v3256_v19 = vsel %vm6653_vm12, %v6703_v4, 0.0  ;;  %v3258_v42 = vsel %vm6679_vm10, %v6729_v55, 0.0 }
 0x4d3   : > { %8104 = vst [vmem:[#allocation43_spill] sm:$0xff] %v6694_v35  ;;  %vm6731_vm13 = vcmp.lt.s32.totalorder %v1129_v40, 15  ;;  %v961_v35 = vadd.s32 232, %v4494_v60 }
 0x4d4   : > { %v8118_v36 = vsel %vm6731_vm13, 4294967295, %v8117_v36  ;;  %v2135_v23 = vsel %vm6731_vm13, %v6729_v55, 0.0  ;;  %v2244_v40 = vsel %vm8129_vm3, %v2170_v49, 0.0  ;;  %v8135_v49 = vrot.slane %v4981_v15, 1 }
 0x4d5   : > { %2233 = vadd.xlane.f32.xlu1 %v2232_v52  ;;  %2993 = vadd.xlane.f32.xlu0 %v2992_v41  ;;  %v959_v41 = vadd.s32 216, %v4494_v60  ;;  %v2936_v52 = vmul.f32 %v6500_v61, %v2900_v28  ;;  %v8123_v28 = vld [vmem:[#allocation47_spill] sm:$0xff] }
 0x4d6   : > { %v6720_v58 = vpop.xlane.xlu1 %3324  ;;  %v6722_v20 = vpop.xlane.xlu0 %2777  ;;  %v8124_v47 = vrot.slane %v8123_v28, 1  ;;  %v2938_v28 = vmul.f32 %v6500_v61, %v2902_v22  ;;  %v8136_v22 = vmov 0 }
 0x4d7   : > { %8113 = vst [vmem:[#allocation42_spill] sm:$0xff] %v6720_v58  ;;  %8114 = vst [vmem:[#allocation169_spill] sm:$0xff] %v6722_v20  ;;  %v2998_v58 = vsel %vm8120_vm15, %v2934_v48, 0.0  ;;  %v8125_v20 = vld [vmem:[#allocation46_spill] sm:$0xff]  ;;  %v3004_v5 = vsel %vm8120_vm15, %v2936_v52, 0.0  ;;  %v8134_v52 = vrot.slane %v4999_v31, 1 }
 0x4d8   : > { %v8126_v48 = vrot.slane %v8125_v20, 1  ;;  %v8130_v20 = vld [vmem:[#allocation183_spill] sm:$0xff] }
 0x4d9   : > { %2239 = vadd.xlane.f32.xlu1 %v2238_v39  ;;  %2999 = vadd.xlane.f32.xlu0 %v2998_v58  ;;  %v8127_v58 = vmov 0  ;;  %v1157_v39 = vand.u32 15, %v959_v41  ;;  %vm8131_vm13 = vnez %v8130_v20 }
 0x4da   : > { %v6746_v34 = vpop.xlane.xlu1 %3330  ;;  %v6748_v43 = vpop.xlane.xlu0 %2783  ;;  %v6755_v54 = vsel %vm8056_vm1, %v8126_v48, %v8124_v47  ;;  %v8128_v58 = vsel %vm6757_vm0, 4294967295, %v8127_v58  ;;  %v2904_v47 = vsel %vm8131_vm13, %v6349_v0, 0.0  ;;  %v1171_v0 = vand.u32 15, %v961_v35  ;;  %vm8138_vm13 = vmmov %vm8129_vm3 }
 0x4db   : > { %8122 = vst [vmem:[#allocation174_spill] sm:$0xff] %v6746_v34  ;;  %v2172_v34 = vmul.f32 %v6471_v56, %v2135_v23  ;;  %v2137_v44 = vsel %vm6757_vm0, %v6755_v54, 0.0  ;;  %v6781_v23 = vsel %vm8056_vm1, %v8135_v49, %v8134_v52  ;;  %vm6783_vm15 = vcmp.lt.s32.totalorder %v1157_v39, 15  ;;  %v8139_v39 = vld [vmem:[#allocation186_spill] sm:$0xff]  ;;  %v8145_v49 = vld [vmem:[#allocation48_spill] sm:$0xff] }
 0x4dc   : > { %v8137_v22 = vsel %vm6783_vm15, 4294967295, %v8136_v22  ;;  %v2174_v31 = vmul.f32 %v6471_v56, %v2137_v44  ;;  %v2139_v15 = vsel %vm6783_vm15, %v6781_v23, 0.0  ;;  %vm8140_vm1 = vnez %v8139_v39 }
 0x4dd   : > { %2245 = vadd.xlane.f32.xlu1 %v2244_v40  ;;  %3005 = vadd.xlane.f32.xlu0 %v3004_v5  ;;  %v963_v5 = vadd.s32 248, %v4494_v60  ;;  %v2940_v40 = vmul.f32 %v6500_v61, %v2904_v47  ;;  %v2250_v20 = vsel %vm8138_vm13, %v2172_v34, 0.0  ;;  %v2906_v35 = vsel %vm8140_vm1, %v6379_v2, 0.0  ;;  %v8143_v47 = vld [vmem:[#allocation49_spill] sm:$0xff] }
 0x4de   : > { %v6772_v41 = vpop.xlane.xlu1 %3336  ;;  %v6774_v48 = vpop.xlane.xlu0 %2789  ;;  %v8144_v34 = vrot.slane %v8143_v47, 1  ;;  %vm8147_vm13 = vcmask 1046528   ;;  %vm8150_vm15 = vcmask 15360   ;;  %v2176_v39 = vmul.f32 %v6471_v56, %v2139_v15  ;;  %v8152_v47 = vld [vmem:[#allocation189_spill] sm:$0xff] }
 0x4df   : > { %8132 = vst [vmem:[#allocation45_spill] sm:$0xff] %v6772_v41  ;;  %8133 = vst [vmem:[#allocation44_spill] sm:$0xff] %v6774_v48  ;;  %v3010_v41 = vsel %vm8129_vm3, %v2938_v28, 0.0  ;;  %v8146_v28 = vrot.slane %v8145_v49, 1  ;;  %vm6809_vm3 = vcmp.lt.s32.totalorder %v1171_v0, 15  ;;  %v3016_v48 = vsel %vm8150_vm15, %v2940_v40, 0.0 }
 0x4e0   : > { %vm8151_vm0 = vmmov %vm8150_vm15  ;;  %vm8153_vm1 = vnez %v8152_v47  ;;  %v8156_v40 = vrot.slane %v5120_v46, 1  ;;  %v8163_v46 = vld [vmem:[#allocation192_spill] sm:$0xff]  ;;  %v3260_v12 = vsel %vm6705_vm14, %v6755_v54, 0.0 }
 0x4e1   : > { %2251 = vadd.xlane.f32.xlu1 %v2250_v20  ;;  %3011 = vadd.xlane.f32.xlu0 %v3010_v41  ;;  %v6807_v44 = vsel %vm8147_vm13, %v8146_v28, %v8144_v34  ;;  %v8148_v41 = vmov 0  ;;  %v1185_v20 = vand.u32 15, %v963_v5  ;;  %v2256_v2 = vsel %vm8151_vm0, %v2174_v31, 0.0  ;;  %vm8158_vm0 = vmmov %vm8147_vm13 }
 0x4e2   : > { %v6798_v52 = vpop.xlane.xlu1 %3342  ;;  %v6800_v60 = vpop.xlane.xlu0 %2795  ;;  %v8149_v41 = vsel %vm6809_vm3, 4294967295, %v8148_v41  ;;  %v2908_v49 = vsel %vm8153_vm1, %v6401_v16, 0.0  ;;  %v2141_v0 = vsel %vm6809_vm3, %v6807_v44, 0.0  ;;  %v8157_v31 = vrot.slane %v5009_v10, 1 }
 0x4e3   : > { %8141 = vst [vmem:[#allocation177_spill] sm:$0xff] %v6798_v52  ;;  %8142 = vst [vmem:[#allocation180_spill] sm:$0xff] %v6800_v60  ;;  %v2942_v52 = vmul.f32 %v6500_v61, %v2906_v35  ;;  %vm6834_vm15 = vcmp.lt.s32.totalorder %v1185_v20, 15  ;;  %v2944_v16 = vmul.f32 %v6500_v61, %v2908_v49  ;;  %vm8161_vm13 = vcmask 15360   ;;  %v8167_v49 = vld [vmem:[#allocation50_spill] sm:$0xff] }
 0x4e4   : > { %v6832_v15 = vsel %vm8158_vm0, %v8157_v31, %v8156_v40  ;;  %vm8162_vm1 = vmmov %vm8161_vm13  ;;  %vm8164_vm0 = vnez %v8163_v46 }
 0x4e5   : > { %2257 = vadd.xlane.f32.xlu1 %v2256_v2  ;;  %3017 = vadd.xlane.f32.xlu0 %v3016_v48  ;;  %v2262_v48 = vsel %vm8161_vm13, %v2176_v39, 0.0  ;;  %v3022_v28 = vsel %vm8162_vm1, %v2942_v52, 0.0  ;;  %v2178_v2 = vmul.f32 %v6471_v56, %v2141_v0  ;;  %v2143_v10 = vsel %vm6834_vm15, %v6832_v15, 0.0  ;;  %vm8170_vm3 = vmmov %vm8162_vm1 }
 0x4e6   : > { %v6823_v34 = vpop.xlane.xlu1 %3348  ;;  %v6825_v5 = vpop.xlane.xlu0 %2801  ;;  %v2910_v20 = vsel %vm8164_vm0, %v6438_v27, 0.0  ;;  %v8168_v39 = vrot.slane %v8167_v49, 7  ;;  %vm8169_vm13 = vcmask 1040384   ;;  %v3028_v0 = vsel %vm8162_vm1, %v2944_v16, 0.0  ;;  %v6871_v16 = vld [vmem:[%s7635_s5 + $0x5] ss:$0 sm:$0xff] }
 0x4e7   : > { %8154 = vst [vmem:[#allocation47_spill] sm:$0xff] %v6823_v34  ;;  %8155 = vst [vmem:[#allocation46_spill] sm:$0xff] %v6825_v5  ;;  %v2268_v31 = vsel %vm8170_vm3, %v2178_v2, 0.0  ;;  %v2684_v27 = vsel %vm6429_vm6, %v6459_v7, 0.0  ;;  %vm8171_vm0 = vnez %v8032_v30  ;;  %v2686_v30 = vsel %vm6461_vm5, %v6490_v24, 0.0 }
 0x4e8   : > { %v2881_v52 = vsel %vm8169_vm13, %v8168_v39, 0.0  ;;  %vm8174_vm3 = vmmov %vm8162_vm1 }
 0x4e9   : > { %2263 = vadd.xlane.f32.xlu1 %v2262_v48  ;;  %3023 = vadd.xlane.f32.xlu0 %v3022_v28  ;;  %v2180_v48 = vmul.f32 %v6471_v56, %v2143_v10  ;;  %v2946_v28 = vmul.f32 %v6500_v61, %v2910_v20  ;;  %v2912_v46 = vsel %vm8171_vm0, %v2881_v52, 0.0  ;;  %v2721_v56 = vmul.f32 %v6871_v16, %v2684_v27  ;;  %vm8175_vm13 = vmmov %vm8162_vm1 }
 0x4ea   : > { %v6848_v47 = vpop.xlane.xlu1 %3354  ;;  %v6850_v40 = vpop.xlane.xlu0 %2807  ;;  %v2948_v10 = vmul.f32 %v6500_v61, %v2912_v46  ;;  %v3240_v20 = vsel %vm6429_vm6, %v6490_v24, 0.0  ;;  %vm8177_vm0 = vmmov %vm8162_vm1  ;;  %v3242_v24 = vsel %vm6461_vm5, %v6521_v45, 0.0 }
 0x4eb   : > { %8165 = vst [vmem:[#allocation183_spill] sm:$0xff] %v6848_v47  ;;  %8166 = vst [vmem:[#allocation186_spill] sm:$0xff] %v6850_v40  ;;  %v2274_v2 = vsel %vm8174_vm3, %v2180_v48, 0.0  ;;  %v3034_v7 = vsel %vm8175_vm13, %v2946_v28, 0.0  ;;  %v2755_v48 = vsel %vm8162_vm1, %v2721_v56, 0.0  ;;  %v8226_v40 = vld [vmem:[#allocation114_spill] sm:$0xff] }
 0x4ec   : > { %v3040_v61 = vsel %vm8177_vm0, %v2948_v10, 0.0  ;;  %v6893_v28 = vld [vmem:[%s7635_s5 + $0x8] ss:$0 sm:$0xff]  ;;  %vm8179_vm6 = vmmov %vm8177_vm0  ;;  %v2725_v10 = vmul.f32 %v6871_v16, %v2688_v6 }
 0x4ed   : > { %2269 = vadd.xlane.f32.xlu1 %v2268_v31  ;;  %3029 = vadd.xlane.f32.xlu0 %v3028_v0  ;;  %v2723_v31 = vmul.f32 %v6871_v16, %v2686_v30  ;;  %v3275_v27 = vmul.f32 %v6893_v28, %v3240_v20  ;;  %vm8180_vm3 = vmmov %vm8177_vm0  ;;  %v3277_v30 = vmul.f32 %v6893_v28, %v3242_v24  ;;  %v2690_v20 = vsel %vm6523_vm8, %v6547_v37, 0.0 }
 0x4ee   : > { %v6864_v47 = vpop.xlane.xlu1 %3360  ;;  %v6866_v39 = vpop.xlane.xlu0 %2813  ;;  %vm8182_vm5 = vmmov %vm8177_vm0  ;;  %v2727_v6 = vmul.f32 %v6871_v16, %v2690_v20  ;;  %v3279_v24 = vmul.f32 %v6893_v28, %v3244_v50  ;;  %v3246_v37 = vsel %vm6523_vm8, %v6573_v57, 0.0  ;;  %v2729_v20 = vmul.f32 %v6871_v16, %v2692_v33 }
 0x4ef   : > { %8172 = vst [vmem:[#allocation49_spill] sm:$0xff] %v6864_v47  ;;  %8173 = vst [vmem:[#allocation48_spill] sm:$0xff] %v6866_v39  ;;  %v3281_v50 = vmul.f32 %v6893_v28, %v3246_v37  ;;  %v3283_v33 = vmul.f32 %v6893_v28, %v3248_v53  ;;  %v2696_v37 = vsel %vm6601_vm7, %v6625_v14, 0.0  ;;  %v2698_v53 = vsel %vm6627_vm11, %v6651_v1, 0.0 }
 0x4f0   : > { %vm8183_vm13 = vmmov %vm8177_vm0 }
 0x4f1   : > { %2275 = vadd.xlane.f32.xlu1 %v2274_v2  ;;  %3035 = vadd.xlane.f32.xlu0 %v3034_v7  ;;  %v2761_v2 = vsel %vm8179_vm6, %v2723_v31, 0.0  ;;  %v3308_v7 = vsel %vm8180_vm3, %v3275_v27, 0.0  ;;  %v4158_v31 = vmov 0   ;;  %v3314_v27 = vsel %vm8183_vm13, %v3277_v30, 0.0  ;;  %vm8185_vm4 = vmmov %vm8177_vm0 }
 0x4f2   : > { %v6883_v52 = vpop.xlane.xlu1 %3366  ;;  %v6885_v0 = vpop.xlane.xlu0 %2819  ;;  %4003 = vset.pattern.permute.xlu0 %v4158_v31  ;;  %4004 = vset.pattern.permute.xlu1 %v4158_v31  ;;  %vm8186_vm1 = vmmov %vm8177_vm0  ;;  %v2694_v31 = vsel %vm6575_vm9, %v6599_v62, 0.0 }
 0x4f3   : > { %8176 = vst [vmem:[#allocation189_spill] sm:$0xff] %v6883_v52  ;;  %v3320_v30 = vsel %vm8186_vm1, %v3279_v24, 0.0  ;;  %vm8189_vm8 = vmmov %vm8177_vm0  ;;  %v2731_v24 = vmul.f32 %v6871_v16, %v2694_v31  ;;  %v3285_v31 = vmul.f32 %v6893_v28, %v3250_v9  ;;  %v2700_v9 = vsel %vm6653_vm12, %v6677_v38, 0.0 }
 0x4f4   : > { %vm8190_vm2 = vmmov %vm8177_vm0  ;;  %vm8200_vm1 = vnez %v8118_v36 }
 0x4f5   : > { %2756 = vadd.xlane.f32.xlu1 %v2755_v48  ;;  %3041 = vadd.xlane.f32.xlu0 %v3040_v61  ;;  %v2767_v61 = vsel %vm8182_vm5, %v2725_v10, 0.0  ;;  %v2773_v10 = vsel %vm8185_vm4, %v2727_v6, 0.0  ;;  %v3326_v6 = vsel %vm8177_vm0, %v3281_v50, 0.0  ;;  %vm8191_vm6 = vmmov %vm8177_vm0  ;;  %v2733_v50 = vmul.f32 %v6871_v16, %v2696_v37 }
 0x4f6   : > { %v6902_v46 = vpop.xlane.xlu1 %3372  ;;  %v6904_v56 = vpop.xlane.xlu0 %2825  ;;  %vm8192_vm9 = vmmov %vm8177_vm0  ;;  %v3287_v37 = vmul.f32 %v6893_v28, %v3252_v32  ;;  %v2702_v32 = vsel %vm6679_vm10, %v6703_v4, 0.0  ;;  %v3262_v8 = vsel %vm8200_vm1, %v6781_v23, 0.0 }
 0x4f7   : > { %8178 = vst [vmem:[#allocation192_spill] sm:$0xff] %v6902_v46  ;;  %vm8193_vm3 = vmmov %vm8177_vm0 }
 0x4f8   : > { %vm8194_vm7 = vmmov %vm8177_vm0 }
 0x4f9   : > { %2762 = vadd.xlane.f32.xlu1 %v2761_v2  ;;  %3309 = vadd.xlane.f32.xlu0 %v3308_v7  ;;  %vm8195_vm5 = vmmov %vm8177_vm0 }
 0x4fa   : > { %v6916_v45 = vpop.xlane.xlu1 %3378  ;;  %v6918_v48 = vpop.xlane.xlu0 %2831  ;;  %vm8196_vm11 = vmmov %vm8177_vm0 }
 0x4fb   : > { %8181 = vst [vmem:[#allocation50_spill] sm:$0xff] %v6916_v45  ;;  %vm8197_vm13 = vmmov %vm8177_vm0 }
 0x4fc   : > { %vm8198_vm12 = vmmov %vm8177_vm0 }
 0x4fd   : > { %2768 = vadd.xlane.f32.xlu1 %v2767_v61  ;;  %3315 = vadd.xlane.f32.xlu0 %v3314_v27  ;;  %v2779_v27 = vsel %vm8189_vm8, %v2729_v20, 0.0  ;;  %v3332_v20 = vsel %vm8191_vm6, %v3283_v33, 0.0  ;;  %v2735_v33 = vmul.f32 %v6871_v16, %v2698_v53  ;;  %v3289_v53 = vmul.f32 %v6893_v28, %v3254_v11  ;;  %vm8199_vm4 = vmmov %vm8177_vm0 }
 0x4fe   : > { %v6930_v2 = vpop.xlane.xlu1 %3384  ;;  %v6932_v7 = vpop.xlane.xlu0 %2837  ;;  %v2704_v11 = vsel %vm6705_vm14, %v6729_v55, 0.0  ;;  %vm8201_vm10 = vmmov %vm8177_vm0  ;;  %vm8205_vm6 = vnez %v8137_v22 }
 0x4ff   : > { %8184 = vst [vmem:[#allocation205_spill] sm:$0xff] %v6930_v2  ;;  %vm8202_vm8 = vmmov %vm8177_vm0  ;;  %vm8203_vm0 = vnez %v8128_v58  ;;  %v3266_v58 = vsel %vm8205_vm6, %v6832_v15, 0.0 }
 0x500   : > { %vm8204_vm14 = vmmov %vm8190_vm2  ;;  %v3264_v36 = vsel %vm8203_vm0, %v6807_v44, 0.0 }
 0x501   : > { %2774 = vadd.xlane.f32.xlu1 %v2773_v10  ;;  %3321 = vadd.xlane.f32.xlu0 %v3320_v30  ;;  %v2785_v30 = vsel %vm8190_vm2, %v2731_v24, 0.0  ;;  %v3338_v24 = vsel %vm8193_vm3, %v3285_v31, 0.0  ;;  %v2737_v31 = vmul.f32 %v6871_v16, %v2700_v9  ;;  %v3291_v9 = vmul.f32 %v6893_v28, %v3256_v19  ;;  %vm8207_vm3 = vmmov %vm8190_vm2 }
 0x502   : > { %v6944_v57 = vpop.xlane.xlu1 %3390  ;;  %v6946_v61 = vpop.xlane.xlu0 %2843  ;;  %v2706_v19 = vsel %vm8200_vm1, %v6755_v54, 0.0  ;;  %vm8220_vm1 = vmmov %vm8190_vm2 }
 0x503   : > { %8187 = vst [vmem:[#allocation206_spill] sm:$0xff] %v6944_v57  ;;  %8188 = vst [vmem:[#allocation207_spill] sm:$0xff] %v6946_v61 }
 0x505   : > { %2780 = vadd.xlane.f32.xlu1 %v2779_v27  ;;  %3327 = vadd.xlane.f32.xlu0 %v3326_v6  ;;  %v2791_v6 = vsel %vm8192_vm9, %v2733_v50, 0.0  ;;  %v3344_v50 = vsel %vm8195_vm5, %v3287_v37, 0.0  ;;  %v2739_v37 = vmul.f32 %v6871_v16, %v2702_v32  ;;  %v3293_v32 = vmul.f32 %v6893_v28, %v3258_v42  ;;  %vm8206_vm9 = vmmov %vm8190_vm2 }
 0x506   : > { %v6958_v62 = vpop.xlane.xlu1 %1642  ;;  %v6960_v10 = vpop.xlane.xlu0 %2386  ;;  %v2708_v42 = vsel %vm8203_vm0, %v6781_v23, 0.0  ;;  %vm8211_vm5 = vcmask 1046528  }
 0x509   : > { %2786 = vadd.xlane.f32.xlu1 %v2785_v30  ;;  %3333 = vadd.xlane.f32.xlu0 %v3332_v20  ;;  %v2797_v20 = vsel %vm8194_vm7, %v2735_v33, 0.0  ;;  %v3350_v33 = vsel %vm8197_vm13, %v3289_v53, 0.0  ;;  %v2741_v53 = vmul.f32 %v6871_v16, %v2704_v11  ;;  %v3295_v11 = vmul.f32 %v6893_v28, %v3260_v12  ;;  %vm8213_vm13 = vmmov %vm8190_vm2 }
 0x50a   : > { %v6972_v14 = vpop.xlane.xlu1 %1648  ;;  %v6974_v27 = vpop.xlane.xlu0 %2392  ;;  %v2710_v12 = vsel %vm8205_vm6, %v6807_v44, 0.0  ;;  %vm8208_vm7 = vnez %v8149_v41  ;;  %v3304_v41 = vmul.f32 0.0, %v6893_v28 }
 0x50d   : > { %2792 = vadd.xlane.f32.xlu1 %v2791_v6  ;;  %3339 = vadd.xlane.f32.xlu0 %v3338_v24  ;;  %v2803_v24 = vsel %vm8196_vm11, %v2737_v31, 0.0  ;;  %v3356_v31 = vsel %vm8199_vm4, %v3291_v9, 0.0  ;;  %v2743_v9 = vmul.f32 %v6871_v16, %v2706_v19  ;;  %v3297_v19 = vmul.f32 %v6893_v28, %v3262_v8  ;;  %vm8212_vm11 = vmmov %vm8190_vm2 }
 0x50e   : > { %v6986_v1 = vpop.xlane.xlu1 %1654  ;;  %v6988_v30 = vpop.xlane.xlu0 %2398  ;;  %v2712_v8 = vsel %vm8208_vm7, %v6832_v15, 0.0  ;;  %vm8217_vm4 = vmmov %vm8190_vm2 }
 0x511   : > { %2798 = vadd.xlane.f32.xlu1 %v2797_v20  ;;  %3345 = vadd.xlane.f32.xlu0 %v3344_v50  ;;  %v2809_v50 = vsel %vm8198_vm12, %v2739_v37, 0.0  ;;  %v3362_v37 = vsel %vm8202_vm8, %v3293_v32, 0.0  ;;  %v2745_v32 = vmul.f32 %v6871_v16, %v2708_v42  ;;  %v3299_v42 = vmul.f32 %v6893_v28, %v3264_v36  ;;  %vm8216_vm12 = vmmov %vm8190_vm2 }
 0x512   : > { %v7000_v38 = vpop.xlane.xlu1 %1660  ;;  %v7002_v6 = vpop.xlane.xlu0 %2404  ;;  %v2749_v36 = vmul.f32 %v6871_v16, %v2712_v8  ;;  %vm8424_vm8 = vcmask 261120  }
 0x513   : > { %vm8426_vm0 = vmmov %vm8424_vm8 }
 0x514   : > { %vm8432_vm6 = vmmov %vm8426_vm0 }
 0x515   : > { %2804 = vadd.xlane.f32.xlu1 %v2803_v24  ;;  %3351 = vadd.xlane.f32.xlu0 %v3350_v33  ;;  %v2815_v33 = vsel %vm8201_vm10, %v2741_v53, 0.0  ;;  %v3368_v53 = vsel %vm8190_vm2, %v3295_v11, 0.0  ;;  %v2747_v11 = vmul.f32 %v6871_v16, %v2710_v12  ;;  %v3380_v12 = vsel %vm8213_vm13, %v3299_v42, 0.0  ;;  %vm8221_vm10 = vmmov %vm8220_vm1 }
 0x516   : > { %v7014_v4 = vpop.xlane.xlu1 %1666  ;;  %v7016_v20 = vpop.xlane.xlu0 %2410  ;;  %vm8444_vm13 = vmmov %vm8426_vm0 }
 0x519   : > { %2810 = vadd.xlane.f32.xlu1 %v2809_v50  ;;  %3357 = vadd.xlane.f32.xlu0 %v3356_v31  ;;  %v2821_v31 = vsel %vm8204_vm14, %v2743_v9, 0.0  ;;  %v3374_v9 = vsel %vm8207_vm3, %v3297_v19, 0.0  ;;  %v2833_v19 = vsel %vm8212_vm11, %v2747_v11, 0.0  ;;  %v2839_v11 = vsel %vm8216_vm12, %v2749_v36, 0.0  ;;  %vm8428_vm14 = vmmov %vm8426_vm0 }
 0x51a   : > { %v7028_v55 = vpop.xlane.xlu1 %1672  ;;  %v7030_v24 = vpop.xlane.xlu0 %2416  ;;  %vm8436_vm3 = vmmov %vm8426_vm0 }
 0x51b   : > { %vm8443_vm11 = vmmov %vm8426_vm0 }
 0x51c   : > { %vm8447_vm12 = vmmov %vm8426_vm0 }
 0x51d   : > { %2816 = vadd.xlane.f32.xlu1 %v2815_v33  ;;  %3363 = vadd.xlane.f32.xlu0 %v3362_v37  ;;  %v2827_v37 = vsel %vm8206_vm9, %v2745_v32, 0.0  ;;  %vm8435_vm9 = vmmov %vm8426_vm0 }
 0x51e   : > { %v7042_v54 = vpop.xlane.xlu1 %1678  ;;  %v7044_v50 = vpop.xlane.xlu0 %2422 }
 0x521   : > { %2822 = vadd.xlane.f32.xlu1 %v2821_v31  ;;  %3369 = vadd.xlane.f32.xlu0 %v3368_v53  ;;  %v8210_v53 = vrot.slane %v8167_v49, 1 }
 0x522   : > { %v7056_v23 = vpop.xlane.xlu1 %1684  ;;  %v7058_v33 = vpop.xlane.xlu0 %2428 }
 0x523   : > { %v2682_v32 = vsel %vm8211_vm5, %v8210_v53, 0.0  ;;  %vm8440_vm5 = vmmov %vm8426_vm0 }
 0x524   : > { %v2714_v22 = vsel %vm6834_vm15, %v2682_v32, 0.0  ;;  %v3268_v15 = vsel %vm8208_vm7, %v2682_v32, 0.0  ;;  %v7096_v32 = vld [vmem:[#allocation2] ss:$0 sm:$0xff]  ;;  %vm8219_vm15 = vmmov %vm8190_vm2 }
 0x525   : > { %2828 = vadd.xlane.f32.xlu1 %v2827_v37  ;;  %3375 = vadd.xlane.f32.xlu0 %v3374_v9  ;;  %v3301_v37 = vmul.f32 %v6893_v28, %v3266_v58  ;;  %v2751_v8 = vmul.f32 %v6871_v16, %v2714_v22  ;;  %v3303_v58 = vmul.f32 %v6893_v28, %v3268_v15  ;;  %v3395_v16 = vsel %vm8221_vm10, %v3304_v41, 0.0  ;;  %v8222_v22 = vld [vmem:[#allocation35_spill] sm:$0xff]  ;;  %v8223_v28 = vld [vmem:[#allocation36_spill] sm:$0xff]  ;;  %vm8430_vm2 = vmmov %vm8426_vm0 }
 0x526   : > { %v7070_v44 = vpop.xlane.xlu1 %1690  ;;  %v7072_v31 = vpop.xlane.xlu0 %2434  ;;  %v1731_v15 = vadd.f32 %v7096_v32, %v8222_v22  ;;  %v8225_v22 = vld [vmem:[#allocation82_spill] sm:$0xff]  ;;  %vm8439_vm7 = vmmov %vm8426_vm0 }
 0x527   : > { %8209 = vst [vmem:[#allocation208_spill] sm:$0xff] %v7072_v31  ;;  %v3386_v42 = vsel %vm8217_vm4, %v3301_v37, 0.0  ;;  %v8236_v31 = vld [vmem:[#allocation173_spill] sm:$0xff]  ;;  %vm8448_vm4 = vmmov %vm8426_vm0 }
 0x528   : > { %v7108_v57 = vadd.f32 %v8223_v28, %v1731_v15  ;;  %vm8455_vm10 = vmmov %vm8426_vm0 }
 0x529   : > { %2834 = vadd.xlane.f32.xlu1 %v2833_v19  ;;  %3381 = vadd.xlane.f32.xlu0 %v3380_v12  ;;  %v2845_v19 = vsel %vm8219_vm15, %v2751_v8, 0.0  ;;  %v3392_v12 = vsel %vm8220_vm1, %v3303_v58, 0.0  ;;  %v8224_v58 = vld [vmem:[#allocation37_spill] sm:$0xff]  ;;  %vm8451_vm15 = vmmov %vm8426_vm0 }
 0x52a   : > { %v7085_v9 = vpop.xlane.xlu1 %1696  ;;  %v7087_v49 = vpop.xlane.xlu0 %2440  ;;  %vm8452_vm1 = vmmov %vm8426_vm0 }
 0x52b   : > { %8214 = vst [vmem:[#allocation209_spill] sm:$0xff] %v7085_v9  ;;  %8215 = vst [vmem:[#allocation210_spill] sm:$0xff] %v7087_v49  ;;  %v8235_v9 = vld [vmem:[#allocation54_spill] sm:$0xff] }
 0x52d   : > { %2840 = vadd.xlane.f32.xlu1 %v2839_v11  ;;  %3387 = vadd.xlane.f32.xlu0 %v3386_v42 }
 0x52e   : > { %v1703_v53 = vpop.xlane.xlu1 %1702  ;;  %v7093_v35 = vpop.xlane.xlu0 %2446 }
 0x52f   : > { %8218 = vst [vmem:[#allocation211_spill] sm:$0xff] %v7093_v35  ;;  %v1752_v60 = vadd.f32 %v7096_v32, %v1703_v53  ;;  %v8238_v53 = vld [vmem:[#allocation176_spill] sm:$0xff] }
 0x531   : > { %2846 = vadd.xlane.f32.xlu1 %v2845_v19  ;;  %3393 = vadd.xlane.f32.xlu0 %v3392_v12  ;;  %v2277_v19 = vadd.f32 %v8224_v58, %v7108_v57 }
 0x532   : > { %v1709_v36 = vpop.xlane.xlu1 %1708  ;;  %v7100_v37 = vpop.xlane.xlu0 %2452 }
 0x533   : > { %v2481_v12 = vadd.f32 %v6960_v10, %v2277_v19 }
 0x535   : > { %3396 = vadd.xlane.f32.xlu1 %v3395_v16  ;;  %v2646_v16 = vadd.f32 %v8225_v22, %v2481_v12 }
 0x536   : > { %v1715_v11 = vpop.xlane.xlu1 %1714  ;;  %v7105_v42 = vpop.xlane.xlu0 %2458 }
 0x537   : > { %v2848_v15 = vadd.f32 %v6618_v21, %v2646_v16 }
 0x53a   : > { %v1721_v8 = vpop.xlane.xlu1 %1720  ;;  %v7110_v2 = vpop.xlane.xlu0 %2464 }
 0x53e   : > { %v7115_v45 = vpop.xlane.xlu1 %1726  ;;  %v7117_v41 = vpop.xlane.xlu0 %2470 }
 0x542   : > { %v7120_v46 = vpop.xlane.xlu1 %2185  ;;  %v7122_v52 = vpop.xlane.xlu0 %2476 }
 0x546   : > { %v7125_v28 = vpop.xlane.xlu1 %2191  ;;  %v2952_v47 = vpop.xlane.xlu0 %2951 }
 0x547   : > { %v3046_v39 = vadd.f32 %v2952_v47, %v2848_v15 }
 0x549   : > { %v3207_v58 = vadd.f32 %v8226_v40, %v3046_v39  ;;  %v1732_v40 = vadd.f32 %v7096_v32, %v6958_v62 }
 0x54a   : > { %v7128_v35 = vpop.xlane.xlu1 %2197  ;;  %v7130_v10 = vpop.xlane.xlu0 %2957 }
 0x54b   : > { %v3398_v19 = vadd.f32 %v6642_v25, %v3207_v58 }
 0x54d   : > { %v3926_v34 = vmul.f32 -1.442695, %v3398_v19  ;;  %v8232_v19 = vld [vmem:[#allocation52_spill] sm:$0xff] }
 0x54e   : > { %v7133_v12 = vpop.xlane.xlu1 %2203  ;;  %v7135_v22 = vpop.xlane.xlu0 %2963  ;;  %v1892_v49 = vadd.f32 %v8232_v19, %v1732_v40 }
 0x54f   : > { %8227 = vst [vmem:[#allocation35_spill] sm:$0xff] %v7133_v12  ;;  %4009 = vpow2.f32 %v3926_v34  ;;  %v1734_v34 = vadd.f32 %v7096_v32, %v6972_v14  ;;  %v8237_v12 = vld [vmem:[#allocation72_spill] sm:$0xff]  ;;  %v1754_v14 = vadd.f32 %v7096_v32, %v1709_v36 }
 0x551   : > { %v1894_v62 = vadd.f32 %v8235_v9, %v1734_v34 }
 0x552   : > { %v7137_v5 = vpop.xlane.xlu1 %2209  ;;  %v7139_v21 = vpop.xlane.xlu0 %2969 }
 0x553   : > { %8228 = vst [vmem:[#allocation36_spill] sm:$0xff] %v7137_v5 }
 0x556   : > { %v7141_v16 = vpop.xlane.xlu1 %2215  ;;  %v7143_v47 = vpop.xlane.xlu0 %2975 }
 0x557   : > { %8229 = vst [vmem:[#allocation37_spill] sm:$0xff] %v7141_v16 }
 0x559   : > { %v4010_v39 = vpop.eup %4009 }
 0x55a   : > { %v3526_v15 = vadd.f32 1.0, %v4010_v39  ;;  %v7147_v25 = vpop.xlane.xlu1 %2221  ;;  %v7149_v58 = vpop.xlane.xlu0 %2981  ;;  %v2279_v39 = vadd.f32 %v8236_v31, %v1892_v49  ;;  %v8240_v31 = vld [vmem:[#allocation74_spill] sm:$0xff] }
 0x55b   : > { %8230 = vst [vmem:[#allocation82_spill] sm:$0xff] %v7147_v25  ;;  %8231 = vst [vmem:[#allocation114_spill] sm:$0xff] %v7149_v58  ;;  %v1736_v25 = vadd.f32 %v7096_v32, %v6986_v1  ;;  %v1912_v58 = vadd.f32 %v8237_v12, %v1752_v60  ;;  %v1914_v49 = vadd.f32 %v8240_v31, %v1754_v14 }
 0x55c   : > { %4011 = vrcp.f32 %v3526_v15  ;;  %v2281_v15 = vadd.f32 %v8238_v53, %v1894_v62  ;;  %v2483_v19 = vadd.f32 %v6974_v27, %v2279_v39  ;;  %v1756_v1 = vadd.f32 %v7096_v32, %v1715_v11  ;;  %v8242_v27 = vld [vmem:[#allocation84_spill] sm:$0xff] }
 0x55d   : > { %v2299_v9 = vadd.f32 %v6483_v29, %v1912_v58  ;;  %v1738_v62 = vadd.f32 %v7096_v32, %v7000_v38  ;;  %v8244_v58 = vld [vmem:[#allocation76_spill] sm:$0xff]  ;;  %v2301_v11 = vadd.f32 %v6514_v63, %v1914_v49  ;;  %v1758_v53 = vadd.f32 %v7096_v32, %v1721_v8 }
 0x55e   : > { %v7155_v16 = vpop.xlane.xlu1 %2227  ;;  %v7157_v5 = vpop.xlane.xlu0 %2987  ;;  %v2485_v12 = vadd.f32 %v6988_v30, %v2281_v15  ;;  %v2648_v39 = vadd.f32 %v8242_v27, %v2483_v19  ;;  %v1916_v14 = vadd.f32 %v8244_v58, %v1756_v1  ;;  %v8247_v30 = vld [vmem:[#allocation144_spill] sm:$0xff]  ;;  %v8248_v15 = vld [vmem:[#allocation86_spill] sm:$0xff] }
 0x55f   : > { %8233 = vst [vmem:[#allocation52_spill] sm:$0xff] %v7155_v16  ;;  %8234 = vst [vmem:[#allocation212_spill] sm:$0xff] %v7157_v5  ;;  %v8239_v16 = vld [vmem:[#allocation56_spill] sm:$0xff]  ;;  %v2503_v29 = vadd.f32 %v7100_v37, %v2299_v9  ;;  %v1733_v38 = vadd.f32 %v7096_v32, %v8247_v30  ;;  %v8249_v19 = vld [vmem:[#allocation58_spill] sm:$0xff]  ;;  %v1740_v37 = vadd.f32 %v7096_v32, %v7014_v4 }
 0x560   : > { %v1896_v5 = vadd.f32 %v8239_v16, %v1736_v25  ;;  %v8243_v16 = vld [vmem:[#allocation179_spill] sm:$0xff]  ;;  %v1898_v27 = vadd.f32 %v8249_v19, %v1738_v62  ;;  %v8250_v9 = vld [vmem:[#allocation104_spill] sm:$0xff]  ;;  %v2850_v8 = vadd.f32 %v6644_v26, %v2648_v39  ;;  %v2505_v49 = vadd.f32 %v7105_v42, %v2301_v11  ;;  %v8251_v1 = vld [vmem:[#allocation78_spill] sm:$0xff] }
 0x561   : > { %v2668_v63 = vadd.f32 %v8250_v9, %v2503_v29  ;;  %v2303_v58 = vadd.f32 %v6540_v3, %v1916_v14  ;;  %v8252_v30 = vld [vmem:[#allocation146_spill] sm:$0xff]  ;;  %v8260_v9 = vld [vmem:[#allocation88_spill] sm:$0xff] }
 0x562   : > { %v7165_v61 = vpop.xlane.xlu1 %2233  ;;  %v7167_v40 = vpop.xlane.xlu0 %2993  ;;  %v2283_v25 = vadd.f32 %v8243_v16, %v1896_v5  ;;  %v1918_v16 = vadd.f32 %v8251_v1, %v1758_v53  ;;  %v1735_v62 = vadd.f32 %v7096_v32, %v8252_v30  ;;  %v8254_v4 = vld [vmem:[#allocation150_spill] sm:$0xff]  ;;  %v3048_v53 = vadd.f32 %v7130_v10, %v2850_v8  ;;  %v8261_v30 = vld [vmem:[#allocation60_spill] sm:$0xff] }
 0x563   : > { %v1739_v29 = vadd.f32 %v7096_v32, %v8254_v4  ;;  %v8258_v3 = vld [vmem:[#allocation154_spill] sm:$0xff]  ;;  %v1742_v4 = vadd.f32 %v7096_v32, %v7028_v55  ;;  %v8264_v10 = vld [vmem:[#allocation156_spill] sm:$0xff] }
 0x564   : > { %v2487_v5 = vadd.f32 %v7002_v6, %v2283_v25  ;;  %v8253_v6 = vld [vmem:[#allocation148_spill] sm:$0xff]  ;;  %v7220_v14 = vadd.f32 %v7096_v32, %v8258_v3  ;;  %v2507_v3 = vadd.f32 %v7110_v2, %v2303_v58 }
 0x565   : > { %v1737_v25 = vadd.f32 %v7096_v32, %v8253_v6  ;;  %v1900_v6 = vadd.f32 %v8261_v30, %v1740_v37  ;;  %v8266_v37 = vld [vmem:[#allocation160_spill] sm:$0xff]  ;;  %v1744_v30 = vadd.f32 %v7096_v32, %v7042_v54 }
 0x566   : > { %v4012_v34 = vpop.eup %4011  ;;  %v7175_v60 = vpop.xlane.xlu1 %2239  ;;  %v2652_v1 = vadd.f32 %v8260_v9, %v2487_v5  ;;  %v7242_v55 = vadd.f32 %v7096_v32, %v8266_v37  ;;  %v8268_v8 = vld [vmem:[#allocation116_spill] sm:$0xff] }
 0x567   : > { %8241 = vst [vmem:[#allocation54_spill] sm:$0xff] %v7175_v60  ;;  %v7177_v36 = vpop.xlane.xlu0 %2999  ;;  %3624 = vperm.xlu0 %4003, %v4012_v34   ;;  %v2650_v34 = vadd.f32 %v8248_v15, %v2485_v12  ;;  %v1760_v12 = vadd.f32 %v7096_v32, %v7115_v45  ;;  %v8255_v15 = vld [vmem:[#allocation152_spill] sm:$0xff]  ;;  %v8259_v45 = vld [vmem:[#allocation182_spill] sm:$0xff] }
 0x568   : > { %v1741_v26 = vadd.f32 %v7096_v32, %v8255_v15  ;;  %v2285_v11 = vadd.f32 %v8259_v45, %v1898_v27  ;;  %v2870_v15 = vadd.f32 %v6885_v0, %v2668_v63  ;;  %v2305_v27 = vadd.f32 %v6566_v13, %v1918_v16  ;;  %v8267_v0 = vld [vmem:[#allocation162_spill] sm:$0xff]  ;;  %v8270_v45 = vld [vmem:[#allocation185_spill] sm:$0xff] }
 0x569   : > { %v2852_v19 = vadd.f32 %v6670_v51, %v2650_v34  ;;  %v1745_v51 = vadd.f32 %v7096_v32, %v8264_v10  ;;  %v8265_v34 = vld [vmem:[#allocation158_spill] sm:$0xff]  ;;  %v7246_v63 = vadd.f32 %v7096_v32, %v8267_v0  ;;  %v2287_v9 = vadd.f32 %v8270_v45, %v1900_v6 }
 0x56a   : > { %v7188_v31 = vpop.xlane.xlu1 %2245  ;;  %v7238_v5 = vadd.f32 %v7096_v32, %v8265_v34  ;;  %v2489_v13 = vadd.f32 %v7016_v20, %v2285_v11  ;;  %v2854_v10 = vadd.f32 %v6696_v59, %v2652_v1  ;;  %v8271_v34 = vld [vmem:[#allocation108_spill] sm:$0xff]  ;;  %v2509_v0 = vadd.f32 %v7117_v41, %v2305_v27  ;;  %v8277_v27 = vld [vmem:[#allocation90_spill] sm:$0xff] }
 0x56b   : > { %8245 = vst [vmem:[#allocation173_spill] sm:$0xff] %v7188_v31  ;;  %v7190_v60 = vpop.xlane.xlu0 %3005  ;;  %v8263_v31 = vld [vmem:[#allocation80_spill] sm:$0xff]  ;;  %v3050_v16 = vadd.f32 %v7135_v22, %v2852_v19  ;;  %v2672_v37 = vadd.f32 %v8271_v34, %v2507_v3  ;;  %v8272_v22 = vld [vmem:[#allocation163_spill] sm:$0xff]  ;;  %v8273_v19 = vld [vmem:[#allocation165_spill] sm:$0xff] }
 0x56c   : > { %8246 = vst [vmem:[#allocation72_spill] sm:$0xff] %v7190_v60  ;;  %v1920_v60 = vadd.f32 %v8263_v31, %v1760_v12  ;;  %v8269_v12 = vld [vmem:[#allocation62_spill] sm:$0xff]  ;;  %v7270_v6 = vadd.f32 %v7096_v32, %v8273_v19  ;;  %v2278_v19 = vadd.f32 %v7120_v46, %v7108_v57  ;;  %v8284_v46 = vld [vmem:[#allocation43_spill] sm:$0xff] }
 0x56e   : > { %v7214_v42 = vpop.xlane.xlu1 %2251  ;;  %v2307_v20 = vadd.f32 %v6592_v18, %v1920_v60  ;;  %v8276_v18 = vld [vmem:[#allocation118_spill] sm:$0xff] }
 0x56f   : > { %8256 = vst [vmem:[#allocation176_spill] sm:$0xff] %v7214_v42  ;;  %v7216_v39 = vpop.xlane.xlu0 %3011  ;;  %v3211_v60 = vadd.f32 %v8276_v18, %v3050_v16  ;;  %v8281_v16 = vld [vmem:[#allocation55_spill] sm:$0xff] }
 0x570   : > { %8257 = vst [vmem:[#allocation56_spill] sm:$0xff] %v7216_v39  ;;  %v8262_v39 = vld [vmem:[#allocation106_spill] sm:$0xff] }
 0x571   : > { %v2670_v42 = vadd.f32 %v8262_v39, %v2505_v49  ;;  %v3209_v49 = vadd.f32 %v8268_v8, %v3048_v53  ;;  %v1902_v39 = vadd.f32 %v8269_v12, %v1742_v4  ;;  %v7266_v53 = vadd.f32 %v7096_v32, %v8272_v22  ;;  %v8274_v4 = vld [vmem:[#allocation51_spill] sm:$0xff]  ;;  %v8278_v12 = vld [vmem:[#allocation64_spill] sm:$0xff] }
 0x572   : > { %v7248_v2 = vpop.xlane.xlu1 %2257  ;;  %v1893_v54 = vadd.f32 %v8274_v4, %v1733_v38  ;;  %v2491_v8 = vadd.f32 %v7030_v24, %v2287_v9  ;;  %v1904_v45 = vadd.f32 %v8278_v12, %v1744_v30  ;;  %v8279_v38 = vld [vmem:[#allocation188_spill] sm:$0xff]  ;;  %v8283_v9 = vld [vmem:[#allocation59_spill] sm:$0xff]  ;;  %v3402_v57 = vadd.f32 %v8284_v46, %v3211_v60 }
 0x573   : > { %v3018_v31 = vpop.xlane.xlu0 %3017  ;;  %v2872_v11 = vadd.f32 %v6904_v56, %v2670_v42  ;;  %v3400_v41 = vadd.f32 %v6668_v17, %v3209_v49  ;;  %v3052_v56 = vadd.f32 %v7139_v21, %v2854_v10  ;;  %v2289_v34 = vadd.f32 %v8279_v38, %v1902_v39  ;;  %v8282_v10 = vld [vmem:[#allocation57_spill] sm:$0xff]  ;;  %v8287_v4 = vld [vmem:[#allocation191_spill] sm:$0xff]  ;;  %v8291_v38 = vld [vmem:[#allocation66_spill] sm:$0xff] }
 0x574   : > { %v7253_v58 = vadd.f32 %v3018_v31, %v2870_v15  ;;  %v8275_v15 = vld [vmem:[#allocation53_spill] sm:$0xff]  ;;  %v2654_v31 = vadd.f32 %v8277_v27, %v2489_v13  ;;  %v2511_v17 = vadd.f32 %v7122_v52, %v2307_v20  ;;  %v2874_v49 = vadd.f32 %v6918_v48, %v2672_v37  ;;  %v8285_v52 = vld [vmem:[#allocation120_spill] sm:$0xff] }
 0x575   : > { %v1895_v59 = vadd.f32 %v8275_v15, %v1735_v62  ;;  %v8280_v62 = vld [vmem:[#allocation110_spill] sm:$0xff]  ;;  %v1746_v21 = vadd.f32 %v7096_v32, %v7056_v23  ;;  %v1897_v13 = vadd.f32 %v8281_v16, %v1737_v25  ;;  %v7294_v24 = vadd.f32 %v8282_v10, %v1739_v29  ;;  %v8286_v37 = vld [vmem:[#allocation92_spill] sm:$0xff]  ;;  %v8288_v15 = vld [vmem:[#allocation169_spill] sm:$0xff] }
 0x576   : > { %v7274_v1 = vpop.xlane.xlu1 %2263  ;;  %v2674_v22 = vadd.f32 %v8280_v62, %v2509_v0  ;;  %v7297_v30 = vadd.f32 %v8283_v9, %v1741_v26  ;;  %v3213_v20 = vadd.f32 %v8285_v52, %v3052_v56  ;;  %v2656_v23 = vadd.f32 %v8286_v37, %v2491_v8  ;;  %v8289_v26 = vld [vmem:[#allocation143_spill] sm:$0xff]  ;;  %v8290_v27 = vld [vmem:[#allocation112_spill] sm:$0xff]  ;;  %v8292_v8 = vld [vmem:[#allocation61_spill] sm:$0xff] }
 0x577   : > { %v3024_v3 = vpop.xlane.xlu0 %3023  ;;  %v2493_v25 = vadd.f32 %v7044_v50, %v2289_v34  ;;  %v2291_v29 = vadd.f32 %v8287_v4, %v1904_v45  ;;  %v2482_v18 = vadd.f32 %v8289_v26, %v2278_v19  ;;  %v2676_v12 = vadd.f32 %v8290_v27, %v2511_v17  ;;  %v8293_v50 = vld [vmem:[#allocation63_spill] sm:$0xff]  ;;  %v8294_v17 = vld [vmem:[#allocation42_spill] sm:$0xff]  ;;  %v8297_v9 = vld [vmem:[#allocation81_spill] sm:$0xff] }
 0x578   : > { %v7279_v42 = vadd.f32 %v3024_v3, %v2872_v11  ;;  %v3928_v11 = vmul.f32 -1.442695, %v3400_v41  ;;  %v2856_v3 = vadd.f32 %v8288_v15, %v2654_v31  ;;  %v2280_v41 = vadd.f32 %v7125_v28, %v1893_v54  ;;  %v8304_v26 = vld [vmem:[#allocation68_spill] sm:$0xff] }
 0x579   : > { %v2876_v60 = vadd.f32 %v6932_v7, %v2674_v22  ;;  %v1906_v56 = vadd.f32 %v8291_v38, %v1746_v21  ;;  %v7320_v45 = vadd.f32 %v8293_v50, %v1745_v51  ;;  %v3930_v19 = vmul.f32 -1.442695, %v3402_v57  ;;  %v8295_v7 = vld [vmem:[#allocation94_spill] sm:$0xff]  ;;  %v8296_v51 = vld [vmem:[#allocation145_spill] sm:$0xff]  ;;  %v8305_v27 = vld [vmem:[#allocation44_spill] sm:$0xff] }
 0x57a   : > { %v7299_v39 = vpop.xlane.xlu1 %2269  ;;  %v3054_v62 = vadd.f32 %v7143_v47, %v2856_v3  ;;  %4013 = vpow2.f32 %v3928_v11  ;;  %v3404_v28 = vadd.f32 %v8294_v17, %v3213_v20  ;;  %v2658_v22 = vadd.f32 %v8295_v7, %v2493_v25  ;;  %v8298_v11 = vld [vmem:[#allocation207_spill] sm:$0xff]  ;;  %v8299_v57 = vld [vmem:[#allocation194_spill] sm:$0xff]  ;;  %v8311_v17 = vld [vmem:[#allocation208_spill] sm:$0xff] }
 0x57b   : > { %v3030_v0 = vpop.xlane.xlu0 %3029  ;;  %v2495_v47 = vadd.f32 %v7058_v33, %v2291_v29  ;;  %v2858_v21 = vadd.f32 %v6748_v43, %v2656_v23  ;;  %v2484_v16 = vadd.f32 %v8296_v51, %v2280_v41  ;;  %v2282_v10 = vadd.f32 %v7128_v35, %v1895_v59  ;;  %v8300_v20 = vld [vmem:[#allocation122_spill] sm:$0xff]  ;;  %v8302_v33 = vld [vmem:[#allocation65_spill] sm:$0xff]  ;;  %v8303_v59 = vld [vmem:[#allocation96_spill] sm:$0xff] }
 0x57c   : > { %v7303_v48 = vadd.f32 %v3030_v0, %v2874_v49  ;;  %v7317_v49 = vadd.f32 %v8292_v8, %v7220_v14  ;;  %v1748_v14 = vadd.f32 %v7096_v32, %v7070_v44  ;;  %v2647_v0 = vadd.f32 %v8297_v9, %v2482_v18  ;;  %v8301_v25 = vld [vmem:[#allocation114_spill] sm:$0xff]  ;;  %v8306_v41 = vld [vmem:[#allocation67_spill] sm:$0xff]  ;;  %v8314_v51 = vld [vmem:[#allocation212_spill] sm:$0xff] }
 0x57d   : > { %v2878_v46 = vadd.f32 %v8298_v11, %v2676_v12  ;;  %v2293_v52 = vadd.f32 %v8299_v57, %v1906_v56  ;;  %v3215_v37 = vadd.f32 %v8300_v20, %v3054_v62  ;;  %v3056_v4 = vadd.f32 %v8301_v25, %v2858_v21  ;;  %v8307_v38 = vld [vmem:[#allocation147_spill] sm:$0xff]  ;;  %v8312_v7 = vld [vmem:[#allocation174_spill] sm:$0xff]  ;;  %v8313_v21 = vld [vmem:[#allocation124_spill] sm:$0xff] }
 0x57e   : > { %v7322_v31 = vpop.xlane.xlu1 %2275  ;;  %v7341_v29 = vadd.f32 %v8302_v33, %v7238_v5  ;;  %4015 = vpow2.f32 %v3930_v19  ;;  %v3932_v23 = vmul.f32 -1.442695, %v3404_v28  ;;  %v2660_v3 = vadd.f32 %v8303_v59, %v2495_v47  ;;  %v8308_v56 = vld [vmem:[#allocation35_spill] sm:$0xff]  ;;  %v8317_v57 = vld [vmem:[#allocation196_spill] sm:$0xff]  ;;  %v8322_v59 = vld [vmem:[#allocation178_spill] sm:$0xff] }
 0x57f   : > { %v3036_v34 = vpop.xlane.xlu0 %3035  ;;  %v1908_v18 = vadd.f32 %v8304_v26, %v1748_v14  ;;  %v2860_v12 = vadd.f32 %v8305_v27, %v2658_v22  ;;  %v2486_v5 = vadd.f32 %v8307_v38, %v2282_v10  ;;  %v2284_v62 = vadd.f32 %v8308_v56, %v1897_v13  ;;  %v8309_v8 = vld [vmem:[#allocation175_spill] sm:$0xff]  ;;  %v8316_v13 = vld [vmem:[#allocation113_spill] sm:$0xff]  ;;  %v8319_v25 = vld [vmem:[#allocation180_spill] sm:$0xff] }
 0x580   : > { %v7325_v54 = vadd.f32 %v3036_v34, %v2876_v60  ;;  %v7350_v60 = vadd.f32 %v8306_v41, %v7242_v55  ;;  %v8310_v34 = vld [vmem:[#allocation83_spill] sm:$0xff]  ;;  %v2497_v28 = vadd.f32 %v8311_v17, %v2293_v52  ;;  %v3406_v47 = vadd.f32 %v8312_v7, %v3215_v37  ;;  %v8315_v55 = vld [vmem:[#allocation209_spill] sm:$0xff]  ;;  %v8324_v41 = vld [vmem:[#allocation98_spill] sm:$0xff] }
 0x581   : > { %v2649_v19 = vadd.f32 %v8310_v34, %v2484_v16  ;;  %v3217_v14 = vadd.f32 %v8313_v21, %v3056_v4  ;;  %v3058_v22 = vadd.f32 %v8314_v51, %v2860_v12  ;;  %v1750_v11 = vadd.f32 %v7096_v32, %v8315_v55  ;;  %v8318_v16 = vld [vmem:[#allocation36_spill] sm:$0xff]  ;;  %v8320_v4 = vld [vmem:[#allocation69_spill] sm:$0xff]  ;;  %v8328_v21 = vld [vmem:[#allocation115_spill] sm:$0xff] }
 0x582   : > { %v2757_v44 = vpop.xlane.xlu1 %2756  ;;  %4017 = vpow2.f32 %v3932_v23  ;;  %v2295_v20 = vadd.f32 %v8317_v57, %v1908_v18  ;;  %v2286_v52 = vadd.f32 %v8318_v16, %v7294_v24  ;;  %v2862_v37 = vadd.f32 %v8319_v25, %v2660_v3  ;;  %v8323_v27 = vld [vmem:[#allocation85_spill] sm:$0xff]  ;;  %v8326_v24 = vld [vmem:[#allocation126_spill] sm:$0xff]  ;;  %v8330_v55 = vld [vmem:[#allocation151_spill] sm:$0xff] }
 0x583   : > { %v3042_v43 = vpop.xlane.xlu0 %3041  ;;  %v2849_v15 = vadd.f32 %v2757_v44, %v2647_v0  ;;  %v7369_v33 = vadd.f32 %v8320_v4, %v7246_v63  ;;  %v2651_v12 = vadd.f32 %v8323_v27, %v2486_v5  ;;  %v2662_v38 = vadd.f32 %v8324_v41, %v2497_v28  ;;  %v8325_v56 = vld [vmem:[#allocation45_spill] sm:$0xff]  ;;  %v8329_v51 = vld [vmem:[#allocation210_spill] sm:$0xff] }
 0x584   : > { %v7343_v35 = vadd.f32 %v3042_v43, %v2878_v46  ;;  %v4014_v44 = vpop.eup %4013  ;;  %v8321_v43 = vld [vmem:[#allocation149_spill] sm:$0xff]  ;;  %v3934_v18 = vmul.f32 -1.442695, %v3406_v47  ;;  %v2490_v5 = vadd.f32 %v8330_v55, %v2286_v52  ;;  %v8335_v4 = vld [vmem:[#allocation46_spill] sm:$0xff]  ;;  %v3060_v52 = vadd.f32 %v7167_v40, %v2862_v37  ;;  %v8342_v37 = vld [vmem:[#allocation52_spill] sm:$0xff] }
 0x585   : > { %v3047_v50 = vadd.f32 %v8309_v8, %v2849_v15  ;;  %v2488_v15 = vadd.f32 %v8321_v43, %v2284_v62  ;;  %v3408_v8 = vadd.f32 %v8325_v56, %v3217_v14  ;;  %v8331_v28 = vld [vmem:[#allocation37_spill] sm:$0xff]  ;;  %v2864_v43 = vadd.f32 %v8335_v4, %v2662_v38  ;;  %v8340_v38 = vld [vmem:[#allocation184_spill] sm:$0xff] }
 0x586   : > { %v2763_v9 = vpop.xlane.xlu1 %2762  ;;  %v2288_v47 = vadd.f32 %v8331_v28, %v7297_v30  ;;  %v8332_v14 = vld [vmem:[#allocation181_spill] sm:$0xff]  ;;  %v2294_v4 = vadd.f32 %v7165_v61, %v7341_v29 }
 0x587   : > { %v3310_v0 = vpop.xlane.xlu0 %3309  ;;  %v2851_v10 = vadd.f32 %v2763_v9, %v2649_v19  ;;  %v3208_v46 = vadd.f32 %v8316_v13, %v3047_v50  ;;  %v3219_v50 = vadd.f32 %v8326_v24, %v3058_v22  ;;  %v8327_v19 = vld [vmem:[#allocation70_spill] sm:$0xff]  ;;  %v2499_v9 = vadd.f32 %v8329_v51, %v2295_v20  ;;  %v8334_v16 = vld [vmem:[#allocation177_spill] sm:$0xff] }
 0x588   : > { %v1910_v63 = vadd.f32 %v8327_v19, %v1750_v11  ;;  %v3936_v11 = vmul.f32 -1.442695, %v3408_v8  ;;  %v8336_v30 = vld [vmem:[#allocation117_spill] sm:$0xff]  ;;  %v8339_v8 = vld [vmem:[#allocation82_spill] sm:$0xff]  ;;  %v2292_v19 = vadd.f32 %v8342_v37, %v7320_v45 }
 0x589   : > { %v3049_v26 = vadd.f32 %v8322_v59, %v2851_v10  ;;  %v3399_v23 = vadd.f32 %v3310_v0, %v3208_v46  ;;  %v3528_v0 = vadd.f32 1.0, %v4014_v44  ;;  %v4016_v10 = vpop.eup %4015  ;;  %v8333_v46 = vld [vmem:[#allocation87_spill] sm:$0xff]  ;;  %v3410_v25 = vadd.f32 %v8334_v16, %v3219_v50  ;;  %v8338_v56 = vld [vmem:[#allocation89_spill] sm:$0xff] }
 0x58a   : > { %v2769_v3 = vpop.xlane.xlu1 %2768  ;;  %v2653_v57 = vadd.f32 %v8333_v46, %v2488_v15  ;;  %v3530_v27 = vadd.f32 1.0, %v4016_v10  ;;  %v2655_v15 = vadd.f32 %v8338_v56, %v2490_v5  ;;  %v2290_v24 = vadd.f32 %v8339_v8, %v7317_v49  ;;  %v8344_v5 = vld [vmem:[#allocation119_spill] sm:$0xff]  ;;  %v8349_v16 = vld [vmem:[#allocation157_spill] sm:$0xff] }
 0x58b   : > { %v3316_v34 = vpop.xlane.xlu0 %3315  ;;  %v3927_v17 = vmul.f32 -1.442695, %v3399_v23  ;;  %v2853_v7 = vadd.f32 %v2769_v3, %v2651_v12  ;;  %v3210_v62 = vadd.f32 %v8328_v21, %v3049_v26  ;;  %v8337_v12 = vld [vmem:[#allocation153_spill] sm:$0xff]  ;;  %v8345_v10 = vld [vmem:[#allocation91_spill] sm:$0xff] }
 0x58c   : > { %v2492_v41 = vadd.f32 %v8337_v12, %v2288_v47  ;;  %v3062_v47 = vadd.f32 %v7177_v36, %v2864_v43  ;;  %v8350_v36 = vld [vmem:[#allocation47_spill] sm:$0xff]  ;;  %v8355_v29 = vld [vmem:[#allocation93_spill] sm:$0xff] }
 0x58d   : > { %4019 = vpow2.f32 %v3927_v17  ;;  %v3051_v22 = vadd.f32 %v8332_v14, %v2853_v7  ;;  %v3401_v13 = vadd.f32 %v3316_v34, %v3210_v62  ;;  %v8341_v34 = vld [vmem:[#allocation198_spill] sm:$0xff]  ;;  %v3938_v17 = vmul.f32 -1.442695, %v3410_v25  ;;  %v8343_v62 = vld [vmem:[#allocation128_spill] sm:$0xff]  ;;  %v8352_v12 = vld [vmem:[#allocation211_spill] sm:$0xff] }
 0x58e   : > { %4021 = vpow2.f32 %v3934_v18  ;;  %v2775_v20 = vpop.xlane.xlu1 %2774  ;;  %v4018_v18 = vpop.eup %4017  ;;  %v2297_v40 = vadd.f32 %v8341_v34, %v1910_v63  ;;  %v3221_v51 = vadd.f32 %v8343_v62, %v3060_v52  ;;  %v2657_v14 = vadd.f32 %v8345_v10, %v2492_v41  ;;  %v8346_v63 = vld [vmem:[#allocation155_spill] sm:$0xff]  ;;  %v8357_v34 = vld [vmem:[#allocation186_spill] sm:$0xff] }
 0x58f   : > { %v3322_v44 = vpop.xlane.xlu0 %3321  ;;  %v3929_v59 = vmul.f32 -1.442695, %v3401_v13  ;;  %v2855_v26 = vadd.f32 %v2775_v20, %v2653_v57  ;;  %v3212_v23 = vadd.f32 %v8336_v30, %v3051_v22  ;;  %4023 = vrcp.f32 %v3528_v0  ;;  %v8347_v13 = vld [vmem:[#allocation187_spill] sm:$0xff]  ;;  %v8348_v57 = vld [vmem:[#allocation100_spill] sm:$0xff]  ;;  %v8351_v30 = vld [vmem:[#allocation121_spill] sm:$0xff] }
 0x590   : > { %v3532_v49 = vadd.f32 1.0, %v4018_v18  ;;  %v2494_v22 = vadd.f32 %v8346_v63, %v2290_v24  ;;  %v2496_v25 = vadd.f32 %v8349_v16, %v2292_v19  ;;  %v3412_v43 = vadd.f32 %v8350_v36, %v3221_v51  ;;  %v8354_v18 = vld [vmem:[#allocation190_spill] sm:$0xff] }
 0x591   : > { %4025 = vpow2.f32 %v3929_v59  ;;  %v3053_v50 = vadd.f32 %v8340_v38, %v2855_v26  ;;  %v3403_v3 = vadd.f32 %v3322_v44, %v3212_v23  ;;  %v2501_v41 = vadd.f32 %v8352_v12, %v2297_v40  ;;  %v8358_v40 = vld [vmem:[#allocation95_spill] sm:$0xff] }
 0x592   : > { %4027 = vpow2.f32 %v3936_v11  ;;  %v2781_v7 = vpop.xlane.xlu1 %2780  ;;  %v2664_v11 = vadd.f32 %v8348_v57, %v2499_v9  ;;  %v8353_v9 = vld [vmem:[#allocation130_spill] sm:$0xff]  ;;  %v2659_v24 = vadd.f32 %v8355_v29, %v2494_v22  ;;  %v3940_v62 = vmul.f32 -1.442695, %v3412_v43  ;;  %v8366_v43 = vld [vmem:[#allocation97_spill] sm:$0xff] }
 0x593   : > { %v3328_v21 = vpop.xlane.xlu0 %3327  ;;  %v3931_v0 = vmul.f32 -1.442695, %v3403_v3  ;;  %v2857_v55 = vadd.f32 %v2781_v7, %v2655_v15  ;;  %v3214_v28 = vadd.f32 %v8344_v5, %v3053_v50  ;;  %4029 = vrcp.f32 %v3530_v27  ;;  %v8356_v50 = vld [vmem:[#allocation159_spill] sm:$0xff] }
 0x594   : > { %v3223_v56 = vadd.f32 %v8353_v9, %v3062_v47  ;;  %v2498_v3 = vadd.f32 %v8356_v50, %v2294_v4  ;;  %v2866_v37 = vadd.f32 %v8357_v34, %v2664_v11  ;;  %v2661_v7 = vadd.f32 %v8358_v40, %v2496_v25  ;;  %v8360_v47 = vld [vmem:[#allocation183_spill] sm:$0xff]  ;;  %v8364_v25 = vld [vmem:[#allocation102_spill] sm:$0xff]  ;;  %v8371_v50 = vld [vmem:[#allocation40_spill] sm:$0xff] }
 0x595   : > { %4031 = vpow2.f32 %v3931_v0  ;;  %v3055_v45 = vadd.f32 %v8347_v13, %v2857_v55  ;;  %v3405_v46 = vadd.f32 %v3328_v21, %v3214_v28  ;;  %v8359_v55 = vld [vmem:[#allocation123_spill] sm:$0xff]  ;;  %v8362_v13 = vld [vmem:[#allocation54_spill] sm:$0xff]  ;;  %v2666_v4 = vadd.f32 %v8364_v25, %v2501_v41  ;;  %v8380_v25 = vld [vmem:[#allocation56_spill] sm:$0xff] }
 0x596   : > { %4033 = vpow2.f32 %v3938_v17  ;;  %v2787_v20 = vpop.xlane.xlu1 %2786  ;;  %v3414_v10 = vadd.f32 %v8360_v47, %v3223_v56  ;;  %v8368_v56 = vld [vmem:[#allocation132_spill] sm:$0xff]  ;;  %v8372_v34 = vld [vmem:[#allocation71_spill] sm:$0xff]  ;;  %v8375_v47 = vld [vmem:[#allocation49_spill] sm:$0xff] }
 0x597   : > { %v3334_v44 = vpop.xlane.xlu0 %3333  ;;  %v4020_v52 = vpop.eup %4019  ;;  %v3933_v59 = vmul.f32 -1.442695, %v3405_v46  ;;  %v2859_v26 = vadd.f32 %v2787_v20, %v2657_v14  ;;  %v3216_v23 = vadd.f32 %v8351_v30, %v3055_v45  ;;  %4035 = vrcp.f32 %v3532_v49  ;;  %v8361_v14 = vld [vmem:[#allocation72_spill] sm:$0xff]  ;;  %v8363_v46 = vld [vmem:[#allocation193_spill] sm:$0xff] }
 0x598   : > { %v4022_v27 = vpop.eup %4021  ;;  %v3527_v15 = vadd.f32 1.0, %v4020_v52  ;;  %v3064_v63 = vadd.f32 %v8361_v14, %v2866_v37  ;;  %v2296_v45 = vadd.f32 %v8362_v13, %v7350_v60  ;;  %v8365_v20 = vld [vmem:[#allocation173_spill] sm:$0xff]  ;;  %v3942_v9 = vmul.f32 -1.442695, %v3414_v10  ;;  %v8376_v14 = vld [vmem:[#allocation176_spill] sm:$0xff] }
 0x599   : > { %4037 = vpow2.f32 %v3933_v59  ;;  %v3057_v8 = vadd.f32 %v8354_v18, %v2859_v26  ;;  %v3407_v61 = vadd.f32 %v3334_v44, %v3216_v23  ;;  %v7413_v38 = vpop.eup %4023  ;;  %v3534_v49 = vadd.f32 1.0, %v4022_v27  ;;  %v8367_v23 = vld [vmem:[#allocation125_spill] sm:$0xff] }
 0x59a   : > { %4039 = vrcp.f32 %v3527_v15  ;;  %v2793_v19 = vpop.xlane.xlu1 %2792  ;;  %v2298_v44 = vadd.f32 %v8365_v20, %v7369_v33  ;;  %v2663_v59 = vadd.f32 %v8366_v43, %v2498_v3  ;;  %v3225_v15 = vadd.f32 %v8368_v56, %v3064_v63  ;;  %v8369_v18 = vld [vmem:[#allocation161_spill] sm:$0xff]  ;;  %v8370_v33 = vld [vmem:[#allocation195_spill] sm:$0xff] }
 0x59b   : > { %v3340_v17 = vpop.xlane.xlu0 %3339  ;;  %v4026_v21 = vpop.eup %4025  ;;  %v3935_v51 = vmul.f32 -1.442695, %v3407_v61  ;;  %v2861_v0 = vadd.f32 %v2793_v19, %v2659_v24  ;;  %v3218_v5 = vadd.f32 %v8359_v55, %v3057_v8  ;;  %v2500_v8 = vadd.f32 %v8369_v18, %v2296_v45  ;;  %v8373_v19 = vld [vmem:[#allocation48_spill] sm:$0xff]  ;;  %v8374_v55 = vld [vmem:[#allocation127_spill] sm:$0xff]  ;;  %v8381_v20 = vld [vmem:[#allocation73_spill] sm:$0xff] }
 0x59c   : > { %v4028_v28 = vpop.eup %4027  ;;  %v3529_v22 = vadd.f32 1.0, %v4026_v21  ;;  %v2502_v3 = vadd.f32 %v8371_v50, %v2298_v44  ;;  %v1913_v37 = vadd.f32 %v8372_v34, %v7266_v53  ;;  %v3416_v10 = vadd.f32 %v8375_v47, %v3225_v15  ;;  %v8377_v53 = vld [vmem:[#allocation197_spill] sm:$0xff]  ;;  %v8386_v34 = vld [vmem:[#allocation168_spill] sm:$0xff] }
 0x59d   : > { %4041 = vpow2.f32 %v3935_v51  ;;  %v3059_v57 = vadd.f32 %v8363_v46, %v2861_v0  ;;  %v3409_v11 = vadd.f32 %v3340_v17, %v3218_v5  ;;  %v7424_v16 = vpop.eup %4029  ;;  %v2868_v17 = vadd.f32 %v8373_v19, %v2666_v4  ;;  %v8378_v46 = vld [vmem:[#allocation99_spill] sm:$0xff]  ;;  %v8387_v19 = vld [vmem:[#allocation134_spill] sm:$0xff] }
 0x59e   : > { %4043 = vrcp.f32 %v3529_v22  ;;  %v2799_v52 = vpop.xlane.xlu1 %2798  ;;  %v2300_v63 = vadd.f32 %v8376_v14, %v1913_v37  ;;  %v1915_v44 = vadd.f32 %v8381_v20, %v7270_v6  ;;  %v1759_v37 = vadd.f32 %v7096_v32, %v8386_v34  ;;  %v8390_v14 = vld [vmem:[#allocation103_spill] sm:$0xff] }
 0x59f   : > { %v3346_v36 = vpop.xlane.xlu0 %3345  ;;  %v4032_v26 = vpop.eup %4031  ;;  %4045 = vpow2.f32 %v3940_v62  ;;  %v3937_v30 = vmul.f32 -1.442695, %v3409_v11  ;;  %v2863_v60 = vadd.f32 %v2799_v52, %v2661_v7  ;;  %v3220_v27 = vadd.f32 %v8367_v23, %v3059_v57  ;;  %v8379_v11 = vld [vmem:[#allocation166_spill] sm:$0xff] }
 0x5a0   : > { %v4034_v12 = vpop.eup %4033  ;;  %4047 = vrcp.f32 %v3534_v49  ;;  %v3531_v41 = vadd.f32 1.0, %v4032_v26  ;;  %v3536_v62 = vadd.f32 1.0, %v4028_v28  ;;  %v2665_v57 = vadd.f32 %v8378_v46, %v2500_v8 }
 0x5a1   : > { %4049 = vpow2.f32 %v3937_v30  ;;  %v3061_v61 = vadd.f32 %v8370_v33, %v2863_v60  ;;  %v3411_v29 = vadd.f32 %v3346_v36, %v3220_v27  ;;  %v7434_v24 = vpop.eup %4035  ;;  %v1757_v28 = vadd.f32 %v7096_v32, %v8379_v11  ;;  %v8382_v30 = vld [vmem:[#allocation129_spill] sm:$0xff]  ;;  %v8385_v33 = vld [vmem:[#allocation199_spill] sm:$0xff] }
 0x5a2   : > { %4051 = vrcp.f32 %v3531_v41  ;;  %v2805_v40 = vpop.xlane.xlu1 %2804  ;;  %v3066_v4 = vadd.f32 %v8380_v25, %v2868_v17  ;;  %v3944_v27 = vmul.f32 -1.442695, %v3416_v10  ;;  %v8384_v41 = vld [vmem:[#allocation101_spill] sm:$0xff]  ;;  %v2302_v6 = vadd.f32 %v7248_v2, %v1915_v44 }
 0x5a3   : > { %v3352_v7 = vpop.xlane.xlu0 %3351  ;;  %v4038_v21 = vpop.eup %4037  ;;  %v3939_v51 = vmul.f32 -1.442695, %v3411_v29  ;;  %v2865_v0 = vadd.f32 %v2805_v40, %v2663_v59  ;;  %v3222_v5 = vadd.f32 %v8374_v55, %v3061_v61  ;;  %4053 = vpow2.f32 %v3942_v9  ;;  %v8383_v9 = vld [vmem:[#allocation164_spill] sm:$0xff]  ;;  %v8388_v40 = vld [vmem:[#allocation75_spill] sm:$0xff]  ;;  %v8395_v44 = vld [vmem:[#allocation189_spill] sm:$0xff] }
 0x5a4   : > { %v4040_v49 = vpop.eup %4039  ;;  %v3533_v22 = vadd.f32 1.0, %v4038_v21  ;;  %v2504_v56 = vadd.f32 %v8383_v9, %v2300_v63  ;;  %v2667_v18 = vadd.f32 %v8384_v41, %v2502_v3  ;;  %v3227_v17 = vadd.f32 %v8387_v19, %v3066_v4  ;;  %v8389_v55 = vld [vmem:[#allocation131_spill] sm:$0xff]  ;;  %v8401_v19 = vld [vmem:[#allocation136_spill] sm:$0xff] }
 0x5a5   : > { %4055 = vpow2.f32 %v3939_v51  ;;  %v3063_v13 = vadd.f32 %v8377_v53, %v2865_v0  ;;  %v3413_v45 = vadd.f32 %v3352_v7, %v3222_v5  ;;  %3629 = vperm.xlu1 %4004, %v4040_v49   ;;  %v1917_v7 = vadd.f32 %v8388_v40, %v1757_v28  ;;  %v8394_v28 = vld [vmem:[#allocation77_spill] sm:$0xff] }
 0x5a6   : > { %4057 = vrcp.f32 %v3533_v22  ;;  %v2811_v52 = vpop.xlane.xlu1 %2810  ;;  %v3538_v51 = vadd.f32 1.0, %v4034_v12  ;;  %v2669_v63 = vadd.f32 %v8390_v14, %v2504_v56  ;;  %v8391_v22 = vld [vmem:[#allocation41_spill] sm:$0xff]  ;;  %v8393_v12 = vld [vmem:[#allocation171_spill] sm:$0xff]  ;;  %v1919_v25 = vadd.f32 %v8394_v28, %v1759_v37 }
 0x5a7   : > { %v3358_v36 = vpop.xlane.xlu0 %3357  ;;  %v4042_v43 = vpop.eup %4041  ;;  %4059 = vrcp.f32 %v3536_v62  ;;  %v3941_v59 = vmul.f32 -1.442695, %v3413_v45  ;;  %v2867_v26 = vadd.f32 %v2811_v52, %v2665_v57  ;;  %v3224_v60 = vadd.f32 %v8382_v30, %v3063_v13  ;;  %v8392_v13 = vld [vmem:[#allocation200_spill] sm:$0xff]  ;;  %v8398_v56 = vld [vmem:[#allocation201_spill] sm:$0xff] }
 0x5a8   : > { %v4044_v23 = vpop.eup %4043  ;;  %v3535_v15 = vadd.f32 1.0, %v4042_v43  ;;  %v2304_v47 = vadd.f32 %v7274_v1, %v1917_v7  ;;  %v2506_v53 = vadd.f32 %v8391_v22, %v2302_v6  ;;  %v1761_v11 = vadd.f32 %v7096_v32, %v8393_v12  ;;  %v8402_v7 = vld [vmem:[#allocation135_spill] sm:$0xff] }
 0x5a9   : > { %v7453_v8 = vpop.eup %4045  ;;  %4061 = vpow2.f32 %v3941_v59  ;;  %v3065_v61 = vadd.f32 %v8385_v33, %v2867_v26  ;;  %v3415_v29 = vadd.f32 %v3358_v36, %v3224_v60  ;;  %3639 = vperm.xlu1 %4004, %v4044_v23   ;;  %v3418_v52 = vadd.f32 %v8395_v44, %v3227_v17  ;;  %v8396_v59 = vld [vmem:[#allocation133_spill] sm:$0xff]  ;;  %v8397_v60 = vld [vmem:[#allocation167_spill] sm:$0xff]  ;;  %v8410_v44 = vld [vmem:[#allocation172_spill] sm:$0xff] }
 0x5aa   : > { %v7457_v50 = vpop.eup %4047  ;;  %4063 = vrcp.f32 %v3535_v15  ;;  %v2817_v3 = vpop.xlane.xlu1 %2816  ;;  %v2508_v23 = vadd.f32 %v8397_v60, %v2304_v47  ;;  %v8400_v33 = vld [vmem:[#allocation79_spill] sm:$0xff]  ;;  %v3229_v17 = vadd.f32 %v8401_v19, %v7253_v58  ;;  %v8405_v47 = vld [vmem:[#allocation202_spill] sm:$0xff] }
 0x5ab   : > { %v3364_v21 = vpop.xlane.xlu0 %3363  ;;  %v4050_v62 = vpop.eup %4049  ;;  %v3943_v2 = vmul.f32 -1.442695, %v3415_v29  ;;  %v2869_v0 = vadd.f32 %v2817_v3, %v2667_v18  ;;  %v3226_v5 = vadd.f32 %v8389_v55, %v3065_v61  ;;  %4065 = vpow2.f32 %v3944_v27  ;;  %v8399_v18 = vld [vmem:[#allocation105_spill] sm:$0xff]  ;;  %v8404_v55 = vld [vmem:[#allocation107_spill] sm:$0xff] }
 0x5ac   : > { %v4052_v49 = vpop.eup %4051  ;;  %v3537_v10 = vadd.f32 1.0, %v4050_v62  ;;  %v2306_v27 = vadd.f32 %v7299_v39, %v1919_v25  ;;  %v2671_v6 = vadd.f32 %v8399_v18, %v2506_v53  ;;  %v1921_v61 = vadd.f32 %v8400_v33, %v1761_v11  ;;  %v8407_v11 = vld [vmem:[#allocation137_spill] sm:$0xff]  ;;  %v8408_v25 = vld [vmem:[#allocation138_spill] sm:$0xff] }
 0x5ad   : > { %4067 = vpow2.f32 %v3943_v2  ;;  %v3067_v45 = vadd.f32 %v8392_v13, %v2869_v0  ;;  %v3417_v46 = vadd.f32 %v3364_v21, %v3226_v5  ;;  %3649 = vperm.xlu1 %4004, %v4052_v49   ;;  %v7468_v57 = vpop.eup %4053  ;;  %v3946_v62 = vmul.f32 -1.442695, %v3418_v52  ;;  %v8406_v13 = vld [vmem:[#allocation192_spill] sm:$0xff] }
 0x5ae   : > { %4069 = vrcp.f32 %v3537_v10  ;;  %v2823_v4 = vpop.xlane.xlu1 %2822  ;;  %v2673_v5 = vadd.f32 %v8404_v55, %v2508_v23  ;;  %v2308_v49 = vadd.f32 %v7322_v31, %v1921_v61  ;;  %v3540_v18 = vadd.f32 1.0, %v7453_v8  ;;  %v8414_v61 = vld [vmem:[#allocation140_spill] sm:$0xff] }
 0x5af   : > { %v3370_v1 = vpop.xlane.xlu0 %3369  ;;  %v4056_v20 = vpop.eup %4055  ;;  %v3945_v36 = vmul.f32 -1.442695, %v3417_v46  ;;  %v2871_v43 = vadd.f32 %v2823_v4, %v2669_v63  ;;  %v3228_v26 = vadd.f32 %v8396_v59, %v3067_v45  ;;  %4071 = vrcp.f32 %v3538_v51  ;;  %v8403_v51 = vld [vmem:[#allocation170_spill] sm:$0xff] }
 0x5b0   : > { %v4058_v30 = vpop.eup %4057  ;;  %v3539_v9 = vadd.f32 1.0, %v4056_v20  ;;  %v2510_v2 = vadd.f32 %v8403_v51, %v2306_v27  ;;  %v3420_v45 = vadd.f32 %v8406_v13, %v3229_v17  ;;  %v3231_v4 = vadd.f32 %v8408_v25, %v7279_v42  ;;  %v8416_v17 = vld [vmem:[#allocation111_spill] sm:$0xff] }
 0x5b1   : > { %v7477_v32 = vpop.eup %4059  ;;  %4073 = vpow2.f32 %v3945_v36  ;;  %v3069_v15 = vadd.f32 %v8398_v56, %v2871_v43  ;;  %v3419_v41 = vadd.f32 %v3370_v1, %v3228_v26  ;;  %3659 = vperm.xlu1 %4004, %v4058_v30   ;;  %v2512_v52 = vadd.f32 %v8410_v44, %v2308_v49  ;;  %v8411_v36 = vld [vmem:[#allocation203_spill] sm:$0xff]  ;;  %v8419_v49 = vld [vmem:[#allocation142_spill] sm:$0xff] }
 0x5b2   : > { %4075 = vrcp.f32 %v3539_v9  ;;  %v2829_v29 = vpop.xlane.xlu1 %2828  ;;  %v3948_v27 = vmul.f32 -1.442695, %v3420_v45  ;;  %v8412_v56 = vld [vmem:[#allocation139_spill] sm:$0xff] }
 0x5b3   : > { %v3376_v34 = vpop.xlane.xlu0 %3375  ;;  %v4062_v37 = vpop.eup %4061  ;;  %v3947_v39 = vmul.f32 -1.442695, %v3419_v41  ;;  %v2873_v40 = vadd.f32 %v2829_v29, %v2671_v6  ;;  %v3230_v3 = vadd.f32 %v8402_v7, %v3069_v15  ;;  %v8413_v6 = vld [vmem:[#allocation50_spill] sm:$0xff]  ;;  %v8421_v45 = vld [vmem:[#allocation39_spill] sm:$0xff] }
 0x5b4   : > { %v4064_v21 = vpop.eup %4063  ;;  %v3541_v0 = vadd.f32 1.0, %v4062_v37  ;;  %v3422_v33 = vadd.f32 %v8413_v6, %v3231_v4 }
 0x5b5   : > { %4077 = vpow2.f32 %v3947_v39  ;;  %v3071_v10 = vadd.f32 %v8405_v47, %v2873_v40  ;;  %v3421_v14 = vadd.f32 %v3376_v34, %v3230_v3  ;;  %3634 = vperm.xlu1 %4004, %v7413_v38   ;;  %3669 = vperm.xlu0 %4003, %v4064_v21   ;;  %v7490_v58 = vpop.eup %4065  ;;  %v8409_v38 = vld [vmem:[#allocation109_spill] sm:$0xff]  ;;  %v8415_v34 = vld [vmem:[#allocation204_spill] sm:$0xff]  ;;  %v2677_v39 = vadd.f32 %v8416_v17, %v2512_v52 }
 0x5b6   : > { %4079 = vrcp.f32 %v3541_v0  ;;  %v2835_v63 = vpop.xlane.xlu1 %2834  ;;  %v2675_v20 = vadd.f32 %v8409_v38, %v2510_v2  ;;  %v3542_v40 = vadd.f32 1.0, %v7468_v57  ;;  %v3950_v2 = vmul.f32 -1.442695, %v3422_v33  ;;  %v8418_v0 = vld [vmem:[#allocation205_spill] sm:$0xff]  ;;  %v8420_v57 = vld [vmem:[#allocation38_spill] sm:$0xff] }
 0x5b7   : > { %v3382_v22 = vpop.xlane.xlu0 %3381  ;;  %v4068_v53 = vpop.eup %4067  ;;  %v3949_v46 = vmul.f32 -1.442695, %v3421_v14  ;;  %v2875_v12 = vadd.f32 %v2835_v63, %v2673_v5  ;;  %v3232_v28 = vadd.f32 %v8407_v11, %v3071_v10  ;;  %4081 = vpow2.f32 %v3946_v62  ;;  %v8417_v62 = vld [vmem:[#allocation141_spill] sm:$0xff] }
 0x5b8   : > { %v4070_v31 = vpop.eup %4069  ;;  %v3543_v1 = vadd.f32 1.0, %v4068_v53  ;;  %v3235_v47 = vadd.f32 %v8419_v49, %v7325_v54  ;;  %v3544_v53 = vadd.f32 1.0, %v7490_v58  ;;  %v3237_v58 = vadd.f32 %v8421_v45, %v7343_v35 }
 0x5b9   : > { %4083 = vpow2.f32 %v3949_v46  ;;  %v3073_v43 = vadd.f32 %v8411_v36, %v2875_v12  ;;  %v3423_v59 = vadd.f32 %v3382_v22, %v3232_v28  ;;  %3644 = vperm.xlu1 %4004, %v7424_v16   ;;  %3679 = vperm.xlu0 %4003, %v4070_v31   ;;  %v7500_v26 = vpop.eup %4071  ;;  %v3233_v16 = vadd.f32 %v8414_v61, %v7303_v48  ;;  %v8422_v31 = vld [vmem:[#allocation206_spill] sm:$0xff] }
 0x5ba   : > { %4085 = vrcp.f32 %v3543_v1  ;;  %v2841_v30 = vpop.xlane.xlu1 %2840  ;;  %v3426_v25 = vadd.f32 %v8422_v31, %v3235_v47  ;;  %v8427_v47 = vld [vmem:[#allocation5_spill] sm:$0xff] }
 0x5bb   : > { %v3388_v60 = vpop.xlane.xlu0 %3387  ;;  %v4074_v23 = vpop.eup %4073  ;;  %v3951_v42 = vmul.f32 -1.442695, %v3423_v59  ;;  %v2877_v9 = vadd.f32 %v2841_v30, %v2675_v20  ;;  %v3234_v15 = vadd.f32 %v8412_v56, %v3073_v43  ;;  %v3424_v55 = vadd.f32 %v8418_v0, %v3233_v16 }
 0x5bc   : > { %v4076_v41 = vpop.eup %4075  ;;  %v3545_v29 = vadd.f32 1.0, %v4074_v23  ;;  %v3954_v36 = vmul.f32 -1.442695, %v3426_v25 }
 0x5bd   : > { %4087 = vpow2.f32 %v3951_v42  ;;  %v3075_v37 = vadd.f32 %v8415_v34, %v2877_v9  ;;  %v3425_v19 = vadd.f32 %v3388_v60, %v3234_v15  ;;  %3654 = vperm.xlu1 %4004, %v7434_v24   ;;  %3689 = vperm.xlu0 %4003, %v4076_v41   ;;  %v3952_v11 = vmul.f32 -1.442695, %v3424_v55 }
 0x5be   : > { %4089 = vrcp.f32 %v3545_v29  ;;  %v2847_v7 = vpop.xlane.xlu1 %2846 }
 0x5bf   : > { %v4078_v8 = vpop.eup %4077  ;;  %4091 = vpow2.f32 %v3948_v27  ;;  %v3953_v3 = vmul.f32 -1.442695, %v3425_v19  ;;  %v2879_v21 = vadd.f32 %v2847_v7, %v2677_v39  ;;  %v3236_v48 = vadd.f32 %v8417_v62, %v3075_v37  ;;  %v3394_v24 = vpop.xlane.xlu0 %3393 }
 0x5c0   : > { %v4080_v51 = vpop.eup %4079  ;;  %4093 = vrcp.f32 %v3540_v18  ;;  %v3547_v5 = vadd.f32 1.0, %v4078_v8 }
 0x5c1   : > { %4095 = vpow2.f32 %v3953_v3  ;;  %v3077_v10 = vadd.f32 %v8420_v57, %v2879_v21  ;;  %v3427_v14 = vadd.f32 %v3394_v24, %v3236_v48  ;;  %3664 = vperm.xlu1 %4004, %v7457_v50   ;;  %3699 = vperm.xlu0 %4003, %v4080_v51   ;;  %v4082_v63 = vpop.eup %4081  ;;  %v8423_v48 = vld [vmem:[#allocation4_spill] sm:$0xff] }
 0x5c2   : > { %4097 = vrcp.f32 %v3547_v5  ;;  %v3397_v28 = vpop.xlane.xlu1 %3396  ;;  %v3546_v20 = vadd.f32 1.0, %v4082_v63  ;;  %v8425_v5 = vld [vmem:[#allocation6_spill] sm:$0xff] }
 0x5c3   : > { %v4084_v22 = vpop.eup %4083  ;;  %4099 = vrcp.f32 %v3542_v40  ;;  %v3955_v13 = vmul.f32 -1.442695, %v3427_v14  ;;  %v3238_v46 = vadd.f32 %v8421_v45, %v3077_v10  ;;  %v3428_v43 = vadd.f32 %v3397_v28, %v3237_v58  ;;  %v8429_v14 = vld [vmem:[#allocation7_spill] sm:$0xff]  ;;  %v8438_v58 = vld [vmem:[#allocation13_spill] sm:$0xff] }
 0x5c4   : > { %v4086_v12 = vpop.eup %4085  ;;  %4101 = vpow2.f32 %v3950_v2  ;;  %v3549_v54 = vadd.f32 1.0, %v4084_v22 }
 0x5c5   : > { %4103 = vpow2.f32 %v3955_v13  ;;  %v3429_v4 = vadd.f32 %v3397_v28, %v3238_v46  ;;  %3674 = vperm.xlu1 %4004, %v7477_v32   ;;  %3709 = vperm.xlu0 %4003, %v4086_v12   ;;  %v3956_v27 = vmul.f32 -1.442695, %v3428_v43  ;;  %v8433_v12 = vld [vmem:[#allocation3_spill] sm:$0xff] }
 0x5c6   : > { %4105 = vrcp.f32 %v3549_v54  ;;  %v8434_v54 = vld [vmem:[#allocation11_spill] sm:$0xff] }
 0x5c7   : > { %v4088_v50 = vpop.eup %4087  ;;  %4107 = vrcp.f32 %v3544_v53  ;;  %v3957_v1 = vmul.f32 -1.442695, %v3429_v4  ;;  %v8431_v53 = vld [vmem:[#allocation9_spill] sm:$0xff]  ;;  %v8437_v4 = vld [vmem:[#allocation8_spill] sm:$0xff] }
 0x5c8   : > { %v4090_v38 = vpop.eup %4089  ;;  %4109 = vpow2.f32 %v3952_v11  ;;  %v3551_v44 = vadd.f32 1.0, %v4088_v50 }
 0x5c9   : > { %v4092_v52 = vpop.eup %4091  ;;  %4111 = vpow2.f32 %v3957_v1  ;;  %3684 = vperm.xlu1 %4004, %v7500_v26   ;;  %3719 = vperm.xlu0 %4003, %v4090_v38  }
 0x5ca   : > { %v4094_v32 = vpop.eup %4093  ;;  %4113 = vrcp.f32 %v3551_v44  ;;  %v3548_v60 = vadd.f32 1.0, %v4092_v52  ;;  %v8441_v44 = vld [vmem:[#allocation10_spill] sm:$0xff] }
 0x5cb   : > { %v4096_v59 = vpop.eup %4095  ;;  %4115 = vrcp.f32 %v3546_v20 }
 0x5cc   : > { %v4098_v30 = vpop.eup %4097  ;;  %v3553_v23 = vadd.f32 1.0, %v4096_v59  ;;  %4117 = vpow2.f32 %v3954_v36  ;;  %v8442_v36 = vld [vmem:[#allocation15_spill] sm:$0xff] }
 0x5cd   : > { %v4100_v35 = vpop.eup %4099  ;;  %3694 = vperm.xlu1 %4004, %v4094_v32   ;;  %3729 = vperm.xlu0 %4003, %v4098_v30   ;;  %v8445_v30 = vld [vmem:[#allocation12_spill] sm:$0xff] }
 0x5ce   : > { %v4102_v42 = vpop.eup %4101  ;;  %4119 = vrcp.f32 %v3553_v23  ;;  %v8446_v23 = vld [vmem:[#allocation17_spill] sm:$0xff] }
 0x5cf   : > { %v4104_v9 = vpop.eup %4103  ;;  %4121 = vrcp.f32 %v3548_v60  ;;  %v3550_v41 = vadd.f32 1.0, %v4102_v42 }
 0x5d0   : > { %v4106_v56 = vpop.eup %4105  ;;  %v3555_v15 = vadd.f32 1.0, %v4104_v9  ;;  %4123 = vpow2.f32 %v3956_v27  ;;  %v8449_v9 = vld [vmem:[#allocation14_spill] sm:$0xff] }
 0x5d1   : > { %v4108_v26 = vpop.eup %4107  ;;  %3704 = vperm.xlu1 %4004, %v4100_v35   ;;  %3739 = vperm.xlu0 %4003, %v4106_v56  }
 0x5d2   : > { %v4110_v18 = vpop.eup %4109  ;;  %4125 = vrcp.f32 %v3555_v15  ;;  %v8450_v15 = vld [vmem:[#allocation19_spill] sm:$0xff] }
 0x5d3   : > { %v4112_v6 = vpop.eup %4111  ;;  %4127 = vrcp.f32 %v3550_v41  ;;  %v3552_v29 = vadd.f32 1.0, %v4110_v18 }
 0x5d4   : > { %v4114_v33 = vpop.eup %4113  ;;  %v3557_v61 = vadd.f32 1.0, %v4112_v6  ;;  %v8453_v6 = vld [vmem:[#allocation16_spill] sm:$0xff] }
 0x5d5   : > { %3714 = vperm.xlu1 %4004, %v4108_v26   ;;  %3749 = vperm.xlu0 %4003, %v4114_v33   ;;  %v4116_v16 = vpop.eup %4115 }
 0x5d6   : > { %4129 = vrcp.f32 %v3557_v61  ;;  %v4118_v34 = vpop.eup %4117  ;;  %v8454_v61 = vld [vmem:[#allocation21_spill] sm:$0xff] }
 0x5d7   : > { %4131 = vrcp.f32 %v3552_v29  ;;  %v3554_v17 = vadd.f32 1.0, %v4118_v34 }
 0x5d8   : > { %v4120_v37 = vpop.eup %4119 }
 0x5d9   : > { %3724 = vperm.xlu1 %4004, %v4116_v16   ;;  %3759 = vperm.xlu0 %4003, %v4120_v37   ;;  %v4122_v19 = vpop.eup %4121  ;;  %4133 = vrcp.f32 %v3554_v17  ;;  %v8457_v37 = vld [vmem:[#allocation18_spill] sm:$0xff]  ;;  %v8458_v17 = vld [vmem:[#allocation23_spill] sm:$0xff] }
 0x5da   : > { %v4124_v39 = vpop.eup %4123 }
 0x5db   : > { %v3556_v7 = vadd.f32 1.0, %v4124_v39 }
 0x5dc   : > { %v4126_v40 = vpop.eup %4125 }
 0x5dd   : > { %3734 = vperm.xlu1 %4004, %v4122_v19   ;;  %3769 = vperm.xlu0 %4003, %v4126_v40   ;;  %v4128_v8 = vpop.eup %4127  ;;  %4135 = vrcp.f32 %v3556_v7 }
 0x5e0   : > { %v4130_v3 = vpop.eup %4129 }
 0x5e1   : > { %3744 = vperm.xlu1 %4004, %v4128_v8   ;;  %3779 = vperm.xlu0 %4003, %v4130_v3   ;;  %v4132_v21 = vpop.eup %4131  ;;  %v8460_v8 = vld [vmem:[#allocation20_spill] sm:$0xff] }
 0x5e3   : > { %v4134_v2 = vpop.eup %4133 }
 0x5e5   : > { %3754 = vperm.xlu1 %4004, %v4132_v21   ;;  %v8461_v21 = vld [vmem:[#allocation25_spill] sm:$0xff] }
 0x5e6   : > { %v3625_v62 = vpop.permute.xlu0 %3624 }
 0x5e7   : > { %v3782_v51 = vmul.f32 %v3625_v62, %v8423_v48  ;;  %v4136_v0 = vpop.eup %4135 }
 0x5e9   : > { %3814 = vst.msk [vmem:[%s7529_s20] sm:$0xff] %vm8424_vm8, %v3782_v51  ;;  %3764 = vperm.xlu1 %4004, %v4134_v2   ;;  %vm8456_vm8 = vmmov %vm8426_vm0  ;;  %v8464_v2 = vld [vmem:[#allocation22_spill] sm:$0xff] }
 0x5ed   : > { %3774 = vperm.xlu1 %4004, %v4136_v0  }
 0x624   : > { %v3630_v55 = vpop.permute.xlu1 %3629 }
 0x625   : > { %v3783_v24 = vmul.f32 %v3630_v55, %v8425_v5  ;;  %v8465_v55 = vld [vmem:[#allocation27_spill] sm:$0xff] }
 0x627   : > { %3815 = vst.msk [vmem:[%s7529_s20 + $0x8] sm:$0xff] %vm8426_vm0, %v3783_v24 }
 0x628   : > { %v3640_v49 = vpop.permute.xlu1 %3639 }
 0x629   : > { %v3785_v57 = vmul.f32 %v3640_v49, %v8427_v47  ;;  %v8468_v47 = vld [vmem:[#allocation24_spill] sm:$0xff] }
 0x62b   : > { %3817 = vst.msk [vmem:[%s7529_s20 + $0x18] sm:$0xff] %vm8428_vm14, %v3785_v57  ;;  %vm8459_vm14 = vmmov %vm8426_vm0 }
 0x62c   : > { %v3650_v10 = vpop.permute.xlu1 %3649 }
 0x62d   : > { %v3787_v63 = vmul.f32 %v3650_v10, %v8429_v14  ;;  %v8469_v10 = vld [vmem:[#allocation29_spill] sm:$0xff] }
 0x62f   : > { %3819 = vst.msk [vmem:[%s7529_s20 + $0x28] sm:$0xff] %vm8430_vm2, %v3787_v63  ;;  %vm8462_vm2 = vmmov %vm8426_vm0 }
 0x630   : > { %v3660_v22 = vpop.permute.xlu1 %3659 }
 0x631   : > { %v3789_v13 = vmul.f32 %v3660_v22, %v8431_v53  ;;  %v8472_v53 = vld [vmem:[#allocation26_spill] sm:$0xff] }
 0x633   : > { %3821 = vst.msk [vmem:[%s7529_s20 + $0x38] sm:$0xff] %vm8432_vm6, %v3789_v13  ;;  %vm8463_vm6 = vmmov %vm8426_vm0 }
 0x634   : > { %v3635_v45 = vpop.permute.xlu1 %3634  ;;  %v3670_v46 = vpop.permute.xlu0 %3669 }
 0x635   : > { %v3784_v11 = vmul.f32 %v3635_v45, %v8433_v12  ;;  %v3791_v28 = vmul.f32 %v3670_v46, %v8434_v54  ;;  %v8473_v45 = vld [vmem:[#allocation31_spill] sm:$0xff]  ;;  %v8476_v54 = vld [vmem:[#allocation28_spill] sm:$0xff] }
 0x637   : > { %3816 = vst.msk [vmem:[%s7529_s20 + $0x10] sm:$0xff] %vm8435_vm9, %v3784_v11  ;;  %vm8466_vm9 = vmmov %vm8426_vm0 }
 0x638   : > { %3823 = vst.msk [vmem:[%s7529_s20 + $0x48] sm:$0xff] %vm8436_vm3, %v3791_v28  ;;  %v3645_v31 = vpop.permute.xlu1 %3644  ;;  %v3680_v25 = vpop.permute.xlu0 %3679  ;;  %vm8467_vm3 = vmmov %vm8426_vm0 }
 0x639   : > { %v3786_v50 = vmul.f32 %v3645_v31, %v8437_v4  ;;  %v3793_v1 = vmul.f32 %v3680_v25, %v8438_v58  ;;  %v8477_v31 = vld [vmem:[#allocation33_spill] sm:$0xff] }
 0x63b   : > { %3818 = vst.msk [vmem:[%s7529_s20 + $0x20] sm:$0xff] %vm8439_vm7, %v3786_v50  ;;  %vm8470_vm7 = vmmov %vm8426_vm0  ;;  %v8480_v50 = vld [vmem:[#allocation30_spill] sm:$0xff] }
 0x63c   : > { %3825 = vst.msk [vmem:[%s7529_s20 + $0x58] sm:$0xff] %vm8440_vm5, %v3793_v1  ;;  %v3655_v38 = vpop.permute.xlu1 %3654  ;;  %v3690_v20 = vpop.permute.xlu0 %3689  ;;  %vm8471_vm5 = vmmov %vm8426_vm0 }
 0x63d   : > { %v3788_v52 = vmul.f32 %v3655_v38, %v8441_v44  ;;  %v3795_v43 = vmul.f32 %v3690_v20, %v8442_v36  ;;  %v8482_v38 = vld [vmem:[#allocation32_spill] sm:$0xff] }
 0x63f   : > { %3820 = vst.msk [vmem:[%s7529_s20 + $0x30] sm:$0xff] %vm8443_vm11, %v3788_v52  ;;  %vm8474_vm11 = vmmov %vm8426_vm0  ;;  %v8484_v52 = vld [vmem:[#allocation34_spill] sm:$0xff] }
 0x640   : > { %3827 = vst.msk [vmem:[%s7529_s20 + $0x68] sm:$0xff] %vm8444_vm13, %v3795_v43  ;;  %v3665_v32 = vpop.permute.xlu1 %3664  ;;  %v3700_v59 = vpop.permute.xlu0 %3699  ;;  %vm8475_vm13 = vmmov %vm8426_vm0 }
 0x641   : > { %v3790_v60 = vmul.f32 %v3665_v32, %v8445_v30  ;;  %v3797_v35 = vmul.f32 %v3700_v59, %v8446_v23 }
 0x643   : > { %3822 = vst.msk [vmem:[%s7529_s20 + $0x40] sm:$0xff] %vm8447_vm12, %v3790_v60  ;;  %vm8478_vm12 = vmmov %vm8426_vm0 }
 0x644   : > { %3829 = vst.msk [vmem:[%s7529_s20 + $0x78] sm:$0xff] %vm8448_vm4, %v3797_v35  ;;  %v3675_v27 = vpop.permute.xlu1 %3674  ;;  %v3710_v42 = vpop.permute.xlu0 %3709  ;;  %vm8479_vm4 = vmmov %vm8426_vm0 }
 0x645   : > { %v3792_v56 = vmul.f32 %v3675_v27, %v8449_v9  ;;  %v3799_v26 = vmul.f32 %v3710_v42, %v8450_v15 }
 0x647   : > { %3824 = vst.msk [vmem:[%s7529_s20 + $0x50] sm:$0xff] %vm8451_vm15, %v3792_v56  ;;  %vm8481_vm15 = vmmov %vm8426_vm0 }
 0x648   : > { %3831 = vst.msk [vmem:[%s7529_s20 + $0x88] sm:$0xff] %vm8452_vm1, %v3799_v26  ;;  %v3685_v41 = vpop.permute.xlu1 %3684  ;;  %v3720_v18 = vpop.permute.xlu0 %3719  ;;  %vm8483_vm1 = vmmov %vm8426_vm0 }
 0x649   : > { %v3794_v33 = vmul.f32 %v3685_v41, %v8453_v6  ;;  %v3801_v16 = vmul.f32 %v3720_v18, %v8454_v61 }
 0x64b   : > { %3826 = vst.msk [vmem:[%s7529_s20 + $0x60] sm:$0xff] %vm8455_vm10, %v3794_v33  ;;  %vm8485_vm10 = vmmov %vm8426_vm0 }
 0x64c   : > { %3833 = vst.msk [vmem:[%s7529_s20 + $0x98] sm:$0xff] %vm8456_vm8, %v3801_v16  ;;  %v3695_v29 = vpop.permute.xlu1 %3694  ;;  %v3730_v34 = vpop.permute.xlu0 %3729 }
 0x64d   : > { %v3796_v19 = vmul.f32 %v3695_v29, %v8457_v37  ;;  %v3803_v39 = vmul.f32 %v3730_v34, %v8458_v17 }
 0x64f   : > { %3828 = vst.msk [vmem:[%s7529_s20 + $0x70] sm:$0xff] %vm8426_vm0, %v3796_v19 }
 0x650   : > { %3835 = vst.msk [vmem:[%s7529_s20 + $0xa8] sm:$0xff] %vm8459_vm14, %v3803_v39  ;;  %v3705_v40 = vpop.permute.xlu1 %3704  ;;  %v3740_v7 = vpop.permute.xlu0 %3739 }
 0x651   : > { %v3798_v3 = vmul.f32 %v3705_v40, %v8460_v8  ;;  %v3805_v62 = vmul.f32 %v3740_v7, %v8461_v21 }
 0x653   : > { %3830 = vst.msk [vmem:[%s7529_s20 + $0x80] sm:$0xff] %vm8462_vm2, %v3798_v3 }
 0x654   : > { %3837 = vst.msk [vmem:[%s7529_s20 + $0xb8] sm:$0xff] %vm8463_vm6, %v3805_v62  ;;  %v3715_v48 = vpop.permute.xlu1 %3714  ;;  %v3750_v51 = vpop.permute.xlu0 %3749 }
 0x655   : > { %v3800_v0 = vmul.f32 %v3715_v48, %v8464_v2  ;;  %v3807_v5 = vmul.f32 %v3750_v51, %v8465_v55 }
 0x657   : > { %3832 = vst.msk [vmem:[%s7529_s20 + $0x90] sm:$0xff] %vm8466_vm9, %v3800_v0 }
 0x658   : > { %3839 = vst.msk [vmem:[%s7529_s20 + $0xc8] sm:$0xff] %vm8467_vm3, %v3807_v5  ;;  %v3725_v24 = vpop.permute.xlu1 %3724  ;;  %v3760_v49 = vpop.permute.xlu0 %3759 }
 0x659   : > { %v3802_v57 = vmul.f32 %v3725_v24, %v8468_v47  ;;  %v3809_v14 = vmul.f32 %v3760_v49, %v8469_v10 }
 0x65b   : > { %3834 = vst.msk [vmem:[%s7529_s20 + $0xa0] sm:$0xff] %vm8470_vm7, %v3802_v57 }
 0x65c   : > { %3841 = vst.msk [vmem:[%s7529_s20 + $0xd8] sm:$0xff] %vm8471_vm5, %v3809_v14  ;;  %v3735_v63 = vpop.permute.xlu1 %3734  ;;  %v3770_v22 = vpop.permute.xlu0 %3769 }
 0x65d   : > { %v3804_v13 = vmul.f32 %v3735_v63, %v8472_v53  ;;  %v3811_v46 = vmul.f32 %v3770_v22, %v8473_v45 }
 0x65f   : > { %3836 = vst.msk [vmem:[%s7529_s20 + $0xb0] sm:$0xff] %vm8474_vm11, %v3804_v13 }
 0x660   : > { %3843 = vst.msk [vmem:[%s7529_s20 + $0xe8] sm:$0xff] %vm8475_vm13, %v3811_v46  ;;  %v3745_v12 = vpop.permute.xlu1 %3744  ;;  %v3780_v11 = vpop.permute.xlu0 %3779 }
 0x661   : > { %v3806_v28 = vmul.f32 %v3745_v12, %v8476_v54  ;;  %v3813_v25 = vmul.f32 %v3780_v11, %v8477_v31 }
 0x663   : > { %3838 = vst.msk [vmem:[%s7529_s20 + $0xc0] sm:$0xff] %vm8478_vm12, %v3806_v28 }
 0x664   : > { %3845 = vst.msk [vmem:[%s7529_s20 + $0xf8] sm:$0xff] %vm8479_vm4, %v3813_v25  ;;  %v3755_v4 = vpop.permute.xlu1 %3754 }
 0x665   : > { %v3808_v58 = vmul.f32 %v3755_v4, %v8480_v50 }
 0x667   : > { %3840 = vst.msk [vmem:[%s7529_s20 + $0xd0] sm:$0xff] %vm8481_vm15, %v3808_v58 }
 0x668   : > { %v3765_v1 = vpop.permute.xlu1 %3764 }
 0x669   : > { %v3810_v20 = vmul.f32 %v3765_v1, %v8482_v38 }
 0x66b   : > { %3842 = vst.msk [vmem:[%s7529_s20 + $0xe0] sm:$0xff] %vm8483_vm1, %v3810_v20 }
 0x66c   : > { %v3775_v44 = vpop.permute.xlu1 %3774 }
 0x66d   : > { %v3812_v36 = vmul.f32 %v3775_v44, %v8484_v52 }
 0x66f   : > { %3844 = vst.msk [vmem:[%s7529_s20 + $0xf0] sm:$0xff] %vm8485_vm10, %v3812_v36 }
 0x670 PF: > { %s19_s26 = sadd.s32 1, %s4153_s26  }
 0x671   : > { %p16_p4 = scmp.ge.s32.totalorder %s19_s26, 4  }
 0x673   :  { %18 = sbr.rel (!%p16_p4) target bundleno = 3 (0x3), region = 78 }

// kernel: unet_block_forward.7
= control target key start
LH: loop header
LB: loop body
LE: loop exit
PB: predicated region body
PF: predicated region fallthrough
CT: control target
= control target key end

     0   :  { %s2290_s12 = smov 0   ;;  %s2292_s13 = smov 0   ;;  %s2778_s0 = inlined_call_operand.vmem [shape: bf16[3,576,32], index: 0, kind: input, shape index: {}]   ;;  %s2779_s1 = inlined_call_operand.vmem [shape: bf16[3,3,32,32], index: 1, kind: input, shape index: {}]   ;;  %s2780_s2 = inlined_call_operand.vmem [shape: f32[1,32], index: 2, kind: input, shape index: {}]   ;;  %s2781_s3 = inlined_call_operand.vmem [shape: f32[576,32], index: 3, kind: output, shape index: {}]  }
   0x1   :  { %s2294_s14 = smov 0   ;;  %s2296_s15 = smov 0  }
   0x2   :  { %s2298_s16 = smov 0  }
   0x3 LB: > { %s22_s17 = sadd.s32 1, %s2259_s14  ;;  %s25_s18 = sadd.s32 1, %s2263_s15  ;;  %s2267_s16 = sphi %s2298_s16, %s13_s16   ;;  %s2263_s15 = sphi %s2296_s15, %s2785_s15   ;;  %s2259_s14 = sphi %s2294_s14, %s2784_s14   ;;  %s2255_s13 = sphi %s2292_s13, %s2783_s13   ;;  %s2251_s12 = sphi %s2290_s12, %s2782_s12  }
   0x4   : > { %p23_p0 = scmp.ge.s32.totalorder %s22_s17, 3  ;;  %p1883_p1 = scmp.ge.s32.totalorder %s2267_s16, 1 }
   0x5   : > { %p166_p2 = scmp.lt.s32.totalorder %s2267_s16, 7 }
   0x6   : > { %s2787_s17 = smov (%p23_p0, %s22_s17), 0  ;;  %s2789_s18 = smov (!%p23_p0, %s25_s18), %s2263_s15 }
   0x7   : > { %p167_p3 = pnand %p1883_p1, %p166_p2  ;;  %p27_p4 = scmp.ge.s32.totalorder %s2789_s18, 2 }
   0x8   : > { %s199_s19 = smul.u32 (!%p167_p3), 36, %s2255_s13  ;;  %p200_p5 = scmp.lt.s32.totalorder (!%p167_p3), %s2251_s12, 2 }
   0x9   : > { %s2791_s18 = smov (%p27_p4, %s2789_s18), 0  ;;  %170 = sbr.rel (%p167_p3) target bundleno = 388 (0x184), region = 32 }
   0xa   : > { %p202_p6 = scmp.lt.s32.totalorder (!%p167_p3), %s199_s19, 71  ;;  %p1887_p7 = scmp.ne.s32.totalorder (!%p167_p3), %s2251_s12, 0 }
  0x10   : > { %s201_s20 = scalar_select %p200_p5, %s2251_s12, 2 }
  0x11   : > { %s2793_s19 = smov (!%p202_p6, %s199_s19), 71  ;;  %224 = sbr.rel (%p1887_p7) target bundleno = 37 (0x25), region = 36 }
  0x12   : > { %s2162_s21 = smul.u32 72, %s201_s20  ;;  %s1886_s24 = sshll.u32 %s2793_s19, 3  ;;  %vm225_vm0 = vcmask (!%p1887_p7), 261120   ;;  %v2269_v0 = vmov (!%p1887_p7), 0.0  }
  0x13   : > { %s2163_s22 = smul.u32 48, %s201_s20  ;;  %s2337_s7 = scalar_lea.vmem %s2781_s3, %s1886_s24  ;;  %226 = vst.msk [vmem:[#allocation2] sm:$0xff] (!%p1887_p7), %vm225_vm0, %v2269_v0  ;;  %227 = vst.msk [vmem:[#allocation2 + $0x8] sm:$0xff] (!%p1887_p7), %vm225_vm0, %v2269_v0 }
  0x14   : > { %s205_s23 = sadd.s32 %s2162_s21, %s2793_s19  ;;  %228 = vst.msk [vmem:[#allocation2 + $0x10] sm:$0xff] (!%p1887_p7), %vm225_vm0, %v2269_v0  ;;  %229 = vst.msk [vmem:[#allocation2 + $0x18] sm:$0xff] (!%p1887_p7), %vm225_vm0, %v2269_v0 }
  0x15   : > { %s1884_s25 = sshll.u32 %s205_s23, 2  ;;  %s2327_s28 = scalar_lea.vmem %s2779_s1, %s2163_s22  ;;  %230 = vst.msk [vmem:[#allocation2 + $0x20] sm:$0xff] (!%p1887_p7), %vm225_vm0, %v2269_v0  ;;  %231 = vst.msk [vmem:[#allocation2 + $0x28] sm:$0xff] (!%p1887_p7), %vm225_vm0, %v2269_v0 }
  0x16   : > { %s2332_s4 = scalar_lea.vmem %s2778_s0, %s1884_s25  ;;  %232 = vst.msk [vmem:[#allocation2 + $0x30] sm:$0xff] (!%p1887_p7), %vm225_vm0, %v2269_v0  ;;  %233 = vst.msk [vmem:[#allocation2 + $0x38] sm:$0xff] (!%p1887_p7), %vm225_vm0, %v2269_v0 }
  0x17   : > { %234 = vst.msk [vmem:[#allocation2 + $0x40] sm:$0xff] (!%p1887_p7), %vm225_vm0, %v2269_v0  ;;  %235 = vst.msk [vmem:[#allocation2 + $0x48] sm:$0xff] (!%p1887_p7), %vm225_vm0, %v2269_v0 }
  0x18   : > { %236 = vst.msk [vmem:[#allocation2 + $0x50] sm:$0xff] %vm225_vm0, %v2269_v0  ;;  %237 = vst.msk [vmem:[#allocation2 + $0x58] sm:$0xff] %vm225_vm0, %v2269_v0 }
  0x19   : > { %238 = vst.msk [vmem:[#allocation2 + $0x60] sm:$0xff] %vm225_vm0, %v2269_v0  ;;  %239 = vst.msk [vmem:[#allocation2 + $0x68] sm:$0xff] %vm225_vm0, %v2269_v0 }
  0x1a   : > { %240 = vst.msk [vmem:[#allocation2 + $0x70] sm:$0xff] %vm225_vm0, %v2269_v0  ;;  %241 = vst.msk [vmem:[#allocation2 + $0x78] sm:$0xff] %vm225_vm0, %v2269_v0 }
  0x1b   : > { %242 = vst.msk [vmem:[#allocation2 + $0x80] sm:$0xff] %vm225_vm0, %v2269_v0  ;;  %243 = vst.msk [vmem:[#allocation2 + $0x88] sm:$0xff] %vm225_vm0, %v2269_v0 }
  0x1c   : > { %244 = vst.msk [vmem:[#allocation2 + $0x90] sm:$0xff] %vm225_vm0, %v2269_v0  ;;  %245 = vst.msk [vmem:[#allocation2 + $0x98] sm:$0xff] %vm225_vm0, %v2269_v0 }
  0x1d   : > { %246 = vst.msk [vmem:[#allocation2 + $0xa0] sm:$0xff] %vm225_vm0, %v2269_v0  ;;  %247 = vst.msk [vmem:[#allocation2 + $0xa8] sm:$0xff] %vm225_vm0, %v2269_v0 }
  0x1e   : > { %248 = vst.msk [vmem:[#allocation2 + $0xb0] sm:$0xff] %vm225_vm0, %v2269_v0  ;;  %249 = vst.msk [vmem:[#allocation2 + $0xb8] sm:$0xff] %vm225_vm0, %v2269_v0 }
  0x1f   : > { %250 = vst.msk [vmem:[#allocation2 + $0xc0] sm:$0xff] %vm225_vm0, %v2269_v0  ;;  %251 = vst.msk [vmem:[#allocation2 + $0xc8] sm:$0xff] %vm225_vm0, %v2269_v0 }
  0x20   : > { %252 = vst.msk [vmem:[#allocation2 + $0xd0] sm:$0xff] %vm225_vm0, %v2269_v0  ;;  %253 = vst.msk [vmem:[#allocation2 + $0xd8] sm:$0xff] %vm225_vm0, %v2269_v0 }
  0x21   : > { %254 = vst.msk [vmem:[#allocation2 + $0xe0] sm:$0xff] %vm225_vm0, %v2269_v0  ;;  %255 = vst.msk [vmem:[#allocation2 + $0xe8] sm:$0xff] %vm225_vm0, %v2269_v0 }
  0x22   : > { %256 = vst.msk [vmem:[#allocation2 + $0xf0] sm:$0xff] %vm225_vm0, %v2269_v0  ;;  %257 = vst.msk [vmem:[#allocation2 + $0xf8] sm:$0xff] %vm225_vm0, %v2269_v0 }
  0x23   : > { %258 = vst.msk [vmem:[#allocation2 + $0x100] sm:$0xff] %vm225_vm0, %v2269_v0  ;;  %259 = vst.msk [vmem:[#allocation2 + $0x108] sm:$0xff] %vm225_vm0, %v2269_v0 }
  0x24   : > { %260 = vst.msk [vmem:[#allocation2 + $0x110] sm:$0xff] %vm225_vm0, %v2269_v0  ;;  %261 = vst.msk [vmem:[#allocation2 + $0x118] sm:$0xff] %vm225_vm0, %v2269_v0 }
  0x25 PF: > { %v2205_v1 = vld [vmem:[%s2327_s28] sm:$0xff]   ;;  %v2206_v2 = vld [vmem:[%s2327_s28 + $0x8] sm:$0xff]   ;;  %vm404_vm1 = vcmask 261120   ;;  %v2380_v4 = vld [vmem:[%s2332_s4 + $0x50] sm:$0xff]   ;;  %vm974_vm2 = vcmask 1046528   ;;  %vm1421_vm3 = vcmask 1045504  }
  0x26   : > { %2038 = vmatprep.subr.bf16.mxu0 %v2205_v1  ;;  %2158 = vmatprep.subr.bf16.mxu1 %v2205_v1  ;;  %v2207_v3 = vld [vmem:[%s2332_s4] sm:$0xff]   ;;  %v2209_v5 = vld [vmem:[%s2332_s4 + $0x8] sm:$0xff]   ;;  %v2387_v6 = vld [vmem:[%s2332_s4 + $0x58] sm:$0xff]   ;;  %p1974_p8 = scmp.ne.s32.totalorder %s2251_s12, 2 }
  0x27   : > { %2039 = vmatpush3.bf16.msra.mxu0 %v2205_v1  ;;  %2160 = vmatpush3.bf16.msra.mxu1 %v2205_v1  ;;  %v2211_v7 = vld [vmem:[%s2327_s28 + $0x10] sm:$0xff]   ;;  %v2212_v8 = vld [vmem:[%s2327_s28 + $0x20] sm:$0xff]   ;;  %v2215_v11 = vld [vmem:[%s2332_s4 + $0x18] sm:$0xff]  }
  0x28   : > { %2040 = vmatprep.subr.bf16.mxu0 %v2206_v2  ;;  %2159 = vmatprep.subr.bf16.mxu1 %v2206_v2  ;;  %v2213_v9 = vld [vmem:[%s2332_s4 + $0x10] sm:$0xff]   ;;  %v2393_v10 = vld [vmem:[%s2332_s4 + $0x60] sm:$0xff]   ;;  %v2216_v12 = vld [vmem:[%s2332_s4 + $0x68] sm:$0xff]  }
  0x29   : > { %2042 = vmatprep.mubr.msk.bf16.mxu0 %vm404_vm1, %v2207_v3  ;;  %2062 = vmatprep.mubr.msk.bf16.mxu1 %vm404_vm1, %v2380_v4  ;;  %v2217_v13 = vld [vmem:[%s2332_s4 + $0x20] sm:$0xff]   ;;  %v2218_v14 = vld [vmem:[%s2332_s4 + $0x70] sm:$0xff]   ;;  %v2221_v15 = vld [vmem:[%s2327_s28 + $0x18] sm:$0xff]  }
  0x2a   : > { %v2222_v16 = vld [vmem:[%s2327_s28 + $0x28] sm:$0xff]   ;;  %v2220_v18 = vld [vmem:[%s2332_s4 + $0x78] sm:$0xff]   ;;  %v2223_v19 = vld [vmem:[%s2332_s4 + $0x30] sm:$0xff]  }
  0x2b   : > { %2041 = vmatpush3.bf16.msra.mxu0 %v2206_v2  ;;  %2161 = vmatpush3.bf16.msra.mxu1 %v2206_v2  ;;  %v2219_v17 = vld [vmem:[%s2332_s4 + $0x28] sm:$0xff]   ;;  %v2224_v20 = vld [vmem:[%s2332_s4 + $0x80] sm:$0xff]   ;;  %v2225_v21 = vld [vmem:[%s2332_s4 + $0x38] sm:$0xff]  }
  0x2c   : > { %2078 = vmatprep.subr.bf16.mxu1 %v2211_v7  ;;  %2118 = vmatprep.subr.bf16.mxu0 %v2212_v8  ;;  %v2226_v22 = vld [vmem:[%s2332_s4 + $0x88] sm:$0xff]   ;;  %v2227_v23 = vld [vmem:[%s2332_s4 + $0x40] sm:$0xff]   ;;  %v638_v25 = vld [vmem:[#allocation2 + $0x10] sm:$0xff] }
  0x2d   : > { %v2228_v24 = vld [vmem:[%s2332_s4 + $0x48] sm:$0xff]   ;;  %v658_v26 = vld [vmem:[#allocation2 + $0xb0] sm:$0xff]  ;;  %v636_v27 = vld [vmem:[#allocation2] sm:$0xff] }
  0x2e   : > { %2043 = vmatmul.mubr.msk.bf16.vlgmr.msra.gmra.mrb[0].mxu0 %vm404_vm1, %v2209_v5  ;;  %2063 = vmatmul.mubr.msk.bf16.vlgmr.msra.gmra.mrb[0].mxu1 %vm404_vm1, %v2387_v6  ;;  %v656_v28 = vld [vmem:[#allocation2 + $0xa0] sm:$0xff]  ;;  %v639_v31 = vld [vmem:[#allocation2 + $0x18] sm:$0xff]  ;;  %v637_v37 = vld [vmem:[#allocation2 + $0x8] sm:$0xff] }
  0x2f   : > { %2079 = vmatpush3.bf16.msra.mxu1 %v2211_v7  ;;  %2119 = vmatpush3.bf16.msra.mxu0 %v2212_v8  ;;  %v659_v32 = vld [vmem:[#allocation2 + $0xb8] sm:$0xff]  ;;  %v657_v38 = vld [vmem:[#allocation2 + $0xa8] sm:$0xff]  ;;  %v642_v49 = vld [vmem:[#allocation2 + $0x30] sm:$0xff] }
  0x30   : > { %2046 = vmatprep.mubr.msk.bf16.mxu0 %vm404_vm1, %v2213_v9  ;;  %2066 = vmatprep.mubr.msk.bf16.mxu1 %vm404_vm1, %v2393_v10  ;;  %v662_v50 = vld [vmem:[#allocation2 + $0xd0] sm:$0xff]  ;;  %v640_v51 = vld [vmem:[#allocation2 + $0x20] sm:$0xff]  ;;  %v643_v55 = vld [vmem:[#allocation2 + $0x38] sm:$0xff] }
  0x31   : > { %2080 = vmatprep.subr.bf16.mxu1 %v2221_v15  ;;  %2120 = vmatprep.subr.bf16.mxu0 %v2222_v16  ;;  %v660_v52 = vld [vmem:[#allocation2 + $0xc0] sm:$0xff]  ;;  %v663_v56 = vld [vmem:[#allocation2 + $0xd8] sm:$0xff]  ;;  %v641_v61 = vld [vmem:[#allocation2 + $0x28] sm:$0xff] }
  0x32   : > { %v661_v62 = vld [vmem:[#allocation2 + $0xc8] sm:$0xff] }
  0x33   : > { %2081 = vmatpush3.bf16.msra.mxu1 %v2221_v15  ;;  %2121 = vmatpush3.bf16.msra.mxu0 %v2222_v16  ;;  %v647_v15 = vld [vmem:[#allocation2 + $0x58] sm:$0xff] }
  0x34   : > { %v667_v16 = vld [vmem:[#allocation2 + $0xf8] sm:$0xff] }
  0x36   : > { %2047 = vmatmul.mubr.msk.bf16.gmra.mrb[4].mxu0 %vm404_vm1, %v2215_v11  ;;  %2067 = vmatmul.mubr.msk.bf16.gmra.mrb[4].mxu1 %vm404_vm1, %v2216_v12 }
  0x37   : > { %2050 = vmatprep.mubr.msk.bf16.mxu0 %vm404_vm1, %v2217_v13  ;;  %2070 = vmatprep.mubr.msk.bf16.mxu1 %vm404_vm1, %v2218_v14 }
  0x3e   : > { %2051 = vmatmul.mubr.msk.bf16.gmra.mrb[8].mxu0 %vm404_vm1, %v2219_v17  ;;  %2071 = vmatmul.mubr.msk.bf16.gmra.mrb[8].mxu1 %vm404_vm1, %v2220_v18 }
  0x3f   : > { %2054 = vmatprep.mubr.msk.bf16.mxu0 %vm404_vm1, %v2223_v19  ;;  %2074 = vmatprep.mubr.msk.bf16.mxu1 %vm404_vm1, %v2224_v20 }
  0x46   : > { %2055 = vmatmul.mubr.msk.bf16.gmra.mrb[12].mxu0 %vm404_vm1, %v2225_v21  ;;  %2075 = vmatmul.mubr.msk.bf16.gmra.mrb[12].mxu1 %vm404_vm1, %v2226_v22 }
  0x47   : > { %2058 = vmatprep.mubr.msk.bf16.mxu0 %vm404_vm1, %v2227_v23  ;;  %2082 = vmatprep.mubr.msk.bf16.mxu1 %vm404_vm1, %v2207_v3 }
  0x4e   : > { %2059 = vmatmul.mubr.msk.bf16.gmra.mrb[16].mxu0 %vm404_vm1, %v2228_v24  ;;  %2083 = vmatmul.mubr.msk.bf16.vlgmr.msra.gmra.mrb[16].mxu1 %vm404_vm1, %v2209_v5 }
  0x4f   : > { %2086 = vmatprep.mubr.msk.bf16.mxu1 %vm404_vm1, %v2213_v9  ;;  %2122 = vmatprep.mubr.msk.bf16.mxu0 %vm404_vm1, %v2207_v3 }
  0x56   : > { %2087 = vmatmul.mubr.msk.bf16.gmra.mrb[20].mxu1 %vm404_vm1, %v2215_v11  ;;  %2123 = vmatmul.mubr.msk.bf16.vlgmr.msra.gmra.mrb[20].mxu0 %vm404_vm1, %v2209_v5 }
  0x57   : > { %2090 = vmatprep.mubr.msk.bf16.mxu1 %vm404_vm1, %v2217_v13  ;;  %2126 = vmatprep.mubr.msk.bf16.mxu0 %vm404_vm1, %v2213_v9  ;;  %v646_v9 = vld [vmem:[#allocation2 + $0x50] sm:$0xff] }
  0x5e   : > { %2091 = vmatmul.mubr.msk.bf16.gmra.mrb[24].mxu1 %vm404_vm1, %v2219_v17  ;;  %2127 = vmatmul.mubr.msk.bf16.gmra.mrb[24].mxu0 %vm404_vm1, %v2215_v11  ;;  %v644_v11 = vld [vmem:[#allocation2 + $0x40] sm:$0xff] }
  0x5f   : > { %2094 = vmatprep.mubr.msk.bf16.mxu1 %vm404_vm1, %v2223_v19  ;;  %2130 = vmatprep.mubr.msk.bf16.mxu0 %vm404_vm1, %v2217_v13 }
  0x66   : > { %2095 = vmatmul.mubr.msk.bf16.gmra.mrb[28].mxu1 %vm404_vm1, %v2225_v21  ;;  %2131 = vmatmul.mubr.msk.bf16.gmra.mrb[28].mxu0 %vm404_vm1, %v2219_v17 }
  0x67   : > { %2098 = vmatprep.mubr.msk.bf16.mxu1 %vm404_vm1, %v2227_v23  ;;  %2134 = vmatprep.mubr.msk.bf16.mxu0 %vm404_vm1, %v2223_v19 }
  0x6e   : > { %2099 = vmatmul.mubr.msk.bf16.gmra.mrb[32].mxu1 %vm404_vm1, %v2228_v24  ;;  %2135 = vmatmul.mubr.msk.bf16.gmra.mrb[32].mxu0 %vm404_vm1, %v2225_v21  ;;  %v645_v21 = vld [vmem:[#allocation2 + $0x48] sm:$0xff] }
  0x6f   : > { %2102 = vmatprep.mubr.msk.bf16.mxu1 %vm404_vm1, %v2380_v4  ;;  %2138 = vmatprep.mubr.msk.bf16.mxu0 %vm404_vm1, %v2227_v23 }
  0x76   : > { %2103 = vmatmul.mubr.msk.bf16.gmra.mrb[36].mxu1 %vm404_vm1, %v2387_v6  ;;  %2139 = vmatmul.mubr.msk.bf16.gmra.mrb[36].mxu0 %vm404_vm1, %v2228_v24 }
  0x77   : > { %2106 = vmatprep.mubr.msk.bf16.mxu1 %vm404_vm1, %v2393_v10  ;;  %2142 = vmatprep.mubr.msk.bf16.mxu0 %vm404_vm1, %v2380_v4 }
  0x7e   : > { %2107 = vmatmul.mubr.msk.bf16.gmra.mrb[40].mxu1 %vm404_vm1, %v2216_v12  ;;  %2143 = vmatmul.mubr.msk.bf16.gmra.mrb[40].mxu0 %vm404_vm1, %v2387_v6 }
  0x7f   : > { %2110 = vmatprep.mubr.msk.bf16.mxu1 %vm404_vm1, %v2218_v14  ;;  %2146 = vmatprep.mubr.msk.bf16.mxu0 %vm404_vm1, %v2393_v10  ;;  %v666_v10 = vld [vmem:[#allocation2 + $0xf0] sm:$0xff] }
  0x86   : > { %2111 = vmatmul.mubr.msk.bf16.gmra.mrb[44].mxu1 %vm404_vm1, %v2220_v18  ;;  %2147 = vmatmul.mubr.msk.bf16.gmra.mrb[44].mxu0 %vm404_vm1, %v2216_v12  ;;  %v664_v12 = vld [vmem:[#allocation2 + $0xe0] sm:$0xff] }
  0x87   : > { %2114 = vmatprep.mubr.msk.bf16.mxu1 %vm404_vm1, %v2224_v20  ;;  %2150 = vmatprep.mubr.msk.bf16.mxu0 %vm404_vm1, %v2218_v14 }
  0x8e   : > { %2115 = vmatmul.mubr.msk.bf16.gmra.mrb[48].mxu1 %vm404_vm1, %v2226_v22  ;;  %2151 = vmatmul.mubr.msk.bf16.gmra.mrb[48].mxu0 %vm404_vm1, %v2220_v18 }
  0x8f   : > { %2154 = vmatprep.mubr.msk.bf16.mxu0 %vm404_vm1, %v2224_v20 }
  0x96   : > { %2155 = vmatmul.mubr.msk.bf16.gmra.mrb[52].mxu0 %vm404_vm1, %v2226_v22  ;;  %v665_v22 = vld [vmem:[#allocation2 + $0xe8] sm:$0xff] }
 0x101   : > { %v2044_v29 = vpop.f32.mrb[0].mxu0  ;;  %v2064_v30 = vpop.f32.mrb[0].mxu1 }
 0x102   : > { %v674_v33 = vadd.f32 %v2044_v29, %v638_v25  ;;  %v694_v34 = vadd.f32 %v2064_v30, %v658_v26  ;;  %v493_v35 = vpop.f32.mrb[1].mxu0  ;;  %v573_v36 = vpop.f32.mrb[1].mxu1 }
 0x103   : > { %v672_v39 = vadd.f32 %v636_v27, %v493_v35  ;;  %v692_v40 = vadd.f32 %v656_v28, %v573_v36  ;;  %v2045_v41 = vpop.f32.mrb[2].mxu0  ;;  %v2065_v42 = vpop.f32.mrb[2].mxu1  ;;  %v648_v35 = vld [vmem:[#allocation2 + $0x60] sm:$0xff] }
 0x104   : > { %710 = vst.msk [vmem:[#allocation2 + $0x10] sm:$0xff] %vm404_vm1, %v674_v33  ;;  %730 = vst.msk [vmem:[#allocation2 + $0xb0] sm:$0xff] %vm404_vm1, %v694_v34  ;;  %v675_v43 = vadd.f32 %v2045_v41, %v639_v31  ;;  %v695_v44 = vadd.f32 %v2065_v42, %v659_v32  ;;  %v496_v45 = vpop.f32.mrb[3].mxu0  ;;  %v576_v46 = vpop.f32.mrb[3].mxu1  ;;  %v650_v33 = vld [vmem:[#allocation2 + $0x70] sm:$0xff]  ;;  %v668_v36 = vld [vmem:[#allocation2 + $0x100] sm:$0xff] }
 0x105   : > { %708 = vst.msk [vmem:[#allocation2] sm:$0xff] %vm404_vm1, %v672_v39  ;;  %728 = vst.msk [vmem:[#allocation2 + $0xa0] sm:$0xff] %vm404_vm1, %v692_v40  ;;  %v673_v47 = vadd.f32 %v637_v37, %v496_v45  ;;  %v693_v48 = vadd.f32 %v657_v38, %v576_v46  ;;  %v670_v34 = vld [vmem:[#allocation2 + $0x110] sm:$0xff]  ;;  %v651_v39 = vld [vmem:[#allocation2 + $0x78] sm:$0xff] }
 0x106   : > { %711 = vst.msk [vmem:[#allocation2 + $0x18] sm:$0xff] %vm404_vm1, %v675_v43  ;;  %731 = vst.msk [vmem:[#allocation2 + $0xb8] sm:$0xff] %vm404_vm1, %v695_v44  ;;  %v671_v40 = vld [vmem:[#allocation2 + $0x118] sm:$0xff]  ;;  %v649_v45 = vld [vmem:[#allocation2 + $0x68] sm:$0xff] }
 0x107   : > { %709 = vst.msk [vmem:[#allocation2 + $0x8] sm:$0xff] %vm404_vm1, %v673_v47  ;;  %729 = vst.msk [vmem:[#allocation2 + $0xa8] sm:$0xff] %vm404_vm1, %v693_v48  ;;  %v669_v46 = vld [vmem:[#allocation2 + $0x108] sm:$0xff] }
 0x109   : > { %v2048_v53 = vpop.f32.mrb[4].mxu0  ;;  %v2068_v54 = vpop.f32.mrb[4].mxu1 }
 0x10a   : > { %v678_v57 = vadd.f32 %v2048_v53, %v642_v49  ;;  %v698_v58 = vadd.f32 %v2068_v54, %v662_v50  ;;  %v509_v59 = vpop.f32.mrb[5].mxu0  ;;  %v589_v60 = vpop.f32.mrb[5].mxu1 }
 0x10b   : > { %v676_v63 = vadd.f32 %v640_v51, %v509_v59  ;;  %v696_v0 = vadd.f32 %v660_v52, %v589_v60  ;;  %v2049_v1 = vpop.f32.mrb[6].mxu0  ;;  %v2069_v2 = vpop.f32.mrb[6].mxu1 }
 0x10c   : > { %714 = vst.msk [vmem:[#allocation2 + $0x30] sm:$0xff] %vm404_vm1, %v678_v57  ;;  %734 = vst.msk [vmem:[#allocation2 + $0xd0] sm:$0xff] %vm404_vm1, %v698_v58  ;;  %v679_v3 = vadd.f32 %v2049_v1, %v643_v55  ;;  %v699_v4 = vadd.f32 %v2069_v2, %v663_v56  ;;  %v512_v5 = vpop.f32.mrb[7].mxu0  ;;  %v592_v6 = vpop.f32.mrb[7].mxu1  ;;  %v654_v57 = vld [vmem:[#allocation2 + $0x90] sm:$0xff]  ;;  %v652_v58 = vld [vmem:[#allocation2 + $0x80] sm:$0xff] }
 0x10d   : > { %712 = vst.msk [vmem:[#allocation2 + $0x20] sm:$0xff] %vm404_vm1, %v676_v63  ;;  %732 = vst.msk [vmem:[#allocation2 + $0xc0] sm:$0xff] %vm404_vm1, %v696_v0  ;;  %v677_v7 = vadd.f32 %v641_v61, %v512_v5  ;;  %v697_v8 = vadd.f32 %v661_v62, %v592_v6  ;;  %v655_v61 = vld [vmem:[#allocation2 + $0x98] sm:$0xff]  ;;  %v653_v1 = vld [vmem:[#allocation2 + $0x88] sm:$0xff] }
 0x10e   : > { %715 = vst.msk [vmem:[#allocation2 + $0x38] sm:$0xff] %vm404_vm1, %v679_v3  ;;  %735 = vst.msk [vmem:[#allocation2 + $0xd8] sm:$0xff] %vm404_vm1, %v699_v4 }
 0x10f   : > { %713 = vst.msk [vmem:[#allocation2 + $0x28] sm:$0xff] %vm404_vm1, %v677_v7  ;;  %733 = vst.msk [vmem:[#allocation2 + $0xc8] sm:$0xff] %vm404_vm1, %v697_v8 }
 0x111   : > { %v2052_v13 = vpop.f32.mrb[8].mxu0  ;;  %v2072_v14 = vpop.f32.mrb[8].mxu1 }
 0x112   : > { %v682_v17 = vadd.f32 %v2052_v13, %v646_v9  ;;  %v702_v18 = vadd.f32 %v2072_v14, %v666_v10  ;;  %v525_v19 = vpop.f32.mrb[9].mxu0  ;;  %v605_v20 = vpop.f32.mrb[9].mxu1  ;;  %v1085_v14 = vld [vmem:[#allocation2 + $0x10] sm:$0xff] }
 0x113   : > { %v680_v23 = vadd.f32 %v644_v11, %v525_v19  ;;  %v700_v24 = vadd.f32 %v664_v12, %v605_v20  ;;  %v2053_v25 = vpop.f32.mrb[10].mxu0  ;;  %v2073_v26 = vpop.f32.mrb[10].mxu1  ;;  %v1084_v19 = vld [vmem:[#allocation2 + $0x8] sm:$0xff] }
 0x114   : > { %718 = vst.msk [vmem:[#allocation2 + $0x50] sm:$0xff] %vm404_vm1, %v682_v17  ;;  %738 = vst.msk [vmem:[#allocation2 + $0xf0] sm:$0xff] %vm404_vm1, %v702_v18  ;;  %v683_v27 = vadd.f32 %v2053_v25, %v647_v15  ;;  %v703_v28 = vadd.f32 %v2073_v26, %v667_v16  ;;  %v528_v29 = vpop.f32.mrb[11].mxu0  ;;  %v608_v30 = vpop.f32.mrb[11].mxu1  ;;  %v1083_v18 = vld [vmem:[#allocation2] sm:$0xff] }
 0x115   : > { %716 = vst.msk [vmem:[#allocation2 + $0x40] sm:$0xff] %vm404_vm1, %v680_v23  ;;  %736 = vst.msk [vmem:[#allocation2 + $0xe0] sm:$0xff] %vm404_vm1, %v700_v24  ;;  %v681_v31 = vadd.f32 %v645_v21, %v528_v29  ;;  %v701_v32 = vadd.f32 %v665_v22, %v608_v30 }
 0x116   : > { %719 = vst.msk [vmem:[#allocation2 + $0x58] sm:$0xff] %vm404_vm1, %v683_v27  ;;  %739 = vst.msk [vmem:[#allocation2 + $0xf8] sm:$0xff] %vm404_vm1, %v703_v28 }
 0x117   : > { %717 = vst.msk [vmem:[#allocation2 + $0x48] sm:$0xff] %vm404_vm1, %v681_v31  ;;  %737 = vst.msk [vmem:[#allocation2 + $0xe8] sm:$0xff] %vm404_vm1, %v701_v32 }
 0x119   : > { %v2056_v37 = vpop.f32.mrb[12].mxu0  ;;  %v2076_v38 = vpop.f32.mrb[12].mxu1 }
 0x11a   : > { %v686_v41 = vadd.f32 %v2056_v37, %v650_v33  ;;  %v706_v42 = vadd.f32 %v2076_v38, %v670_v34  ;;  %v541_v43 = vpop.f32.mrb[13].mxu0  ;;  %v621_v44 = vpop.f32.mrb[13].mxu1  ;;  %v1086_v37 = vld [vmem:[#allocation2 + $0x18] sm:$0xff] }
 0x11b   : > { %v684_v47 = vadd.f32 %v648_v35, %v541_v43  ;;  %v704_v48 = vadd.f32 %v668_v36, %v621_v44  ;;  %v2057_v49 = vpop.f32.mrb[14].mxu0  ;;  %v2077_v50 = vpop.f32.mrb[14].mxu1 }
 0x11c   : > { %722 = vst.msk [vmem:[#allocation2 + $0x70] sm:$0xff] %vm404_vm1, %v686_v41  ;;  %742 = vst.msk [vmem:[#allocation2 + $0x110] sm:$0xff] %vm404_vm1, %v706_v42  ;;  %v687_v51 = vadd.f32 %v2057_v49, %v651_v39  ;;  %v707_v52 = vadd.f32 %v2077_v50, %v671_v40  ;;  %v544_v53 = vpop.f32.mrb[15].mxu0  ;;  %v624_v54 = vpop.f32.mrb[15].mxu1  ;;  %v1089_v42 = vld [vmem:[#allocation2 + $0x30] sm:$0xff] }
 0x11d   : > { %720 = vst.msk [vmem:[#allocation2 + $0x60] sm:$0xff] %vm404_vm1, %v684_v47  ;;  %740 = vst.msk [vmem:[#allocation2 + $0x100] sm:$0xff] %vm404_vm1, %v704_v48  ;;  %v685_v55 = vadd.f32 %v649_v45, %v544_v53  ;;  %v705_v56 = vadd.f32 %v669_v46, %v624_v54  ;;  %v1087_v47 = vld [vmem:[#allocation2 + $0x20] sm:$0xff]  ;;  %v1088_v48 = vld [vmem:[#allocation2 + $0x28] sm:$0xff] }
 0x11e   : > { %723 = vst.msk [vmem:[#allocation2 + $0x78] sm:$0xff] %vm404_vm1, %v687_v51  ;;  %743 = vst.msk [vmem:[#allocation2 + $0x118] sm:$0xff] %vm404_vm1, %v707_v52 }
 0x11f   : > { %721 = vst.msk [vmem:[#allocation2 + $0x68] sm:$0xff] %vm404_vm1, %v685_v55  ;;  %741 = vst.msk [vmem:[#allocation2 + $0x108] sm:$0xff] %vm404_vm1, %v705_v56 }
 0x121   : > { %v2060_v59 = vpop.f32.mrb[16].mxu0  ;;  %v2084_v60 = vpop.f32.mrb[16].mxu1 }
 0x122   : > { %v690_v62 = vadd.f32 %v2060_v59, %v654_v57  ;;  %v557_v63 = vpop.f32.mrb[17].mxu0  ;;  %v795_v0 = vpop.f32.mrb[17].mxu1  ;;  %v978_v5 = vrot.slane %v2084_v60, 1 }
 0x123   : > { %v688_v2 = vadd.f32 %v652_v58, %v557_v63  ;;  %v2061_v3 = vpop.f32.mrb[18].mxu0  ;;  %v2085_v4 = vpop.f32.mrb[18].mxu1  ;;  %v975_v10 = vrot.slane %v795_v0, 1 }
 0x124   : > { %726 = vst.msk [vmem:[#allocation2 + $0x90] sm:$0xff] %vm404_vm1, %v690_v62  ;;  %v691_v6 = vadd.f32 %v2061_v3, %v655_v61  ;;  %v980_v7 = vrot.slane %v2085_v4, 1  ;;  %v560_v8 = vpop.f32.mrb[19].mxu0  ;;  %v798_v9 = vpop.f32.mrb[19].mxu1 }
 0x125   : > { %724 = vst.msk [vmem:[#allocation2 + $0x80] sm:$0xff] %vm404_vm1, %v688_v2  ;;  %v689_v11 = vadd.f32 %v653_v1, %v560_v8  ;;  %v976_v12 = vrot.slane %v798_v9, 1 }
 0x126   : > { %727 = vst.msk [vmem:[#allocation2 + $0x98] sm:$0xff] %vm404_vm1, %v691_v6  ;;  %v981_v13 = vsel %vm974_vm2, %v978_v5, %v980_v7 }
 0x127   : > { %v1121_v15 = vadd.f32 %v1085_v14, %v981_v13  ;;  %725 = vst.msk [vmem:[#allocation2 + $0x88] sm:$0xff] %vm404_vm1, %v689_v11  ;;  %v977_v16 = vsel %vm974_vm2, %v975_v10, %v976_v12  ;;  %v979_v17 = vsel %vm974_vm2, %v976_v12, %v978_v5  ;;  %v1090_v10 = vld [vmem:[#allocation2 + $0x38] sm:$0xff] }
 0x128   : > { %v1119_v20 = vadd.f32 %v1083_v18, %v977_v16  ;;  %v1120_v21 = vadd.f32 %v1084_v19, %v979_v17  ;;  %v1093_v16 = vld [vmem:[#allocation2 + $0x50] sm:$0xff] }
 0x129   : > { %1157 = vst.msk [vmem:[#allocation2 + $0x10] sm:$0xff] %vm404_vm1, %v1121_v15  ;;  %v2088_v22 = vpop.f32.mrb[20].mxu1  ;;  %v2124_v23 = vpop.f32.mrb[20].mxu0 }
 0x12a   : > { %1155 = vst.msk [vmem:[#allocation2] sm:$0xff] %vm404_vm1, %v1119_v20  ;;  %1156 = vst.msk [vmem:[#allocation2 + $0x8] sm:$0xff] %vm404_vm1, %v1120_v21  ;;  %v1425_v24 = vrot.slane %v2124_v23, 2  ;;  %v811_v25 = vpop.f32.mrb[21].mxu1  ;;  %v1242_v26 = vpop.f32.mrb[21].mxu0  ;;  %v986_v31 = vrot.slane %v2088_v22, 1 }
 0x12b   : > { %v982_v27 = vrot.slane %v811_v25, 1  ;;  %v1422_v28 = vrot.slane %v1242_v26, 2  ;;  %v2089_v29 = vpop.f32.mrb[22].mxu1  ;;  %v2125_v30 = vpop.f32.mrb[22].mxu0  ;;  %v1091_v22 = vld [vmem:[#allocation2 + $0x40] sm:$0xff]  ;;  %v1092_v23 = vld [vmem:[#allocation2 + $0x48] sm:$0xff] }
 0x12c   : > { %v988_v32 = vrot.slane %v2089_v29, 1  ;;  %v1427_v33 = vrot.slane %v2125_v30, 2  ;;  %v814_v34 = vpop.f32.mrb[23].mxu1  ;;  %v1245_v35 = vpop.f32.mrb[23].mxu0 }
 0x12d   : > { %v983_v36 = vsel %vm974_vm2, %v980_v7, %v982_v27  ;;  %v984_v38 = vrot.slane %v814_v34, 1  ;;  %v1423_v39 = vrot.slane %v1245_v35, 2 }
 0x12e   : > { %v1122_v40 = vadd.f32 %v1086_v37, %v983_v36  ;;  %v989_v41 = vsel %vm974_vm2, %v986_v31, %v988_v32  ;;  %v1428_v43 = vsel %vm1421_vm3, %v1425_v24, %v1427_v33 }
 0x12f   : > { %v1125_v44 = vadd.f32 %v1089_v42, %v989_v41  ;;  %v985_v45 = vsel %vm974_vm2, %v982_v27, %v984_v38  ;;  %v987_v46 = vsel %vm974_vm2, %v984_v38, %v986_v31  ;;  %v1424_v49 = vsel %vm1421_vm3, %v1422_v28, %v1423_v39 }
 0x130   : > { %1158 = vst.msk [vmem:[#allocation2 + $0x18] sm:$0xff] %vm404_vm1, %v1122_v40  ;;  %v1532_v50 = vld [vmem:[#allocation2 + $0x10] sm:$0xff]  ;;  %v1123_v51 = vadd.f32 %v1087_v47, %v985_v45  ;;  %v1124_v52 = vadd.f32 %v1088_v48, %v987_v46  ;;  %v1426_v53 = vsel %vm1421_vm3, %v1423_v39, %v1425_v24 }
 0x131   : > { %1161 = vst.msk [vmem:[#allocation2 + $0x30] sm:$0xff] %vm404_vm1, %v1125_v44  ;;  %v1568_v54 = vadd.f32 %v1532_v50, %v1428_v43  ;;  %v1530_v55 = vld [vmem:[#allocation2] sm:$0xff]  ;;  %v1531_v56 = vld [vmem:[#allocation2 + $0x8] sm:$0xff]  ;;  %v2092_v57 = vpop.f32.mrb[24].mxu1  ;;  %v2128_v58 = vpop.f32.mrb[24].mxu0  ;;  %v1094_v50 = vld [vmem:[#allocation2 + $0x58] sm:$0xff] }
 0x132   : > { %1159 = vst.msk [vmem:[#allocation2 + $0x20] sm:$0xff] %vm404_vm1, %v1123_v51  ;;  %1160 = vst.msk [vmem:[#allocation2 + $0x28] sm:$0xff] %vm404_vm1, %v1124_v52  ;;  %v1566_v59 = vadd.f32 %v1530_v55, %v1424_v49  ;;  %v1567_v60 = vadd.f32 %v1531_v56, %v1426_v53  ;;  %v1433_v61 = vrot.slane %v2128_v58, 2  ;;  %v827_v62 = vpop.f32.mrb[25].mxu1  ;;  %v1258_v63 = vpop.f32.mrb[25].mxu0  ;;  %v994_v4 = vrot.slane %v2092_v57, 1 }
 0x133   : > { %1604 = vst.msk [vmem:[#allocation2 + $0x10] sm:$0xff] %vm404_vm1, %v1568_v54  ;;  %v990_v0 = vrot.slane %v827_v62, 1  ;;  %v1429_v1 = vrot.slane %v1258_v63, 2  ;;  %v2093_v2 = vpop.f32.mrb[26].mxu1  ;;  %v2129_v3 = vpop.f32.mrb[26].mxu0  ;;  %v1097_v56 = vld [vmem:[#allocation2 + $0x70] sm:$0xff] }
 0x134   : > { %1602 = vst.msk [vmem:[#allocation2] sm:$0xff] %vm404_vm1, %v1566_v59  ;;  %1603 = vst.msk [vmem:[#allocation2 + $0x8] sm:$0xff] %vm404_vm1, %v1567_v60  ;;  %v996_v5 = vrot.slane %v2093_v2, 1  ;;  %v1435_v6 = vrot.slane %v2129_v3, 2  ;;  %v830_v7 = vpop.f32.mrb[27].mxu1  ;;  %v1261_v8 = vpop.f32.mrb[27].mxu0 }
 0x135   : > { %v991_v9 = vsel %vm974_vm2, %v988_v32, %v990_v0  ;;  %v1430_v11 = vsel %vm1421_vm3, %v1427_v33, %v1429_v1  ;;  %v992_v12 = vrot.slane %v830_v7, 1  ;;  %v1431_v13 = vrot.slane %v1261_v8, 2  ;;  %v1095_v62 = vld [vmem:[#allocation2 + $0x60] sm:$0xff]  ;;  %v1096_v63 = vld [vmem:[#allocation2 + $0x68] sm:$0xff] }
 0x136   : > { %v1126_v14 = vadd.f32 %v1090_v10, %v991_v9  ;;  %v997_v15 = vsel %vm974_vm2, %v994_v4, %v996_v5  ;;  %v1436_v17 = vsel %vm1421_vm3, %v1433_v61, %v1435_v6 }
 0x137   : > { %v1533_v18 = vld [vmem:[#allocation2 + $0x18] sm:$0xff]  ;;  %v1129_v19 = vadd.f32 %v1093_v16, %v997_v15  ;;  %v993_v20 = vsel %vm974_vm2, %v990_v0, %v992_v12  ;;  %v995_v21 = vsel %vm974_vm2, %v992_v12, %v994_v4  ;;  %v1432_v24 = vsel %vm1421_vm3, %v1429_v1, %v1431_v13 }
 0x138   : > { %1162 = vst.msk [vmem:[#allocation2 + $0x38] sm:$0xff] %vm404_vm1, %v1126_v14  ;;  %v1569_v25 = vadd.f32 %v1533_v18, %v1430_v11  ;;  %v1536_v26 = vld [vmem:[#allocation2 + $0x30] sm:$0xff]  ;;  %v1127_v27 = vadd.f32 %v1091_v22, %v993_v20  ;;  %v1128_v28 = vadd.f32 %v1092_v23, %v995_v21  ;;  %v1434_v29 = vsel %vm1421_vm3, %v1431_v13, %v1433_v61 }
 0x139   : > { %1165 = vst.msk [vmem:[#allocation2 + $0x50] sm:$0xff] %vm404_vm1, %v1129_v19  ;;  %v1572_v30 = vadd.f32 %v1536_v26, %v1436_v17  ;;  %v1534_v31 = vld [vmem:[#allocation2 + $0x20] sm:$0xff]  ;;  %v1535_v32 = vld [vmem:[#allocation2 + $0x28] sm:$0xff]  ;;  %v2096_v33 = vpop.f32.mrb[28].mxu1  ;;  %v2132_v34 = vpop.f32.mrb[28].mxu0  ;;  %v1098_v26 = vld [vmem:[#allocation2 + $0x78] sm:$0xff] }
 0x13a   : > { %1605 = vst.msk [vmem:[#allocation2 + $0x18] sm:$0xff] %vm404_vm1, %v1569_v25  ;;  %1163 = vst.msk [vmem:[#allocation2 + $0x40] sm:$0xff] %vm404_vm1, %v1127_v27  ;;  %v1570_v35 = vadd.f32 %v1534_v31, %v1432_v24  ;;  %v1571_v36 = vadd.f32 %v1535_v32, %v1434_v29  ;;  %v1441_v37 = vrot.slane %v2132_v34, 2  ;;  %v843_v38 = vpop.f32.mrb[29].mxu1  ;;  %v1274_v39 = vpop.f32.mrb[29].mxu0  ;;  %v1002_v44 = vrot.slane %v2096_v33, 1 }
 0x13b   : > { %1164 = vst.msk [vmem:[#allocation2 + $0x48] sm:$0xff] %vm404_vm1, %v1128_v28  ;;  %1608 = vst.msk [vmem:[#allocation2 + $0x30] sm:$0xff] %vm404_vm1, %v1572_v30  ;;  %v998_v40 = vrot.slane %v843_v38, 1  ;;  %v1437_v41 = vrot.slane %v1274_v39, 2  ;;  %v2097_v42 = vpop.f32.mrb[30].mxu1  ;;  %v2133_v43 = vpop.f32.mrb[30].mxu0 }
 0x13c   : > { %1606 = vst.msk [vmem:[#allocation2 + $0x20] sm:$0xff] %vm404_vm1, %v1570_v35  ;;  %1607 = vst.msk [vmem:[#allocation2 + $0x28] sm:$0xff] %vm404_vm1, %v1571_v36  ;;  %v1004_v45 = vrot.slane %v2097_v42, 1  ;;  %v1443_v46 = vrot.slane %v2133_v43, 2  ;;  %v846_v47 = vpop.f32.mrb[31].mxu1  ;;  %v1277_v48 = vpop.f32.mrb[31].mxu0 }
 0x13d   : > { %v999_v49 = vsel %vm974_vm2, %v996_v5, %v998_v40  ;;  %v1438_v51 = vsel %vm1421_vm3, %v1435_v6, %v1437_v41  ;;  %v1000_v52 = vrot.slane %v846_v47, 1  ;;  %v1439_v53 = vrot.slane %v1277_v48, 2  ;;  %v1101_v32 = vld [vmem:[#allocation2 + $0x90] sm:$0xff]  ;;  %v1099_v38 = vld [vmem:[#allocation2 + $0x80] sm:$0xff]  ;;  %v1100_v39 = vld [vmem:[#allocation2 + $0x88] sm:$0xff] }
 0x13e   : > { %v1130_v54 = vadd.f32 %v1094_v50, %v999_v49  ;;  %v1005_v55 = vsel %vm974_vm2, %v1002_v44, %v1004_v45  ;;  %v1444_v57 = vsel %vm1421_vm3, %v1441_v37, %v1443_v46 }
 0x13f   : > { %v1537_v58 = vld [vmem:[#allocation2 + $0x38] sm:$0xff]  ;;  %v1133_v59 = vadd.f32 %v1097_v56, %v1005_v55  ;;  %v1001_v60 = vsel %vm974_vm2, %v998_v40, %v1000_v52  ;;  %v1003_v61 = vsel %vm974_vm2, %v1000_v52, %v1002_v44  ;;  %v1440_v0 = vsel %vm1421_vm3, %v1437_v41, %v1439_v53 }
 0x140   : > { %1166 = vst.msk [vmem:[#allocation2 + $0x58] sm:$0xff] %vm404_vm1, %v1130_v54  ;;  %v1573_v1 = vadd.f32 %v1537_v58, %v1438_v51  ;;  %v1540_v2 = vld [vmem:[#allocation2 + $0x50] sm:$0xff]  ;;  %v1131_v3 = vadd.f32 %v1095_v62, %v1001_v60  ;;  %v1132_v4 = vadd.f32 %v1096_v63, %v1003_v61  ;;  %v1442_v5 = vsel %vm1421_vm3, %v1439_v53, %v1441_v37 }
 0x141   : > { %1169 = vst.msk [vmem:[#allocation2 + $0x70] sm:$0xff] %vm404_vm1, %v1133_v59  ;;  %v1576_v6 = vadd.f32 %v1540_v2, %v1444_v57  ;;  %v1538_v7 = vld [vmem:[#allocation2 + $0x40] sm:$0xff]  ;;  %v2100_v9 = vpop.f32.mrb[32].mxu1  ;;  %v2136_v10 = vpop.f32.mrb[32].mxu0  ;;  %v1102_v2 = vld [vmem:[#allocation2 + $0x98] sm:$0xff] }
 0x142   : > { %v1539_v8 = vld [vmem:[#allocation2 + $0x48] sm:$0xff]  ;;  %1609 = vst.msk [vmem:[#allocation2 + $0x38] sm:$0xff] %vm404_vm1, %v1573_v1  ;;  %1167 = vst.msk [vmem:[#allocation2 + $0x60] sm:$0xff] %vm404_vm1, %v1131_v3  ;;  %v1574_v11 = vadd.f32 %v1538_v7, %v1440_v0  ;;  %v1449_v13 = vrot.slane %v2136_v10, 2  ;;  %v859_v14 = vpop.f32.mrb[33].mxu1  ;;  %v1290_v15 = vpop.f32.mrb[33].mxu0 }
 0x143   : > { %1168 = vst.msk [vmem:[#allocation2 + $0x68] sm:$0xff] %vm404_vm1, %v1132_v4  ;;  %v1575_v12 = vadd.f32 %v1539_v8, %v1442_v5  ;;  %1612 = vst.msk [vmem:[#allocation2 + $0x50] sm:$0xff] %vm404_vm1, %v1576_v6  ;;  %v1006_v16 = vrot.slane %v859_v14, 1  ;;  %v1445_v17 = vrot.slane %v1290_v15, 2  ;;  %v2101_v18 = vpop.f32.mrb[34].mxu1  ;;  %v2137_v19 = vpop.f32.mrb[34].mxu0 }
 0x144   : > { %1610 = vst.msk [vmem:[#allocation2 + $0x40] sm:$0xff] %vm404_vm1, %v1574_v11  ;;  %v1010_v20 = vrot.slane %v2100_v9, 1  ;;  %v1012_v21 = vrot.slane %v2101_v18, 1  ;;  %v1451_v22 = vrot.slane %v2137_v19, 2  ;;  %v862_v23 = vpop.f32.mrb[35].mxu1  ;;  %v1293_v24 = vpop.f32.mrb[35].mxu0 }
 0x145   : > { %1611 = vst.msk [vmem:[#allocation2 + $0x48] sm:$0xff] %vm404_vm1, %v1575_v12  ;;  %v1007_v25 = vsel %vm974_vm2, %v1004_v45, %v1006_v16  ;;  %v1446_v27 = vsel %vm1421_vm3, %v1443_v46, %v1445_v17  ;;  %v1008_v28 = vrot.slane %v862_v23, 1  ;;  %v1447_v29 = vrot.slane %v1293_v24, 2  ;;  %v1105_v8 = vld [vmem:[#allocation2 + $0xb0] sm:$0xff]  ;;  %v1103_v14 = vld [vmem:[#allocation2 + $0xa0] sm:$0xff]  ;;  %v1104_v15 = vld [vmem:[#allocation2 + $0xa8] sm:$0xff] }
 0x146   : > { %v1134_v30 = vadd.f32 %v1098_v26, %v1007_v25  ;;  %v1013_v31 = vsel %vm974_vm2, %v1010_v20, %v1012_v21  ;;  %v1452_v33 = vsel %vm1421_vm3, %v1449_v13, %v1451_v22 }
 0x147   : > { %v1541_v34 = vld [vmem:[#allocation2 + $0x58] sm:$0xff]  ;;  %v1137_v35 = vadd.f32 %v1101_v32, %v1013_v31  ;;  %v1009_v36 = vsel %vm974_vm2, %v1006_v16, %v1008_v28  ;;  %v1011_v37 = vsel %vm974_vm2, %v1008_v28, %v1010_v20  ;;  %v1448_v40 = vsel %vm1421_vm3, %v1445_v17, %v1447_v29 }
 0x148   : > { %1170 = vst.msk [vmem:[#allocation2 + $0x78] sm:$0xff] %vm404_vm1, %v1134_v30  ;;  %v1577_v41 = vadd.f32 %v1541_v34, %v1446_v27  ;;  %v1544_v42 = vld [vmem:[#allocation2 + $0x70] sm:$0xff]  ;;  %v1135_v43 = vadd.f32 %v1099_v38, %v1009_v36  ;;  %v1136_v44 = vadd.f32 %v1100_v39, %v1011_v37  ;;  %v1450_v45 = vsel %vm1421_vm3, %v1447_v29, %v1449_v13 }
 0x149   : > { %1173 = vst.msk [vmem:[#allocation2 + $0x90] sm:$0xff] %vm404_vm1, %v1137_v35  ;;  %v1580_v46 = vadd.f32 %v1544_v42, %v1452_v33  ;;  %v1542_v47 = vld [vmem:[#allocation2 + $0x60] sm:$0xff]  ;;  %v2104_v49 = vpop.f32.mrb[36].mxu1  ;;  %v2140_v50 = vpop.f32.mrb[36].mxu0  ;;  %v1106_v42 = vld [vmem:[#allocation2 + $0xb8] sm:$0xff] }
 0x14a   : > { %v1543_v48 = vld [vmem:[#allocation2 + $0x68] sm:$0xff]  ;;  %1613 = vst.msk [vmem:[#allocation2 + $0x58] sm:$0xff] %vm404_vm1, %v1577_v41  ;;  %1171 = vst.msk [vmem:[#allocation2 + $0x80] sm:$0xff] %vm404_vm1, %v1135_v43  ;;  %v1578_v51 = vadd.f32 %v1542_v47, %v1448_v40  ;;  %v1457_v53 = vrot.slane %v2140_v50, 2  ;;  %v875_v54 = vpop.f32.mrb[37].mxu1  ;;  %v1306_v55 = vpop.f32.mrb[37].mxu0 }
 0x14b   : > { %1172 = vst.msk [vmem:[#allocation2 + $0x88] sm:$0xff] %vm404_vm1, %v1136_v44  ;;  %v1579_v52 = vadd.f32 %v1543_v48, %v1450_v45  ;;  %1616 = vst.msk [vmem:[#allocation2 + $0x70] sm:$0xff] %vm404_vm1, %v1580_v46  ;;  %v1014_v56 = vrot.slane %v875_v54, 1  ;;  %v1453_v57 = vrot.slane %v1306_v55, 2  ;;  %v2105_v58 = vpop.f32.mrb[38].mxu1  ;;  %v2141_v59 = vpop.f32.mrb[38].mxu0 }
 0x14c   : > { %1614 = vst.msk [vmem:[#allocation2 + $0x60] sm:$0xff] %vm404_vm1, %v1578_v51  ;;  %v1018_v60 = vrot.slane %v2104_v49, 1  ;;  %v1020_v61 = vrot.slane %v2105_v58, 1  ;;  %v1459_v62 = vrot.slane %v2141_v59, 2  ;;  %v878_v63 = vpop.f32.mrb[39].mxu1  ;;  %v1309_v0 = vpop.f32.mrb[39].mxu0 }
 0x14d   : > { %1615 = vst.msk [vmem:[#allocation2 + $0x68] sm:$0xff] %vm404_vm1, %v1579_v52  ;;  %v1015_v1 = vsel %vm974_vm2, %v1012_v21, %v1014_v56  ;;  %v1454_v3 = vsel %vm1421_vm3, %v1451_v22, %v1453_v57  ;;  %v1016_v4 = vrot.slane %v878_v63, 1  ;;  %v1455_v5 = vrot.slane %v1309_v0, 2  ;;  %v1109_v48 = vld [vmem:[#allocation2 + $0xd0] sm:$0xff]  ;;  %v1107_v54 = vld [vmem:[#allocation2 + $0xc0] sm:$0xff]  ;;  %v1108_v55 = vld [vmem:[#allocation2 + $0xc8] sm:$0xff] }
 0x14e   : > { %v1138_v6 = vadd.f32 %v1102_v2, %v1015_v1  ;;  %v1021_v7 = vsel %vm974_vm2, %v1018_v60, %v1020_v61  ;;  %v1460_v9 = vsel %vm1421_vm3, %v1457_v53, %v1459_v62 }
 0x14f   : > { %v1545_v10 = vld [vmem:[#allocation2 + $0x78] sm:$0xff]  ;;  %v1141_v11 = vadd.f32 %v1105_v8, %v1021_v7  ;;  %v1017_v12 = vsel %vm974_vm2, %v1014_v56, %v1016_v4  ;;  %v1019_v13 = vsel %vm974_vm2, %v1016_v4, %v1018_v60  ;;  %v1456_v16 = vsel %vm1421_vm3, %v1453_v57, %v1455_v5 }
 0x150   : > { %1174 = vst.msk [vmem:[#allocation2 + $0x98] sm:$0xff] %vm404_vm1, %v1138_v6  ;;  %v1581_v17 = vadd.f32 %v1545_v10, %v1454_v3  ;;  %v1548_v18 = vld [vmem:[#allocation2 + $0x90] sm:$0xff]  ;;  %v1139_v19 = vadd.f32 %v1103_v14, %v1017_v12  ;;  %v1140_v20 = vadd.f32 %v1104_v15, %v1019_v13  ;;  %v1458_v21 = vsel %vm1421_vm3, %v1455_v5, %v1457_v53 }
 0x151   : > { %1177 = vst.msk [vmem:[#allocation2 + $0xb0] sm:$0xff] %vm404_vm1, %v1141_v11  ;;  %v1584_v22 = vadd.f32 %v1548_v18, %v1460_v9  ;;  %v1546_v23 = vld [vmem:[#allocation2 + $0x80] sm:$0xff]  ;;  %v2108_v25 = vpop.f32.mrb[40].mxu1  ;;  %v2144_v26 = vpop.f32.mrb[40].mxu0  ;;  %v1110_v18 = vld [vmem:[#allocation2 + $0xd8] sm:$0xff] }
 0x152   : > { %v1547_v24 = vld [vmem:[#allocation2 + $0x88] sm:$0xff]  ;;  %1617 = vst.msk [vmem:[#allocation2 + $0x78] sm:$0xff] %vm404_vm1, %v1581_v17  ;;  %1175 = vst.msk [vmem:[#allocation2 + $0xa0] sm:$0xff] %vm404_vm1, %v1139_v19  ;;  %v1582_v27 = vadd.f32 %v1546_v23, %v1456_v16  ;;  %v1465_v29 = vrot.slane %v2144_v26, 2  ;;  %v891_v30 = vpop.f32.mrb[41].mxu1  ;;  %v1322_v31 = vpop.f32.mrb[41].mxu0 }
 0x153   : > { %1176 = vst.msk [vmem:[#allocation2 + $0xa8] sm:$0xff] %vm404_vm1, %v1140_v20  ;;  %v1583_v28 = vadd.f32 %v1547_v24, %v1458_v21  ;;  %1620 = vst.msk [vmem:[#allocation2 + $0x90] sm:$0xff] %vm404_vm1, %v1584_v22  ;;  %v1022_v32 = vrot.slane %v891_v30, 1  ;;  %v1461_v33 = vrot.slane %v1322_v31, 2  ;;  %v2109_v34 = vpop.f32.mrb[42].mxu1  ;;  %v2145_v35 = vpop.f32.mrb[42].mxu0 }
 0x154   : > { %1618 = vst.msk [vmem:[#allocation2 + $0x80] sm:$0xff] %vm404_vm1, %v1582_v27  ;;  %v1026_v36 = vrot.slane %v2108_v25, 1  ;;  %v1028_v37 = vrot.slane %v2109_v34, 1  ;;  %v1467_v38 = vrot.slane %v2145_v35, 2  ;;  %v894_v39 = vpop.f32.mrb[43].mxu1  ;;  %v1325_v40 = vpop.f32.mrb[43].mxu0 }
 0x155   : > { %1619 = vst.msk [vmem:[#allocation2 + $0x88] sm:$0xff] %vm404_vm1, %v1583_v28  ;;  %v1023_v41 = vsel %vm974_vm2, %v1020_v61, %v1022_v32  ;;  %v1462_v43 = vsel %vm1421_vm3, %v1459_v62, %v1461_v33  ;;  %v1024_v44 = vrot.slane %v894_v39, 1  ;;  %v1463_v45 = vrot.slane %v1325_v40, 2  ;;  %v1113_v24 = vld [vmem:[#allocation2 + $0xf0] sm:$0xff]  ;;  %v1111_v30 = vld [vmem:[#allocation2 + $0xe0] sm:$0xff]  ;;  %v1112_v31 = vld [vmem:[#allocation2 + $0xe8] sm:$0xff] }
 0x156   : > { %v1142_v46 = vadd.f32 %v1106_v42, %v1023_v41  ;;  %v1029_v47 = vsel %vm974_vm2, %v1026_v36, %v1028_v37  ;;  %v1468_v49 = vsel %vm1421_vm3, %v1465_v29, %v1467_v38 }
 0x157   : > { %v1549_v50 = vld [vmem:[#allocation2 + $0x98] sm:$0xff]  ;;  %v1145_v51 = vadd.f32 %v1109_v48, %v1029_v47  ;;  %v1025_v52 = vsel %vm974_vm2, %v1022_v32, %v1024_v44  ;;  %v1027_v53 = vsel %vm974_vm2, %v1024_v44, %v1026_v36  ;;  %v1464_v56 = vsel %vm1421_vm3, %v1461_v33, %v1463_v45 }
 0x158   : > { %1178 = vst.msk [vmem:[#allocation2 + $0xb8] sm:$0xff] %vm404_vm1, %v1142_v46  ;;  %v1585_v57 = vadd.f32 %v1549_v50, %v1462_v43  ;;  %v1552_v58 = vld [vmem:[#allocation2 + $0xb0] sm:$0xff]  ;;  %v1143_v59 = vadd.f32 %v1107_v54, %v1025_v52  ;;  %v1144_v60 = vadd.f32 %v1108_v55, %v1027_v53  ;;  %v1466_v61 = vsel %vm1421_vm3, %v1463_v45, %v1465_v29 }
 0x159   : > { %1181 = vst.msk [vmem:[#allocation2 + $0xd0] sm:$0xff] %vm404_vm1, %v1145_v51  ;;  %v1588_v62 = vadd.f32 %v1552_v58, %v1468_v49  ;;  %v1550_v63 = vld [vmem:[#allocation2 + $0xa0] sm:$0xff]  ;;  %v2112_v1 = vpop.f32.mrb[44].mxu1  ;;  %v2148_v2 = vpop.f32.mrb[44].mxu0  ;;  %v1114_v58 = vld [vmem:[#allocation2 + $0xf8] sm:$0xff] }
 0x15a   : > { %v1551_v0 = vld [vmem:[#allocation2 + $0xa8] sm:$0xff]  ;;  %1621 = vst.msk [vmem:[#allocation2 + $0x98] sm:$0xff] %vm404_vm1, %v1585_v57  ;;  %1179 = vst.msk [vmem:[#allocation2 + $0xc0] sm:$0xff] %vm404_vm1, %v1143_v59  ;;  %v1586_v3 = vadd.f32 %v1550_v63, %v1464_v56  ;;  %v1473_v5 = vrot.slane %v2148_v2, 2  ;;  %v907_v6 = vpop.f32.mrb[45].mxu1  ;;  %v1338_v7 = vpop.f32.mrb[45].mxu0 }
 0x15b   : > { %1180 = vst.msk [vmem:[#allocation2 + $0xc8] sm:$0xff] %vm404_vm1, %v1144_v60  ;;  %v1587_v4 = vadd.f32 %v1551_v0, %v1466_v61  ;;  %1624 = vst.msk [vmem:[#allocation2 + $0xb0] sm:$0xff] %vm404_vm1, %v1588_v62  ;;  %v1030_v8 = vrot.slane %v907_v6, 1  ;;  %v1469_v9 = vrot.slane %v1338_v7, 2  ;;  %v2113_v10 = vpop.f32.mrb[46].mxu1  ;;  %v2149_v11 = vpop.f32.mrb[46].mxu0 }
 0x15c   : > { %1622 = vst.msk [vmem:[#allocation2 + $0xa0] sm:$0xff] %vm404_vm1, %v1586_v3  ;;  %v1034_v12 = vrot.slane %v2112_v1, 1  ;;  %v1036_v13 = vrot.slane %v2113_v10, 1  ;;  %v1475_v14 = vrot.slane %v2149_v11, 2  ;;  %v910_v15 = vpop.f32.mrb[47].mxu1  ;;  %v1341_v16 = vpop.f32.mrb[47].mxu0 }
 0x15d   : > { %1623 = vst.msk [vmem:[#allocation2 + $0xa8] sm:$0xff] %vm404_vm1, %v1587_v4  ;;  %v1031_v17 = vsel %vm974_vm2, %v1028_v37, %v1030_v8  ;;  %v1470_v19 = vsel %vm1421_vm3, %v1467_v38, %v1469_v9  ;;  %v1032_v20 = vrot.slane %v910_v15, 1  ;;  %v1471_v21 = vrot.slane %v1341_v16, 2  ;;  %v1117_v1 = vld [vmem:[#allocation2 + $0x110] sm:$0xff]  ;;  %v1118_v2 = vld [vmem:[#allocation2 + $0x118] sm:$0xff]  ;;  %v1116_v10 = vld [vmem:[#allocation2 + $0x108] sm:$0xff] }
 0x15e   : > { %v1146_v22 = vadd.f32 %v1110_v18, %v1031_v17  ;;  %v1037_v23 = vsel %vm974_vm2, %v1034_v12, %v1036_v13  ;;  %v1476_v25 = vsel %vm1421_vm3, %v1473_v5, %v1475_v14 }
 0x15f   : > { %v1553_v26 = vld [vmem:[#allocation2 + $0xb8] sm:$0xff]  ;;  %v1149_v27 = vadd.f32 %v1113_v24, %v1037_v23  ;;  %v1033_v28 = vsel %vm974_vm2, %v1030_v8, %v1032_v20  ;;  %v1035_v29 = vsel %vm974_vm2, %v1032_v20, %v1034_v12  ;;  %v1472_v32 = vsel %vm1421_vm3, %v1469_v9, %v1471_v21  ;;  %v1115_v9 = vld [vmem:[#allocation2 + $0x100] sm:$0xff] }
 0x160   : > { %1182 = vst.msk [vmem:[#allocation2 + $0xd8] sm:$0xff] %vm404_vm1, %v1146_v22  ;;  %v1589_v33 = vadd.f32 %v1553_v26, %v1470_v19  ;;  %v1556_v34 = vld [vmem:[#allocation2 + $0xd0] sm:$0xff]  ;;  %v1147_v35 = vadd.f32 %v1111_v30, %v1033_v28  ;;  %v1148_v36 = vadd.f32 %v1112_v31, %v1035_v29  ;;  %v1474_v37 = vsel %vm1421_vm3, %v1471_v21, %v1473_v5 }
 0x161   : > { %1185 = vst.msk [vmem:[#allocation2 + $0xf0] sm:$0xff] %vm404_vm1, %v1149_v27  ;;  %v1592_v38 = vadd.f32 %v1556_v34, %v1476_v25  ;;  %v1554_v39 = vld [vmem:[#allocation2 + $0xc0] sm:$0xff]  ;;  %v2116_v41 = vpop.f32.mrb[48].mxu1  ;;  %v2152_v42 = vpop.f32.mrb[48].mxu0 }
 0x162   : > { %v1555_v40 = vld [vmem:[#allocation2 + $0xc8] sm:$0xff]  ;;  %1625 = vst.msk [vmem:[#allocation2 + $0xb8] sm:$0xff] %vm404_vm1, %v1589_v33  ;;  %1183 = vst.msk [vmem:[#allocation2 + $0xe0] sm:$0xff] %vm404_vm1, %v1147_v35  ;;  %v1590_v43 = vadd.f32 %v1554_v39, %v1472_v32  ;;  %v1481_v45 = vrot.slane %v2152_v42, 2  ;;  %v923_v46 = vpop.f32.mrb[49].mxu1  ;;  %v1354_v47 = vpop.f32.mrb[49].mxu0 }
 0x163   : > { %1184 = vst.msk [vmem:[#allocation2 + $0xe8] sm:$0xff] %vm404_vm1, %v1148_v36  ;;  %v1591_v44 = vadd.f32 %v1555_v40, %v1474_v37  ;;  %1628 = vst.msk [vmem:[#allocation2 + $0xd0] sm:$0xff] %vm404_vm1, %v1592_v38  ;;  %v1038_v48 = vrot.slane %v923_v46, 1  ;;  %v1477_v49 = vrot.slane %v1354_v47, 2  ;;  %v2117_v50 = vpop.f32.mrb[50].mxu1  ;;  %v2153_v51 = vpop.f32.mrb[50].mxu0 }
 0x164   : > { %1626 = vst.msk [vmem:[#allocation2 + $0xc0] sm:$0xff] %vm404_vm1, %v1590_v43  ;;  %v1042_v52 = vrot.slane %v2116_v41, 1  ;;  %v1044_v53 = vrot.slane %v2117_v50, 1  ;;  %v1483_v54 = vrot.slane %v2153_v51, 2  ;;  %v926_v55 = vpop.f32.mrb[51].mxu1  ;;  %v1357_v56 = vpop.f32.mrb[51].mxu0 }
 0x165   : > { %1627 = vst.msk [vmem:[#allocation2 + $0xc8] sm:$0xff] %vm404_vm1, %v1591_v44  ;;  %v1039_v57 = vsel %vm974_vm2, %v1036_v13, %v1038_v48  ;;  %v1478_v59 = vsel %vm1421_vm3, %v1475_v14, %v1477_v49  ;;  %v1040_v60 = vrot.slane %v926_v55, 1  ;;  %v1479_v61 = vrot.slane %v1357_v56, 2  ;;  %v2653_v46 = vld [vmem:[%s2780_s2] ss:$0 sm:$0xff] (!%p1974_p8)  ;;  %v1643_v47 = vld [vmem:[#allocation2 + $0x8] sm:$0xff] (!%p1974_p8) }
 0x166   : > { %v1150_v62 = vadd.f32 %v1114_v58, %v1039_v57  ;;  %v1045_v63 = vsel %vm974_vm2, %v1042_v52, %v1044_v53  ;;  %v1082_v0 = vsel %vm974_vm2, %v1044_v53, 0.0  ;;  %v1484_v3 = vsel %vm1421_vm3, %v1481_v45, %v1483_v54  ;;  %v1644_v50 = vld [vmem:[#allocation2 + $0x10] sm:$0xff] (!%p1974_p8)  ;;  %v1645_v51 = vld [vmem:[#allocation2 + $0x18] sm:$0xff] (!%p1974_p8)  ;;  %v1647_v56 = vld [vmem:[#allocation2 + $0x28] sm:$0xff] (!%p1974_p8) }
 0x167   : > { %v1557_v4 = vld [vmem:[#allocation2 + $0xd8] sm:$0xff]  ;;  %v1153_v5 = vadd.f32 %v1117_v1, %v1045_v63  ;;  %v1154_v6 = vadd.f32 %v1118_v2, %v1082_v0  ;;  %v1041_v7 = vsel %vm974_vm2, %v1038_v48, %v1040_v60  ;;  %v1043_v8 = vsel %vm974_vm2, %v1040_v60, %v1042_v52  ;;  %v1646_v52 = vld [vmem:[#allocation2 + $0x20] sm:$0xff] (!%p1974_p8)  ;;  %v1648_v57 = vld [vmem:[#allocation2 + $0x30] sm:$0xff] (!%p1974_p8) }
 0x168   : > { %1186 = vst.msk [vmem:[#allocation2 + $0xf8] sm:$0xff] %vm404_vm1, %v1150_v62  ;;  %v1593_v11 = vadd.f32 %v1557_v4, %v1478_v59  ;;  %v1560_v12 = vld [vmem:[#allocation2 + $0xf0] sm:$0xff]  ;;  %v1151_v13 = vadd.f32 %v1115_v9, %v1041_v7  ;;  %v1152_v14 = vadd.f32 %v1116_v10, %v1043_v8  ;;  %v1480_v15 = vsel %vm1421_vm3, %v1477_v49, %v1479_v61  ;;  %v1649_v58 = vld [vmem:[#allocation2 + $0x38] sm:$0xff] (!%p1974_p8)  ;;  %v1650_v63 = vld [vmem:[#allocation2 + $0x40] sm:$0xff] (!%p1974_p8) }
 0x169   : > { %1189 = vst.msk [vmem:[#allocation2 + $0x110] sm:$0xff] %vm404_vm1, %v1153_v5  ;;  %1190 = vst.msk [vmem:[#allocation2 + $0x118] sm:$0xff] %vm404_vm1, %v1154_v6  ;;  %v1596_v16 = vadd.f32 %v1560_v12, %v1484_v3  ;;  %v1482_v17 = vsel %vm1421_vm3, %v1479_v61, %v1481_v45  ;;  %v1558_v18 = vld [vmem:[#allocation2 + $0xe0] sm:$0xff]  ;;  %v2156_v20 = vpop.f32.mrb[52].mxu0  ;;  %v1686_v49 = vadd.f32 (!%p1974_p8), %v2653_v46, %v1643_v47  ;;  %v1651_v0 = vld [vmem:[#allocation2 + $0x48] sm:$0xff] (!%p1974_p8) }
 0x16a   : > { %v1559_v19 = vld [vmem:[#allocation2 + $0xe8] sm:$0xff]  ;;  %1629 = vst.msk [vmem:[#allocation2 + $0xd8] sm:$0xff] %vm404_vm1, %v1593_v11  ;;  %1187 = vst.msk [vmem:[#allocation2 + $0x100] sm:$0xff] %vm404_vm1, %v1151_v13  ;;  %v1594_v21 = vadd.f32 %v1558_v18, %v1480_v15  ;;  %v1489_v23 = vrot.slane %v2156_v20, 2  ;;  %v1370_v24 = vpop.f32.mrb[53].mxu0  ;;  %v1642_v45 = vld [vmem:[#allocation2] sm:$0xff] (!%p1974_p8)  ;;  %v1687_v53 = vadd.f32 (!%p1974_p8), %v2653_v46, %v1644_v50  ;;  %v1689_v55 = vadd.f32 (!%p1974_p8), %v2653_v46, %v1646_v52 }
 0x16b   : > { %1188 = vst.msk [vmem:[#allocation2 + $0x108] sm:$0xff] %vm404_vm1, %v1152_v14  ;;  %v1595_v22 = vadd.f32 %v1559_v19, %v1482_v17  ;;  %1632 = vst.msk [vmem:[#allocation2 + $0xf0] sm:$0xff] %vm404_vm1, %v1596_v16  ;;  %v1485_v25 = vrot.slane %v1370_v24, 2  ;;  %v2157_v26 = vpop.f32.mrb[54].mxu0  ;;  %v1685_v48 = vadd.f32 (!%p1974_p8), %v2653_v46, %v1642_v45  ;;  %v1722_v60 = vmax.f32 (!%p1974_p8), %v1686_v49, 0.0  ;;  %v1652_v1 = vld [vmem:[#allocation2 + $0x50] sm:$0xff] (!%p1974_p8) }
 0x16c   : > { %1630 = vst.msk [vmem:[#allocation2 + $0xe0] sm:$0xff] %vm404_vm1, %v1594_v21  ;;  %v1491_v27 = vrot.slane %v2157_v26, 2  ;;  %v1373_v28 = vpop.f32.mrb[55].mxu0  ;;  %v1690_v61 = vadd.f32 (!%p1974_p8), %v2653_v46, %v1647_v56  ;;  %v1691_v62 = vadd.f32 (!%p1974_p8), %v2653_v46, %v1648_v57  ;;  %v1723_v2 = vmax.f32 (!%p1974_p8), %v1687_v53, 0.0  ;;  %v1653_v6 = vld [vmem:[#allocation2 + $0x58] sm:$0xff] (!%p1974_p8)  ;;  %v1654_v7 = vld [vmem:[#allocation2 + $0x60] sm:$0xff] (!%p1974_p8) }
 0x16d   : > { %1631 = vst.msk [vmem:[#allocation2 + $0xe8] sm:$0xff] %vm404_vm1, %v1595_v22  ;;  %v1486_v29 = vsel %vm1421_vm3, %v1483_v54, %v1485_v25  ;;  %v1487_v30 = vrot.slane %v1373_v28, 2  ;;  %v1688_v54 = vadd.f32 (!%p1974_p8), %v2653_v46, %v1645_v51  ;;  %v1721_v59 = vmax.f32 (!%p1974_p8), %v1685_v48, 0.0  ;;  %v1655_v8 = vld [vmem:[#allocation2 + $0x68] sm:$0xff] (!%p1974_p8)  ;;  %1758 = vst.msk [vmem:[%s2337_s7 + $0x8] sm:$0xff] (!%p1974_p8), %vm404_vm1, %v1722_v60  ;;  %v1656_v13 = vld [vmem:[#allocation2 + $0x70] sm:$0xff] (!%p1974_p8) }
 0x16e   : > { %v1492_v31 = vsel %vm1421_vm3, %v1489_v23, %v1491_v27  ;;  %v1529_v36 = vsel %vm1421_vm3, %v1491_v27, 0.0  ;;  %v1725_v4 = vmax.f32 (!%p1974_p8), %v1689_v55, 0.0  ;;  %v1692_v5 = vadd.f32 (!%p1974_p8), %v2653_v46, %v1649_v58  ;;  %v1657_v14 = vld [vmem:[#allocation2 + $0x78] sm:$0xff] (!%p1974_p8)  ;;  %1759 = vst.msk [vmem:[%s2337_s7 + $0x10] sm:$0xff] (!%p1974_p8), %vm404_vm1, %v1723_v2  ;;  %v1658_v19 = vld [vmem:[#allocation2 + $0x80] sm:$0xff] (!%p1974_p8)  ;;  %v1659_v20 = vld [vmem:[#allocation2 + $0x88] sm:$0xff] (!%p1974_p8) }
 0x16f   : > { %v1561_v32 = vld [vmem:[#allocation2 + $0xf8] sm:$0xff]  ;;  %v1488_v33 = vsel %vm1421_vm3, %v1485_v25, %v1487_v30  ;;  %v1490_v34 = vsel %vm1421_vm3, %v1487_v30, %v1489_v23  ;;  %1641 = sbr.rel (%p1974_p8) target bundleno = 388 (0x184), region = 40  ;;  %v1724_v3 = vmax.f32 (!%p1974_p8), %v1688_v54, 0.0  ;;  %1757 = vst.msk [vmem:[%s2337_s7] sm:$0xff] (!%p1974_p8), %vm404_vm1, %v1721_v59  ;;  %v1726_v9 = vmax.f32 (!%p1974_p8), %v1690_v61, 0.0  ;;  %v1660_v25 = vld [vmem:[#allocation2 + $0x90] sm:$0xff] (!%p1974_p8) }
 0x170   : > { %v1597_v35 = vadd.f32 %v1561_v32, %v1486_v29  ;;  %v1564_v37 = vld [vmem:[#allocation2 + $0x110] sm:$0xff]  ;;  %v1565_v38 = vld [vmem:[#allocation2 + $0x118] sm:$0xff]  ;;  %v1727_v10 = vmax.f32 (!%p1974_p8), %v1691_v62, 0.0  ;;  %v1693_v11 = vadd.f32 (!%p1974_p8), %v2653_v46, %v1650_v63  ;;  %v1694_v12 = vadd.f32 (!%p1974_p8), %v2653_v46, %v1651_v0  ;;  %1761 = vst.msk [vmem:[%s2337_s7 + $0x20] sm:$0xff] (!%p1974_p8), %vm404_vm1, %v1725_v4  ;;  %v1662_v27 = vld [vmem:[#allocation2 + $0xa0] sm:$0xff] (!%p1974_p8) }
 0x171   : > { %v1600_v39 = vadd.f32 %v1564_v37, %v1492_v31  ;;  %v1601_v40 = vadd.f32 %v1565_v38, %v1529_v36  ;;  %v1562_v41 = vld [vmem:[#allocation2 + $0x100] sm:$0xff]  ;;  %1760 = vst.msk [vmem:[%s2337_s7 + $0x18] sm:$0xff] (!%p1974_p8), %vm404_vm1, %v1724_v3  ;;  %v1728_v15 = vmax.f32 (!%p1974_p8), %v1692_v5, 0.0  ;;  %v1695_v16 = vadd.f32 (!%p1974_p8), %v2653_v46, %v1652_v1  ;;  %1762 = vst.msk [vmem:[%s2337_s7 + $0x28] sm:$0xff] (!%p1974_p8), %vm404_vm1, %v1726_v9  ;;  %v1661_v26 = vld [vmem:[#allocation2 + $0x98] sm:$0xff] (!%p1974_p8) }
 0x172   : > { %v1563_v42 = vld [vmem:[#allocation2 + $0x108] sm:$0xff]  ;;  %1633 = vst.msk [vmem:[#allocation2 + $0xf8] sm:$0xff] %vm404_vm1, %v1597_v35  ;;  %v1598_v43 = vadd.f32 %v1562_v41, %v1488_v33  ;;  %v1696_v17 = vadd.f32 (!%p1974_p8), %v2653_v46, %v1653_v6  ;;  %v1697_v18 = vadd.f32 (!%p1974_p8), %v2653_v46, %v1654_v7  ;;  %1763 = vst.msk [vmem:[%s2337_s7 + $0x30] sm:$0xff] (!%p1974_p8), %vm404_vm1, %v1727_v10  ;;  %v1729_v21 = vmax.f32 (!%p1974_p8), %v1693_v11, 0.0  ;;  %v1664_v33 = vld [vmem:[#allocation2 + $0xb0] sm:$0xff] (!%p1974_p8) }
 0x173   : > { %v1599_v44 = vadd.f32 %v1563_v42, %v1490_v34  ;;  %1636 = vst.msk [vmem:[#allocation2 + $0x110] sm:$0xff] %vm404_vm1, %v1600_v39  ;;  %1637 = vst.msk [vmem:[#allocation2 + $0x118] sm:$0xff] %vm404_vm1, %v1601_v40  ;;  %v1730_v22 = vmax.f32 (!%p1974_p8), %v1694_v12, 0.0  ;;  %v1698_v23 = vadd.f32 (!%p1974_p8), %v2653_v46, %v1655_v8  ;;  %v1699_v24 = vadd.f32 (!%p1974_p8), %v2653_v46, %v1656_v13  ;;  %v1663_v32 = vld [vmem:[#allocation2 + $0xa8] sm:$0xff] (!%p1974_p8)  ;;  %v1665_v38 = vld [vmem:[#allocation2 + $0xb8] sm:$0xff] (!%p1974_p8) }
 0x174   : > { %1634 = vst.msk [vmem:[#allocation2 + $0x100] sm:$0xff] %vm404_vm1, %v1598_v43  ;;  %1764 = vst.msk [vmem:[%s2337_s7 + $0x38] sm:$0xff] (!%p1974_p8), %vm404_vm1, %v1728_v15  ;;  %v1731_v28 = vmax.f32 (!%p1974_p8), %v1695_v16, 0.0  ;;  %v1732_v29 = vmax.f32 (!%p1974_p8), %v1696_v17, 0.0  ;;  %v1733_v30 = vmax.f32 (!%p1974_p8), %v1697_v18, 0.0  ;;  %v1700_v31 = vadd.f32 (!%p1974_p8), %v2653_v46, %v1657_v14  ;;  %v1666_v43 = vld [vmem:[#allocation2 + $0xc0] sm:$0xff] (!%p1974_p8) }
 0x175   : > { %1635 = vst.msk [vmem:[#allocation2 + $0x108] sm:$0xff] %vm404_vm1, %v1599_v44  ;;  %1765 = vst.msk [vmem:[%s2337_s7 + $0x40] sm:$0xff] (!%p1974_p8), %vm404_vm1, %v1729_v21  ;;  %v1734_v34 = vmax.f32 (!%p1974_p8), %v1698_v23, 0.0  ;;  %v1735_v35 = vmax.f32 (!%p1974_p8), %v1699_v24, 0.0  ;;  %v1701_v36 = vadd.f32 (!%p1974_p8), %v2653_v46, %v1658_v19  ;;  %v1702_v37 = vadd.f32 (!%p1974_p8), %v2653_v46, %v1659_v20  ;;  %v1667_v44 = vld [vmem:[#allocation2 + $0xc8] sm:$0xff] (!%p1974_p8)  ;;  %v1668_v50 = vld [vmem:[#allocation2 + $0xd0] sm:$0xff] (!%p1974_p8) }
 0x176   : > { %1766 = vst.msk [vmem:[%s2337_s7 + $0x48] sm:$0xff] %vm404_vm1, %v1730_v22  ;;  %1767 = vst.msk [vmem:[%s2337_s7 + $0x50] sm:$0xff] %vm404_vm1, %v1731_v28  ;;  %v1736_v39 = vmax.f32 %v1700_v31, 0.0  ;;  %v1703_v40 = vadd.f32 %v2653_v46, %v1660_v25  ;;  %v1704_v41 = vadd.f32 %v2653_v46, %v1661_v26  ;;  %v1705_v42 = vadd.f32 %v2653_v46, %v1662_v27  ;;  %v1669_v51 = vld [vmem:[#allocation2 + $0xd8] sm:$0xff]  ;;  %v1670_v52 = vld [vmem:[#allocation2 + $0xe0] sm:$0xff] }
 0x177   : > { %1768 = vst.msk [vmem:[%s2337_s7 + $0x58] sm:$0xff] %vm404_vm1, %v1732_v29  ;;  %1769 = vst.msk [vmem:[%s2337_s7 + $0x60] sm:$0xff] %vm404_vm1, %v1733_v30  ;;  %v1737_v45 = vmax.f32 %v1701_v36, 0.0  ;;  %v1738_v47 = vmax.f32 %v1702_v37, 0.0  ;;  %v1706_v48 = vadd.f32 %v2653_v46, %v1663_v32  ;;  %v1707_v49 = vadd.f32 %v2653_v46, %v1664_v33  ;;  %v1671_v57 = vld [vmem:[#allocation2 + $0xe8] sm:$0xff]  ;;  %v1672_v58 = vld [vmem:[#allocation2 + $0xf0] sm:$0xff] }
 0x178   : > { %1770 = vst.msk [vmem:[%s2337_s7 + $0x68] sm:$0xff] %vm404_vm1, %v1734_v34  ;;  %1771 = vst.msk [vmem:[%s2337_s7 + $0x70] sm:$0xff] %vm404_vm1, %v1735_v35  ;;  %v1739_v53 = vmax.f32 %v1703_v40, 0.0  ;;  %v1740_v54 = vmax.f32 %v1704_v41, 0.0  ;;  %v1741_v55 = vmax.f32 %v1705_v42, 0.0  ;;  %v1708_v56 = vadd.f32 %v2653_v46, %v1665_v38 }
 0x179   : > { %1772 = vst.msk [vmem:[%s2337_s7 + $0x78] sm:$0xff] %vm404_vm1, %v1736_v39  ;;  %1773 = vst.msk [vmem:[%s2337_s7 + $0x80] sm:$0xff] %vm404_vm1, %v1737_v45  ;;  %v1742_v59 = vmax.f32 %v1706_v48, 0.0  ;;  %v1743_v60 = vmax.f32 %v1707_v49, 0.0  ;;  %v1709_v61 = vadd.f32 %v2653_v46, %v1666_v43  ;;  %v1710_v62 = vadd.f32 %v2653_v46, %v1667_v44  ;;  %v1673_v63 = vld [vmem:[#allocation2 + $0xf8] sm:$0xff] }
 0x17a   : > { %1774 = vst.msk [vmem:[%s2337_s7 + $0x88] sm:$0xff] %vm404_vm1, %v1738_v47  ;;  %1775 = vst.msk [vmem:[%s2337_s7 + $0x90] sm:$0xff] %vm404_vm1, %v1739_v53  ;;  %v1744_v0 = vmax.f32 %v1708_v56, 0.0  ;;  %v1711_v1 = vadd.f32 %v2653_v46, %v1668_v50  ;;  %v1712_v2 = vadd.f32 %v2653_v46, %v1669_v51  ;;  %v1713_v3 = vadd.f32 %v2653_v46, %v1670_v52  ;;  %v1676_v10 = vld [vmem:[#allocation2 + $0x110] sm:$0xff]  ;;  %v1677_v11 = vld [vmem:[#allocation2 + $0x118] sm:$0xff] }
 0x17b   : > { %1776 = vst.msk [vmem:[%s2337_s7 + $0x98] sm:$0xff] %vm404_vm1, %v1740_v54  ;;  %1777 = vst.msk [vmem:[%s2337_s7 + $0xa0] sm:$0xff] %vm404_vm1, %v1741_v55  ;;  %v1674_v4 = vld [vmem:[#allocation2 + $0x100] sm:$0xff]  ;;  %v1745_v6 = vmax.f32 %v1709_v61, 0.0  ;;  %v1746_v7 = vmax.f32 %v1710_v62, 0.0  ;;  %v1714_v8 = vadd.f32 %v2653_v46, %v1671_v57  ;;  %v1715_v9 = vadd.f32 %v2653_v46, %v1672_v58 }
 0x17c   : > { %v1675_v5 = vld [vmem:[#allocation2 + $0x108] sm:$0xff]  ;;  %1778 = vst.msk [vmem:[%s2337_s7 + $0xa8] sm:$0xff] %vm404_vm1, %v1742_v59  ;;  %1779 = vst.msk [vmem:[%s2337_s7 + $0xb0] sm:$0xff] %vm404_vm1, %v1743_v60  ;;  %v1747_v12 = vmax.f32 %v1711_v1, 0.0  ;;  %v1748_v13 = vmax.f32 %v1712_v2, 0.0  ;;  %v1749_v14 = vmax.f32 %v1713_v3, 0.0  ;;  %v1716_v15 = vadd.f32 %v2653_v46, %v1673_v63 }
 0x17d   : > { %1780 = vst.msk [vmem:[%s2337_s7 + $0xb8] sm:$0xff] %vm404_vm1, %v1744_v0  ;;  %1781 = vst.msk [vmem:[%s2337_s7 + $0xc0] sm:$0xff] %vm404_vm1, %v1745_v6  ;;  %v1750_v16 = vmax.f32 %v1714_v8, 0.0  ;;  %v1751_v17 = vmax.f32 %v1715_v9, 0.0  ;;  %v1717_v18 = vadd.f32 %v2653_v46, %v1674_v4  ;;  %v1718_v19 = vadd.f32 %v2653_v46, %v1675_v5 }
 0x17e   : > { %1782 = vst.msk [vmem:[%s2337_s7 + $0xc8] sm:$0xff] %vm404_vm1, %v1746_v7  ;;  %1783 = vst.msk [vmem:[%s2337_s7 + $0xd0] sm:$0xff] %vm404_vm1, %v1747_v12  ;;  %v1752_v20 = vmax.f32 %v1716_v15, 0.0  ;;  %v1719_v21 = vadd.f32 %v2653_v46, %v1676_v10  ;;  %v1720_v22 = vadd.f32 %v2653_v46, %v1677_v11 }
 0x17f   : > { %1784 = vst.msk [vmem:[%s2337_s7 + $0xd8] sm:$0xff] %vm404_vm1, %v1748_v13  ;;  %1785 = vst.msk [vmem:[%s2337_s7 + $0xe0] sm:$0xff] %vm404_vm1, %v1749_v14  ;;  %v1753_v23 = vmax.f32 %v1717_v18, 0.0  ;;  %v1754_v24 = vmax.f32 %v1718_v19, 0.0 }
 0x180   : > { %1786 = vst.msk [vmem:[%s2337_s7 + $0xe8] sm:$0xff] %vm404_vm1, %v1750_v16  ;;  %1787 = vst.msk [vmem:[%s2337_s7 + $0xf0] sm:$0xff] %vm404_vm1, %v1751_v17  ;;  %v1755_v25 = vmax.f32 %v1719_v21, 0.0  ;;  %v1756_v26 = vmax.f32 %v1720_v22, 0.0 }
 0x181   : > { %1788 = vst.msk [vmem:[%s2337_s7 + $0xf8] sm:$0xff] %vm404_vm1, %v1752_v20  ;;  %1789 = vst.msk [vmem:[%s2337_s7 + $0x100] sm:$0xff] %vm404_vm1, %v1753_v23 }
 0x182   : > { %1790 = vst.msk [vmem:[%s2337_s7 + $0x108] sm:$0xff] %vm404_vm1, %v1754_v24  ;;  %1791 = vst.msk [vmem:[%s2337_s7 + $0x110] sm:$0xff] %vm404_vm1, %v1755_v25 }
 0x183   : > { %1792 = vst.msk [vmem:[%s2337_s7 + $0x118] sm:$0xff] %vm404_vm1, %v1756_v26 }
 0x184 PF: > { %s13_s16 = sadd.s32 1, %s2267_s16   ;;  %s2782_s12 = smov %s2259_s14 }
 0x185   : > { %p10_p9 = scmp.ge.s32.totalorder %s13_s16, 8   ;;  %s2783_s13 = smov %s2263_s15 }
 0x186   : > { %s2784_s14 = smov %s2787_s17  ;;  %s2785_s15 = smov %s2791_s18 }
 0x187   :  { %12 = sbr.rel (!%p10_p9) target bundleno = 3 (0x3), region = 75 }

</bundles_post_ra>
